<compile_context>
chip_gen: v7x
topology: tpu7x:2x2x1
jax: 0.10.0
libtpu: 0.0.40
codegen_flags: <defaults>
</compile_context>

<pallas_src>
import functools

import jax
import jax.numpy as jnp
from jax.experimental import pallas as pl
from jax.experimental.pallas import tpu as pltpu

_LANE = 128
_NUM_CLASSES = 27


def _round_up(x, m):
    return ((x + m - 1) // m) * m


# ----------------------- fused conv + ReLU + maxpool -----------------------

def _conv_relu_pool_kernel(x_ref, w_ref, b_ref, o_ref, *, kk):
    """im2col-matmul + bias + ReLU per pooling tap, max over taps, one store.

    x_ref: (kk, tmo, F) bf16 tap-major patches, w_ref: (F, 128) bf16,
    b_ref: (1, 128) f32, o_ref: (tmo, 128) bf16.
    """
    w = w_ref[...]
    b = b_ref[...]
    acc = None
    for j in range(kk):                      # static unroll over pooling taps
        y = jnp.dot(x_ref[j], w, preferred_element_type=jnp.float32) + b
        y = jnp.maximum(y, 0.0)
        acc = y if acc is None else jnp.maximum(acc, y)
    o_ref[...] = acc.astype(o_ref.dtype)


def conv_relu_pool_pallas(x, wm, bm, cout, *, kh, kw, padding, pool_k):
    """Fused stride-1 conv + ReLU + non-overlapping pool_k x pool_k max pool.

    x: NHWC (f32 or bf16); wm: (KH*KW*Cin, 128) bf16 lane-padded weight;
    bm: (1, 128) f32 lane-padded bias.  Floor-mode pooling (PyTorch default):
    conv outputs outside the pooled region are never computed.
    Returns NHWC bf16 with `cout` channels.
    """
    N, H, W, Cin = x.shape
    if padding:
        x = jnp.pad(x, ((0, 0), (padding, padding), (padding, padding), (0, 0)))
    Ho = H + 2 * padding - kh + 1
    Wo = W + 2 * padding - kw + 1
    F = kh * kw * Cin

    # im2col (pure XLA slicing glue), emitted in bf16 -> half the HBM bytes.
    taps = [x[:, dy:dy + Ho, dx:dx + Wo, :]
            for dy in range(kh) for dx in range(kw)]
    patches = jnp.concatenate(taps, axis=-1).astype(jnp.bfloat16)

    # Pool-tap-major row order: (kk, N*Hop*Wop, F); floor-mode crop first.
    k = pool_k
    Hop, Wop = Ho // k, Wo // k
    patches = patches[:, :Hop * k, :Wop * k, :]
    patches = patches.reshape(N, Hop, k, Wop, k, F)
    patches = patches.transpose(2, 4, 0, 1, 3, 5).reshape(k * k, N * Hop * Wop, F)

    kk = k * k
    Mo = N * Hop * Wop
    # Row tile: >=2 blocks when Mo is large (v7x megacore), 16-aligned (bf16).
    tmo = min(1024, max(_round_up(-(-Mo // 2), 16), 256))
    tmo = min(tmo, _round_up(Mo, 16))
    Mp = _round_up(Mo, tmo)
    if Mp != Mo:
        patches = jnp.pad(patches, ((0, 0), (0, Mp - Mo), (0, 0)))

    out = pl.pallas_call(
        functools.partial(_conv_relu_pool_kernel, kk=kk),
        out_shape=jax.ShapeDtypeStruct((Mp, _LANE), jnp.bfloat16),
        grid=(Mp // tmo,),
        in_specs=[
            pl.BlockSpec((kk, tmo, F), lambda i: (0, i, 0)),
            pl.BlockSpec((F, _LANE), lambda i: (0, 0)),
            pl.BlockSpec((1, _LANE), lambda i: (0, 0)),
        ],
        out_specs=pl.BlockSpec((tmo, _LANE), lambda i: (i, 0)),
        compiler_params=pltpu.CompilerParams(
            dimension_semantics=("parallel",)),
    )(patches, wm, bm)

    return out[:Mo, :cout].reshape(N, Hop, Wop, cout)


# ----------------- fused tail: conv4 + pool + flatten + fc1..fc4 -----------------

def _tail_kernel(x_ref, w4_ref, b4_ref, w1_ref, b1_ref, w2_ref, b2_ref,
                 w3_ref, b3_ref, w5_ref, b5_ref, o_ref, *, n):
    """conv4(k2)+ReLU+2x2 maxpool, flatten, fc1..fc4, all resident in VMEM.

    x_ref: (kk, npos*n, F) bf16 conv4 patches, rows ordered (spatial pos, batch).
    """
    kk = x_ref.shape[0]
    c4 = w4_ref.shape[1]
    npos = x_ref.shape[1] // n

    # conv4 + ReLU + max over pooling taps -> (npos*n, c4) f32
    w4 = w4_ref[...]
    b4 = b4_ref[...]
    h = None
    for j in range(kk):
        y = jnp.maximum(
            jnp.dot(x_ref[j], w4, preferred_element_type=jnp.float32) + b4, 0.0)
        h = y if h is None else jnp.maximum(h, y)

    # Flatten + fc1.  fc1 weight rows were pre-permuted to (spatial, channel)
    # order, so fc1 == sum over spatial positions of (n, c4) @ (c4, 32).
    w1 = w1_ref[...]
    z = None
    for p in range(npos):
        part = jnp.dot(h[p * n:(p + 1) * n].astype(jnp.bfloat16),
                       w1[p * c4:(p + 1) * c4],
                       preferred_element_type=jnp.float32)
        z = part if z is None else z + part
    h = jnp.maximum(z + b1_ref[...], 0.0)
    h = jnp.maximum(jnp.dot(h.astype(jnp.bfloat16), w2_ref[...],
                            preferred_element_type=jnp.float32) + b2_ref[...], 0.0)
    h = jnp.maximum(jnp.dot(h.astype(jnp.bfloat16), w3_ref[...],
                            preferred_element_type=jnp.float32) + b3_ref[...], 0.0)
    o_ref[...] = (jnp.dot(h.astype(jnp.bfloat16), w5_ref[...],
                          preferred_element_type=jnp.float32) + b5_ref[...])


def tail_conv4_fc_pallas(x, prep, num_classes=_NUM_CLASSES):
    """x: (N, 5, 5, 64) bf16 NHWC (conv3 output). Returns (N, num_classes) f32."""
    N, H, W, Cin = x.shape
    KH = KW = 2
    Ho, Wo = H - KH + 1, W - KW + 1          # 4, 4
    Hop, Wop = Ho // 2, Wo // 2              # 2, 2
    F = KH * KW * Cin                        # 256
    Np = _round_up(max(N, 8), 8)
    if Np != N:
        x = jnp.pad(x, ((0, Np - N), (0, 0), (0, 0), (0, 0)))

    taps = [x[:, dy:dy + Ho, dx:dx + Wo, :]
            for dy in range(KH) for dx in range(KW)]
    patches = jnp.concatenate(taps, axis=-1).astype(jnp.bfloat16)   # (Np,4,4,F)
    patches = patches.reshape(Np, Hop, 2, Wop, 2, F)
    # -> (pool_dy, pool_dx, Hop, Wop, Np, F): rows ordered (spatial pos, batch)
    patches = patches.transpose(2, 4, 1, 3, 0, 5).reshape(4, Hop * Wop * Np, F)

    w4, b4 = prep["conv4"]
    w1, b1 = prep["fc1"]
    w2, b2 = prep["fc2"]
    w3, b3 = prep["fc3"]
    w5, b5 = prep["fc4"]

    vmem = pl.BlockSpec(memory_space=pltpu.MemorySpace.VMEM)
    out = pl.pallas_call(
        functools.partial(_tail_kernel, n=Np),
        out_shape=jax.ShapeDtypeStruct((Np, _LANE), jnp.float32),
        in_specs=[vmem] * 11,
        out_specs=vmem,
    )(patches, w4, b4, w1, b1, w2, b2, w3, b3, w5, b5)
    return out[:N, :num_classes]


# ------------------------------------ params ------------------------------------

def init_params(key):
    """PyTorch-default-style init; conv weights (KH,KW,Cin,Cout), fc (in,out)."""
    def conv_p(k, kh, kw, cin, cout):
        k1, k2 = jax.random.split(k)
        bound = 1.0 / (kh * kw * cin) ** 0.5
        w = jax.random.uniform(k1, (kh, kw, cin, cout), jnp.float32, -bound, bound)
        b = jax.random.uniform(k2, (cout,), jnp.float32, -bound, bound)
        return w, b

    def fc_p(k, fin, fout):
        k1, k2 = jax.random.split(k)
        bound = 1.0 / fin ** 0.5
        w = jax.random.uniform(k1, (fin, fout), jnp.float32, -bound, bound)
        b = jax.random.uniform(k2, (fout,), jnp.float32, -bound, bound)
        return w, b

    ks = jax.random.split(key, 8)
    return {
        "conv1": conv_p(ks[0], 3, 3, 1, 16),
        "conv2": conv_p(ks[1], 3, 3, 16, 32),
        "conv3": conv_p(ks[2], 3, 3, 32, 64),
        "conv4": conv_p(ks[3], 2, 2, 64, 64),
        "fc1": fc_p(ks[4], 64 * 2 * 2, 32),
        "fc2": fc_p(ks[5], 32, 64),
        "fc3": fc_p(ks[6], 64, 128),
        "fc4": fc_p(ks[7], 128, _NUM_CLASSES),
    }


def prepare_params(params):
    """One-time layout prep (outside jit): bf16 MXU weights, lane-padded conv /
    fc4 matmul layouts, NCHW-flatten permutation baked into fc1's rows."""
    prep = {}
    for name in ("conv1", "conv2", "conv3"):
        w, b = params[name]
        kh, kw, cin, cout = w.shape
        wm = jnp.pad(w.reshape(kh * kw * cin, cout).astype(jnp.bfloat16),
                     ((0, 0), (0, _LANE - cout)))
        bm = jnp.pad(b.reshape(1, cout), ((0, 0), (0, _LANE - cout)))
        prep[name] = (wm, bm.astype(jnp.float32))

    w, b = params["conv4"]                              # conv4 output stays in-register
    prep["conv4"] = (w.reshape(-1, w.shape[-1]).astype(jnp.bfloat16),
                     b.reshape(1, -1).astype(jnp.float32))

    # fc1: PyTorch flattens NCHW (feature = c*H*W + h*W + w); the tail kernel
    # produces features ordered (spatial position, channel) -> permute rows once.
    w1, b1 = params["fc1"]                              # (64*2*2, 32), CHW row order
    c4 = params["conv4"][0].shape[-1]                   # 64
    w1 = w1.reshape(c4, 2, 2, w1.shape[1]).transpose(1, 2, 0, 3).reshape(c4 * 4, -1)
    prep["fc1"] = (w1.astype(jnp.bfloat16), b1.reshape(1, -1).astype(jnp.float32))

    for name in ("fc2", "fc3"):
        w, b = params[name]
        prep[name] = (w.astype(jnp.bfloat16), b.reshape(1, -1).astype(jnp.float32))

    w4, b4 = params["fc4"]                              # (128, 27) -> lane-dense store
    nout = w4.shape[1]
    prep["fc4"] = (jnp.pad(w4, ((0, 0), (0, _LANE - nout))).astype(jnp.bfloat16),
                   jnp.pad(b4.reshape(1, -1),
                           ((0, 0), (0, _LANE - nout))).astype(jnp.float32))
    return prep


# ------------------------------------ model ------------------------------------

@jax.jit
def cnn_forward(prep, x_nchw):
    x = jnp.transpose(x_nchw, (0, 2, 3, 1))                               # NCHW -> NHWC
    w, b = prep["conv1"]
    x = conv_relu_pool_pallas(x, w, b, 16, kh=3, kw=3, padding=1, pool_k=2)  # 64 -> 32
    w, b = prep["conv2"]
    x = conv_relu_pool_pallas(x, w, b, 32, kh=3, kw=3, padding=1, pool_k=3)  # 32 -> 10
    w, b = prep["conv3"]
    x = conv_relu_pool_pallas(x, w, b, 64, kh=3, kw=3, padding=1, pool_k=2)  # 10 -> 5
    return tail_conv4_fc_pallas(x, prep)            # conv4 (5->4->2) + flatten + fc1..4


if __name__ == "__main__":
    key = jax.random.PRNGKey(0)
    pkey, xkey = jax.random.split(key)
    params = init_params(pkey)
    prep = prepare_params(params)
    # Smallest input consistent with the module's fc1 (64*2*2 features): 64x64.
    x = jax.random.normal(xkey, (2, 1, 64, 64), jnp.float32)
    out = cnn_forward(prep, x)
    out = jax.block_until_ready(out)
    assert out.shape == (2, _NUM_CLASSES), out.shape
    assert jnp.isfinite(out).all()
    print("KERNEL_OK")
</pallas_src>

<mosaic_0001>
module attributes {stable_mosaic.version = 11 : i64} {
  func.func @_conv_relu_pool_kernel(%arg0: i32, %arg1: memref<4x1024x9xbf16, #tpu.memory_space<vmem>>, %arg2: memref<9x128xbf16, #tpu.memory_space<vmem>>, %arg3: memref<1x128xf32, #tpu.memory_space<vmem>>, %arg4: memref<1024x128xbf16, #tpu.memory_space<vmem>>) attributes {dimension_semantics = [#tpu.dimension_semantics<parallel>], iteration_bounds = array<i64: 2>, scalar_prefetch = 0 : i64, scratch_operands = 0 : i64, tpu.core_type = #tpu.core_type<tc>, window_params = [{transform_indices = @transform_0, window_bounds = array<i64: 4, 1024, 9>}, {pipeline_mode = #tpu.pipeline_mode<synchronous>, transform_indices = @transform_1, window_bounds = array<i64: 9, 128>}, {pipeline_mode = #tpu.pipeline_mode<synchronous>, transform_indices = @transform_2, window_bounds = array<i64: 1, 128>}, {transform_indices = @transform_3, window_bounds = array<i64: 1024, 128>}]} {
    %c0 = arith.constant 0 : index
    %c0_0 = arith.constant 0 : index
    %0 = vector.load %arg2[%c0, %c0_0] : memref<9x128xbf16, #tpu.memory_space<vmem>>, vector<9x128xbf16>
    %c0_1 = arith.constant 0 : index
    %c0_2 = arith.constant 0 : index
    %1 = vector.load %arg3[%c0_1, %c0_2] : memref<1x128xf32, #tpu.memory_space<vmem>>, vector<1x128xf32>
    %c0_3 = arith.constant 0 : index
    %c0_4 = arith.constant 0 : index
    %c0_5 = arith.constant 0 : index
    %2 = vector.load %arg1[%c0_3, %c0_4, %c0_5] : memref<4x1024x9xbf16, #tpu.memory_space<vmem>>, vector<1x1024x9xbf16>
    %3 = vector.shape_cast %2 : vector<1x1024x9xbf16> to vector<1024x9xbf16>
    %cst = arith.constant dense<0.000000e+00> : vector<1024x128xf32>
    %4 = tpu.matmul %3, %0, %cst {dimension_numbers = #tpu.dot_dimension_numbers<[1], [0], [0], [1], [0, 0, 1, 1], [], []>} : vector<1024x9xbf16>, vector<9x128xbf16>, vector<1024x128xf32> -> vector<1024x128xf32>
    %5 = vector.broadcast %1 : vector<1x128xf32> to vector<1024x128xf32>
    %6 = arith.addf %4, %5 : vector<1024x128xf32>
    %cst_6 = arith.constant 0.000000e+00 : f32
    %7 = vector.broadcast %cst_6 : f32 to vector<1024x128xf32>
    %8 = arith.maximumf %6, %7 : vector<1024x128xf32>
    %c1 = arith.constant 1 : index
    %c0_7 = arith.constant 0 : index
    %c0_8 = arith.constant 0 : index
    %9 = vector.load %arg1[%c1, %c0_7, %c0_8] : memref<4x1024x9xbf16, #tpu.memory_space<vmem>>, vector<1x1024x9xbf16>
    %10 = vector.shape_cast %9 : vector<1x1024x9xbf16> to vector<1024x9xbf16>
    %cst_9 = arith.constant dense<0.000000e+00> : vector<1024x128xf32>
    %11 = tpu.matmul %10, %0, %cst_9 {dimension_numbers = #tpu.dot_dimension_numbers<[1], [0], [0], [1], [0, 0, 1, 1], [], []>} : vector<1024x9xbf16>, vector<9x128xbf16>, vector<1024x128xf32> -> vector<1024x128xf32>
    %12 = vector.broadcast %1 : vector<1x128xf32> to vector<1024x128xf32>
    %13 = arith.addf %11, %12 : vector<1024x128xf32>
    %cst_10 = arith.constant 0.000000e+00 : f32
    %14 = vector.broadcast %cst_10 : f32 to vector<1024x128xf32>
    %15 = arith.maximumf %13, %14 : vector<1024x128xf32>
    %16 = arith.maximumf %8, %15 : vector<1024x128xf32>
    %c2 = arith.constant 2 : index
    %c0_11 = arith.constant 0 : index
    %c0_12 = arith.constant 0 : index
    %17 = vector.load %arg1[%c2, %c0_11, %c0_12] : memref<4x1024x9xbf16, #tpu.memory_space<vmem>>, vector<1x1024x9xbf16>
    %18 = vector.shape_cast %17 : vector<1x1024x9xbf16> to vector<1024x9xbf16>
    %cst_13 = arith.constant dense<0.000000e+00> : vector<1024x128xf32>
    %19 = tpu.matmul %18, %0, %cst_13 {dimension_numbers = #tpu.dot_dimension_numbers<[1], [0], [0], [1], [0, 0, 1, 1], [], []>} : vector<1024x9xbf16>, vector<9x128xbf16>, vector<1024x128xf32> -> vector<1024x128xf32>
    %20 = vector.broadcast %1 : vector<1x128xf32> to vector<1024x128xf32>
    %21 = arith.addf %19, %20 : vector<1024x128xf32>
    %cst_14 = arith.constant 0.000000e+00 : f32
    %22 = vector.broadcast %cst_14 : f32 to vector<1024x128xf32>
    %23 = arith.maximumf %21, %22 : vector<1024x128xf32>
    %24 = arith.maximumf %16, %23 : vector<1024x128xf32>
    %c3 = arith.constant 3 : index
    %c0_15 = arith.constant 0 : index
    %c0_16 = arith.constant 0 : index
    %25 = vector.load %arg1[%c3, %c0_15, %c0_16] : memref<4x1024x9xbf16, #tpu.memory_space<vmem>>, vector<1x1024x9xbf16>
    %26 = vector.shape_cast %25 : vector<1x1024x9xbf16> to vector<1024x9xbf16>
    %cst_17 = arith.constant dense<0.000000e+00> : vector<1024x128xf32>
    %27 = tpu.matmul %26, %0, %cst_17 {dimension_numbers = #tpu.dot_dimension_numbers<[1], [0], [0], [1], [0, 0, 1, 1], [], []>} : vector<1024x9xbf16>, vector<9x128xbf16>, vector<1024x128xf32> -> vector<1024x128xf32>
    %28 = vector.broadcast %1 : vector<1x128xf32> to vector<1024x128xf32>
    %29 = arith.addf %27, %28 : vector<1024x128xf32>
    %cst_18 = arith.constant 0.000000e+00 : f32
    %30 = vector.broadcast %cst_18 : f32 to vector<1024x128xf32>
    %31 = arith.maximumf %29, %30 : vector<1024x128xf32>
    %32 = arith.maximumf %24, %31 : vector<1024x128xf32>
    %33 = arith.truncf %32 : vector<1024x128xf32> to vector<1024x128xbf16>
    %c0_19 = arith.constant 0 : index
    %c0_20 = arith.constant 0 : index
    %34 = vector.load %arg4[%c0_19, %c0_20] : memref<1024x128xbf16, #tpu.memory_space<vmem>>, vector<1024x128xbf16>
    tpu.vector_store %arg4[%c0_19, %c0_20], %33 {strides = array<i32>} : memref<1024x128xbf16, #tpu.memory_space<vmem>>, vector<1024x128xbf16>,
    return
  }
  func.func @transform_0(%arg0: i32) -> (i32, i32, i32) {
    %c0_i32 = arith.constant 0 : i32
    %c0_i32_0 = arith.constant 0 : i32
    %c0_i32_1 = arith.constant 0 : i32
    return %c0_i32, %arg0, %c0_i32_0 : i32, i32, i32
  }
  func.func @transform_1(%arg0: i32) -> (i32, i32) {
    %c0_i32 = arith.constant 0 : i32
    %c0_i32_0 = arith.constant 0 : i32
    %c0_i32_1 = arith.constant 0 : i32
    return %c0_i32, %c0_i32_0 : i32, i32
  }
  func.func @transform_2(%arg0: i32) -> (i32, i32) {
    %c0_i32 = arith.constant 0 : i32
    %c0_i32_0 = arith.constant 0 : i32
    %c0_i32_1 = arith.constant 0 : i32
    return %c0_i32, %c0_i32_0 : i32, i32
  }
  func.func @transform_3(%arg0: i32) -> (i32, i32) {
    %c0_i32 = arith.constant 0 : i32
    %c0_i32_0 = arith.constant 0 : i32
    return %arg0, %c0_i32 : i32, i32
  }
}

module attributes {stable_mosaic.version = 11 : i64} {
  func.func @_conv_relu_pool_kernel(%arg0: i32, %arg1: memref<9x208x144xbf16, #tpu.memory_space<vmem>>, %arg2: memref<144x128xbf16, #tpu.memory_space<vmem>>, %arg3: memref<1x128xf32, #tpu.memory_space<vmem>>, %arg4: memref<208x128xbf16, #tpu.memory_space<vmem>>) attributes {dimension_semantics = [#tpu.dimension_semantics<parallel>], iteration_bounds = array<i64: 1>, scalar_prefetch = 0 : i64, scratch_operands = 0 : i64, tpu.core_type = #tpu.core_type<tc>, window_params = [{transform_indices = @transform_0, window_bounds = array<i64: 9, 208, 144>}, {pipeline_mode = #tpu.pipeline_mode<synchronous>, transform_indices = @transform_1, window_bounds = array<i64: 144, 128>}, {pipeline_mode = #tpu.pipeline_mode<synchronous>, transform_indices = @transform_2, window_bounds = array<i64: 1, 128>}, {transform_indices = @transform_3, window_bounds = array<i64: 208, 128>}]} {
    %c0 = arith.constant 0 : index
    %c0_0 = arith.constant 0 : index
    %0 = vector.load %arg2[%c0, %c0_0] : memref<144x128xbf16, #tpu.memory_space<vmem>>, vector<144x128xbf16>
    %c0_1 = arith.constant 0 : index
    %c0_2 = arith.constant 0 : index
    %1 = vector.load %arg3[%c0_1, %c0_2] : memref<1x128xf32, #tpu.memory_space<vmem>>, vector<1x128xf32>
    %c0_3 = arith.constant 0 : index
    %c0_4 = arith.constant 0 : index
    %c0_5 = arith.constant 0 : index
    %2 = vector.load %arg1[%c0_3, %c0_4, %c0_5] : memref<9x208x144xbf16, #tpu.memory_space<vmem>>, vector<1x208x144xbf16>
    %3 = vector.shape_cast %2 : vector<1x208x144xbf16> to vector<208x144xbf16>
    %cst = arith.constant dense<0.000000e+00> : vector<208x128xf32>
    %4 = tpu.matmul %3, %0, %cst {dimension_numbers = #tpu.dot_dimension_numbers<[1], [0], [0], [1], [0, 0, 1, 1], [], []>} : vector<208x144xbf16>, vector<144x128xbf16>, vector<208x128xf32> -> vector<208x128xf32>
    %5 = vector.broadcast %1 : vector<1x128xf32> to vector<208x128xf32>
    %6 = arith.addf %4, %5 : vector<208x128xf32>
    %cst_6 = arith.constant 0.000000e+00 : f32
    %7 = vector.broadcast %cst_6 : f32 to vector<208x128xf32>
    %8 = arith.maximumf %6, %7 : vector<208x128xf32>
    %c1 = arith.constant 1 : index
    %c0_7 = arith.constant 0 : index
    %c0_8 = arith.constant 0 : index
    %9 = vector.load %arg1[%c1, %c0_7, %c0_8] : memref<9x208x144xbf16, #tpu.memory_space<vmem>>, vector<1x208x144xbf16>
    %10 = vector.shape_cast %9 : vector<1x208x144xbf16> to vector<208x144xbf16>
    %cst_9 = arith.constant dense<0.000000e+00> : vector<208x128xf32>
    %11 = tpu.matmul %10, %0, %cst_9 {dimension_numbers = #tpu.dot_dimension_numbers<[1], [0], [0], [1], [0, 0, 1, 1], [], []>} : vector<208x144xbf16>, vector<144x128xbf16>, vector<208x128xf32> -> vector<208x128xf32>
    %12 = vector.broadcast %1 : vector<1x128xf32> to vector<208x128xf32>
    %13 = arith.addf %11, %12 : vector<208x128xf32>
    %cst_10 = arith.constant 0.000000e+00 : f32
    %14 = vector.broadcast %cst_10 : f32 to vector<208x128xf32>
    %15 = arith.maximumf %13, %14 : vector<208x128xf32>
    %16 = arith.maximumf %8, %15 : vector<208x128xf32>
    %c2 = arith.constant 2 : index
    %c0_11 = arith.constant 0 : index
    %c0_12 = arith.constant 0 : index
    %17 = vector.load %arg1[%c2, %c0_11, %c0_12] : memref<9x208x144xbf16, #tpu.memory_space<vmem>>, vector<1x208x144xbf16>
    %18 = vector.shape_cast %17 : vector<1x208x144xbf16> to vector<208x144xbf16>
    %cst_13 = arith.constant dense<0.000000e+00> : vector<208x128xf32>
    %19 = tpu.matmul %18, %0, %cst_13 {dimension_numbers = #tpu.dot_dimension_numbers<[1], [0], [0], [1], [0, 0, 1, 1], [], []>} : vector<208x144xbf16>, vector<144x128xbf16>, vector<208x128xf32> -> vector<208x128xf32>
    %20 = vector.broadcast %1 : vector<1x128xf32> to vector<208x128xf32>
    %21 = arith.addf %19, %20 : vector<208x128xf32>
    %cst_14 = arith.constant 0.000000e+00 : f32
    %22 = vector.broadcast %cst_14 : f32 to vector<208x128xf32>
    %23 = arith.maximumf %21, %22 : vector<208x128xf32>
    %24 = arith.maximumf %16, %23 : vector<208x128xf32>
    %c3 = arith.constant 3 : index
    %c0_15 = arith.constant 0 : index
    %c0_16 = arith.constant 0 : index
    %25 = vector.load %arg1[%c3, %c0_15, %c0_16] : memref<9x208x144xbf16, #tpu.memory_space<vmem>>, vector<1x208x144xbf16>
    %26 = vector.shape_cast %25 : vector<1x208x144xbf16> to vector<208x144xbf16>
    %cst_17 = arith.constant dense<0.000000e+00> : vector<208x128xf32>
    %27 = tpu.matmul %26, %0, %cst_17 {dimension_numbers = #tpu.dot_dimension_numbers<[1], [0], [0], [1], [0, 0, 1, 1], [], []>} : vector<208x144xbf16>, vector<144x128xbf16>, vector<208x128xf32> -> vector<208x128xf32>
    %28 = vector.broadcast %1 : vector<1x128xf32> to vector<208x128xf32>
    %29 = arith.addf %27, %28 : vector<208x128xf32>
    %cst_18 = arith.constant 0.000000e+00 : f32
    %30 = vector.broadcast %cst_18 : f32 to vector<208x128xf32>
    %31 = arith.maximumf %29, %30 : vector<208x128xf32>
    %32 = arith.maximumf %24, %31 : vector<208x128xf32>
    %c4 = arith.constant 4 : index
    %c0_19 = arith.constant 0 : index
    %c0_20 = arith.constant 0 : index
    %33 = vector.load %arg1[%c4, %c0_19, %c0_20] : memref<9x208x144xbf16, #tpu.memory_space<vmem>>, vector<1x208x144xbf16>
    %34 = vector.shape_cast %33 : vector<1x208x144xbf16> to vector<208x144xbf16>
    %cst_21 = arith.constant dense<0.000000e+00> : vector<208x128xf32>
    %35 = tpu.matmul %34, %0, %cst_21 {dimension_numbers = #tpu.dot_dimension_numbers<[1], [0], [0], [1], [0, 0, 1, 1], [], []>} : vector<208x144xbf16>, vector<144x128xbf16>, vector<208x128xf32> -> vector<208x128xf32>
    %36 = vector.broadcast %1 : vector<1x128xf32> to vector<208x128xf32>
    %37 = arith.addf %35, %36 : vector<208x128xf32>
    %cst_22 = arith.constant 0.000000e+00 : f32
    %38 = vector.broadcast %cst_22 : f32 to vector<208x128xf32>
    %39 = arith.maximumf %37, %38 : vector<208x128xf32>
    %40 = arith.maximumf %32, %39 : vector<208x128xf32>
    %c5 = arith.constant 5 : index
    %c0_23 = arith.constant 0 : index
    %c0_24 = arith.constant 0 : index
    %41 = vector.load %arg1[%c5, %c0_23, %c0_24] : memref<9x208x144xbf16, #tpu.memory_space<vmem>>, vector<1x208x144xbf16>
    %42 = vector.shape_cast %41 : vector<1x208x144xbf16> to vector<208x144xbf16>
    %cst_25 = arith.constant dense<0.000000e+00> : vector<208x128xf32>
    %43 = tpu.matmul %42, %0, %cst_25 {dimension_numbers = #tpu.dot_dimension_numbers<[1], [0], [0], [1], [0, 0, 1, 1], [], []>} : vector<208x144xbf16>, vector<144x128xbf16>, vector<208x128xf32> -> vector<208x128xf32>
    %44 = vector.broadcast %1 : vector<1x128xf32> to vector<208x128xf32>
    %45 = arith.addf %43, %44 : vector<208x128xf32>
    %cst_26 = arith.constant 0.000000e+00 : f32
    %46 = vector.broadcast %cst_26 : f32 to vector<208x128xf32>
    %47 = arith.maximumf %45, %46 : vector<208x128xf32>
    %48 = arith.maximumf %40, %47 : vector<208x128xf32>
    %c6 = arith.constant 6 : index
    %c0_27 = arith.constant 0 : index
    %c0_28 = arith.constant 0 : index
    %49 = vector.load %arg1[%c6, %c0_27, %c0_28] : memref<9x208x144xbf16, #tpu.memory_space<vmem>>, vector<1x208x144xbf16>
    %50 = vector.shape_cast %49 : vector<1x208x144xbf16> to vector<208x144xbf16>
    %cst_29 = arith.constant dense<0.000000e+00> : vector<208x128xf32>
    %51 = tpu.matmul %50, %0, %cst_29 {dimension_numbers = #tpu.dot_dimension_numbers<[1], [0], [0], [1], [0, 0, 1, 1], [], []>} : vector<208x144xbf16>, vector<144x128xbf16>, vector<208x128xf32> -> vector<208x128xf32>
    %52 = vector.broadcast %1 : vector<1x128xf32> to vector<208x128xf32>
    %53 = arith.addf %51, %52 : vector<208x128xf32>
    %cst_30 = arith.constant 0.000000e+00 : f32
    %54 = vector.broadcast %cst_30 : f32 to vector<208x128xf32>
    %55 = arith.maximumf %53, %54 : vector<208x128xf32>
    %56 = arith.maximumf %48, %55 : vector<208x128xf32>
    %c7 = arith.constant 7 : index
    %c0_31 = arith.constant 0 : index
    %c0_32 = arith.constant 0 : index
    %57 = vector.load %arg1[%c7, %c0_31, %c0_32] : memref<9x208x144xbf16, #tpu.memory_space<vmem>>, vector<1x208x144xbf16>
    %58 = vector.shape_cast %57 : vector<1x208x144xbf16> to vector<208x144xbf16>
    %cst_33 = arith.constant dense<0.000000e+00> : vector<208x128xf32>
    %59 = tpu.matmul %58, %0, %cst_33 {dimension_numbers = #tpu.dot_dimension_numbers<[1], [0], [0], [1], [0, 0, 1, 1], [], []>} : vector<208x144xbf16>, vector<144x128xbf16>, vector<208x128xf32> -> vector<208x128xf32>
    %60 = vector.broadcast %1 : vector<1x128xf32> to vector<208x128xf32>
    %61 = arith.addf %59, %60 : vector<208x128xf32>
    %cst_34 = arith.constant 0.000000e+00 : f32
    %62 = vector.broadcast %cst_34 : f32 to vector<208x128xf32>
    %63 = arith.maximumf %61, %62 : vector<208x128xf32>
    %64 = arith.maximumf %56, %63 : vector<208x128xf32>
    %c8 = arith.constant 8 : index
    %c0_35 = arith.constant 0 : index
    %c0_36 = arith.constant 0 : index
    %65 = vector.load %arg1[%c8, %c0_35, %c0_36] : memref<9x208x144xbf16, #tpu.memory_space<vmem>>, vector<1x208x144xbf16>
    %66 = vector.shape_cast %65 : vector<1x208x144xbf16> to vector<208x144xbf16>
    %cst_37 = arith.constant dense<0.000000e+00> : vector<208x128xf32>
    %67 = tpu.matmul %66, %0, %cst_37 {dimension_numbers = #tpu.dot_dimension_numbers<[1], [0], [0], [1], [0, 0, 1, 1], [], []>} : vector<208x144xbf16>, vector<144x128xbf16>, vector<208x128xf32> -> vector<208x128xf32>
    %68 = vector.broadcast %1 : vector<1x128xf32> to vector<208x128xf32>
    %69 = arith.addf %67, %68 : vector<208x128xf32>
    %cst_38 = arith.constant 0.000000e+00 : f32
    %70 = vector.broadcast %cst_38 : f32 to vector<208x128xf32>
    %71 = arith.maximumf %69, %70 : vector<208x128xf32>
    %72 = arith.maximumf %64, %71 : vector<208x128xf32>
    %73 = arith.truncf %72 : vector<208x128xf32> to vector<208x128xbf16>
    %c0_39 = arith.constant 0 : index
    %c0_40 = arith.constant 0 : index
    %74 = vector.load %arg4[%c0_39, %c0_40] : memref<208x128xbf16, #tpu.memory_space<vmem>>, vector<208x128xbf16>
    tpu.vector_store %arg4[%c0_39, %c0_40], %73 {strides = array<i32>} : memref<208x128xbf16, #tpu.memory_space<vmem>>, vector<208x128xbf16>,
    return
  }
  func.func @transform_0(%arg0: i32) -> (i32, i32, i32) {
    %c0_i32 = arith.constant 0 : i32
    %c0_i32_0 = arith.constant 0 : i32
    %c0_i32_1 = arith.constant 0 : i32
    return %c0_i32, %arg0, %c0_i32_0 : i32, i32, i32
  }
  func.func @transform_1(%arg0: i32) -> (i32, i32) {
    %c0_i32 = arith.constant 0 : i32
    %c0_i32_0 = arith.constant 0 : i32
    %c0_i32_1 = arith.constant 0 : i32
    return %c0_i32, %c0_i32_0 : i32, i32
  }
  func.func @transform_2(%arg0: i32) -> (i32, i32) {
    %c0_i32 = arith.constant 0 : i32
    %c0_i32_0 = arith.constant 0 : i32
    %c0_i32_1 = arith.constant 0 : i32
    return %c0_i32, %c0_i32_0 : i32, i32
  }
  func.func @transform_3(%arg0: i32) -> (i32, i32) {
    %c0_i32 = arith.constant 0 : i32
    %c0_i32_0 = arith.constant 0 : i32
    return %arg0, %c0_i32 : i32, i32
  }
}

module attributes {stable_mosaic.version = 11 : i64} {
  func.func @_conv_relu_pool_kernel(%arg0: i32, %arg1: memref<4x64x288xbf16, #tpu.memory_space<vmem>>, %arg2: memref<288x128xbf16, #tpu.memory_space<vmem>>, %arg3: memref<1x128xf32, #tpu.memory_space<vmem>>, %arg4: memref<64x128xbf16, #tpu.memory_space<vmem>>) attributes {dimension_semantics = [#tpu.dimension_semantics<parallel>], iteration_bounds = array<i64: 1>, scalar_prefetch = 0 : i64, scratch_operands = 0 : i64, tpu.core_type = #tpu.core_type<tc>, window_params = [{transform_indices = @transform_0, window_bounds = array<i64: 4, 64, 288>}, {pipeline_mode = #tpu.pipeline_mode<synchronous>, transform_indices = @transform_1, window_bounds = array<i64: 288, 128>}, {pipeline_mode = #tpu.pipeline_mode<synchronous>, transform_indices = @transform_2, window_bounds = array<i64: 1, 128>}, {transform_indices = @transform_3, window_bounds = array<i64: 64, 128>}]} {
    %c0 = arith.constant 0 : index
    %c0_0 = arith.constant 0 : index
    %0 = vector.load %arg2[%c0, %c0_0] : memref<288x128xbf16, #tpu.memory_space<vmem>>, vector<288x128xbf16>
    %c0_1 = arith.constant 0 : index
    %c0_2 = arith.constant 0 : index
    %1 = vector.load %arg3[%c0_1, %c0_2] : memref<1x128xf32, #tpu.memory_space<vmem>>, vector<1x128xf32>
    %c0_3 = arith.constant 0 : index
    %c0_4 = arith.constant 0 : index
    %c0_5 = arith.constant 0 : index
    %2 = vector.load %arg1[%c0_3, %c0_4, %c0_5] : memref<4x64x288xbf16, #tpu.memory_space<vmem>>, vector<1x64x288xbf16>
    %3 = vector.shape_cast %2 : vector<1x64x288xbf16> to vector<64x288xbf16>
    %cst = arith.constant dense<0.000000e+00> : vector<64x128xf32>
    %4 = tpu.matmul %3, %0, %cst {dimension_numbers = #tpu.dot_dimension_numbers<[1], [0], [0], [1], [0, 0, 1, 1], [], []>} : vector<64x288xbf16>, vector<288x128xbf16>, vector<64x128xf32> -> vector<64x128xf32>
    %5 = vector.broadcast %1 : vector<1x128xf32> to vector<64x128xf32>
    %6 = arith.addf %4, %5 : vector<64x128xf32>
    %cst_6 = arith.constant 0.000000e+00 : f32
    %7 = vector.broadcast %cst_6 : f32 to vector<64x128xf32>
    %8 = arith.maximumf %6, %7 : vector<64x128xf32>
    %c1 = arith.constant 1 : index
    %c0_7 = arith.constant 0 : index
    %c0_8 = arith.constant 0 : index
    %9 = vector.load %arg1[%c1, %c0_7, %c0_8] : memref<4x64x288xbf16, #tpu.memory_space<vmem>>, vector<1x64x288xbf16>
    %10 = vector.shape_cast %9 : vector<1x64x288xbf16> to vector<64x288xbf16>
    %cst_9 = arith.constant dense<0.000000e+00> : vector<64x128xf32>
    %11 = tpu.matmul %10, %0, %cst_9 {dimension_numbers = #tpu.dot_dimension_numbers<[1], [0], [0], [1], [0, 0, 1, 1], [], []>} : vector<64x288xbf16>, vector<288x128xbf16>, vector<64x128xf32> -> vector<64x128xf32>
    %12 = vector.broadcast %1 : vector<1x128xf32> to vector<64x128xf32>
    %13 = arith.addf %11, %12 : vector<64x128xf32>
    %cst_10 = arith.constant 0.000000e+00 : f32
    %14 = vector.broadcast %cst_10 : f32 to vector<64x128xf32>
    %15 = arith.maximumf %13, %14 : vector<64x128xf32>
    %16 = arith.maximumf %8, %15 : vector<64x128xf32>
    %c2 = arith.constant 2 : index
    %c0_11 = arith.constant 0 : index
    %c0_12 = arith.constant 0 : index
    %17 = vector.load %arg1[%c2, %c0_11, %c0_12] : memref<4x64x288xbf16, #tpu.memory_space<vmem>>, vector<1x64x288xbf16>
    %18 = vector.shape_cast %17 : vector<1x64x288xbf16> to vector<64x288xbf16>
    %cst_13 = arith.constant dense<0.000000e+00> : vector<64x128xf32>
    %19 = tpu.matmul %18, %0, %cst_13 {dimension_numbers = #tpu.dot_dimension_numbers<[1], [0], [0], [1], [0, 0, 1, 1], [], []>} : vector<64x288xbf16>, vector<288x128xbf16>, vector<64x128xf32> -> vector<64x128xf32>
    %20 = vector.broadcast %1 : vector<1x128xf32> to vector<64x128xf32>
    %21 = arith.addf %19, %20 : vector<64x128xf32>
    %cst_14 = arith.constant 0.000000e+00 : f32
    %22 = vector.broadcast %cst_14 : f32 to vector<64x128xf32>
    %23 = arith.maximumf %21, %22 : vector<64x128xf32>
    %24 = arith.maximumf %16, %23 : vector<64x128xf32>
    %c3 = arith.constant 3 : index
    %c0_15 = arith.constant 0 : index
    %c0_16 = arith.constant 0 : index
    %25 = vector.load %arg1[%c3, %c0_15, %c0_16] : memref<4x64x288xbf16, #tpu.memory_space<vmem>>, vector<1x64x288xbf16>
    %26 = vector.shape_cast %25 : vector<1x64x288xbf16> to vector<64x288xbf16>
    %cst_17 = arith.constant dense<0.000000e+00> : vector<64x128xf32>
    %27 = tpu.matmul %26, %0, %cst_17 {dimension_numbers = #tpu.dot_dimension_numbers<[1], [0], [0], [1], [0, 0, 1, 1], [], []>} : vector<64x288xbf16>, vector<288x128xbf16>, vector<64x128xf32> -> vector<64x128xf32>
    %28 = vector.broadcast %1 : vector<1x128xf32> to vector<64x128xf32>
    %29 = arith.addf %27, %28 : vector<64x128xf32>
    %cst_18 = arith.constant 0.000000e+00 : f32
    %30 = vector.broadcast %cst_18 : f32 to vector<64x128xf32>
    %31 = arith.maximumf %29, %30 : vector<64x128xf32>
    %32 = arith.maximumf %24, %31 : vector<64x128xf32>
    %33 = arith.truncf %32 : vector<64x128xf32> to vector<64x128xbf16>
    %c0_19 = arith.constant 0 : index
    %c0_20 = arith.constant 0 : index
    %34 = vector.load %arg4[%c0_19, %c0_20] : memref<64x128xbf16, #tpu.memory_space<vmem>>, vector<64x128xbf16>
    tpu.vector_store %arg4[%c0_19, %c0_20], %33 {strides = array<i32>} : memref<64x128xbf16, #tpu.memory_space<vmem>>, vector<64x128xbf16>,
    return
  }
  func.func @transform_0(%arg0: i32) -> (i32, i32, i32) {
    %c0_i32 = arith.constant 0 : i32
    %c0_i32_0 = arith.constant 0 : i32
    %c0_i32_1 = arith.constant 0 : i32
    return %c0_i32, %arg0, %c0_i32_0 : i32, i32, i32
  }
  func.func @transform_1(%arg0: i32) -> (i32, i32) {
    %c0_i32 = arith.constant 0 : i32
    %c0_i32_0 = arith.constant 0 : i32
    %c0_i32_1 = arith.constant 0 : i32
    return %c0_i32, %c0_i32_0 : i32, i32
  }
  func.func @transform_2(%arg0: i32) -> (i32, i32) {
    %c0_i32 = arith.constant 0 : i32
    %c0_i32_0 = arith.constant 0 : i32
    %c0_i32_1 = arith.constant 0 : i32
    return %c0_i32, %c0_i32_0 : i32, i32
  }
  func.func @transform_3(%arg0: i32) -> (i32, i32) {
    %c0_i32 = arith.constant 0 : i32
    %c0_i32_0 = arith.constant 0 : i32
    return %arg0, %c0_i32 : i32, i32
  }
}

module attributes {stable_mosaic.version = 11 : i64} {
  func.func @_tail_kernel(%arg0: memref<4x32x256xbf16, #tpu.memory_space<vmem>>, %arg1: memref<256x64xbf16, #tpu.memory_space<vmem>>, %arg2: memref<1x64xf32, #tpu.memory_space<vmem>>, %arg3: memref<256x32xbf16, #tpu.memory_space<vmem>>, %arg4: memref<1x32xf32, #tpu.memory_space<vmem>>, %arg5: memref<32x64xbf16, #tpu.memory_space<vmem>>, %arg6: memref<1x64xf32, #tpu.memory_space<vmem>>, %arg7: memref<64x128xbf16, #tpu.memory_space<vmem>>, %arg8: memref<1x128xf32, #tpu.memory_space<vmem>>, %arg9: memref<128x128xbf16, #tpu.memory_space<vmem>>, %arg10: memref<1x128xf32, #tpu.memory_space<vmem>>, %arg11: memref<8x128xf32, #tpu.memory_space<vmem>>) attributes {dimension_semantics = [], scalar_prefetch = 0 : i64, scratch_operands = 0 : i64, tpu.core_type = #tpu.core_type<tc>} {
    %c0 = arith.constant 0 : index
    %c0_0 = arith.constant 0 : index
    %0 = vector.load %arg1[%c0, %c0_0] : memref<256x64xbf16, #tpu.memory_space<vmem>>, vector<256x64xbf16>
    %c0_1 = arith.constant 0 : index
    %c0_2 = arith.constant 0 : index
    %1 = vector.load %arg2[%c0_1, %c0_2] : memref<1x64xf32, #tpu.memory_space<vmem>>, vector<1x64xf32>
    %c0_3 = arith.constant 0 : index
    %c0_4 = arith.constant 0 : index
    %c0_5 = arith.constant 0 : index
    %2 = vector.load %arg0[%c0_3, %c0_4, %c0_5] : memref<4x32x256xbf16, #tpu.memory_space<vmem>>, vector<1x32x256xbf16>
    %3 = vector.shape_cast %2 : vector<1x32x256xbf16> to vector<32x256xbf16>
    %cst = arith.constant dense<0.000000e+00> : vector<32x64xf32>
    %4 = tpu.matmul %3, %0, %cst {dimension_numbers = #tpu.dot_dimension_numbers<[1], [0], [0], [1], [0, 0, 1, 1], [], []>} : vector<32x256xbf16>, vector<256x64xbf16>, vector<32x64xf32> -> vector<32x64xf32>
    %5 = vector.broadcast %1 : vector<1x64xf32> to vector<32x64xf32>
    %6 = arith.addf %4, %5 : vector<32x64xf32>
    %cst_6 = arith.constant 0.000000e+00 : f32
    %7 = vector.broadcast %cst_6 : f32 to vector<32x64xf32>
    %8 = arith.maximumf %6, %7 : vector<32x64xf32>
    %c1 = arith.constant 1 : index
    %c0_7 = arith.constant 0 : index
    %c0_8 = arith.constant 0 : index
    %9 = vector.load %arg0[%c1, %c0_7, %c0_8] : memref<4x32x256xbf16, #tpu.memory_space<vmem>>, vector<1x32x256xbf16>
    %10 = vector.shape_cast %9 : vector<1x32x256xbf16> to vector<32x256xbf16>
    %cst_9 = arith.constant dense<0.000000e+00> : vector<32x64xf32>
    %11 = tpu.matmul %10, %0, %cst_9 {dimension_numbers = #tpu.dot_dimension_numbers<[1], [0], [0], [1], [0, 0, 1, 1], [], []>} : vector<32x256xbf16>, vector<256x64xbf16>, vector<32x64xf32> -> vector<32x64xf32>
    %12 = vector.broadcast %1 : vector<1x64xf32> to vector<32x64xf32>
    %13 = arith.addf %11, %12 : vector<32x64xf32>
    %cst_10 = arith.constant 0.000000e+00 : f32
    %14 = vector.broadcast %cst_10 : f32 to vector<32x64xf32>
    %15 = arith.maximumf %13, %14 : vector<32x64xf32>
    %16 = arith.maximumf %8, %15 : vector<32x64xf32>
    %c2 = arith.constant 2 : index
    %c0_11 = arith.constant 0 : index
    %c0_12 = arith.constant 0 : index
    %17 = vector.load %arg0[%c2, %c0_11, %c0_12] : memref<4x32x256xbf16, #tpu.memory_space<vmem>>, vector<1x32x256xbf16>
    %18 = vector.shape_cast %17 : vector<1x32x256xbf16> to vector<32x256xbf16>
    %cst_13 = arith.constant dense<0.000000e+00> : vector<32x64xf32>
    %19 = tpu.matmul %18, %0, %cst_13 {dimension_numbers = #tpu.dot_dimension_numbers<[1], [0], [0], [1], [0, 0, 1, 1], [], []>} : vector<32x256xbf16>, vector<256x64xbf16>, vector<32x64xf32> -> vector<32x64xf32>
    %20 = vector.broadcast %1 : vector<1x64xf32> to vector<32x64xf32>
    %21 = arith.addf %19, %20 : vector<32x64xf32>
    %cst_14 = arith.constant 0.000000e+00 : f32
    %22 = vector.broadcast %cst_14 : f32 to vector<32x64xf32>
    %23 = arith.maximumf %21, %22 : vector<32x64xf32>
    %24 = arith.maximumf %16, %23 : vector<32x64xf32>
    %c3 = arith.constant 3 : index
    %c0_15 = arith.constant 0 : index
    %c0_16 = arith.constant 0 : index
    %25 = vector.load %arg0[%c3, %c0_15, %c0_16] : memref<4x32x256xbf16, #tpu.memory_space<vmem>>, vector<1x32x256xbf16>
    %26 = vector.shape_cast %25 : vector<1x32x256xbf16> to vector<32x256xbf16>
    %cst_17 = arith.constant dense<0.000000e+00> : vector<32x64xf32>
    %27 = tpu.matmul %26, %0, %cst_17 {dimension_numbers = #tpu.dot_dimension_numbers<[1], [0], [0], [1], [0, 0, 1, 1], [], []>} : vector<32x256xbf16>, vector<256x64xbf16>, vector<32x64xf32> -> vector<32x64xf32>
    %28 = vector.broadcast %1 : vector<1x64xf32> to vector<32x64xf32>
    %29 = arith.addf %27, %28 : vector<32x64xf32>
    %cst_18 = arith.constant 0.000000e+00 : f32
    %30 = vector.broadcast %cst_18 : f32 to vector<32x64xf32>
    %31 = arith.maximumf %29, %30 : vector<32x64xf32>
    %32 = arith.maximumf %24, %31 : vector<32x64xf32>
    %c0_19 = arith.constant 0 : index
    %c0_20 = arith.constant 0 : index
    %33 = vector.load %arg3[%c0_19, %c0_20] : memref<256x32xbf16, #tpu.memory_space<vmem>>, vector<256x32xbf16>
    %34 = vector.extract_strided_slice %32 {offsets = [0, 0], sizes = [8, 64], strides = [1, 1]} : vector<32x64xf32> to vector<8x64xf32>
    %35 = arith.truncf %34 : vector<8x64xf32> to vector<8x64xbf16>
    %36 = vector.extract_strided_slice %33 {offsets = [0, 0], sizes = [64, 32], strides = [1, 1]} : vector<256x32xbf16> to vector<64x32xbf16>
    %cst_21 = arith.constant dense<0.000000e+00> : vector<8x32xf32>
    %37 = tpu.matmul %35, %36, %cst_21 {dimension_numbers = #tpu.dot_dimension_numbers<[1], [0], [0], [1], [0, 0, 1, 1], [], []>} : vector<8x64xbf16>, vector<64x32xbf16>, vector<8x32xf32> -> vector<8x32xf32>
    %38 = vector.extract_strided_slice %32 {offsets = [8, 0], sizes = [8, 64], strides = [1, 1]} : vector<32x64xf32> to vector<8x64xf32>
    %39 = arith.truncf %38 : vector<8x64xf32> to vector<8x64xbf16>
    %40 = vector.extract_strided_slice %33 {offsets = [64, 0], sizes = [64, 32], strides = [1, 1]} : vector<256x32xbf16> to vector<64x32xbf16>
    %cst_22 = arith.constant dense<0.000000e+00> : vector<8x32xf32>
    %41 = tpu.matmul %39, %40, %cst_22 {dimension_numbers = #tpu.dot_dimension_numbers<[1], [0], [0], [1], [0, 0, 1, 1], [], []>} : vector<8x64xbf16>, vector<64x32xbf16>, vector<8x32xf32> -> vector<8x32xf32>
    %42 = arith.addf %37, %41 : vector<8x32xf32>
    %43 = vector.extract_strided_slice %32 {offsets = [16, 0], sizes = [8, 64], strides = [1, 1]} : vector<32x64xf32> to vector<8x64xf32>
    %44 = arith.truncf %43 : vector<8x64xf32> to vector<8x64xbf16>
    %45 = vector.extract_strided_slice %33 {offsets = [128, 0], sizes = [64, 32], strides = [1, 1]} : vector<256x32xbf16> to vector<64x32xbf16>
    %cst_23 = arith.constant dense<0.000000e+00> : vector<8x32xf32>
    %46 = tpu.matmul %44, %45, %cst_23 {dimension_numbers = #tpu.dot_dimension_numbers<[1], [0], [0], [1], [0, 0, 1, 1], [], []>} : vector<8x64xbf16>, vector<64x32xbf16>, vector<8x32xf32> -> vector<8x32xf32>
    %47 = arith.addf %42, %46 : vector<8x32xf32>
    %48 = vector.extract_strided_slice %32 {offsets = [24, 0], sizes = [8, 64], strides = [1, 1]} : vector<32x64xf32> to vector<8x64xf32>
    %49 = arith.truncf %48 : vector<8x64xf32> to vector<8x64xbf16>
    %50 = vector.extract_strided_slice %33 {offsets = [192, 0], sizes = [64, 32], strides = [1, 1]} : vector<256x32xbf16> to vector<64x32xbf16>
    %cst_24 = arith.constant dense<0.000000e+00> : vector<8x32xf32>
    %51 = tpu.matmul %49, %50, %cst_24 {dimension_numbers = #tpu.dot_dimension_numbers<[1], [0], [0], [1], [0, 0, 1, 1], [], []>} : vector<8x64xbf16>, vector<64x32xbf16>, vector<8x32xf32> -> vector<8x32xf32>
    %52 = arith.addf %47, %51 : vector<8x32xf32>
    %c0_25 = arith.constant 0 : index
    %c0_26 = arith.constant 0 : index
    %53 = vector.load %arg4[%c0_25, %c0_26] : memref<1x32xf32, #tpu.memory_space<vmem>>, vector<1x32xf32>
    %54 = vector.broadcast %53 : vector<1x32xf32> to vector<8x32xf32>
    %55 = arith.addf %52, %54 : vector<8x32xf32>
    %cst_27 = arith.constant 0.000000e+00 : f32
    %56 = vector.broadcast %cst_27 : f32 to vector<8x32xf32>
    %57 = arith.maximumf %55, %56 : vector<8x32xf32>
    %58 = arith.truncf %57 : vector<8x32xf32> to vector<8x32xbf16>
    %c0_28 = arith.constant 0 : index
    %c0_29 = arith.constant 0 : index
    %59 = vector.load %arg5[%c0_28, %c0_29] : memref<32x64xbf16, #tpu.memory_space<vmem>>, vector<32x64xbf16>
    %cst_30 = arith.constant dense<0.000000e+00> : vector<8x64xf32>
    %60 = tpu.matmul %58, %59, %cst_30 {dimension_numbers = #tpu.dot_dimension_numbers<[1], [0], [0], [1], [0, 0, 1, 1], [], []>} : vector<8x32xbf16>, vector<32x64xbf16>, vector<8x64xf32> -> vector<8x64xf32>
    %c0_31 = arith.constant 0 : index
    %c0_32 = arith.constant 0 : index
    %61 = vector.load %arg6[%c0_31, %c0_32] : memref<1x64xf32, #tpu.memory_space<vmem>>, vector<1x64xf32>
    %62 = vector.broadcast %61 : vector<1x64xf32> to vector<8x64xf32>
    %63 = arith.addf %60, %62 : vector<8x64xf32>
    %cst_33 = arith.constant 0.000000e+00 : f32
    %64 = vector.broadcast %cst_33 : f32 to vector<8x64xf32>
    %65 = arith.maximumf %63, %64 : vector<8x64xf32>
    %66 = arith.truncf %65 : vector<8x64xf32> to vector<8x64xbf16>
    %c0_34 = arith.constant 0 : index
    %c0_35 = arith.constant 0 : index
    %67 = vector.load %arg7[%c0_34, %c0_35] : memref<64x128xbf16, #tpu.memory_space<vmem>>, vector<64x128xbf16>
    %cst_36 = arith.constant dense<0.000000e+00> : vector<8x128xf32>
    %68 = tpu.matmul %66, %67, %cst_36 {dimension_numbers = #tpu.dot_dimension_numbers<[1], [0], [0], [1], [0, 0, 1, 1], [], []>} : vector<8x64xbf16>, vector<64x128xbf16>, vector<8x128xf32> -> vector<8x128xf32>
    %c0_37 = arith.constant 0 : index
    %c0_38 = arith.constant 0 : index
    %69 = vector.load %arg8[%c0_37, %c0_38] : memref<1x128xf32, #tpu.memory_space<vmem>>, vector<1x128xf32>
    %70 = vector.broadcast %69 : vector<1x128xf32> to vector<8x128xf32>
    %71 = arith.addf %68, %70 : vector<8x128xf32>
    %cst_39 = arith.constant 0.000000e+00 : f32
    %72 = vector.broadcast %cst_39 : f32 to vector<8x128xf32>
    %73 = arith.maximumf %71, %72 : vector<8x128xf32>
    %74 = arith.truncf %73 : vector<8x128xf32> to vector<8x128xbf16>
    %c0_40 = arith.constant 0 : index
    %c0_41 = arith.constant 0 : index
    %75 = vector.load %arg9[%c0_40, %c0_41] : memref<128x128xbf16, #tpu.memory_space<vmem>>, vector<128x128xbf16>
    %cst_42 = arith.constant dense<0.000000e+00> : vector<8x128xf32>
    %76 = tpu.matmul %74, %75, %cst_42 {dimension_numbers = #tpu.dot_dimension_numbers<[1], [0], [0], [1], [0, 0, 1, 1], [], []>} : vector<8x128xbf16>, vector<128x128xbf16>, vector<8x128xf32> -> vector<8x128xf32>
    %c0_43 = arith.constant 0 : index
    %c0_44 = arith.constant 0 : index
    %77 = vector.load %arg10[%c0_43, %c0_44] : memref<1x128xf32, #tpu.memory_space<vmem>>, vector<1x128xf32>
    %78 = vector.broadcast %77 : vector<1x128xf32> to vector<8x128xf32>
    %79 = arith.addf %76, %78 : vector<8x128xf32>
    %c0_45 = arith.constant 0 : index
    %c0_46 = arith.constant 0 : index
    %80 = vector.load %arg11[%c0_45, %c0_46] : memref<8x128xf32, #tpu.memory_space<vmem>>, vector<8x128xf32>
    tpu.vector_store %arg11[%c0_45, %c0_46], %79 {strides = array<i32>} : memref<8x128xf32, #tpu.memory_space<vmem>>, vector<8x128xf32>,
    return
  }
}

</mosaic_0001>

<bundles_post_ra>
// kernel: cnn_forward.4
= control target key start
LH: loop header
LB: loop body
LE: loop exit
PB: predicated region body
PF: predicated region fallthrough
CT: control target
= control target key end

     0   :  { %s13371_s12 = smov 0   ;;  %s13373_s13 = smov 0   ;;  %s15452_s0 = inlined_call_operand.vmem [shape: bf16[4,2048,9], index: 0, kind: input, shape index: {}]   ;;  %s15453_s1 = inlined_call_operand.vmem [shape: bf16[9,128], index: 1, kind: input, shape index: {}]   ;;  %s15454_s2 = inlined_call_operand.vmem [shape: f32[1,128], index: 2, kind: input, shape index: {}]   ;;  %s15455_s3 = inlined_call_operand.vmem [shape: bf16[2048,128], index: 3, kind: output, shape index: {}]  }
   0x1   :  { %s13375_s14 = smov 0  }
   0x2 LB: > { %s10709_s15 = sadd.s32 4294967295, %s13348_s14   ;;  %s13388_s16 = sadd.s32 1, %s13348_s14   ;;  %s13348_s14 = sphi %s13375_s14, %s15634_s14   ;;  %s13344_s13 = sphi %s13373_s13, %s15633_s13   ;;  %s13340_s12 = sphi %s13371_s12, %s15632_s12  }
   0x3   : > { %s17_s17 = ssub.s32 %s13348_s14, %s13388_s16  ;;  %s20_s18 = sadd.s32 1, %s13344_s13 }
   0x4   : > { %p18_p0 = scmp.eq.s32.totalorder %s17_s17, 0  ;;  %p27_p1 = scmp.ne.s32.totalorder %s13344_s13, %s13340_s12 }
   0x5   : > { %p28_p2 = scmp.eq.s32.totalorder %s13348_s14, 0  ;;  %p10712_p4 = scmp.ge.s32.totalorder %s13348_s14, 2 }
   0x6   : > { %s13397_s19 = scalar_select %p18_p0, %s13344_s13, %s20_s18  }
   0x7   : > { %p29_p3 = por %p28_p2, %p27_p1  ;;  %127 = sbr.rel (%p10712_p4) target bundleno = 146 (0x92), region = 24 }
   0xe   : > { %130 = sbr.rel (!%p29_p3) target bundleno = 146 (0x92), region = 28  ;;  %s132_s20 = sand.u32 (%p29_p3), 1, %s13344_s13  }
   0xf   : > { %s11748_s21 = sshll.u32 (%p29_p3), %s13348_s14, 9  ;;  %s10713_s22 = sshll.u32 (%p29_p3), %s132_s20, 11 }
  0x10   : > { %s13405_s25 = scalar_lea.vmem (%p29_p3), %s15452_s0, %s11748_s21  ;;  %s13410_s26 = scalar_lea.vmem (%p29_p3), [#allocation2], %s10713_s22 }
  0x11   : > { %v153_v0 = vld [vmem:[%s13405_s25] sm:$0xff] (%p29_p3)   ;;  %v157_v1 = vld [vmem:[%s13405_s25 + $0x8] sm:$0xff] (%p29_p3)   ;;  %v161_v2 = vld [vmem:[%s13405_s25 + $0x10] sm:$0xff] (%p29_p3)  }
  0x12   : > { %154 = vst [vmem:[%s13410_s26] sm:$0xff] (%p29_p3), %v153_v0   ;;  %158 = vst [vmem:[%s13410_s26 + $0x8] sm:$0xff] (%p29_p3), %v157_v1   ;;  %v165_v3 = vld [vmem:[%s13405_s25 + $0x18] sm:$0xff] (%p29_p3)   ;;  %v169_v4 = vld [vmem:[%s13405_s25 + $0x20] sm:$0xff] (%p29_p3)  }
  0x13   : > { %162 = vst [vmem:[%s13410_s26 + $0x10] sm:$0xff] (%p29_p3), %v161_v2   ;;  %v173_v5 = vld [vmem:[%s13405_s25 + $0x28] sm:$0xff] (%p29_p3)   ;;  %166 = vst [vmem:[%s13410_s26 + $0x18] sm:$0xff] (%p29_p3), %v165_v3   ;;  %v177_v6 = vld [vmem:[%s13405_s25 + $0x30] sm:$0xff] (%p29_p3)  }
  0x14   : > { %170 = vst [vmem:[%s13410_s26 + $0x20] sm:$0xff] (%p29_p3), %v169_v4   ;;  %174 = vst [vmem:[%s13410_s26 + $0x28] sm:$0xff] (%p29_p3), %v173_v5   ;;  %v181_v7 = vld [vmem:[%s13405_s25 + $0x38] sm:$0xff] (%p29_p3)   ;;  %v185_v8 = vld [vmem:[%s13405_s25 + $0x40] sm:$0xff] (%p29_p3)  }
  0x15   : > { %178 = vst [vmem:[%s13410_s26 + $0x30] sm:$0xff] %v177_v6   ;;  %182 = vst [vmem:[%s13410_s26 + $0x38] sm:$0xff] %v181_v7   ;;  %v189_v9 = vld [vmem:[%s13405_s25 + $0x48] sm:$0xff]   ;;  %v193_v10 = vld [vmem:[%s13405_s25 + $0x50] sm:$0xff]  }
  0x16   : > { %186 = vst [vmem:[%s13410_s26 + $0x40] sm:$0xff] %v185_v8   ;;  %v197_v11 = vld [vmem:[%s13405_s25 + $0x58] sm:$0xff]   ;;  %190 = vst [vmem:[%s13410_s26 + $0x48] sm:$0xff] %v189_v9   ;;  %v201_v12 = vld [vmem:[%s13405_s25 + $0x60] sm:$0xff]  }
  0x17   : > { %194 = vst [vmem:[%s13410_s26 + $0x50] sm:$0xff] %v193_v10   ;;  %198 = vst [vmem:[%s13410_s26 + $0x58] sm:$0xff] %v197_v11   ;;  %v205_v13 = vld [vmem:[%s13405_s25 + $0x68] sm:$0xff]   ;;  %v209_v14 = vld [vmem:[%s13405_s25 + $0x70] sm:$0xff]  }
  0x18   : > { %202 = vst [vmem:[%s13410_s26 + $0x60] sm:$0xff] %v201_v12   ;;  %206 = vst [vmem:[%s13410_s26 + $0x68] sm:$0xff] %v205_v13   ;;  %v213_v15 = vld [vmem:[%s13405_s25 + $0x78] sm:$0xff]   ;;  %v217_v16 = vld [vmem:[%s13405_s25 + $0x80] sm:$0xff]  }
  0x19   : > { %210 = vst [vmem:[%s13410_s26 + $0x70] sm:$0xff] %v209_v14   ;;  %v221_v17 = vld [vmem:[%s13405_s25 + $0x88] sm:$0xff]   ;;  %214 = vst [vmem:[%s13410_s26 + $0x78] sm:$0xff] %v213_v15   ;;  %v225_v18 = vld [vmem:[%s13405_s25 + $0x90] sm:$0xff]  }
  0x1a   : > { %218 = vst [vmem:[%s13410_s26 + $0x80] sm:$0xff] %v217_v16   ;;  %222 = vst [vmem:[%s13410_s26 + $0x88] sm:$0xff] %v221_v17   ;;  %v229_v19 = vld [vmem:[%s13405_s25 + $0x98] sm:$0xff]   ;;  %v233_v20 = vld [vmem:[%s13405_s25 + $0xa0] sm:$0xff]  }
  0x1b   : > { %226 = vst [vmem:[%s13410_s26 + $0x90] sm:$0xff] %v225_v18   ;;  %230 = vst [vmem:[%s13410_s26 + $0x98] sm:$0xff] %v229_v19   ;;  %v237_v21 = vld [vmem:[%s13405_s25 + $0xa8] sm:$0xff]   ;;  %v241_v22 = vld [vmem:[%s13405_s25 + $0xb0] sm:$0xff]  }
  0x1c   : > { %234 = vst [vmem:[%s13410_s26 + $0xa0] sm:$0xff] %v233_v20   ;;  %v245_v23 = vld [vmem:[%s13405_s25 + $0xb8] sm:$0xff]   ;;  %238 = vst [vmem:[%s13410_s26 + $0xa8] sm:$0xff] %v237_v21   ;;  %v249_v24 = vld [vmem:[%s13405_s25 + $0xc0] sm:$0xff]  }
  0x1d   : > { %242 = vst [vmem:[%s13410_s26 + $0xb0] sm:$0xff] %v241_v22   ;;  %246 = vst [vmem:[%s13410_s26 + $0xb8] sm:$0xff] %v245_v23   ;;  %v253_v25 = vld [vmem:[%s13405_s25 + $0xc8] sm:$0xff]   ;;  %v257_v26 = vld [vmem:[%s13405_s25 + $0xd0] sm:$0xff]  }
  0x1e   : > { %250 = vst [vmem:[%s13410_s26 + $0xc0] sm:$0xff] %v249_v24   ;;  %254 = vst [vmem:[%s13410_s26 + $0xc8] sm:$0xff] %v253_v25   ;;  %v261_v27 = vld [vmem:[%s13405_s25 + $0xd8] sm:$0xff]   ;;  %v265_v28 = vld [vmem:[%s13405_s25 + $0xe0] sm:$0xff]  }
  0x1f   : > { %258 = vst [vmem:[%s13410_s26 + $0xd0] sm:$0xff] %v257_v26   ;;  %v269_v29 = vld [vmem:[%s13405_s25 + $0xe8] sm:$0xff]   ;;  %262 = vst [vmem:[%s13410_s26 + $0xd8] sm:$0xff] %v261_v27   ;;  %v273_v30 = vld [vmem:[%s13405_s25 + $0xf0] sm:$0xff]  }
  0x20   : > { %266 = vst [vmem:[%s13410_s26 + $0xe0] sm:$0xff] %v265_v28   ;;  %270 = vst [vmem:[%s13410_s26 + $0xe8] sm:$0xff] %v269_v29   ;;  %v277_v31 = vld [vmem:[%s13405_s25 + $0xf8] sm:$0xff]   ;;  %v281_v32 = vld [vmem:[%s13405_s25 + $0x100] sm:$0xff]  }
  0x21   : > { %274 = vst [vmem:[%s13410_s26 + $0xf0] sm:$0xff] %v273_v30   ;;  %278 = vst [vmem:[%s13410_s26 + $0xf8] sm:$0xff] %v277_v31   ;;  %v285_v33 = vld [vmem:[%s13405_s25 + $0x108] sm:$0xff]   ;;  %v289_v34 = vld [vmem:[%s13405_s25 + $0x110] sm:$0xff]  }
  0x22   : > { %282 = vst [vmem:[%s13410_s26 + $0x100] sm:$0xff] %v281_v32   ;;  %v293_v35 = vld [vmem:[%s13405_s25 + $0x118] sm:$0xff]   ;;  %286 = vst [vmem:[%s13410_s26 + $0x108] sm:$0xff] %v285_v33   ;;  %v297_v36 = vld [vmem:[%s13405_s25 + $0x120] sm:$0xff]  }
  0x23   : > { %290 = vst [vmem:[%s13410_s26 + $0x110] sm:$0xff] %v289_v34   ;;  %294 = vst [vmem:[%s13410_s26 + $0x118] sm:$0xff] %v293_v35   ;;  %v301_v37 = vld [vmem:[%s13405_s25 + $0x128] sm:$0xff]   ;;  %v305_v38 = vld [vmem:[%s13405_s25 + $0x130] sm:$0xff]  }
  0x24   : > { %298 = vst [vmem:[%s13410_s26 + $0x120] sm:$0xff] %v297_v36   ;;  %302 = vst [vmem:[%s13410_s26 + $0x128] sm:$0xff] %v301_v37   ;;  %v309_v39 = vld [vmem:[%s13405_s25 + $0x138] sm:$0xff]   ;;  %v313_v40 = vld [vmem:[%s13405_s25 + $0x140] sm:$0xff]  }
  0x25   : > { %306 = vst [vmem:[%s13410_s26 + $0x130] sm:$0xff] %v305_v38   ;;  %v317_v41 = vld [vmem:[%s13405_s25 + $0x148] sm:$0xff]   ;;  %310 = vst [vmem:[%s13410_s26 + $0x138] sm:$0xff] %v309_v39   ;;  %v321_v42 = vld [vmem:[%s13405_s25 + $0x150] sm:$0xff]  }
  0x26   : > { %314 = vst [vmem:[%s13410_s26 + $0x140] sm:$0xff] %v313_v40   ;;  %318 = vst [vmem:[%s13410_s26 + $0x148] sm:$0xff] %v317_v41   ;;  %v325_v43 = vld [vmem:[%s13405_s25 + $0x158] sm:$0xff]   ;;  %v329_v44 = vld [vmem:[%s13405_s25 + $0x160] sm:$0xff]  }
  0x27   : > { %322 = vst [vmem:[%s13410_s26 + $0x150] sm:$0xff] %v321_v42   ;;  %326 = vst [vmem:[%s13410_s26 + $0x158] sm:$0xff] %v325_v43   ;;  %v333_v45 = vld [vmem:[%s13405_s25 + $0x168] sm:$0xff]   ;;  %v337_v46 = vld [vmem:[%s13405_s25 + $0x170] sm:$0xff]  }
  0x28   : > { %330 = vst [vmem:[%s13410_s26 + $0x160] sm:$0xff] %v329_v44   ;;  %v341_v47 = vld [vmem:[%s13405_s25 + $0x178] sm:$0xff]   ;;  %334 = vst [vmem:[%s13410_s26 + $0x168] sm:$0xff] %v333_v45   ;;  %v345_v48 = vld [vmem:[%s13405_s25 + $0x180] sm:$0xff]  }
  0x29   : > { %338 = vst [vmem:[%s13410_s26 + $0x170] sm:$0xff] %v337_v46   ;;  %342 = vst [vmem:[%s13410_s26 + $0x178] sm:$0xff] %v341_v47   ;;  %v349_v49 = vld [vmem:[%s13405_s25 + $0x188] sm:$0xff]   ;;  %v353_v50 = vld [vmem:[%s13405_s25 + $0x190] sm:$0xff]  }
  0x2a   : > { %346 = vst [vmem:[%s13410_s26 + $0x180] sm:$0xff] %v345_v48   ;;  %350 = vst [vmem:[%s13410_s26 + $0x188] sm:$0xff] %v349_v49   ;;  %v357_v51 = vld [vmem:[%s13405_s25 + $0x198] sm:$0xff]   ;;  %v361_v52 = vld [vmem:[%s13405_s25 + $0x1a0] sm:$0xff]  }
  0x2b   : > { %354 = vst [vmem:[%s13410_s26 + $0x190] sm:$0xff] %v353_v50   ;;  %v365_v53 = vld [vmem:[%s13405_s25 + $0x1a8] sm:$0xff]   ;;  %358 = vst [vmem:[%s13410_s26 + $0x198] sm:$0xff] %v357_v51   ;;  %v369_v54 = vld [vmem:[%s13405_s25 + $0x1b0] sm:$0xff]  }
  0x2c   : > { %362 = vst [vmem:[%s13410_s26 + $0x1a0] sm:$0xff] %v361_v52   ;;  %366 = vst [vmem:[%s13410_s26 + $0x1a8] sm:$0xff] %v365_v53   ;;  %v373_v55 = vld [vmem:[%s13405_s25 + $0x1b8] sm:$0xff]   ;;  %v377_v56 = vld [vmem:[%s13405_s25 + $0x1c0] sm:$0xff]  }
  0x2d   : > { %370 = vst [vmem:[%s13410_s26 + $0x1b0] sm:$0xff] %v369_v54   ;;  %374 = vst [vmem:[%s13410_s26 + $0x1b8] sm:$0xff] %v373_v55   ;;  %v381_v57 = vld [vmem:[%s13405_s25 + $0x1c8] sm:$0xff]   ;;  %v385_v58 = vld [vmem:[%s13405_s25 + $0x1d0] sm:$0xff]  }
  0x2e   : > { %378 = vst [vmem:[%s13410_s26 + $0x1c0] sm:$0xff] %v377_v56   ;;  %v389_v59 = vld [vmem:[%s13405_s25 + $0x1d8] sm:$0xff]   ;;  %382 = vst [vmem:[%s13410_s26 + $0x1c8] sm:$0xff] %v381_v57   ;;  %v393_v60 = vld [vmem:[%s13405_s25 + $0x1e0] sm:$0xff]  }
  0x2f   : > { %386 = vst [vmem:[%s13410_s26 + $0x1d0] sm:$0xff] %v385_v58   ;;  %390 = vst [vmem:[%s13410_s26 + $0x1d8] sm:$0xff] %v389_v59   ;;  %v397_v61 = vld [vmem:[%s13405_s25 + $0x1e8] sm:$0xff]   ;;  %v401_v62 = vld [vmem:[%s13405_s25 + $0x1f0] sm:$0xff]  }
  0x30   : > { %394 = vst [vmem:[%s13410_s26 + $0x1e0] sm:$0xff] %v393_v60   ;;  %398 = vst [vmem:[%s13410_s26 + $0x1e8] sm:$0xff] %v397_v61   ;;  %v405_v63 = vld [vmem:[%s13405_s25 + $0x1f8] sm:$0xff]   ;;  %v409_v0 = vld [vmem:[%s13405_s25 + $0x400] sm:$0xff]  }
  0x31   : > { %402 = vst [vmem:[%s13410_s26 + $0x1f0] sm:$0xff] %v401_v62   ;;  %v413_v1 = vld [vmem:[%s13405_s25 + $0x408] sm:$0xff]   ;;  %406 = vst [vmem:[%s13410_s26 + $0x1f8] sm:$0xff] %v405_v63   ;;  %v417_v2 = vld [vmem:[%s13405_s25 + $0x410] sm:$0xff]  }
  0x32   : > { %410 = vst [vmem:[%s13410_s26 + $0x200] sm:$0xff] %v409_v0   ;;  %414 = vst [vmem:[%s13410_s26 + $0x208] sm:$0xff] %v413_v1   ;;  %v421_v3 = vld [vmem:[%s13405_s25 + $0x418] sm:$0xff]   ;;  %v425_v4 = vld [vmem:[%s13405_s25 + $0x420] sm:$0xff]  }
  0x33   : > { %418 = vst [vmem:[%s13410_s26 + $0x210] sm:$0xff] %v417_v2   ;;  %422 = vst [vmem:[%s13410_s26 + $0x218] sm:$0xff] %v421_v3   ;;  %v429_v5 = vld [vmem:[%s13405_s25 + $0x428] sm:$0xff]   ;;  %v433_v6 = vld [vmem:[%s13405_s25 + $0x430] sm:$0xff]  }
  0x34   : > { %426 = vst [vmem:[%s13410_s26 + $0x220] sm:$0xff] %v425_v4   ;;  %v437_v7 = vld [vmem:[%s13405_s25 + $0x438] sm:$0xff]   ;;  %430 = vst [vmem:[%s13410_s26 + $0x228] sm:$0xff] %v429_v5   ;;  %v441_v8 = vld [vmem:[%s13405_s25 + $0x440] sm:$0xff]  }
  0x35   : > { %434 = vst [vmem:[%s13410_s26 + $0x230] sm:$0xff] %v433_v6   ;;  %438 = vst [vmem:[%s13410_s26 + $0x238] sm:$0xff] %v437_v7   ;;  %v445_v9 = vld [vmem:[%s13405_s25 + $0x448] sm:$0xff]   ;;  %v449_v10 = vld [vmem:[%s13405_s25 + $0x450] sm:$0xff]  }
  0x36   : > { %442 = vst [vmem:[%s13410_s26 + $0x240] sm:$0xff] %v441_v8   ;;  %446 = vst [vmem:[%s13410_s26 + $0x248] sm:$0xff] %v445_v9   ;;  %v453_v11 = vld [vmem:[%s13405_s25 + $0x458] sm:$0xff]   ;;  %v457_v12 = vld [vmem:[%s13405_s25 + $0x460] sm:$0xff]  }
  0x37   : > { %450 = vst [vmem:[%s13410_s26 + $0x250] sm:$0xff] %v449_v10   ;;  %v461_v13 = vld [vmem:[%s13405_s25 + $0x468] sm:$0xff]   ;;  %454 = vst [vmem:[%s13410_s26 + $0x258] sm:$0xff] %v453_v11   ;;  %v465_v14 = vld [vmem:[%s13405_s25 + $0x470] sm:$0xff]  }
  0x38   : > { %458 = vst [vmem:[%s13410_s26 + $0x260] sm:$0xff] %v457_v12   ;;  %462 = vst [vmem:[%s13410_s26 + $0x268] sm:$0xff] %v461_v13   ;;  %v469_v15 = vld [vmem:[%s13405_s25 + $0x478] sm:$0xff]   ;;  %v473_v16 = vld [vmem:[%s13405_s25 + $0x480] sm:$0xff]  }
  0x39   : > { %466 = vst [vmem:[%s13410_s26 + $0x270] sm:$0xff] %v465_v14   ;;  %470 = vst [vmem:[%s13410_s26 + $0x278] sm:$0xff] %v469_v15   ;;  %v477_v17 = vld [vmem:[%s13405_s25 + $0x488] sm:$0xff]   ;;  %v481_v18 = vld [vmem:[%s13405_s25 + $0x490] sm:$0xff]  }
  0x3a   : > { %474 = vst [vmem:[%s13410_s26 + $0x280] sm:$0xff] %v473_v16   ;;  %v485_v19 = vld [vmem:[%s13405_s25 + $0x498] sm:$0xff]   ;;  %478 = vst [vmem:[%s13410_s26 + $0x288] sm:$0xff] %v477_v17   ;;  %v489_v20 = vld [vmem:[%s13405_s25 + $0x4a0] sm:$0xff]  }
  0x3b   : > { %482 = vst [vmem:[%s13410_s26 + $0x290] sm:$0xff] %v481_v18   ;;  %486 = vst [vmem:[%s13410_s26 + $0x298] sm:$0xff] %v485_v19   ;;  %v493_v21 = vld [vmem:[%s13405_s25 + $0x4a8] sm:$0xff]   ;;  %v497_v22 = vld [vmem:[%s13405_s25 + $0x4b0] sm:$0xff]  }
  0x3c   : > { %490 = vst [vmem:[%s13410_s26 + $0x2a0] sm:$0xff] %v489_v20   ;;  %494 = vst [vmem:[%s13410_s26 + $0x2a8] sm:$0xff] %v493_v21   ;;  %v501_v23 = vld [vmem:[%s13405_s25 + $0x4b8] sm:$0xff]   ;;  %v505_v24 = vld [vmem:[%s13405_s25 + $0x4c0] sm:$0xff]  }
  0x3d   : > { %498 = vst [vmem:[%s13410_s26 + $0x2b0] sm:$0xff] %v497_v22   ;;  %v509_v25 = vld [vmem:[%s13405_s25 + $0x4c8] sm:$0xff]   ;;  %502 = vst [vmem:[%s13410_s26 + $0x2b8] sm:$0xff] %v501_v23   ;;  %v513_v26 = vld [vmem:[%s13405_s25 + $0x4d0] sm:$0xff]  }
  0x3e   : > { %506 = vst [vmem:[%s13410_s26 + $0x2c0] sm:$0xff] %v505_v24   ;;  %510 = vst [vmem:[%s13410_s26 + $0x2c8] sm:$0xff] %v509_v25   ;;  %v517_v27 = vld [vmem:[%s13405_s25 + $0x4d8] sm:$0xff]   ;;  %v521_v28 = vld [vmem:[%s13405_s25 + $0x4e0] sm:$0xff]  }
  0x3f   : > { %514 = vst [vmem:[%s13410_s26 + $0x2d0] sm:$0xff] %v513_v26   ;;  %518 = vst [vmem:[%s13410_s26 + $0x2d8] sm:$0xff] %v517_v27   ;;  %v525_v29 = vld [vmem:[%s13405_s25 + $0x4e8] sm:$0xff]   ;;  %v529_v30 = vld [vmem:[%s13405_s25 + $0x4f0] sm:$0xff]  }
  0x40   : > { %522 = vst [vmem:[%s13410_s26 + $0x2e0] sm:$0xff] %v521_v28   ;;  %v533_v31 = vld [vmem:[%s13405_s25 + $0x4f8] sm:$0xff]   ;;  %526 = vst [vmem:[%s13410_s26 + $0x2e8] sm:$0xff] %v525_v29   ;;  %v537_v32 = vld [vmem:[%s13405_s25 + $0x500] sm:$0xff]  }
  0x41   : > { %530 = vst [vmem:[%s13410_s26 + $0x2f0] sm:$0xff] %v529_v30   ;;  %534 = vst [vmem:[%s13410_s26 + $0x2f8] sm:$0xff] %v533_v31   ;;  %v541_v33 = vld [vmem:[%s13405_s25 + $0x508] sm:$0xff]   ;;  %v545_v34 = vld [vmem:[%s13405_s25 + $0x510] sm:$0xff]  }
  0x42   : > { %538 = vst [vmem:[%s13410_s26 + $0x300] sm:$0xff] %v537_v32   ;;  %542 = vst [vmem:[%s13410_s26 + $0x308] sm:$0xff] %v541_v33   ;;  %v549_v35 = vld [vmem:[%s13405_s25 + $0x518] sm:$0xff]   ;;  %v553_v36 = vld [vmem:[%s13405_s25 + $0x520] sm:$0xff]  }
  0x43   : > { %546 = vst [vmem:[%s13410_s26 + $0x310] sm:$0xff] %v545_v34   ;;  %v557_v37 = vld [vmem:[%s13405_s25 + $0x528] sm:$0xff]   ;;  %550 = vst [vmem:[%s13410_s26 + $0x318] sm:$0xff] %v549_v35   ;;  %v561_v38 = vld [vmem:[%s13405_s25 + $0x530] sm:$0xff]  }
  0x44   : > { %554 = vst [vmem:[%s13410_s26 + $0x320] sm:$0xff] %v553_v36   ;;  %558 = vst [vmem:[%s13410_s26 + $0x328] sm:$0xff] %v557_v37   ;;  %v565_v39 = vld [vmem:[%s13405_s25 + $0x538] sm:$0xff]   ;;  %v569_v40 = vld [vmem:[%s13405_s25 + $0x540] sm:$0xff]  }
  0x45   : > { %562 = vst [vmem:[%s13410_s26 + $0x330] sm:$0xff] %v561_v38   ;;  %566 = vst [vmem:[%s13410_s26 + $0x338] sm:$0xff] %v565_v39   ;;  %v573_v41 = vld [vmem:[%s13405_s25 + $0x548] sm:$0xff]   ;;  %v577_v42 = vld [vmem:[%s13405_s25 + $0x550] sm:$0xff]  }
  0x46   : > { %570 = vst [vmem:[%s13410_s26 + $0x340] sm:$0xff] %v569_v40   ;;  %v581_v43 = vld [vmem:[%s13405_s25 + $0x558] sm:$0xff]   ;;  %574 = vst [vmem:[%s13410_s26 + $0x348] sm:$0xff] %v573_v41   ;;  %v585_v44 = vld [vmem:[%s13405_s25 + $0x560] sm:$0xff]  }
  0x47   : > { %578 = vst [vmem:[%s13410_s26 + $0x350] sm:$0xff] %v577_v42   ;;  %582 = vst [vmem:[%s13410_s26 + $0x358] sm:$0xff] %v581_v43   ;;  %v589_v45 = vld [vmem:[%s13405_s25 + $0x568] sm:$0xff]   ;;  %v593_v46 = vld [vmem:[%s13405_s25 + $0x570] sm:$0xff]  }
  0x48   : > { %586 = vst [vmem:[%s13410_s26 + $0x360] sm:$0xff] %v585_v44   ;;  %590 = vst [vmem:[%s13410_s26 + $0x368] sm:$0xff] %v589_v45   ;;  %v597_v47 = vld [vmem:[%s13405_s25 + $0x578] sm:$0xff]   ;;  %v601_v48 = vld [vmem:[%s13405_s25 + $0x580] sm:$0xff]  }
  0x49   : > { %594 = vst [vmem:[%s13410_s26 + $0x370] sm:$0xff] %v593_v46   ;;  %v605_v49 = vld [vmem:[%s13405_s25 + $0x588] sm:$0xff]   ;;  %598 = vst [vmem:[%s13410_s26 + $0x378] sm:$0xff] %v597_v47   ;;  %v609_v50 = vld [vmem:[%s13405_s25 + $0x590] sm:$0xff]  }
  0x4a   : > { %602 = vst [vmem:[%s13410_s26 + $0x380] sm:$0xff] %v601_v48   ;;  %606 = vst [vmem:[%s13410_s26 + $0x388] sm:$0xff] %v605_v49   ;;  %v613_v51 = vld [vmem:[%s13405_s25 + $0x598] sm:$0xff]   ;;  %v617_v52 = vld [vmem:[%s13405_s25 + $0x5a0] sm:$0xff]  }
  0x4b   : > { %610 = vst [vmem:[%s13410_s26 + $0x390] sm:$0xff] %v609_v50   ;;  %614 = vst [vmem:[%s13410_s26 + $0x398] sm:$0xff] %v613_v51   ;;  %v621_v53 = vld [vmem:[%s13405_s25 + $0x5a8] sm:$0xff]   ;;  %v625_v54 = vld [vmem:[%s13405_s25 + $0x5b0] sm:$0xff]  }
  0x4c   : > { %618 = vst [vmem:[%s13410_s26 + $0x3a0] sm:$0xff] %v617_v52   ;;  %v629_v55 = vld [vmem:[%s13405_s25 + $0x5b8] sm:$0xff]   ;;  %622 = vst [vmem:[%s13410_s26 + $0x3a8] sm:$0xff] %v621_v53   ;;  %v633_v56 = vld [vmem:[%s13405_s25 + $0x5c0] sm:$0xff]  }
  0x4d   : > { %626 = vst [vmem:[%s13410_s26 + $0x3b0] sm:$0xff] %v625_v54   ;;  %630 = vst [vmem:[%s13410_s26 + $0x3b8] sm:$0xff] %v629_v55   ;;  %v637_v57 = vld [vmem:[%s13405_s25 + $0x5c8] sm:$0xff]   ;;  %v641_v58 = vld [vmem:[%s13405_s25 + $0x5d0] sm:$0xff]  }
  0x4e   : > { %634 = vst [vmem:[%s13410_s26 + $0x3c0] sm:$0xff] %v633_v56   ;;  %638 = vst [vmem:[%s13410_s26 + $0x3c8] sm:$0xff] %v637_v57   ;;  %v645_v59 = vld [vmem:[%s13405_s25 + $0x5d8] sm:$0xff]   ;;  %v649_v60 = vld [vmem:[%s13405_s25 + $0x5e0] sm:$0xff]  }
  0x4f   : > { %642 = vst [vmem:[%s13410_s26 + $0x3d0] sm:$0xff] %v641_v58   ;;  %v653_v61 = vld [vmem:[%s13405_s25 + $0x5e8] sm:$0xff]   ;;  %646 = vst [vmem:[%s13410_s26 + $0x3d8] sm:$0xff] %v645_v59   ;;  %v657_v62 = vld [vmem:[%s13405_s25 + $0x5f0] sm:$0xff]  }
  0x50   : > { %650 = vst [vmem:[%s13410_s26 + $0x3e0] sm:$0xff] %v649_v60   ;;  %654 = vst [vmem:[%s13410_s26 + $0x3e8] sm:$0xff] %v653_v61   ;;  %v661_v63 = vld [vmem:[%s13405_s25 + $0x5f8] sm:$0xff]   ;;  %v665_v0 = vld [vmem:[%s13405_s25 + $0x800] sm:$0xff]  }
  0x51   : > { %658 = vst [vmem:[%s13410_s26 + $0x3f0] sm:$0xff] %v657_v62   ;;  %662 = vst [vmem:[%s13410_s26 + $0x3f8] sm:$0xff] %v661_v63   ;;  %v669_v1 = vld [vmem:[%s13405_s25 + $0x808] sm:$0xff]   ;;  %v673_v2 = vld [vmem:[%s13405_s25 + $0x810] sm:$0xff]  }
  0x52   : > { %666 = vst [vmem:[%s13410_s26 + $0x400] sm:$0xff] %v665_v0   ;;  %v677_v3 = vld [vmem:[%s13405_s25 + $0x818] sm:$0xff]   ;;  %670 = vst [vmem:[%s13410_s26 + $0x408] sm:$0xff] %v669_v1   ;;  %v681_v4 = vld [vmem:[%s13405_s25 + $0x820] sm:$0xff]  }
  0x53   : > { %674 = vst [vmem:[%s13410_s26 + $0x410] sm:$0xff] %v673_v2   ;;  %678 = vst [vmem:[%s13410_s26 + $0x418] sm:$0xff] %v677_v3   ;;  %v685_v5 = vld [vmem:[%s13405_s25 + $0x828] sm:$0xff]   ;;  %v689_v6 = vld [vmem:[%s13405_s25 + $0x830] sm:$0xff]  }
  0x54   : > { %682 = vst [vmem:[%s13410_s26 + $0x420] sm:$0xff] %v681_v4   ;;  %686 = vst [vmem:[%s13410_s26 + $0x428] sm:$0xff] %v685_v5   ;;  %v693_v7 = vld [vmem:[%s13405_s25 + $0x838] sm:$0xff]   ;;  %v697_v8 = vld [vmem:[%s13405_s25 + $0x840] sm:$0xff]  }
  0x55   : > { %690 = vst [vmem:[%s13410_s26 + $0x430] sm:$0xff] %v689_v6   ;;  %v701_v9 = vld [vmem:[%s13405_s25 + $0x848] sm:$0xff]   ;;  %694 = vst [vmem:[%s13410_s26 + $0x438] sm:$0xff] %v693_v7   ;;  %v705_v10 = vld [vmem:[%s13405_s25 + $0x850] sm:$0xff]  }
  0x56   : > { %698 = vst [vmem:[%s13410_s26 + $0x440] sm:$0xff] %v697_v8   ;;  %702 = vst [vmem:[%s13410_s26 + $0x448] sm:$0xff] %v701_v9   ;;  %v709_v11 = vld [vmem:[%s13405_s25 + $0x858] sm:$0xff]   ;;  %v713_v12 = vld [vmem:[%s13405_s25 + $0x860] sm:$0xff]  }
  0x57   : > { %706 = vst [vmem:[%s13410_s26 + $0x450] sm:$0xff] %v705_v10   ;;  %710 = vst [vmem:[%s13410_s26 + $0x458] sm:$0xff] %v709_v11   ;;  %v717_v13 = vld [vmem:[%s13405_s25 + $0x868] sm:$0xff]   ;;  %v721_v14 = vld [vmem:[%s13405_s25 + $0x870] sm:$0xff]  }
  0x58   : > { %714 = vst [vmem:[%s13410_s26 + $0x460] sm:$0xff] %v713_v12   ;;  %v725_v15 = vld [vmem:[%s13405_s25 + $0x878] sm:$0xff]   ;;  %718 = vst [vmem:[%s13410_s26 + $0x468] sm:$0xff] %v717_v13   ;;  %v729_v16 = vld [vmem:[%s13405_s25 + $0x880] sm:$0xff]  }
  0x59   : > { %722 = vst [vmem:[%s13410_s26 + $0x470] sm:$0xff] %v721_v14   ;;  %726 = vst [vmem:[%s13410_s26 + $0x478] sm:$0xff] %v725_v15   ;;  %v733_v17 = vld [vmem:[%s13405_s25 + $0x888] sm:$0xff]   ;;  %v737_v18 = vld [vmem:[%s13405_s25 + $0x890] sm:$0xff]  }
  0x5a   : > { %730 = vst [vmem:[%s13410_s26 + $0x480] sm:$0xff] %v729_v16   ;;  %734 = vst [vmem:[%s13410_s26 + $0x488] sm:$0xff] %v733_v17   ;;  %v741_v19 = vld [vmem:[%s13405_s25 + $0x898] sm:$0xff]   ;;  %v745_v20 = vld [vmem:[%s13405_s25 + $0x8a0] sm:$0xff]  }
  0x5b   : > { %738 = vst [vmem:[%s13410_s26 + $0x490] sm:$0xff] %v737_v18   ;;  %v749_v21 = vld [vmem:[%s13405_s25 + $0x8a8] sm:$0xff]   ;;  %742 = vst [vmem:[%s13410_s26 + $0x498] sm:$0xff] %v741_v19   ;;  %v753_v22 = vld [vmem:[%s13405_s25 + $0x8b0] sm:$0xff]  }
  0x5c   : > { %746 = vst [vmem:[%s13410_s26 + $0x4a0] sm:$0xff] %v745_v20   ;;  %750 = vst [vmem:[%s13410_s26 + $0x4a8] sm:$0xff] %v749_v21   ;;  %v757_v23 = vld [vmem:[%s13405_s25 + $0x8b8] sm:$0xff]   ;;  %v761_v24 = vld [vmem:[%s13405_s25 + $0x8c0] sm:$0xff]  }
  0x5d   : > { %754 = vst [vmem:[%s13410_s26 + $0x4b0] sm:$0xff] %v753_v22   ;;  %758 = vst [vmem:[%s13410_s26 + $0x4b8] sm:$0xff] %v757_v23   ;;  %v765_v25 = vld [vmem:[%s13405_s25 + $0x8c8] sm:$0xff]   ;;  %v769_v26 = vld [vmem:[%s13405_s25 + $0x8d0] sm:$0xff]  }
  0x5e   : > { %762 = vst [vmem:[%s13410_s26 + $0x4c0] sm:$0xff] %v761_v24   ;;  %v773_v27 = vld [vmem:[%s13405_s25 + $0x8d8] sm:$0xff]   ;;  %766 = vst [vmem:[%s13410_s26 + $0x4c8] sm:$0xff] %v765_v25   ;;  %v777_v28 = vld [vmem:[%s13405_s25 + $0x8e0] sm:$0xff]  }
  0x5f   : > { %770 = vst [vmem:[%s13410_s26 + $0x4d0] sm:$0xff] %v769_v26   ;;  %774 = vst [vmem:[%s13410_s26 + $0x4d8] sm:$0xff] %v773_v27   ;;  %v781_v29 = vld [vmem:[%s13405_s25 + $0x8e8] sm:$0xff]   ;;  %v785_v30 = vld [vmem:[%s13405_s25 + $0x8f0] sm:$0xff]  }
  0x60   : > { %778 = vst [vmem:[%s13410_s26 + $0x4e0] sm:$0xff] %v777_v28   ;;  %782 = vst [vmem:[%s13410_s26 + $0x4e8] sm:$0xff] %v781_v29   ;;  %v789_v31 = vld [vmem:[%s13405_s25 + $0x8f8] sm:$0xff]   ;;  %v793_v32 = vld [vmem:[%s13405_s25 + $0x900] sm:$0xff]  }
  0x61   : > { %786 = vst [vmem:[%s13410_s26 + $0x4f0] sm:$0xff] %v785_v30   ;;  %v797_v33 = vld [vmem:[%s13405_s25 + $0x908] sm:$0xff]   ;;  %790 = vst [vmem:[%s13410_s26 + $0x4f8] sm:$0xff] %v789_v31   ;;  %v801_v34 = vld [vmem:[%s13405_s25 + $0x910] sm:$0xff]  }
  0x62   : > { %794 = vst [vmem:[%s13410_s26 + $0x500] sm:$0xff] %v793_v32   ;;  %798 = vst [vmem:[%s13410_s26 + $0x508] sm:$0xff] %v797_v33   ;;  %v805_v35 = vld [vmem:[%s13405_s25 + $0x918] sm:$0xff]   ;;  %v809_v36 = vld [vmem:[%s13405_s25 + $0x920] sm:$0xff]  }
  0x63   : > { %802 = vst [vmem:[%s13410_s26 + $0x510] sm:$0xff] %v801_v34   ;;  %806 = vst [vmem:[%s13410_s26 + $0x518] sm:$0xff] %v805_v35   ;;  %v813_v37 = vld [vmem:[%s13405_s25 + $0x928] sm:$0xff]   ;;  %v817_v38 = vld [vmem:[%s13405_s25 + $0x930] sm:$0xff]  }
  0x64   : > { %810 = vst [vmem:[%s13410_s26 + $0x520] sm:$0xff] %v809_v36   ;;  %v821_v39 = vld [vmem:[%s13405_s25 + $0x938] sm:$0xff]   ;;  %814 = vst [vmem:[%s13410_s26 + $0x528] sm:$0xff] %v813_v37   ;;  %v825_v40 = vld [vmem:[%s13405_s25 + $0x940] sm:$0xff]  }
  0x65   : > { %818 = vst [vmem:[%s13410_s26 + $0x530] sm:$0xff] %v817_v38   ;;  %822 = vst [vmem:[%s13410_s26 + $0x538] sm:$0xff] %v821_v39   ;;  %v829_v41 = vld [vmem:[%s13405_s25 + $0x948] sm:$0xff]   ;;  %v833_v42 = vld [vmem:[%s13405_s25 + $0x950] sm:$0xff]  }
  0x66   : > { %826 = vst [vmem:[%s13410_s26 + $0x540] sm:$0xff] %v825_v40   ;;  %830 = vst [vmem:[%s13410_s26 + $0x548] sm:$0xff] %v829_v41   ;;  %v837_v43 = vld [vmem:[%s13405_s25 + $0x958] sm:$0xff]   ;;  %v841_v44 = vld [vmem:[%s13405_s25 + $0x960] sm:$0xff]  }
  0x67   : > { %834 = vst [vmem:[%s13410_s26 + $0x550] sm:$0xff] %v833_v42   ;;  %v845_v45 = vld [vmem:[%s13405_s25 + $0x968] sm:$0xff]   ;;  %838 = vst [vmem:[%s13410_s26 + $0x558] sm:$0xff] %v837_v43   ;;  %v849_v46 = vld [vmem:[%s13405_s25 + $0x970] sm:$0xff]  }
  0x68   : > { %842 = vst [vmem:[%s13410_s26 + $0x560] sm:$0xff] %v841_v44   ;;  %846 = vst [vmem:[%s13410_s26 + $0x568] sm:$0xff] %v845_v45   ;;  %v853_v47 = vld [vmem:[%s13405_s25 + $0x978] sm:$0xff]   ;;  %v857_v48 = vld [vmem:[%s13405_s25 + $0x980] sm:$0xff]  }
  0x69   : > { %850 = vst [vmem:[%s13410_s26 + $0x570] sm:$0xff] %v849_v46   ;;  %854 = vst [vmem:[%s13410_s26 + $0x578] sm:$0xff] %v853_v47   ;;  %v861_v49 = vld [vmem:[%s13405_s25 + $0x988] sm:$0xff]   ;;  %v865_v50 = vld [vmem:[%s13405_s25 + $0x990] sm:$0xff]  }
  0x6a   : > { %858 = vst [vmem:[%s13410_s26 + $0x580] sm:$0xff] %v857_v48   ;;  %v869_v51 = vld [vmem:[%s13405_s25 + $0x998] sm:$0xff]   ;;  %862 = vst [vmem:[%s13410_s26 + $0x588] sm:$0xff] %v861_v49   ;;  %v873_v52 = vld [vmem:[%s13405_s25 + $0x9a0] sm:$0xff]  }
  0x6b   : > { %866 = vst [vmem:[%s13410_s26 + $0x590] sm:$0xff] %v865_v50   ;;  %870 = vst [vmem:[%s13410_s26 + $0x598] sm:$0xff] %v869_v51   ;;  %v877_v53 = vld [vmem:[%s13405_s25 + $0x9a8] sm:$0xff]   ;;  %v881_v54 = vld [vmem:[%s13405_s25 + $0x9b0] sm:$0xff]  }
  0x6c   : > { %874 = vst [vmem:[%s13410_s26 + $0x5a0] sm:$0xff] %v873_v52   ;;  %878 = vst [vmem:[%s13410_s26 + $0x5a8] sm:$0xff] %v877_v53   ;;  %v885_v55 = vld [vmem:[%s13405_s25 + $0x9b8] sm:$0xff]   ;;  %v889_v56 = vld [vmem:[%s13405_s25 + $0x9c0] sm:$0xff]  }
  0x6d   : > { %882 = vst [vmem:[%s13410_s26 + $0x5b0] sm:$0xff] %v881_v54   ;;  %v893_v57 = vld [vmem:[%s13405_s25 + $0x9c8] sm:$0xff]   ;;  %886 = vst [vmem:[%s13410_s26 + $0x5b8] sm:$0xff] %v885_v55   ;;  %v897_v58 = vld [vmem:[%s13405_s25 + $0x9d0] sm:$0xff]  }
  0x6e   : > { %890 = vst [vmem:[%s13410_s26 + $0x5c0] sm:$0xff] %v889_v56   ;;  %894 = vst [vmem:[%s13410_s26 + $0x5c8] sm:$0xff] %v893_v57   ;;  %v901_v59 = vld [vmem:[%s13405_s25 + $0x9d8] sm:$0xff]   ;;  %v905_v60 = vld [vmem:[%s13405_s25 + $0x9e0] sm:$0xff]  }
  0x6f   : > { %898 = vst [vmem:[%s13410_s26 + $0x5d0] sm:$0xff] %v897_v58   ;;  %902 = vst [vmem:[%s13410_s26 + $0x5d8] sm:$0xff] %v901_v59   ;;  %v909_v61 = vld [vmem:[%s13405_s25 + $0x9e8] sm:$0xff]   ;;  %v913_v62 = vld [vmem:[%s13405_s25 + $0x9f0] sm:$0xff]  }
  0x70   : > { %906 = vst [vmem:[%s13410_s26 + $0x5e0] sm:$0xff] %v905_v60   ;;  %v917_v63 = vld [vmem:[%s13405_s25 + $0x9f8] sm:$0xff]   ;;  %910 = vst [vmem:[%s13410_s26 + $0x5e8] sm:$0xff] %v909_v61   ;;  %v921_v0 = vld [vmem:[%s13405_s25 + $0xc00] sm:$0xff]  }
  0x71   : > { %914 = vst [vmem:[%s13410_s26 + $0x5f0] sm:$0xff] %v913_v62   ;;  %918 = vst [vmem:[%s13410_s26 + $0x5f8] sm:$0xff] %v917_v63   ;;  %v925_v1 = vld [vmem:[%s13405_s25 + $0xc08] sm:$0xff]   ;;  %v929_v2 = vld [vmem:[%s13405_s25 + $0xc10] sm:$0xff]  }
  0x72   : > { %922 = vst [vmem:[%s13410_s26 + $0x600] sm:$0xff] %v921_v0   ;;  %926 = vst [vmem:[%s13410_s26 + $0x608] sm:$0xff] %v925_v1   ;;  %v933_v3 = vld [vmem:[%s13405_s25 + $0xc18] sm:$0xff]   ;;  %v937_v4 = vld [vmem:[%s13405_s25 + $0xc20] sm:$0xff]  }
  0x73   : > { %930 = vst [vmem:[%s13410_s26 + $0x610] sm:$0xff] %v929_v2   ;;  %v941_v5 = vld [vmem:[%s13405_s25 + $0xc28] sm:$0xff]   ;;  %934 = vst [vmem:[%s13410_s26 + $0x618] sm:$0xff] %v933_v3   ;;  %v945_v6 = vld [vmem:[%s13405_s25 + $0xc30] sm:$0xff]  }
  0x74   : > { %938 = vst [vmem:[%s13410_s26 + $0x620] sm:$0xff] %v937_v4   ;;  %942 = vst [vmem:[%s13410_s26 + $0x628] sm:$0xff] %v941_v5   ;;  %v949_v7 = vld [vmem:[%s13405_s25 + $0xc38] sm:$0xff]   ;;  %v953_v8 = vld [vmem:[%s13405_s25 + $0xc40] sm:$0xff]  }
  0x75   : > { %946 = vst [vmem:[%s13410_s26 + $0x630] sm:$0xff] %v945_v6   ;;  %950 = vst [vmem:[%s13410_s26 + $0x638] sm:$0xff] %v949_v7   ;;  %v957_v9 = vld [vmem:[%s13405_s25 + $0xc48] sm:$0xff]   ;;  %v961_v10 = vld [vmem:[%s13405_s25 + $0xc50] sm:$0xff]  }
  0x76   : > { %954 = vst [vmem:[%s13410_s26 + $0x640] sm:$0xff] %v953_v8   ;;  %v965_v11 = vld [vmem:[%s13405_s25 + $0xc58] sm:$0xff]   ;;  %958 = vst [vmem:[%s13410_s26 + $0x648] sm:$0xff] %v957_v9   ;;  %v969_v12 = vld [vmem:[%s13405_s25 + $0xc60] sm:$0xff]  }
  0x77   : > { %962 = vst [vmem:[%s13410_s26 + $0x650] sm:$0xff] %v961_v10   ;;  %966 = vst [vmem:[%s13410_s26 + $0x658] sm:$0xff] %v965_v11   ;;  %v973_v13 = vld [vmem:[%s13405_s25 + $0xc68] sm:$0xff]   ;;  %v977_v14 = vld [vmem:[%s13405_s25 + $0xc70] sm:$0xff]  }
  0x78   : > { %970 = vst [vmem:[%s13410_s26 + $0x660] sm:$0xff] %v969_v12   ;;  %974 = vst [vmem:[%s13410_s26 + $0x668] sm:$0xff] %v973_v13   ;;  %v981_v15 = vld [vmem:[%s13405_s25 + $0xc78] sm:$0xff]   ;;  %v985_v16 = vld [vmem:[%s13405_s25 + $0xc80] sm:$0xff]  }
  0x79   : > { %978 = vst [vmem:[%s13410_s26 + $0x670] sm:$0xff] %v977_v14   ;;  %v989_v17 = vld [vmem:[%s13405_s25 + $0xc88] sm:$0xff]   ;;  %982 = vst [vmem:[%s13410_s26 + $0x678] sm:$0xff] %v981_v15   ;;  %v993_v18 = vld [vmem:[%s13405_s25 + $0xc90] sm:$0xff]  }
  0x7a   : > { %986 = vst [vmem:[%s13410_s26 + $0x680] sm:$0xff] %v985_v16   ;;  %990 = vst [vmem:[%s13410_s26 + $0x688] sm:$0xff] %v989_v17   ;;  %v997_v19 = vld [vmem:[%s13405_s25 + $0xc98] sm:$0xff]   ;;  %v1001_v20 = vld [vmem:[%s13405_s25 + $0xca0] sm:$0xff]  }
  0x7b   : > { %994 = vst [vmem:[%s13410_s26 + $0x690] sm:$0xff] %v993_v18   ;;  %998 = vst [vmem:[%s13410_s26 + $0x698] sm:$0xff] %v997_v19   ;;  %v1005_v21 = vld [vmem:[%s13405_s25 + $0xca8] sm:$0xff]   ;;  %v1009_v22 = vld [vmem:[%s13405_s25 + $0xcb0] sm:$0xff]  }
  0x7c   : > { %1002 = vst [vmem:[%s13410_s26 + $0x6a0] sm:$0xff] %v1001_v20   ;;  %v1013_v23 = vld [vmem:[%s13405_s25 + $0xcb8] sm:$0xff]   ;;  %1006 = vst [vmem:[%s13410_s26 + $0x6a8] sm:$0xff] %v1005_v21   ;;  %v1017_v24 = vld [vmem:[%s13405_s25 + $0xcc0] sm:$0xff]  }
  0x7d   : > { %1010 = vst [vmem:[%s13410_s26 + $0x6b0] sm:$0xff] %v1009_v22   ;;  %1014 = vst [vmem:[%s13410_s26 + $0x6b8] sm:$0xff] %v1013_v23   ;;  %v1021_v25 = vld [vmem:[%s13405_s25 + $0xcc8] sm:$0xff]   ;;  %v1025_v26 = vld [vmem:[%s13405_s25 + $0xcd0] sm:$0xff]  }
  0x7e   : > { %1018 = vst [vmem:[%s13410_s26 + $0x6c0] sm:$0xff] %v1017_v24   ;;  %1022 = vst [vmem:[%s13410_s26 + $0x6c8] sm:$0xff] %v1021_v25   ;;  %v1029_v27 = vld [vmem:[%s13405_s25 + $0xcd8] sm:$0xff]   ;;  %v1033_v28 = vld [vmem:[%s13405_s25 + $0xce0] sm:$0xff]  }
  0x7f   : > { %1026 = vst [vmem:[%s13410_s26 + $0x6d0] sm:$0xff] %v1025_v26   ;;  %v1037_v29 = vld [vmem:[%s13405_s25 + $0xce8] sm:$0xff]   ;;  %1030 = vst [vmem:[%s13410_s26 + $0x6d8] sm:$0xff] %v1029_v27   ;;  %v1041_v30 = vld [vmem:[%s13405_s25 + $0xcf0] sm:$0xff]  }
  0x80   : > { %1034 = vst [vmem:[%s13410_s26 + $0x6e0] sm:$0xff] %v1033_v28   ;;  %1038 = vst [vmem:[%s13410_s26 + $0x6e8] sm:$0xff] %v1037_v29   ;;  %v1045_v31 = vld [vmem:[%s13405_s25 + $0xcf8] sm:$0xff]   ;;  %v1049_v32 = vld [vmem:[%s13405_s25 + $0xd00] sm:$0xff]  }
  0x81   : > { %1042 = vst [vmem:[%s13410_s26 + $0x6f0] sm:$0xff] %v1041_v30   ;;  %1046 = vst [vmem:[%s13410_s26 + $0x6f8] sm:$0xff] %v1045_v31   ;;  %v1053_v33 = vld [vmem:[%s13405_s25 + $0xd08] sm:$0xff]   ;;  %v1057_v34 = vld [vmem:[%s13405_s25 + $0xd10] sm:$0xff]  }
  0x82   : > { %1050 = vst [vmem:[%s13410_s26 + $0x700] sm:$0xff] %v1049_v32   ;;  %v1061_v35 = vld [vmem:[%s13405_s25 + $0xd18] sm:$0xff]   ;;  %1054 = vst [vmem:[%s13410_s26 + $0x708] sm:$0xff] %v1053_v33   ;;  %v1065_v36 = vld [vmem:[%s13405_s25 + $0xd20] sm:$0xff]  }
  0x83   : > { %1058 = vst [vmem:[%s13410_s26 + $0x710] sm:$0xff] %v1057_v34   ;;  %1062 = vst [vmem:[%s13410_s26 + $0x718] sm:$0xff] %v1061_v35   ;;  %v1069_v37 = vld [vmem:[%s13405_s25 + $0xd28] sm:$0xff]   ;;  %v1073_v38 = vld [vmem:[%s13405_s25 + $0xd30] sm:$0xff]  }
  0x84   : > { %1066 = vst [vmem:[%s13410_s26 + $0x720] sm:$0xff] %v1065_v36   ;;  %1070 = vst [vmem:[%s13410_s26 + $0x728] sm:$0xff] %v1069_v37   ;;  %v1077_v39 = vld [vmem:[%s13405_s25 + $0xd38] sm:$0xff]   ;;  %v1081_v40 = vld [vmem:[%s13405_s25 + $0xd40] sm:$0xff]  }
  0x85   : > { %1074 = vst [vmem:[%s13410_s26 + $0x730] sm:$0xff] %v1073_v38   ;;  %v1085_v41 = vld [vmem:[%s13405_s25 + $0xd48] sm:$0xff]   ;;  %1078 = vst [vmem:[%s13410_s26 + $0x738] sm:$0xff] %v1077_v39   ;;  %v1089_v42 = vld [vmem:[%s13405_s25 + $0xd50] sm:$0xff]  }
  0x86   : > { %1082 = vst [vmem:[%s13410_s26 + $0x740] sm:$0xff] %v1081_v40   ;;  %1086 = vst [vmem:[%s13410_s26 + $0x748] sm:$0xff] %v1085_v41   ;;  %v1093_v43 = vld [vmem:[%s13405_s25 + $0xd58] sm:$0xff]   ;;  %v1097_v44 = vld [vmem:[%s13405_s25 + $0xd60] sm:$0xff]  }
  0x87   : > { %1090 = vst [vmem:[%s13410_s26 + $0x750] sm:$0xff] %v1089_v42   ;;  %1094 = vst [vmem:[%s13410_s26 + $0x758] sm:$0xff] %v1093_v43   ;;  %v1101_v45 = vld [vmem:[%s13405_s25 + $0xd68] sm:$0xff]   ;;  %v1105_v46 = vld [vmem:[%s13405_s25 + $0xd70] sm:$0xff]  }
  0x88   : > { %1098 = vst [vmem:[%s13410_s26 + $0x760] sm:$0xff] %v1097_v44   ;;  %v1109_v47 = vld [vmem:[%s13405_s25 + $0xd78] sm:$0xff]   ;;  %1102 = vst [vmem:[%s13410_s26 + $0x768] sm:$0xff] %v1101_v45   ;;  %v1113_v48 = vld [vmem:[%s13405_s25 + $0xd80] sm:$0xff]  }
  0x89   : > { %1106 = vst [vmem:[%s13410_s26 + $0x770] sm:$0xff] %v1105_v46   ;;  %1110 = vst [vmem:[%s13410_s26 + $0x778] sm:$0xff] %v1109_v47   ;;  %v1117_v49 = vld [vmem:[%s13405_s25 + $0xd88] sm:$0xff]   ;;  %v1121_v50 = vld [vmem:[%s13405_s25 + $0xd90] sm:$0xff]  }
  0x8a   : > { %1114 = vst [vmem:[%s13410_s26 + $0x780] sm:$0xff] %v1113_v48   ;;  %1118 = vst [vmem:[%s13410_s26 + $0x788] sm:$0xff] %v1117_v49   ;;  %v1125_v51 = vld [vmem:[%s13405_s25 + $0xd98] sm:$0xff]   ;;  %v1129_v52 = vld [vmem:[%s13405_s25 + $0xda0] sm:$0xff]  }
  0x8b   : > { %1122 = vst [vmem:[%s13410_s26 + $0x790] sm:$0xff] %v1121_v50   ;;  %v1133_v53 = vld [vmem:[%s13405_s25 + $0xda8] sm:$0xff]   ;;  %1126 = vst [vmem:[%s13410_s26 + $0x798] sm:$0xff] %v1125_v51   ;;  %v1137_v54 = vld [vmem:[%s13405_s25 + $0xdb0] sm:$0xff]  }
  0x8c   : > { %1130 = vst [vmem:[%s13410_s26 + $0x7a0] sm:$0xff] %v1129_v52   ;;  %1134 = vst [vmem:[%s13410_s26 + $0x7a8] sm:$0xff] %v1133_v53   ;;  %v1141_v55 = vld [vmem:[%s13405_s25 + $0xdb8] sm:$0xff]   ;;  %v1145_v56 = vld [vmem:[%s13405_s25 + $0xdc0] sm:$0xff]  }
  0x8d   : > { %1138 = vst [vmem:[%s13410_s26 + $0x7b0] sm:$0xff] %v1137_v54   ;;  %1142 = vst [vmem:[%s13410_s26 + $0x7b8] sm:$0xff] %v1141_v55   ;;  %v1149_v57 = vld [vmem:[%s13405_s25 + $0xdc8] sm:$0xff]   ;;  %v1153_v58 = vld [vmem:[%s13405_s25 + $0xdd0] sm:$0xff]  }
  0x8e   : > { %1146 = vst [vmem:[%s13410_s26 + $0x7c0] sm:$0xff] %v1145_v56   ;;  %v1157_v59 = vld [vmem:[%s13405_s25 + $0xdd8] sm:$0xff]   ;;  %1150 = vst [vmem:[%s13410_s26 + $0x7c8] sm:$0xff] %v1149_v57   ;;  %v1161_v60 = vld [vmem:[%s13405_s25 + $0xde0] sm:$0xff]  }
  0x8f   : > { %1154 = vst [vmem:[%s13410_s26 + $0x7d0] sm:$0xff] %v1153_v58   ;;  %1158 = vst [vmem:[%s13410_s26 + $0x7d8] sm:$0xff] %v1157_v59   ;;  %v1165_v61 = vld [vmem:[%s13405_s25 + $0xde8] sm:$0xff]   ;;  %v1169_v62 = vld [vmem:[%s13405_s25 + $0xdf0] sm:$0xff]  }
  0x90   : > { %1162 = vst [vmem:[%s13410_s26 + $0x7e0] sm:$0xff] %v1161_v60   ;;  %1166 = vst [vmem:[%s13410_s26 + $0x7e8] sm:$0xff] %v1165_v61   ;;  %v1173_v63 = vld [vmem:[%s13405_s25 + $0xdf8] sm:$0xff]  }
  0x91   : > { %1170 = vst [vmem:[%s13410_s26 + $0x7f0] sm:$0xff] %v1169_v62   ;;  %1174 = vst [vmem:[%s13410_s26 + $0x7f8] sm:$0xff] %v1173_v63  }
  0x92 PF: > { %p10716_p5 = scmp.ge.s32.totalorder %s13348_s14, 1  ;;  %p4300_p6 = scmp.lt.s32.totalorder %s13348_s14, 3 }
  0x94   : > { %p4301_p7 = pnand %p10716_p5, %p4300_p6 }
  0x96   : > { %4304 = sbr.rel (%p4301_p7) target bundleno = 898 (0x382), region = 80 }
  0x9d   : > { %v13065_v0 = vld [vmem:[%s15453_s1] sm:$0x1f]   ;;  %vm4993_vm0 = vcmask 1043456   ;;  %vm4994_vm1 = vcmask 1044480   ;;  %s4307_s29 = sand.u32 1, %s13340_s12   ;;  %v13350_v1 = vmov 65535  }
  0x9e   : > { %v4995_v2 = vsel %vm4993_vm0, 4294967295, %v13350_v1  ;;  %s10717_s30 = sshll.u32 %s4307_s29, 11  ;;  %vm4800_vm2 = vcmask 72704   ;;  %s14922_s11 = sshll.u32 %s10709_s15, 7 }
  0x9f   : > { %v4996_v3 = vsel %vm4994_vm1, %v4995_v2, 0  ;;  %s13927_s4 = scalar_lea.vmem [#allocation2], %s10717_s30  ;;  %p4332_p8 = scmp.lt.s32.totalorder %s14922_s11, 255 }
  0xa0   : > { %v4998_v4 = vand.u32 %v13065_v0, %v4996_v3  ;;  %v13066_v5 = vld [vmem:[%s13927_s4] sm:$0xff]   ;;  %v13068_v7 = vld [vmem:[%s13927_s4 + $0x8] sm:$0xff]   ;;  %v13070_v9 = vld [vmem:[%s13927_s4 + $0x10] sm:$0xff]  }
  0xa1   : > { %v13067_v6 = vld [vmem:[%s13927_s4 + $0x200] sm:$0xff]   ;;  %v13069_v8 = vld [vmem:[%s13927_s4 + $0x208] sm:$0xff]   ;;  %12522 = vmatprep.mubr.msk.bf16.mxu0 %vm4800_vm2, %v13066_v5  ;;  %v13071_v10 = vld [vmem:[%s13927_s4 + $0x210] sm:$0xff]   ;;  %s15636_s11 = smov (!%p4332_p8, %s14922_s11), 255 }
  0xa2   : > { %12520 = vmatprep.subr.bf16.mxu0 %v4998_v4  ;;  %12650 = vmatprep.subr.bf16.mxu1 %v4998_v4  ;;  %v13072_v11 = vld [vmem:[%s13927_s4 + $0x18] sm:$0xff]   ;;  %v13074_v13 = vld [vmem:[%s13927_s4 + $0x20] sm:$0xff]   ;;  %v13076_v15 = vld [vmem:[%s13927_s4 + $0x28] sm:$0xff]   ;;  %s10719_s12 = sshll.u32 %s15636_s11, 2 }
  0xa3   : > { %12521 = vmatpush3.bf16.msra.mxu0 %v4998_v4  ;;  %12651 = vmatpush3.bf16.msra.mxu1 %v4998_v4  ;;  %v13073_v12 = vld [vmem:[%s13927_s4 + $0x218] sm:$0xff]   ;;  %v13075_v14 = vld [vmem:[%s13927_s4 + $0x220] sm:$0xff]   ;;  %v13077_v16 = vld [vmem:[%s13927_s4 + $0x228] sm:$0xff]   ;;  %s14970_s17 = scalar_lea.vmem %s15455_s3, %s10719_s12 }
  0xa4   : > { %12652 = vmatprep.mubr.msk.bf16.mxu1 %vm4800_vm2, %v13067_v6  ;;  %12780 = vmatprep.subr.bf16.mxu0 %v4998_v4  ;;  %v13078_v17 = vld [vmem:[%s13927_s4 + $0x30] sm:$0xff]   ;;  %v13080_v19 = vld [vmem:[%s13927_s4 + $0x38] sm:$0xff]   ;;  %v13082_v21 = vld [vmem:[%s13927_s4 + $0x40] sm:$0xff]  }
  0xa5   : > { %12910 = vmatprep.subr.bf16.mxu1 %v4998_v4  ;;  %v13079_v18 = vld [vmem:[%s13927_s4 + $0x230] sm:$0xff]   ;;  %v13081_v20 = vld [vmem:[%s13927_s4 + $0x238] sm:$0xff]   ;;  %v13083_v22 = vld [vmem:[%s13927_s4 + $0x240] sm:$0xff]  }
  0xa6   : > { %12523 = vmatmul.mubr.msk.bf16.vlgmr.msra.gmra.mrb[0].mxu0 %vm4800_vm2, %v13068_v7  ;;  %12653 = vmatmul.mubr.msk.bf16.vlgmr.msra.gmra.mrb[0].mxu1 %vm4800_vm2, %v13069_v8  ;;  %v13084_v23 = vld [vmem:[%s13927_s4 + $0x48] sm:$0xff]   ;;  %v13086_v25 = vld [vmem:[%s13927_s4 + $0x50] sm:$0xff]   ;;  %v13088_v27 = vld [vmem:[%s13927_s4 + $0x58] sm:$0xff]  }
  0xa7   : > { %12781 = vmatpush3.bf16.msra.mxu0 %v4998_v4  ;;  %12911 = vmatpush3.bf16.msra.mxu1 %v4998_v4  ;;  %v13085_v24 = vld [vmem:[%s13927_s4 + $0x248] sm:$0xff]   ;;  %v13087_v26 = vld [vmem:[%s13927_s4 + $0x250] sm:$0xff]   ;;  %v13089_v28 = vld [vmem:[%s13927_s4 + $0x258] sm:$0xff]  }
  0xa8   : > { %12526 = vmatprep.mubr.msk.bf16.mxu0 %vm4800_vm2, %v13070_v9  ;;  %12656 = vmatprep.mubr.msk.bf16.mxu1 %vm4800_vm2, %v13071_v10  ;;  %v13090_v29 = vld [vmem:[%s13927_s4 + $0x60] sm:$0xff]   ;;  %v13092_v31 = vld [vmem:[%s13927_s4 + $0x68] sm:$0xff]   ;;  %v13094_v33 = vld [vmem:[%s13927_s4 + $0x70] sm:$0xff]  }
  0xa9   : > { %v13091_v30 = vld [vmem:[%s13927_s4 + $0x260] sm:$0xff]   ;;  %v13093_v32 = vld [vmem:[%s13927_s4 + $0x268] sm:$0xff]   ;;  %v13095_v34 = vld [vmem:[%s13927_s4 + $0x270] sm:$0xff]  }
  0xaa   : > { %v13096_v35 = vld [vmem:[%s13927_s4 + $0x78] sm:$0xff]   ;;  %v13098_v37 = vld [vmem:[%s13927_s4 + $0x80] sm:$0xff]   ;;  %v13100_v39 = vld [vmem:[%s13927_s4 + $0x88] sm:$0xff]  }
  0xab   : > { %v13097_v36 = vld [vmem:[%s13927_s4 + $0x278] sm:$0xff]   ;;  %v13099_v38 = vld [vmem:[%s13927_s4 + $0x280] sm:$0xff]   ;;  %v13101_v40 = vld [vmem:[%s13927_s4 + $0x288] sm:$0xff]  }
  0xac   : > { %v13102_v41 = vld [vmem:[%s13927_s4 + $0x90] sm:$0xff]   ;;  %v13104_v43 = vld [vmem:[%s13927_s4 + $0x98] sm:$0xff]   ;;  %v13106_v45 = vld [vmem:[%s13927_s4 + $0xa0] sm:$0xff]  }
  0xad   : > { %v13103_v42 = vld [vmem:[%s13927_s4 + $0x290] sm:$0xff]   ;;  %v13105_v44 = vld [vmem:[%s13927_s4 + $0x298] sm:$0xff]   ;;  %v13107_v46 = vld [vmem:[%s13927_s4 + $0x2a0] sm:$0xff]  }
  0xae   : > { %12527 = vmatmul.mubr.msk.bf16.gmra.mrb[4].mxu0 %vm4800_vm2, %v13072_v11  ;;  %12657 = vmatmul.mubr.msk.bf16.gmra.mrb[4].mxu1 %vm4800_vm2, %v13073_v12  ;;  %v13108_v47 = vld [vmem:[%s13927_s4 + $0xa8] sm:$0xff]   ;;  %v13110_v49 = vld [vmem:[%s13927_s4 + $0xb0] sm:$0xff]   ;;  %v13112_v51 = vld [vmem:[%s13927_s4 + $0xb8] sm:$0xff]  }
  0xaf   : > { %12530 = vmatprep.mubr.msk.bf16.mxu0 %vm4800_vm2, %v13074_v13  ;;  %12660 = vmatprep.mubr.msk.bf16.mxu1 %vm4800_vm2, %v13075_v14  ;;  %v13109_v48 = vld [vmem:[%s13927_s4 + $0x2a8] sm:$0xff]   ;;  %v13111_v50 = vld [vmem:[%s13927_s4 + $0x2b0] sm:$0xff]   ;;  %v13113_v52 = vld [vmem:[%s13927_s4 + $0x2b8] sm:$0xff]  }
  0xb0   : > { %v13114_v53 = vld [vmem:[%s13927_s4 + $0xc0] sm:$0xff]   ;;  %v13116_v55 = vld [vmem:[%s13927_s4 + $0xc8] sm:$0xff]   ;;  %v13118_v57 = vld [vmem:[%s13927_s4 + $0xd0] sm:$0xff]  }
  0xb1   : > { %v13115_v54 = vld [vmem:[%s13927_s4 + $0x2c0] sm:$0xff]   ;;  %v13117_v56 = vld [vmem:[%s13927_s4 + $0x2c8] sm:$0xff]   ;;  %v13119_v58 = vld [vmem:[%s13927_s4 + $0x2d0] sm:$0xff]  }
  0xb2   : > { %v13120_v59 = vld [vmem:[%s13927_s4 + $0xd8] sm:$0xff]   ;;  %v13122_v61 = vld [vmem:[%s13927_s4 + $0xe0] sm:$0xff]   ;;  %v13124_v63 = vld [vmem:[%s13927_s4 + $0xe8] sm:$0xff]  }
  0xb3   : > { %v13121_v60 = vld [vmem:[%s13927_s4 + $0x2d8] sm:$0xff]   ;;  %v13123_v62 = vld [vmem:[%s13927_s4 + $0x2e0] sm:$0xff]   ;;  %v13125_v0 = vld [vmem:[%s13927_s4 + $0x2e8] sm:$0xff]  }
  0xb4   : > { %v13126_v1 = vld [vmem:[%s13927_s4 + $0xf0] sm:$0xff]   ;;  %v13128_v3 = vld [vmem:[%s13927_s4 + $0xf8] sm:$0xff]   ;;  %v13130_v5 = vld [vmem:[%s13927_s4 + $0x100] sm:$0xff]  }
  0xb5   : > { %v13127_v2 = vld [vmem:[%s13927_s4 + $0x2f0] sm:$0xff]   ;;  %v13129_v4 = vld [vmem:[%s13927_s4 + $0x2f8] sm:$0xff]   ;;  %v13131_v6 = vld [vmem:[%s13927_s4 + $0x300] sm:$0xff]  }
  0xb6   : > { %12531 = vmatmul.mubr.msk.bf16.gmra.mrb[8].mxu0 %vm4800_vm2, %v13076_v15  ;;  %12661 = vmatmul.mubr.msk.bf16.gmra.mrb[8].mxu1 %vm4800_vm2, %v13077_v16  ;;  %v13132_v7 = vld [vmem:[%s13927_s4 + $0x108] sm:$0xff]   ;;  %v13134_v9 = vld [vmem:[%s13927_s4 + $0x110] sm:$0xff]   ;;  %v13136_v11 = vld [vmem:[%s13927_s4 + $0x118] sm:$0xff]  }
  0xb7   : > { %12534 = vmatprep.mubr.msk.bf16.mxu0 %vm4800_vm2, %v13078_v17  ;;  %12664 = vmatprep.mubr.msk.bf16.mxu1 %vm4800_vm2, %v13079_v18  ;;  %v13133_v8 = vld [vmem:[%s13927_s4 + $0x308] sm:$0xff]   ;;  %v13135_v10 = vld [vmem:[%s13927_s4 + $0x310] sm:$0xff]   ;;  %v13137_v12 = vld [vmem:[%s13927_s4 + $0x318] sm:$0xff]  }
  0xb8   : > { %v13138_v13 = vld [vmem:[%s13927_s4 + $0x120] sm:$0xff]   ;;  %v13140_v15 = vld [vmem:[%s13927_s4 + $0x128] sm:$0xff]   ;;  %v13142_v17 = vld [vmem:[%s13927_s4 + $0x130] sm:$0xff]  }
  0xb9   : > { %v13139_v14 = vld [vmem:[%s13927_s4 + $0x320] sm:$0xff]   ;;  %v13141_v16 = vld [vmem:[%s13927_s4 + $0x328] sm:$0xff]   ;;  %v13143_v18 = vld [vmem:[%s13927_s4 + $0x330] sm:$0xff]  }
  0xbe   : > { %12535 = vmatmul.mubr.msk.bf16.gmra.mrb[12].mxu0 %vm4800_vm2, %v13080_v19  ;;  %12665 = vmatmul.mubr.msk.bf16.gmra.mrb[12].mxu1 %vm4800_vm2, %v13081_v20  ;;  %v13144_v19 = vld [vmem:[%s13927_s4 + $0x138] sm:$0xff]  }
  0xbf   : > { %12538 = vmatprep.mubr.msk.bf16.mxu0 %vm4800_vm2, %v13082_v21  ;;  %12668 = vmatprep.mubr.msk.bf16.mxu1 %vm4800_vm2, %v13083_v22  ;;  %v13145_v20 = vld [vmem:[%s13927_s4 + $0x338] sm:$0xff]   ;;  %v13146_v21 = vld [vmem:[%s13927_s4 + $0x140] sm:$0xff]  }
  0xc0   : > { %v13147_v22 = vld [vmem:[%s13927_s4 + $0x340] sm:$0xff]  }
  0xc6   : > { %12539 = vmatmul.mubr.msk.bf16.gmra.mrb[16].mxu0 %vm4800_vm2, %v13084_v23  ;;  %12669 = vmatmul.mubr.msk.bf16.gmra.mrb[16].mxu1 %vm4800_vm2, %v13085_v24  ;;  %v13148_v23 = vld [vmem:[%s13927_s4 + $0x148] sm:$0xff]  }
  0xc7   : > { %12542 = vmatprep.mubr.msk.bf16.mxu0 %vm4800_vm2, %v13086_v25  ;;  %12672 = vmatprep.mubr.msk.bf16.mxu1 %vm4800_vm2, %v13087_v26  ;;  %v13149_v24 = vld [vmem:[%s13927_s4 + $0x348] sm:$0xff]   ;;  %v13150_v25 = vld [vmem:[%s13927_s4 + $0x150] sm:$0xff]  }
  0xc8   : > { %v13151_v26 = vld [vmem:[%s13927_s4 + $0x350] sm:$0xff]  }
  0xce   : > { %12543 = vmatmul.mubr.msk.bf16.gmra.mrb[20].mxu0 %vm4800_vm2, %v13088_v27  ;;  %12673 = vmatmul.mubr.msk.bf16.gmra.mrb[20].mxu1 %vm4800_vm2, %v13089_v28  ;;  %v13152_v27 = vld [vmem:[%s13927_s4 + $0x158] sm:$0xff]  }
  0xcf   : > { %12546 = vmatprep.mubr.msk.bf16.mxu0 %vm4800_vm2, %v13090_v29  ;;  %12676 = vmatprep.mubr.msk.bf16.mxu1 %vm4800_vm2, %v13091_v30  ;;  %v13153_v28 = vld [vmem:[%s13927_s4 + $0x358] sm:$0xff]   ;;  %v13154_v29 = vld [vmem:[%s13927_s4 + $0x160] sm:$0xff]  }
  0xd0   : > { %v13155_v30 = vld [vmem:[%s13927_s4 + $0x360] sm:$0xff]  }
  0xd6   : > { %12547 = vmatmul.mubr.msk.bf16.gmra.mrb[24].mxu0 %vm4800_vm2, %v13092_v31  ;;  %12677 = vmatmul.mubr.msk.bf16.gmra.mrb[24].mxu1 %vm4800_vm2, %v13093_v32  ;;  %v13156_v31 = vld [vmem:[%s13927_s4 + $0x168] sm:$0xff]  }
  0xd7   : > { %12550 = vmatprep.mubr.msk.bf16.mxu0 %vm4800_vm2, %v13094_v33  ;;  %12680 = vmatprep.mubr.msk.bf16.mxu1 %vm4800_vm2, %v13095_v34  ;;  %v13157_v32 = vld [vmem:[%s13927_s4 + $0x368] sm:$0xff]   ;;  %v13158_v33 = vld [vmem:[%s13927_s4 + $0x170] sm:$0xff]  }
  0xd8   : > { %v13159_v34 = vld [vmem:[%s13927_s4 + $0x370] sm:$0xff]  }
  0xde   : > { %12551 = vmatmul.mubr.msk.bf16.gmra.mrb[28].mxu0 %vm4800_vm2, %v13096_v35  ;;  %12681 = vmatmul.mubr.msk.bf16.gmra.mrb[28].mxu1 %vm4800_vm2, %v13097_v36  ;;  %v13160_v35 = vld [vmem:[%s13927_s4 + $0x178] sm:$0xff]  }
  0xdf   : > { %12554 = vmatprep.mubr.msk.bf16.mxu0 %vm4800_vm2, %v13098_v37  ;;  %12684 = vmatprep.mubr.msk.bf16.mxu1 %vm4800_vm2, %v13099_v38  ;;  %v13161_v36 = vld [vmem:[%s13927_s4 + $0x378] sm:$0xff]   ;;  %v13162_v37 = vld [vmem:[%s13927_s4 + $0x180] sm:$0xff]  }
  0xe0   : > { %v13163_v38 = vld [vmem:[%s13927_s4 + $0x380] sm:$0xff]  }
  0xe6   : > { %12555 = vmatmul.mubr.msk.bf16.gmra.mrb[32].mxu0 %vm4800_vm2, %v13100_v39  ;;  %12685 = vmatmul.mubr.msk.bf16.gmra.mrb[32].mxu1 %vm4800_vm2, %v13101_v40  ;;  %v13164_v39 = vld [vmem:[%s13927_s4 + $0x188] sm:$0xff]  }
  0xe7   : > { %12558 = vmatprep.mubr.msk.bf16.mxu0 %vm4800_vm2, %v13102_v41  ;;  %12688 = vmatprep.mubr.msk.bf16.mxu1 %vm4800_vm2, %v13103_v42  ;;  %v13165_v40 = vld [vmem:[%s13927_s4 + $0x388] sm:$0xff]   ;;  %v13166_v41 = vld [vmem:[%s13927_s4 + $0x190] sm:$0xff]  }
  0xe8   : > { %v13167_v42 = vld [vmem:[%s13927_s4 + $0x390] sm:$0xff]  }
  0xee   : > { %12559 = vmatmul.mubr.msk.bf16.gmra.mrb[36].mxu0 %vm4800_vm2, %v13104_v43  ;;  %12689 = vmatmul.mubr.msk.bf16.gmra.mrb[36].mxu1 %vm4800_vm2, %v13105_v44  ;;  %v13168_v43 = vld [vmem:[%s13927_s4 + $0x198] sm:$0xff]  }
  0xef   : > { %12562 = vmatprep.mubr.msk.bf16.mxu0 %vm4800_vm2, %v13106_v45  ;;  %12692 = vmatprep.mubr.msk.bf16.mxu1 %vm4800_vm2, %v13107_v46  ;;  %v13169_v44 = vld [vmem:[%s13927_s4 + $0x398] sm:$0xff]   ;;  %v13170_v45 = vld [vmem:[%s13927_s4 + $0x1a0] sm:$0xff]  }
  0xf0   : > { %v13171_v46 = vld [vmem:[%s13927_s4 + $0x3a0] sm:$0xff]  }
  0xf6   : > { %12563 = vmatmul.mubr.msk.bf16.gmra.mrb[40].mxu0 %vm4800_vm2, %v13108_v47  ;;  %12693 = vmatmul.mubr.msk.bf16.gmra.mrb[40].mxu1 %vm4800_vm2, %v13109_v48  ;;  %v13172_v47 = vld [vmem:[%s13927_s4 + $0x1a8] sm:$0xff]  }
  0xf7   : > { %12566 = vmatprep.mubr.msk.bf16.mxu0 %vm4800_vm2, %v13110_v49  ;;  %12696 = vmatprep.mubr.msk.bf16.mxu1 %vm4800_vm2, %v13111_v50  ;;  %v13173_v48 = vld [vmem:[%s13927_s4 + $0x3a8] sm:$0xff]   ;;  %v13174_v49 = vld [vmem:[%s13927_s4 + $0x1b0] sm:$0xff]  }
  0xf8   : > { %v13175_v50 = vld [vmem:[%s13927_s4 + $0x3b0] sm:$0xff]  }
  0xfe   : > { %12567 = vmatmul.mubr.msk.bf16.gmra.mrb[44].mxu0 %vm4800_vm2, %v13112_v51  ;;  %12697 = vmatmul.mubr.msk.bf16.gmra.mrb[44].mxu1 %vm4800_vm2, %v13113_v52  ;;  %v14148_v51 = vld [vmem:[%s15454_s2] ss:$0 sm:$0xff]  ;;  %v13176_v52 = vld [vmem:[%s13927_s4 + $0x1b8] sm:$0xff]  }
  0xff   : > { %12570 = vmatprep.mubr.msk.bf16.mxu0 %vm4800_vm2, %v13114_v53  ;;  %12700 = vmatprep.mubr.msk.bf16.mxu1 %vm4800_vm2, %v13115_v54  ;;  %v13177_v53 = vld [vmem:[%s13927_s4 + $0x3b8] sm:$0xff]  }
 0x106   : > { %12571 = vmatmul.mubr.msk.bf16.gmra.mrb[48].mxu0 %vm4800_vm2, %v13116_v55  ;;  %12701 = vmatmul.mubr.msk.bf16.gmra.mrb[48].mxu1 %vm4800_vm2, %v13117_v56 }
 0x107   : > { %12574 = vmatprep.mubr.msk.bf16.mxu0 %vm4800_vm2, %v13118_v57  ;;  %12704 = vmatprep.mubr.msk.bf16.mxu1 %vm4800_vm2, %v13119_v58 }
 0x10e   : > { %12575 = vmatmul.mubr.msk.bf16.gmra.mrb[52].mxu0 %vm4800_vm2, %v13120_v59  ;;  %12705 = vmatmul.mubr.msk.bf16.gmra.mrb[52].mxu1 %vm4800_vm2, %v13121_v60 }
 0x10f   : > { %12578 = vmatprep.mubr.msk.bf16.mxu0 %vm4800_vm2, %v13122_v61  ;;  %12708 = vmatprep.mubr.msk.bf16.mxu1 %vm4800_vm2, %v13123_v62 }
 0x116   : > { %12579 = vmatmul.mubr.msk.bf16.gmra.mrb[56].mxu0 %vm4800_vm2, %v13124_v63  ;;  %12709 = vmatmul.mubr.msk.bf16.gmra.mrb[56].mxu1 %vm4800_vm2, %v13125_v0  ;;  %v13178_v0 = vld [vmem:[%s13927_s4 + $0x1c0] sm:$0xff]  }
 0x117   : > { %12582 = vmatprep.mubr.msk.bf16.mxu0 %vm4800_vm2, %v13126_v1  ;;  %12712 = vmatprep.mubr.msk.bf16.mxu1 %vm4800_vm2, %v13127_v2  ;;  %v13179_v1 = vld [vmem:[%s13927_s4 + $0x3c0] sm:$0xff]  }
 0x11e   : > { %12583 = vmatmul.mubr.msk.bf16.gmra.mrb[60].mxu0 %vm4800_vm2, %v13128_v3  ;;  %12713 = vmatmul.mubr.msk.bf16.gmra.mrb[60].mxu1 %vm4800_vm2, %v13129_v4 }
 0x11f   : > { %12586 = vmatprep.mubr.msk.bf16.mxu0 %vm4800_vm2, %v13130_v5  ;;  %12716 = vmatprep.mubr.msk.bf16.mxu1 %vm4800_vm2, %v13131_v6 }
 0x126   : > { %12587 = vmatmul.mubr.msk.bf16.gmra.mrb[64].mxu0 %vm4800_vm2, %v13132_v7  ;;  %12717 = vmatmul.mubr.msk.bf16.gmra.mrb[64].mxu1 %vm4800_vm2, %v13133_v8 }
 0x127   : > { %12590 = vmatprep.mubr.msk.bf16.mxu0 %vm4800_vm2, %v13134_v9  ;;  %12720 = vmatprep.mubr.msk.bf16.mxu1 %vm4800_vm2, %v13135_v10 }
 0x12e   : > { %12591 = vmatmul.mubr.msk.bf16.gmra.mrb[68].mxu0 %vm4800_vm2, %v13136_v11  ;;  %12721 = vmatmul.mubr.msk.bf16.gmra.mrb[68].mxu1 %vm4800_vm2, %v13137_v12 }
 0x12f   : > { %12594 = vmatprep.mubr.msk.bf16.mxu0 %vm4800_vm2, %v13138_v13  ;;  %12724 = vmatprep.mubr.msk.bf16.mxu1 %vm4800_vm2, %v13139_v14 }
 0x136   : > { %12595 = vmatmul.mubr.msk.bf16.gmra.mrb[72].mxu0 %vm4800_vm2, %v13140_v15  ;;  %12725 = vmatmul.mubr.msk.bf16.gmra.mrb[72].mxu1 %vm4800_vm2, %v13141_v16 }
 0x137   : > { %12598 = vmatprep.mubr.msk.bf16.mxu0 %vm4800_vm2, %v13142_v17  ;;  %12728 = vmatprep.mubr.msk.bf16.mxu1 %vm4800_vm2, %v13143_v18 }
 0x13e   : > { %12599 = vmatmul.mubr.msk.bf16.gmra.mrb[76].mxu0 %vm4800_vm2, %v13144_v19  ;;  %12729 = vmatmul.mubr.msk.bf16.gmra.mrb[76].mxu1 %vm4800_vm2, %v13145_v20  ;;  %v13180_v19 = vld [vmem:[%s13927_s4 + $0x1c8] sm:$0xff]  }
 0x13f   : > { %12602 = vmatprep.mubr.msk.bf16.mxu0 %vm4800_vm2, %v13146_v21  ;;  %12732 = vmatprep.mubr.msk.bf16.mxu1 %vm4800_vm2, %v13147_v22  ;;  %v13181_v20 = vld [vmem:[%s13927_s4 + $0x3c8] sm:$0xff]  }
 0x146   : > { %12603 = vmatmul.mubr.msk.bf16.gmra.mrb[80].mxu0 %vm4800_vm2, %v13148_v23  ;;  %12733 = vmatmul.mubr.msk.bf16.gmra.mrb[80].mxu1 %vm4800_vm2, %v13149_v24 }
 0x147   : > { %12606 = vmatprep.mubr.msk.bf16.mxu0 %vm4800_vm2, %v13150_v25  ;;  %12736 = vmatprep.mubr.msk.bf16.mxu1 %vm4800_vm2, %v13151_v26 }
 0x14e   : > { %12607 = vmatmul.mubr.msk.bf16.gmra.mrb[84].mxu0 %vm4800_vm2, %v13152_v27  ;;  %12737 = vmatmul.mubr.msk.bf16.gmra.mrb[84].mxu1 %vm4800_vm2, %v13153_v28 }
 0x14f   : > { %12610 = vmatprep.mubr.msk.bf16.mxu0 %vm4800_vm2, %v13154_v29  ;;  %12740 = vmatprep.mubr.msk.bf16.mxu1 %vm4800_vm2, %v13155_v30 }
 0x156   : > { %12611 = vmatmul.mubr.msk.bf16.gmra.mrb[88].mxu0 %vm4800_vm2, %v13156_v31  ;;  %12741 = vmatmul.mubr.msk.bf16.gmra.mrb[88].mxu1 %vm4800_vm2, %v13157_v32  ;;  %v13182_v32 = vld [vmem:[%s13927_s4 + $0x1d0] sm:$0xff]  }
 0x157   : > { %12614 = vmatprep.mubr.msk.bf16.mxu0 %vm4800_vm2, %v13158_v33  ;;  %12744 = vmatprep.mubr.msk.bf16.mxu1 %vm4800_vm2, %v13159_v34  ;;  %v13183_v33 = vld [vmem:[%s13927_s4 + $0x3d0] sm:$0xff]  }
 0x15e   : > { %12615 = vmatmul.mubr.msk.bf16.gmra.mrb[92].mxu0 %vm4800_vm2, %v13160_v35  ;;  %12745 = vmatmul.mubr.msk.bf16.gmra.mrb[92].mxu1 %vm4800_vm2, %v13161_v36 }
 0x15f   : > { %12618 = vmatprep.mubr.msk.bf16.mxu0 %vm4800_vm2, %v13162_v37  ;;  %12748 = vmatprep.mubr.msk.bf16.mxu1 %vm4800_vm2, %v13163_v38 }
 0x166   : > { %12619 = vmatmul.mubr.msk.bf16.gmra.mrb[96].mxu0 %vm4800_vm2, %v13164_v39  ;;  %12749 = vmatmul.mubr.msk.bf16.gmra.mrb[96].mxu1 %vm4800_vm2, %v13165_v40 }
 0x167   : > { %12622 = vmatprep.mubr.msk.bf16.mxu0 %vm4800_vm2, %v13166_v41  ;;  %12752 = vmatprep.mubr.msk.bf16.mxu1 %vm4800_vm2, %v13167_v42 }
 0x16e   : > { %12623 = vmatmul.mubr.msk.bf16.gmra.mrb[100].mxu0 %vm4800_vm2, %v13168_v43  ;;  %12753 = vmatmul.mubr.msk.bf16.gmra.mrb[100].mxu1 %vm4800_vm2, %v13169_v44 }
 0x16f   : > { %12626 = vmatprep.mubr.msk.bf16.mxu0 %vm4800_vm2, %v13170_v45  ;;  %12756 = vmatprep.mubr.msk.bf16.mxu1 %vm4800_vm2, %v13171_v46 }
 0x176   : > { %12627 = vmatmul.mubr.msk.bf16.gmra.mrb[104].mxu0 %vm4800_vm2, %v13172_v47  ;;  %12757 = vmatmul.mubr.msk.bf16.gmra.mrb[104].mxu1 %vm4800_vm2, %v13173_v48 }
 0x177   : > { %12630 = vmatprep.mubr.msk.bf16.mxu0 %vm4800_vm2, %v13174_v49  ;;  %12760 = vmatprep.mubr.msk.bf16.mxu1 %vm4800_vm2, %v13175_v50 }
 0x179   : > { %v12524_v54 = vpop.f32.mrb[0].mxu0  ;;  %v12654_v55 = vpop.f32.mrb[0].mxu1 }
 0x17a   : > { %v5043_v56 = vadd.f32 %v12524_v54, %v14148_v51  ;;  %v6357_v57 = vadd.f32 %v12654_v55, %v14148_v51  ;;  %v5034_v58 = vpop.f32.mrb[1].mxu0  ;;  %v6348_v59 = vpop.f32.mrb[1].mxu1 }
 0x17b   : > { %v5035_v60 = vadd.f32 %v14148_v51, %v5034_v58  ;;  %v6349_v61 = vadd.f32 %v14148_v51, %v6348_v59  ;;  %v12525_v62 = vpop.f32.mrb[2].mxu0  ;;  %v12655_v63 = vpop.f32.mrb[2].mxu1 }
 0x17c   : > { %v5547_v2 = vmax.f32 %v5043_v56, 0.0  ;;  %v6861_v3 = vmax.f32 %v6357_v57, 0.0  ;;  %v5046_v4 = vadd.f32 %v12525_v62, %v14148_v51  ;;  %v6360_v5 = vadd.f32 %v12655_v63, %v14148_v51  ;;  %v5037_v6 = vpop.f32.mrb[3].mxu0  ;;  %v6351_v7 = vpop.f32.mrb[3].mxu1 }
 0x17d   : > { %v5545_v8 = vmax.f32 %v5035_v60, 0.0  ;;  %v6859_v9 = vmax.f32 %v6349_v61, 0.0  ;;  %v5038_v10 = vadd.f32 %v14148_v51, %v5037_v6  ;;  %v6352_v11 = vadd.f32 %v14148_v51, %v6351_v7 }
 0x17e   : > { %v14166_v12 = vmax.f32 %v5547_v2, %v6861_v3  ;;  %v5548_v13 = vmax.f32 %v5046_v4, 0.0  ;;  %v6862_v14 = vmax.f32 %v6360_v5, 0.0  ;;  %12631 = vmatmul.mubr.msk.bf16.gmra.mrb[108].mxu0 %vm4800_vm2, %v13176_v52  ;;  %12761 = vmatmul.mubr.msk.bf16.gmra.mrb[108].mxu1 %vm4800_vm2, %v13177_v53  ;;  %v13184_v52 = vld [vmem:[%s13927_s4 + $0x1d8] sm:$0xff]   ;;  %v13187_v2 = vld [vmem:[%s13927_s4 + $0x3e0] sm:$0xff]  }
 0x17f   : > { %v14170_v15 = vmax.f32 %v5545_v8, %v6859_v9  ;;  %v5546_v16 = vmax.f32 %v5038_v10, 0.0  ;;  %v6860_v17 = vmax.f32 %v6352_v11, 0.0  ;;  %12634 = vmatprep.mubr.msk.bf16.mxu0 %vm4800_vm2, %v13178_v0  ;;  %12764 = vmatprep.mubr.msk.bf16.mxu1 %vm4800_vm2, %v13179_v1  ;;  %v13185_v53 = vld [vmem:[%s13927_s4 + $0x3d8] sm:$0xff]   ;;  %v13186_v1 = vld [vmem:[%s13927_s4 + $0x1e0] sm:$0xff]  }
 0x180   : > { %v14174_v18 = vmax.f32 %v5548_v13, %v6862_v14 }
 0x181   : > { %v14178_v21 = vmax.f32 %v5546_v16, %v6860_v17  ;;  %v12528_v22 = vpop.f32.mrb[4].mxu0  ;;  %v12658_v23 = vpop.f32.mrb[4].mxu1 }
 0x182   : > { %v5059_v24 = vadd.f32 %v12528_v22, %v14148_v51  ;;  %v6373_v25 = vadd.f32 %v12658_v23, %v14148_v51  ;;  %v5050_v26 = vpop.f32.mrb[5].mxu0  ;;  %v6364_v27 = vpop.f32.mrb[5].mxu1 }
 0x183   : > { %v5051_v28 = vadd.f32 %v14148_v51, %v5050_v26  ;;  %v6365_v29 = vadd.f32 %v14148_v51, %v6364_v27  ;;  %v12529_v30 = vpop.f32.mrb[6].mxu0  ;;  %v12659_v31 = vpop.f32.mrb[6].mxu1 }
 0x184   : > { %v5551_v34 = vmax.f32 %v5059_v24, 0.0  ;;  %v6865_v35 = vmax.f32 %v6373_v25, 0.0  ;;  %v5062_v36 = vadd.f32 %v12529_v30, %v14148_v51  ;;  %v6376_v37 = vadd.f32 %v12659_v31, %v14148_v51  ;;  %v5053_v38 = vpop.f32.mrb[7].mxu0  ;;  %v6367_v39 = vpop.f32.mrb[7].mxu1  ;;  %v13188_v31 = vld [vmem:[%s13927_s4 + $0x1e8] sm:$0xff]  }
 0x185   : > { %v5549_v40 = vmax.f32 %v5051_v28, 0.0  ;;  %v6863_v41 = vmax.f32 %v6365_v29, 0.0  ;;  %v5054_v42 = vadd.f32 %v14148_v51, %v5053_v38  ;;  %v6368_v43 = vadd.f32 %v14148_v51, %v6367_v39  ;;  %v13191_v38 = vld [vmem:[%s13927_s4 + $0x3f0] sm:$0xff]  }
 0x186   : > { %v14190_v44 = vmax.f32 %v5551_v34, %v6865_v35  ;;  %v5552_v45 = vmax.f32 %v5062_v36, 0.0  ;;  %v6866_v46 = vmax.f32 %v6376_v37, 0.0  ;;  %12635 = vmatmul.mubr.msk.bf16.gmra.mrb[112].mxu0 %vm4800_vm2, %v13180_v19  ;;  %12765 = vmatmul.mubr.msk.bf16.gmra.mrb[112].mxu1 %vm4800_vm2, %v13181_v20  ;;  %v13190_v37 = vld [vmem:[%s13927_s4 + $0x1f0] sm:$0xff]  }
 0x187   : > { %v14194_v47 = vmax.f32 %v5549_v40, %v6863_v41  ;;  %v5550_v48 = vmax.f32 %v5054_v42, 0.0  ;;  %v6864_v49 = vmax.f32 %v6368_v43, 0.0  ;;  %12638 = vmatprep.mubr.msk.bf16.mxu0 %vm4800_vm2, %v13182_v32  ;;  %12768 = vmatprep.mubr.msk.bf16.mxu1 %vm4800_vm2, %v13183_v33  ;;  %v13189_v32 = vld [vmem:[%s13927_s4 + $0x3e8] sm:$0xff]  }
 0x188   : > { %v14198_v50 = vmax.f32 %v5552_v45, %v6866_v46 }
 0x189   : > { %v14202_v54 = vmax.f32 %v5550_v48, %v6864_v49  ;;  %v12532_v55 = vpop.f32.mrb[8].mxu0  ;;  %v12662_v56 = vpop.f32.mrb[8].mxu1 }
 0x18a   : > { %v5075_v57 = vadd.f32 %v12532_v55, %v14148_v51  ;;  %v6389_v58 = vadd.f32 %v12662_v56, %v14148_v51  ;;  %v5066_v59 = vpop.f32.mrb[9].mxu0  ;;  %v6380_v60 = vpop.f32.mrb[9].mxu1 }
 0x18b   : > { %v5067_v61 = vadd.f32 %v14148_v51, %v5066_v59  ;;  %v6381_v62 = vadd.f32 %v14148_v51, %v6380_v60  ;;  %v12533_v63 = vpop.f32.mrb[10].mxu0  ;;  %v12663_v0 = vpop.f32.mrb[10].mxu1 }
 0x18c   : > { %v5555_v3 = vmax.f32 %v5075_v57, 0.0  ;;  %v6869_v4 = vmax.f32 %v6389_v58, 0.0  ;;  %v5078_v5 = vadd.f32 %v12533_v63, %v14148_v51  ;;  %v6392_v6 = vadd.f32 %v12663_v0, %v14148_v51  ;;  %v5069_v7 = vpop.f32.mrb[11].mxu0  ;;  %v6383_v8 = vpop.f32.mrb[11].mxu1 }
 0x18d   : > { %v5553_v9 = vmax.f32 %v5067_v61, 0.0  ;;  %v6867_v10 = vmax.f32 %v6381_v62, 0.0  ;;  %v5070_v11 = vadd.f32 %v14148_v51, %v5069_v7  ;;  %v6384_v13 = vadd.f32 %v14148_v51, %v6383_v8 }
 0x18e   : > { %v14214_v14 = vmax.f32 %v5555_v3, %v6869_v4  ;;  %v5556_v16 = vmax.f32 %v5078_v5, 0.0  ;;  %v6870_v17 = vmax.f32 %v6392_v6, 0.0  ;;  %12639 = vmatmul.mubr.msk.bf16.gmra.mrb[116].mxu0 %vm4800_vm2, %v13184_v52  ;;  %12769 = vmatmul.mubr.msk.bf16.gmra.mrb[116].mxu1 %vm4800_vm2, %v13185_v53  ;;  %v13192_v4 = vld [vmem:[%s13927_s4 + $0x1f8] sm:$0xff]  }
 0x18f   : > { %v14218_v19 = vmax.f32 %v5553_v9, %v6867_v10  ;;  %v5554_v20 = vmax.f32 %v5070_v11, 0.0  ;;  %v6868_v22 = vmax.f32 %v6384_v13, 0.0  ;;  %12642 = vmatprep.mubr.msk.bf16.mxu0 %vm4800_vm2, %v13186_v1  ;;  %12772 = vmatprep.mubr.msk.bf16.mxu1 %vm4800_vm2, %v13187_v2  ;;  %v13193_v5 = vld [vmem:[%s13927_s4 + $0x3f8] sm:$0xff]   ;;  %v13194_v10 = vld [vmem:[%s13927_s4 + $0x400] sm:$0xff]  }
 0x190   : > { %v14222_v23 = vmax.f32 %v5556_v16, %v6870_v17  ;;  %v13195_v11 = vld [vmem:[%s13927_s4 + $0x600] sm:$0xff]  }
 0x191   : > { %v14224_v24 = vmax.f32 %v5554_v20, %v6868_v22  ;;  %v12536_v25 = vpop.f32.mrb[12].mxu0  ;;  %v12666_v26 = vpop.f32.mrb[12].mxu1 }
 0x192   : > { %v5091_v27 = vadd.f32 %v12536_v25, %v14148_v51  ;;  %v6405_v28 = vadd.f32 %v12666_v26, %v14148_v51  ;;  %v5082_v29 = vpop.f32.mrb[13].mxu0  ;;  %v6396_v30 = vpop.f32.mrb[13].mxu1 }
 0x193   : > { %v5083_v33 = vadd.f32 %v14148_v51, %v5082_v29  ;;  %v6397_v34 = vadd.f32 %v14148_v51, %v6396_v30  ;;  %v12537_v35 = vpop.f32.mrb[14].mxu0  ;;  %v12667_v36 = vpop.f32.mrb[14].mxu1 }
 0x194   : > { %v5559_v39 = vmax.f32 %v5091_v27, 0.0  ;;  %v6873_v40 = vmax.f32 %v6405_v28, 0.0  ;;  %v5094_v41 = vadd.f32 %v12537_v35, %v14148_v51  ;;  %v6408_v42 = vadd.f32 %v12667_v36, %v14148_v51  ;;  %v5085_v43 = vpop.f32.mrb[15].mxu0  ;;  %v6399_v45 = vpop.f32.mrb[15].mxu1 }
 0x195   : > { %v5557_v46 = vmax.f32 %v5083_v33, 0.0  ;;  %v6871_v48 = vmax.f32 %v6397_v34, 0.0  ;;  %v5086_v49 = vadd.f32 %v14148_v51, %v5085_v43  ;;  %v6400_v52 = vadd.f32 %v14148_v51, %v6399_v45  ;;  %v13196_v45 = vld [vmem:[%s13927_s4 + $0x408] sm:$0xff]  }
 0x196   : > { %v14238_v53 = vmax.f32 %v5559_v39, %v6873_v40  ;;  %v5560_v55 = vmax.f32 %v5094_v41, 0.0  ;;  %v6874_v56 = vmax.f32 %v6408_v42, 0.0  ;;  %12643 = vmatmul.mubr.msk.bf16.gmra.mrb[120].mxu0 %vm4800_vm2, %v13188_v31  ;;  %12773 = vmatmul.mubr.msk.bf16.gmra.mrb[120].mxu1 %vm4800_vm2, %v13189_v32 }
 0x197   : > { %v14242_v57 = vmax.f32 %v5557_v46, %v6871_v48  ;;  %v5558_v58 = vmax.f32 %v5086_v49, 0.0  ;;  %v6872_v59 = vmax.f32 %v6400_v52, 0.0  ;;  %12646 = vmatprep.mubr.msk.bf16.mxu0 %vm4800_vm2, %v13190_v37  ;;  %12776 = vmatprep.mubr.msk.bf16.mxu1 %vm4800_vm2, %v13191_v38  ;;  %v13197_v46 = vld [vmem:[%s13927_s4 + $0x608] sm:$0xff]  }
 0x198   : > { %v14246_v60 = vmax.f32 %v5560_v55, %v6874_v56  ;;  %v13198_v56 = vld [vmem:[%s13927_s4 + $0x410] sm:$0xff]  }
 0x199   : > { %v14248_v61 = vmax.f32 %v5558_v58, %v6872_v59  ;;  %v12540_v62 = vpop.f32.mrb[16].mxu0  ;;  %v12670_v63 = vpop.f32.mrb[16].mxu1  ;;  %v13199_v58 = vld [vmem:[%s13927_s4 + $0x610] sm:$0xff]  }
 0x19a   : > { %v5107_v0 = vadd.f32 %v12540_v62, %v14148_v51  ;;  %v6421_v1 = vadd.f32 %v12670_v63, %v14148_v51  ;;  %v5098_v2 = vpop.f32.mrb[17].mxu0  ;;  %v6412_v3 = vpop.f32.mrb[17].mxu1 }
 0x19b   : > { %v5099_v6 = vadd.f32 %v14148_v51, %v5098_v2  ;;  %v6413_v7 = vadd.f32 %v14148_v51, %v6412_v3  ;;  %v12541_v8 = vpop.f32.mrb[18].mxu0  ;;  %v12671_v9 = vpop.f32.mrb[18].mxu1 }
 0x19c   : > { %v5563_v13 = vmax.f32 %v5107_v0, 0.0  ;;  %v6877_v16 = vmax.f32 %v6421_v1, 0.0  ;;  %v5110_v17 = vadd.f32 %v12541_v8, %v14148_v51  ;;  %v6424_v20 = vadd.f32 %v12671_v9, %v14148_v51  ;;  %v5101_v22 = vpop.f32.mrb[19].mxu0  ;;  %v6415_v25 = vpop.f32.mrb[19].mxu1 }
 0x19d   : > { %v5561_v26 = vmax.f32 %v5099_v6, 0.0  ;;  %v6875_v27 = vmax.f32 %v6413_v7, 0.0  ;;  %v5102_v28 = vadd.f32 %v14148_v51, %v5101_v22  ;;  %v6416_v29 = vadd.f32 %v14148_v51, %v6415_v25 }
 0x19e   : > { %v14262_v30 = vmax.f32 %v5563_v13, %v6877_v16  ;;  %v5564_v31 = vmax.f32 %v5110_v17, 0.0  ;;  %v6878_v32 = vmax.f32 %v6424_v20, 0.0  ;;  %12647 = vmatmul.mubr.msk.bf16.gmra.mrb[124].mxu0 %vm4800_vm2, %v13192_v4  ;;  %12777 = vmatmul.mubr.msk.bf16.gmra.mrb[124].mxu1 %vm4800_vm2, %v13193_v5 }
 0x19f   : > { %v14266_v33 = vmax.f32 %v5561_v26, %v6875_v27  ;;  %v5562_v34 = vmax.f32 %v5102_v28, 0.0  ;;  %v6876_v35 = vmax.f32 %v6416_v29, 0.0  ;;  %12782 = vmatprep.mubr.msk.bf16.mxu0 %vm4800_vm2, %v13194_v10  ;;  %12912 = vmatprep.mubr.msk.bf16.mxu1 %vm4800_vm2, %v13195_v11  ;;  %v13200_v29 = vld [vmem:[%s13927_s4 + $0x418] sm:$0xff]  }
 0x1a0   : > { %v14270_v36 = vmax.f32 %v5564_v31, %v6878_v32  ;;  %v13201_v31 = vld [vmem:[%s13927_s4 + $0x618] sm:$0xff]  }
 0x1a1   : > { %v14272_v37 = vmax.f32 %v5562_v34, %v6876_v35  ;;  %v12544_v38 = vpop.f32.mrb[20].mxu0  ;;  %v12674_v39 = vpop.f32.mrb[20].mxu1 }
 0x1a2   : > { %v5123_v40 = vadd.f32 %v12544_v38, %v14148_v51  ;;  %v6437_v41 = vadd.f32 %v12674_v39, %v14148_v51  ;;  %v5114_v42 = vpop.f32.mrb[21].mxu0  ;;  %v6428_v43 = vpop.f32.mrb[21].mxu1  ;;  %v13202_v39 = vld [vmem:[%s13927_s4 + $0x420] sm:$0xff]  }
 0x1a3   : > { %v5115_v48 = vadd.f32 %v14148_v51, %v5114_v42  ;;  %v6429_v49 = vadd.f32 %v14148_v51, %v6428_v43  ;;  %v12545_v52 = vpop.f32.mrb[22].mxu0  ;;  %v12675_v55 = vpop.f32.mrb[22].mxu1 }
 0x1a4   : > { %v5567_v59 = vmax.f32 %v5123_v40, 0.0  ;;  %v6881_v62 = vmax.f32 %v6437_v41, 0.0  ;;  %v5126_v63 = vadd.f32 %v12545_v52, %v14148_v51  ;;  %v6440_v0 = vadd.f32 %v12675_v55, %v14148_v51  ;;  %v5117_v1 = vpop.f32.mrb[23].mxu0  ;;  %v6431_v2 = vpop.f32.mrb[23].mxu1  ;;  %v13203_v40 = vld [vmem:[%s13927_s4 + $0x620] sm:$0xff]  }
 0x1a5   : > { %v5565_v3 = vmax.f32 %v5115_v48, 0.0  ;;  %v6879_v4 = vmax.f32 %v6429_v49, 0.0  ;;  %v5118_v5 = vadd.f32 %v14148_v51, %v5117_v1  ;;  %v6432_v6 = vadd.f32 %v14148_v51, %v6431_v2 }
 0x1a6   : > { %v14286_v7 = vmax.f32 %v5567_v59, %v6881_v62  ;;  %v5568_v8 = vmax.f32 %v5126_v63, 0.0  ;;  %v6882_v9 = vmax.f32 %v6440_v0, 0.0  ;;  %12783 = vmatmul.mubr.msk.bf16.vlgmr.msra.gmra.mrb[128].mxu0 %vm4800_vm2, %v13196_v45  ;;  %12913 = vmatmul.mubr.msk.bf16.vlgmr.msra.gmra.mrb[128].mxu1 %vm4800_vm2, %v13197_v46 }
 0x1a7   : > { %v14290_v10 = vmax.f32 %v5565_v3, %v6879_v4  ;;  %v5566_v11 = vmax.f32 %v5118_v5, 0.0  ;;  %v6880_v13 = vmax.f32 %v6432_v6, 0.0  ;;  %12786 = vmatprep.mubr.msk.bf16.mxu0 %vm4800_vm2, %v13198_v56  ;;  %12916 = vmatprep.mubr.msk.bf16.mxu1 %vm4800_vm2, %v13199_v58 }
 0x1a8   : > { %v14294_v16 = vmax.f32 %v5568_v8, %v6882_v9 }
 0x1a9   : > { %v14296_v17 = vmax.f32 %v5566_v11, %v6880_v13  ;;  %v12548_v20 = vpop.f32.mrb[24].mxu0  ;;  %v12678_v22 = vpop.f32.mrb[24].mxu1  ;;  %v13204_v13 = vld [vmem:[%s13927_s4 + $0x428] sm:$0xff]  }
 0x1aa   : > { %v5139_v25 = vadd.f32 %v12548_v20, %v14148_v51  ;;  %v6453_v26 = vadd.f32 %v12678_v22, %v14148_v51  ;;  %v5130_v27 = vpop.f32.mrb[25].mxu0  ;;  %v6444_v28 = vpop.f32.mrb[25].mxu1  ;;  %v13205_v20 = vld [vmem:[%s13927_s4 + $0x628] sm:$0xff]  }
 0x1ab   : > { %v5131_v32 = vadd.f32 %v14148_v51, %v5130_v27  ;;  %v6445_v34 = vadd.f32 %v14148_v51, %v6444_v28  ;;  %v12549_v35 = vpop.f32.mrb[26].mxu0  ;;  %v12679_v38 = vpop.f32.mrb[26].mxu1  ;;  %v13206_v28 = vld [vmem:[%s13927_s4 + $0x430] sm:$0xff]  }
 0x1ac   : > { %v5571_v41 = vmax.f32 %v5139_v25, 0.0  ;;  %v6885_v42 = vmax.f32 %v6453_v26, 0.0  ;;  %v5142_v43 = vadd.f32 %v12549_v35, %v14148_v51  ;;  %v6456_v45 = vadd.f32 %v12679_v38, %v14148_v51  ;;  %v5133_v46 = vpop.f32.mrb[27].mxu0  ;;  %v6447_v48 = vpop.f32.mrb[27].mxu1 }
 0x1ad   : > { %v5569_v49 = vmax.f32 %v5131_v32, 0.0  ;;  %v6883_v52 = vmax.f32 %v6445_v34, 0.0  ;;  %v5134_v55 = vadd.f32 %v14148_v51, %v5133_v46  ;;  %v6448_v56 = vadd.f32 %v14148_v51, %v6447_v48 }
 0x1ae   : > { %v14310_v58 = vmax.f32 %v5571_v41, %v6885_v42  ;;  %v5572_v59 = vmax.f32 %v5142_v43, 0.0  ;;  %v6886_v62 = vmax.f32 %v6456_v45, 0.0  ;;  %12787 = vmatmul.mubr.msk.bf16.gmra.mrb[132].mxu0 %vm4800_vm2, %v13200_v29  ;;  %12917 = vmatmul.mubr.msk.bf16.gmra.mrb[132].mxu1 %vm4800_vm2, %v13201_v31  ;;  %v13207_v29 = vld [vmem:[%s13927_s4 + $0x630] sm:$0xff]  }
 0x1af   : > { %v14314_v63 = vmax.f32 %v5569_v49, %v6883_v52  ;;  %v5570_v0 = vmax.f32 %v5134_v55, 0.0  ;;  %v6884_v1 = vmax.f32 %v6448_v56, 0.0  ;;  %12790 = vmatprep.mubr.msk.bf16.mxu0 %vm4800_vm2, %v13202_v39  ;;  %12920 = vmatprep.mubr.msk.bf16.mxu1 %vm4800_vm2, %v13203_v40 }
 0x1b0   : > { %v14318_v2 = vmax.f32 %v5572_v59, %v6886_v62 }
 0x1b1   : > { %v14320_v3 = vmax.f32 %v5570_v0, %v6884_v1  ;;  %v12552_v4 = vpop.f32.mrb[28].mxu0  ;;  %v12682_v5 = vpop.f32.mrb[28].mxu1 }
 0x1b2   : > { %v5155_v6 = vadd.f32 %v12552_v4, %v14148_v51  ;;  %v6469_v8 = vadd.f32 %v12682_v5, %v14148_v51  ;;  %v5146_v9 = vpop.f32.mrb[29].mxu0  ;;  %v6460_v11 = vpop.f32.mrb[29].mxu1 }
 0x1b3   : > { %v5147_v22 = vadd.f32 %v14148_v51, %v5146_v9  ;;  %v6461_v25 = vadd.f32 %v14148_v51, %v6460_v11  ;;  %v12553_v26 = vpop.f32.mrb[30].mxu0  ;;  %v12683_v27 = vpop.f32.mrb[30].mxu1  ;;  %v13209_v9 = vld [vmem:[%s13927_s4 + $0x638] sm:$0xff]  }
 0x1b4   : > { %v5575_v31 = vmax.f32 %v5155_v6, 0.0  ;;  %v6889_v32 = vmax.f32 %v6469_v8, 0.0  ;;  %v5158_v34 = vadd.f32 %v12553_v26, %v14148_v51  ;;  %v6472_v35 = vadd.f32 %v12683_v27, %v14148_v51  ;;  %v5149_v38 = vpop.f32.mrb[31].mxu0  ;;  %v6463_v39 = vpop.f32.mrb[31].mxu1  ;;  %v13208_v8 = vld [vmem:[%s13927_s4 + $0x438] sm:$0xff]   ;;  %v13211_v26 = vld [vmem:[%s13927_s4 + $0x640] sm:$0xff]  }
 0x1b5   : > { %v5573_v40 = vmax.f32 %v5147_v22, 0.0  ;;  %v6887_v41 = vmax.f32 %v6461_v25, 0.0  ;;  %v5150_v42 = vadd.f32 %v14148_v51, %v5149_v38  ;;  %v6464_v43 = vadd.f32 %v14148_v51, %v6463_v39  ;;  %v13210_v25 = vld [vmem:[%s13927_s4 + $0x440] sm:$0xff]  }
 0x1b6   : > { %v14334_v45 = vmax.f32 %v5575_v31, %v6889_v32  ;;  %v5576_v46 = vmax.f32 %v5158_v34, 0.0  ;;  %v6890_v48 = vmax.f32 %v6472_v35, 0.0  ;;  %12791 = vmatmul.mubr.msk.bf16.gmra.mrb[136].mxu0 %vm4800_vm2, %v13204_v13  ;;  %12921 = vmatmul.mubr.msk.bf16.gmra.mrb[136].mxu1 %vm4800_vm2, %v13205_v20 }
 0x1b7   : > { %v14338_v49 = vmax.f32 %v5573_v40, %v6887_v41  ;;  %v5574_v52 = vmax.f32 %v5150_v42, 0.0  ;;  %v6888_v55 = vmax.f32 %v6464_v43, 0.0  ;;  %12794 = vmatprep.mubr.msk.bf16.mxu0 %vm4800_vm2, %v13206_v28  ;;  %12924 = vmatprep.mubr.msk.bf16.mxu1 %vm4800_vm2, %v13207_v29 }
 0x1b8   : > { %v14342_v56 = vmax.f32 %v5576_v46, %v6890_v48 }
 0x1b9   : > { %v14344_v59 = vmax.f32 %v5574_v52, %v6888_v55  ;;  %v12556_v62 = vpop.f32.mrb[32].mxu0  ;;  %v12686_v0 = vpop.f32.mrb[32].mxu1 }
 0x1ba   : > { %v5171_v1 = vadd.f32 %v12556_v62, %v14148_v51  ;;  %v6485_v4 = vadd.f32 %v12686_v0, %v14148_v51  ;;  %v5162_v5 = vpop.f32.mrb[33].mxu0  ;;  %v6476_v6 = vpop.f32.mrb[33].mxu1 }
 0x1bb   : > { %v5163_v11 = vadd.f32 %v14148_v51, %v5162_v5  ;;  %v6477_v13 = vadd.f32 %v14148_v51, %v6476_v6  ;;  %v12557_v20 = vpop.f32.mrb[34].mxu0  ;;  %v12687_v22 = vpop.f32.mrb[34].mxu1 }
 0x1bc   : > { %v5579_v27 = vmax.f32 %v5171_v1, 0.0  ;;  %v6893_v28 = vmax.f32 %v6485_v4, 0.0  ;;  %v5174_v29 = vadd.f32 %v12557_v20, %v14148_v51  ;;  %v6488_v31 = vadd.f32 %v12687_v22, %v14148_v51  ;;  %v5165_v32 = vpop.f32.mrb[35].mxu0  ;;  %v6479_v34 = vpop.f32.mrb[35].mxu1 }
 0x1bd   : > { %v5577_v35 = vmax.f32 %v5163_v11, 0.0  ;;  %v6891_v38 = vmax.f32 %v6477_v13, 0.0  ;;  %v5166_v39 = vadd.f32 %v14148_v51, %v5165_v32  ;;  %v6480_v40 = vadd.f32 %v14148_v51, %v6479_v34  ;;  %v13213_v11 = vld [vmem:[%s13927_s4 + $0x648] sm:$0xff]  }
 0x1be   : > { %v14358_v41 = vmax.f32 %v5579_v27, %v6893_v28  ;;  %v5580_v42 = vmax.f32 %v5174_v29, 0.0  ;;  %v6894_v43 = vmax.f32 %v6488_v31, 0.0  ;;  %12795 = vmatmul.mubr.msk.bf16.gmra.mrb[140].mxu0 %vm4800_vm2, %v13208_v8  ;;  %12925 = vmatmul.mubr.msk.bf16.gmra.mrb[140].mxu1 %vm4800_vm2, %v13209_v9  ;;  %v13212_v9 = vld [vmem:[%s13927_s4 + $0x448] sm:$0xff]   ;;  %v13215_v27 = vld [vmem:[%s13927_s4 + $0x650] sm:$0xff]  }
 0x1bf   : > { %v14362_v46 = vmax.f32 %v5577_v35, %v6891_v38  ;;  %v5578_v48 = vmax.f32 %v5166_v39, 0.0  ;;  %v6892_v52 = vmax.f32 %v6480_v40, 0.0  ;;  %12798 = vmatprep.mubr.msk.bf16.mxu0 %vm4800_vm2, %v13210_v25  ;;  %12928 = vmatprep.mubr.msk.bf16.mxu1 %vm4800_vm2, %v13211_v26  ;;  %v13214_v26 = vld [vmem:[%s13927_s4 + $0x450] sm:$0xff]  }
 0x1c0   : > { %v14366_v55 = vmax.f32 %v5580_v42, %v6894_v43 }
 0x1c1   : > { %v14368_v62 = vmax.f32 %v5578_v48, %v6892_v52  ;;  %v12560_v0 = vpop.f32.mrb[36].mxu0  ;;  %v12690_v1 = vpop.f32.mrb[36].mxu1 }
 0x1c2   : > { %v5187_v4 = vadd.f32 %v12560_v0, %v14148_v51  ;;  %v6501_v5 = vadd.f32 %v12690_v1, %v14148_v51  ;;  %v5178_v6 = vpop.f32.mrb[37].mxu0  ;;  %v6492_v8 = vpop.f32.mrb[37].mxu1 }
 0x1c3   : > { %v5179_v13 = vadd.f32 %v14148_v51, %v5178_v6  ;;  %v6493_v20 = vadd.f32 %v14148_v51, %v6492_v8  ;;  %v12561_v22 = vpop.f32.mrb[38].mxu0  ;;  %v12691_v25 = vpop.f32.mrb[38].mxu1 }
 0x1c4   : > { %v5583_v28 = vmax.f32 %v5187_v4, 0.0  ;;  %v6897_v29 = vmax.f32 %v6501_v5, 0.0  ;;  %v5190_v31 = vadd.f32 %v12561_v22, %v14148_v51  ;;  %v6504_v32 = vadd.f32 %v12691_v25, %v14148_v51  ;;  %v5181_v34 = vpop.f32.mrb[39].mxu0  ;;  %v6495_v35 = vpop.f32.mrb[39].mxu1  ;;  %v13216_v25 = vld [vmem:[%s13927_s4 + $0x458] sm:$0xff]  }
 0x1c5   : > { %v5581_v38 = vmax.f32 %v5179_v13, 0.0  ;;  %v6895_v39 = vmax.f32 %v6493_v20, 0.0  ;;  %v5182_v40 = vadd.f32 %v14148_v51, %v5181_v34  ;;  %v6496_v42 = vadd.f32 %v14148_v51, %v6495_v35  ;;  %v13219_v34 = vld [vmem:[%s13927_s4 + $0x660] sm:$0xff]  }
 0x1c6   : > { %v14382_v43 = vmax.f32 %v5583_v28, %v6897_v29  ;;  %v5584_v48 = vmax.f32 %v5190_v31, 0.0  ;;  %v6898_v52 = vmax.f32 %v6504_v32, 0.0  ;;  %12799 = vmatmul.mubr.msk.bf16.gmra.mrb[144].mxu0 %vm4800_vm2, %v13212_v9  ;;  %12929 = vmatmul.mubr.msk.bf16.gmra.mrb[144].mxu1 %vm4800_vm2, %v13213_v11  ;;  %v13217_v28 = vld [vmem:[%s13927_s4 + $0x658] sm:$0xff]   ;;  %v13218_v32 = vld [vmem:[%s13927_s4 + $0x460] sm:$0xff]  }
 0x1c7   : > { %v14386_v0 = vmax.f32 %v5581_v38, %v6895_v39  ;;  %v5582_v1 = vmax.f32 %v5182_v40, 0.0  ;;  %v6896_v4 = vmax.f32 %v6496_v42, 0.0  ;;  %12802 = vmatprep.mubr.msk.bf16.mxu0 %vm4800_vm2, %v13214_v26  ;;  %12932 = vmatprep.mubr.msk.bf16.mxu1 %vm4800_vm2, %v13215_v27 }
 0x1c8   : > { %v14390_v5 = vmax.f32 %v5584_v48, %v6898_v52 }
 0x1c9   : > { %v14392_v6 = vmax.f32 %v5582_v1, %v6896_v4  ;;  %v12564_v8 = vpop.f32.mrb[40].mxu0  ;;  %v12694_v13 = vpop.f32.mrb[40].mxu1 }
 0x1ca   : > { %v5203_v9 = vadd.f32 %v12564_v8, %v14148_v51  ;;  %v6517_v11 = vadd.f32 %v12694_v13, %v14148_v51  ;;  %v5194_v20 = vpop.f32.mrb[41].mxu0  ;;  %v6508_v22 = vpop.f32.mrb[41].mxu1 }
 0x1cb   : > { %v5195_v26 = vadd.f32 %v14148_v51, %v5194_v20  ;;  %v6509_v29 = vadd.f32 %v14148_v51, %v6508_v22  ;;  %v12565_v27 = vpop.f32.mrb[42].mxu0  ;;  %v12695_v31 = vpop.f32.mrb[42].mxu1 }
 0x1cc   : > { %v5587_v35 = vmax.f32 %v5203_v9, 0.0  ;;  %v6901_v38 = vmax.f32 %v6517_v11, 0.0  ;;  %v5206_v39 = vadd.f32 %v12565_v27, %v14148_v51  ;;  %v6520_v40 = vadd.f32 %v12695_v31, %v14148_v51  ;;  %v5197_v42 = vpop.f32.mrb[43].mxu0  ;;  %v6511_v48 = vpop.f32.mrb[43].mxu1 }
 0x1cd   : > { %v5585_v52 = vmax.f32 %v5195_v26, 0.0  ;;  %v6899_v1 = vmax.f32 %v6509_v29, 0.0  ;;  %v5198_v4 = vadd.f32 %v14148_v51, %v5197_v42  ;;  %v6512_v8 = vadd.f32 %v14148_v51, %v6511_v48  ;;  %v13221_v42 = vld [vmem:[%s13927_s4 + $0x668] sm:$0xff]  }
 0x1ce   : > { %v14406_v13 = vmax.f32 %v5587_v35, %v6901_v38  ;;  %v5588_v20 = vmax.f32 %v5206_v39, 0.0  ;;  %v6902_v22 = vmax.f32 %v6520_v40, 0.0  ;;  %12803 = vmatmul.mubr.msk.bf16.gmra.mrb[148].mxu0 %vm4800_vm2, %v13216_v25  ;;  %12933 = vmatmul.mubr.msk.bf16.gmra.mrb[148].mxu1 %vm4800_vm2, %v13217_v28  ;;  %v13220_v40 = vld [vmem:[%s13927_s4 + $0x468] sm:$0xff]  }
 0x1cf   : > { %v14410_v9 = vmax.f32 %v5585_v52, %v6899_v1  ;;  %v5586_v11 = vmax.f32 %v5198_v4, 0.0  ;;  %v6900_v27 = vmax.f32 %v6512_v8, 0.0  ;;  %12806 = vmatprep.mubr.msk.bf16.mxu0 %vm4800_vm2, %v13218_v32  ;;  %12936 = vmatprep.mubr.msk.bf16.mxu1 %vm4800_vm2, %v13219_v34  ;;  %v13222_v1 = vld [vmem:[%s13927_s4 + $0x470] sm:$0xff]  }
 0x1d0   : > { %15456 = vst [vmem:[#allocation3_spill] sm:$0xff] %v14406_v13  ;;  %v14414_v26 = vmax.f32 %v5588_v20, %v6902_v22  ;;  %v13223_v4 = vld [vmem:[%s13927_s4 + $0x670] sm:$0xff]  }
 0x1d1   : > { %15457 = vst [vmem:[#allocation4_spill] sm:$0xff] %v14410_v9  ;;  %v14416_v29 = vmax.f32 %v5586_v11, %v6900_v27  ;;  %v12568_v31 = vpop.f32.mrb[44].mxu0  ;;  %v12698_v35 = vpop.f32.mrb[44].mxu1 }
 0x1d2   : > { %15458 = vst [vmem:[#allocation5_spill] sm:$0xff] %v14414_v26  ;;  %v5219_v25 = vadd.f32 %v12568_v31, %v14148_v51  ;;  %v6533_v28 = vadd.f32 %v12698_v35, %v14148_v51  ;;  %v5210_v38 = vpop.f32.mrb[45].mxu0  ;;  %v6524_v39 = vpop.f32.mrb[45].mxu1 }
 0x1d3   : > { %15459 = vst [vmem:[#allocation6_spill] sm:$0xff] %v14416_v29  ;;  %v5211_v32 = vadd.f32 %v14148_v51, %v5210_v38  ;;  %v6525_v48 = vadd.f32 %v14148_v51, %v6524_v39  ;;  %v12569_v34 = vpop.f32.mrb[46].mxu0  ;;  %v12699_v52 = vpop.f32.mrb[46].mxu1 }
 0x1d4   : > { %v5591_v8 = vmax.f32 %v5219_v25, 0.0  ;;  %v6905_v20 = vmax.f32 %v6533_v28, 0.0  ;;  %v5222_v22 = vadd.f32 %v12569_v34, %v14148_v51  ;;  %v6536_v11 = vadd.f32 %v12699_v52, %v14148_v51  ;;  %v5213_v27 = vpop.f32.mrb[47].mxu0  ;;  %v6527_v31 = vpop.f32.mrb[47].mxu1 }
 0x1d5   : > { %v5589_v35 = vmax.f32 %v5211_v32, 0.0  ;;  %v6903_v29 = vmax.f32 %v6525_v48, 0.0  ;;  %v5214_v26 = vadd.f32 %v14148_v51, %v5213_v27  ;;  %v6528_v38 = vadd.f32 %v14148_v51, %v6527_v31  ;;  %v13227_v31 = vld [vmem:[%s13927_s4 + $0x680] sm:$0xff]  }
 0x1d6   : > { %v14430_v9 = vmax.f32 %v5591_v8, %v6905_v20  ;;  %v5592_v39 = vmax.f32 %v5222_v22, 0.0  ;;  %v6906_v13 = vmax.f32 %v6536_v11, 0.0  ;;  %12807 = vmatmul.mubr.msk.bf16.gmra.mrb[152].mxu0 %vm4800_vm2, %v13220_v40  ;;  %12937 = vmatmul.mubr.msk.bf16.gmra.mrb[152].mxu1 %vm4800_vm2, %v13221_v42  ;;  %v13225_v22 = vld [vmem:[%s13927_s4 + $0x678] sm:$0xff]  }
 0x1d7   : > { %v14434_v25 = vmax.f32 %v5589_v35, %v6903_v29  ;;  %v5590_v28 = vmax.f32 %v5214_v26, 0.0  ;;  %v6904_v34 = vmax.f32 %v6528_v38, 0.0  ;;  %12810 = vmatprep.mubr.msk.bf16.mxu0 %vm4800_vm2, %v13222_v1  ;;  %12940 = vmatprep.mubr.msk.bf16.mxu1 %vm4800_vm2, %v13223_v4  ;;  %v13224_v26 = vld [vmem:[%s13927_s4 + $0x478] sm:$0xff]  }
 0x1d8   : > { %15460 = vst [vmem:[#allocation7_spill] sm:$0xff] %v14430_v9  ;;  %v14438_v32 = vmax.f32 %v5592_v39, %v6906_v13  ;;  %v13226_v13 = vld [vmem:[%s13927_s4 + $0x480] sm:$0xff]  }
 0x1d9   : > { %15461 = vst [vmem:[#allocation8_spill] sm:$0xff] %v14434_v25  ;;  %v14440_v48 = vmax.f32 %v5590_v28, %v6904_v34  ;;  %v12572_v52 = vpop.f32.mrb[48].mxu0  ;;  %v12702_v8 = vpop.f32.mrb[48].mxu1 }
 0x1da   : > { %15462 = vst [vmem:[#allocation9_spill] sm:$0xff] %v14438_v32  ;;  %v5235_v40 = vadd.f32 %v12572_v52, %v14148_v51  ;;  %v6549_v42 = vadd.f32 %v12702_v8, %v14148_v51  ;;  %v5226_v29 = vpop.f32.mrb[49].mxu0  ;;  %v6540_v20 = vpop.f32.mrb[49].mxu1 }
 0x1db   : > { %15463 = vst [vmem:[#allocation10_spill] sm:$0xff] %v14440_v48  ;;  %v5227_v1 = vadd.f32 %v14148_v51, %v5226_v29  ;;  %v6541_v11 = vadd.f32 %v14148_v51, %v6540_v20  ;;  %v12573_v4 = vpop.f32.mrb[50].mxu0  ;;  %v12703_v27 = vpop.f32.mrb[50].mxu1 }
 0x1dc   : > { %v5595_v35 = vmax.f32 %v5235_v40, 0.0  ;;  %v6909_v38 = vmax.f32 %v6549_v42, 0.0  ;;  %v5238_v39 = vadd.f32 %v12573_v4, %v14148_v51  ;;  %v6552_v28 = vadd.f32 %v12703_v27, %v14148_v51  ;;  %v5229_v34 = vpop.f32.mrb[51].mxu0  ;;  %v6543_v52 = vpop.f32.mrb[51].mxu1 }
 0x1dd   : > { %v5593_v8 = vmax.f32 %v5227_v1, 0.0  ;;  %v6907_v48 = vmax.f32 %v6541_v11, 0.0  ;;  %v5230_v32 = vadd.f32 %v14148_v51, %v5229_v34  ;;  %v6544_v29 = vadd.f32 %v14148_v51, %v6543_v52  ;;  %v13230_v34 = vld [vmem:[%s13927_s4 + $0x490] sm:$0xff]  }
 0x1de   : > { %v14454_v25 = vmax.f32 %v5595_v35, %v6909_v38  ;;  %v5596_v20 = vmax.f32 %v5238_v39, 0.0  ;;  %v6910_v9 = vmax.f32 %v6552_v28, 0.0  ;;  %12811 = vmatmul.mubr.msk.bf16.gmra.mrb[156].mxu0 %vm4800_vm2, %v13224_v26  ;;  %12941 = vmatmul.mubr.msk.bf16.gmra.mrb[156].mxu1 %vm4800_vm2, %v13225_v22  ;;  %v14469_v22 = vld [vmem:[%s15454_s2] ss:$0 sm:$0xff]  ;;  %v13229_v35 = vld [vmem:[%s13927_s4 + $0x688] sm:$0xff]   ;;  %v13231_v52 = vld [vmem:[%s13927_s4 + $0x690] sm:$0xff]  }
 0x1df   : > { %v14458_v40 = vmax.f32 %v5593_v8, %v6907_v48  ;;  %v5594_v42 = vmax.f32 %v5230_v32, 0.0  ;;  %v6908_v4 = vmax.f32 %v6544_v29, 0.0  ;;  %12814 = vmatprep.mubr.msk.bf16.mxu0 %vm4800_vm2, %v13226_v13  ;;  %12944 = vmatprep.mubr.msk.bf16.mxu1 %vm4800_vm2, %v13227_v31  ;;  %v13228_v31 = vld [vmem:[%s13927_s4 + $0x488] sm:$0xff]  }
 0x1e0   : > { %15464 = vst [vmem:[#allocation11_spill] sm:$0xff] %v14454_v25  ;;  %v14462_v51 = vmax.f32 %v5596_v20, %v6910_v9 }
 0x1e1   : > { %15465 = vst [vmem:[#allocation12_spill] sm:$0xff] %v14458_v40  ;;  %v14464_v1 = vmax.f32 %v5594_v42, %v6908_v4  ;;  %v12576_v11 = vpop.f32.mrb[52].mxu0  ;;  %v12706_v26 = vpop.f32.mrb[52].mxu1 }
 0x1e2   : > { %15466 = vst [vmem:[#allocation13_spill] sm:$0xff] %v14462_v51  ;;  %v5251_v32 = vadd.f32 %v14469_v22, %v12576_v11  ;;  %v6565_v48 = vadd.f32 %v14469_v22, %v12706_v26  ;;  %v5242_v27 = vpop.f32.mrb[53].mxu0  ;;  %v6556_v13 = vpop.f32.mrb[53].mxu1 }
 0x1e3   : > { %15467 = vst [vmem:[#allocation14_spill] sm:$0xff] %v14464_v1  ;;  %v5243_v9 = vadd.f32 %v14469_v22, %v5242_v27  ;;  %v6557_v38 = vadd.f32 %v14469_v22, %v6556_v13  ;;  %v12577_v39 = vpop.f32.mrb[54].mxu0  ;;  %v12707_v28 = vpop.f32.mrb[54].mxu1 }
 0x1e4   : > { %v5599_v8 = vmax.f32 %v5251_v32, 0.0  ;;  %v6913_v29 = vmax.f32 %v6565_v48, 0.0  ;;  %v5254_v20 = vadd.f32 %v14469_v22, %v12577_v39  ;;  %v6568_v42 = vadd.f32 %v14469_v22, %v12707_v28  ;;  %v5245_v4 = vpop.f32.mrb[55].mxu0  ;;  %v6559_v11 = vpop.f32.mrb[55].mxu1 }
 0x1e5   : > { %v5597_v26 = vmax.f32 %v5243_v9, 0.0  ;;  %v6911_v1 = vmax.f32 %v6557_v38, 0.0  ;;  %v5246_v51 = vadd.f32 %v14469_v22, %v5245_v4  ;;  %v6560_v27 = vadd.f32 %v14469_v22, %v6559_v11  ;;  %v13235_v11 = vld [vmem:[%s13927_s4 + $0x6a0] sm:$0xff]  }
 0x1e6   : > { %v14483_v40 = vmax.f32 %v5599_v8, %v6913_v29  ;;  %v5600_v13 = vmax.f32 %v5254_v20, 0.0  ;;  %v6914_v25 = vmax.f32 %v6568_v42, 0.0  ;;  %12815 = vmatmul.mubr.msk.bf16.gmra.mrb[160].mxu0 %vm4800_vm2, %v13228_v31  ;;  %12945 = vmatmul.mubr.msk.bf16.gmra.mrb[160].mxu1 %vm4800_vm2, %v13229_v35  ;;  %v13233_v20 = vld [vmem:[%s13927_s4 + $0x698] sm:$0xff]  }
 0x1e7   : > { %v14487_v32 = vmax.f32 %v5597_v26, %v6911_v1  ;;  %v5598_v48 = vmax.f32 %v5246_v51, 0.0  ;;  %v6912_v39 = vmax.f32 %v6560_v27, 0.0  ;;  %12818 = vmatprep.mubr.msk.bf16.mxu0 %vm4800_vm2, %v13230_v34  ;;  %12948 = vmatprep.mubr.msk.bf16.mxu1 %vm4800_vm2, %v13231_v52  ;;  %v13232_v51 = vld [vmem:[%s13927_s4 + $0x498] sm:$0xff]  }
 0x1e8   : > { %15468 = vst [vmem:[#allocation15_spill] sm:$0xff] %v14483_v40  ;;  %v14491_v9 = vmax.f32 %v5600_v13, %v6914_v25  ;;  %v13234_v25 = vld [vmem:[%s13927_s4 + $0x4a0] sm:$0xff]  }
 0x1e9   : > { %15469 = vst [vmem:[#allocation16_spill] sm:$0xff] %v14487_v32  ;;  %v14493_v38 = vmax.f32 %v5598_v48, %v6912_v39  ;;  %v12580_v28 = vpop.f32.mrb[56].mxu0  ;;  %v12710_v8 = vpop.f32.mrb[56].mxu1 }
 0x1ea   : > { %15470 = vst [vmem:[#allocation17_spill] sm:$0xff] %v14491_v9  ;;  %v5267_v31 = vadd.f32 %v14469_v22, %v12580_v28  ;;  %v6581_v35 = vadd.f32 %v14469_v22, %v12710_v8  ;;  %v5258_v1 = vpop.f32.mrb[57].mxu0  ;;  %v6572_v29 = vpop.f32.mrb[57].mxu1 }
 0x1eb   : > { %15471 = vst [vmem:[#allocation18_spill] sm:$0xff] %v14493_v38  ;;  %v5259_v34 = vadd.f32 %v14469_v22, %v5258_v1  ;;  %v6573_v42 = vadd.f32 %v14469_v22, %v6572_v29  ;;  %v12581_v52 = vpop.f32.mrb[58].mxu0  ;;  %v12711_v4 = vpop.f32.mrb[58].mxu1 }
 0x1ec   : > { %v5603_v26 = vmax.f32 %v5267_v31, 0.0  ;;  %v6917_v27 = vmax.f32 %v6581_v35, 0.0  ;;  %v5270_v13 = vadd.f32 %v14469_v22, %v12581_v52  ;;  %v6584_v48 = vadd.f32 %v14469_v22, %v12711_v4  ;;  %v5261_v39 = vpop.f32.mrb[59].mxu0  ;;  %v6575_v28 = vpop.f32.mrb[59].mxu1 }
 0x1ed   : > { %v5601_v8 = vmax.f32 %v5259_v34, 0.0  ;;  %v6915_v38 = vmax.f32 %v6573_v42, 0.0  ;;  %v5262_v9 = vadd.f32 %v14469_v22, %v5261_v39  ;;  %v6576_v1 = vadd.f32 %v14469_v22, %v6575_v28  ;;  %v13239_v28 = vld [vmem:[%s13927_s4 + $0x6b0] sm:$0xff]  }
 0x1ee   : > { %v14507_v32 = vmax.f32 %v5603_v26, %v6917_v27  ;;  %v5604_v29 = vmax.f32 %v5270_v13, 0.0  ;;  %v6918_v40 = vmax.f32 %v6584_v48, 0.0  ;;  %12819 = vmatmul.mubr.msk.bf16.gmra.mrb[164].mxu0 %vm4800_vm2, %v13232_v51  ;;  %12949 = vmatmul.mubr.msk.bf16.gmra.mrb[164].mxu1 %vm4800_vm2, %v13233_v20  ;;  %v13237_v13 = vld [vmem:[%s13927_s4 + $0x6a8] sm:$0xff]  }
 0x1ef   : > { %v14511_v31 = vmax.f32 %v5601_v8, %v6915_v38  ;;  %v5602_v35 = vmax.f32 %v5262_v9, 0.0  ;;  %v6916_v52 = vmax.f32 %v6576_v1, 0.0  ;;  %12822 = vmatprep.mubr.msk.bf16.mxu0 %vm4800_vm2, %v13234_v25  ;;  %12952 = vmatprep.mubr.msk.bf16.mxu1 %vm4800_vm2, %v13235_v11  ;;  %v13236_v9 = vld [vmem:[%s13927_s4 + $0x4a8] sm:$0xff]  }
 0x1f0   : > { %15472 = vst [vmem:[#allocation19_spill] sm:$0xff] %v14507_v32  ;;  %v14515_v34 = vmax.f32 %v5604_v29, %v6918_v40  ;;  %v13238_v40 = vld [vmem:[%s13927_s4 + $0x4b0] sm:$0xff]  }
 0x1f1   : > { %15473 = vst [vmem:[#allocation20_spill] sm:$0xff] %v14511_v31  ;;  %v14517_v42 = vmax.f32 %v5602_v35, %v6916_v52  ;;  %v12584_v4 = vpop.f32.mrb[60].mxu0  ;;  %v12714_v26 = vpop.f32.mrb[60].mxu1 }
 0x1f2   : > { %15474 = vst [vmem:[#allocation21_spill] sm:$0xff] %v14515_v34  ;;  %v5283_v51 = vadd.f32 %v14469_v22, %v12584_v4  ;;  %v6597_v20 = vadd.f32 %v14469_v22, %v12714_v26  ;;  %v5274_v38 = vpop.f32.mrb[61].mxu0  ;;  %v6588_v27 = vpop.f32.mrb[61].mxu1 }
 0x1f3   : > { %15475 = vst [vmem:[#allocation22_spill] sm:$0xff] %v14517_v42  ;;  %v5275_v25 = vadd.f32 %v14469_v22, %v5274_v38  ;;  %v6589_v48 = vadd.f32 %v14469_v22, %v6588_v27  ;;  %v12585_v11 = vpop.f32.mrb[62].mxu0  ;;  %v12715_v39 = vpop.f32.mrb[62].mxu1 }
 0x1f4   : > { %v5607_v8 = vmax.f32 %v5283_v51, 0.0  ;;  %v6921_v1 = vmax.f32 %v6597_v20, 0.0  ;;  %v5286_v29 = vadd.f32 %v14469_v22, %v12585_v11  ;;  %v6600_v35 = vadd.f32 %v14469_v22, %v12715_v39  ;;  %v5277_v52 = vpop.f32.mrb[63].mxu0  ;;  %v6591_v4 = vpop.f32.mrb[63].mxu1 }
 0x1f5   : > { %v5605_v26 = vmax.f32 %v5275_v25, 0.0  ;;  %v6919_v42 = vmax.f32 %v6589_v48, 0.0  ;;  %v5278_v34 = vadd.f32 %v14469_v22, %v5277_v52  ;;  %v6592_v38 = vadd.f32 %v14469_v22, %v6591_v4  ;;  %v13243_v4 = vld [vmem:[%s13927_s4 + $0x6c0] sm:$0xff]  }
 0x1f6   : > { %v14531_v31 = vmax.f32 %v5607_v8, %v6921_v1  ;;  %v5608_v27 = vmax.f32 %v5286_v29, 0.0  ;;  %v6922_v32 = vmax.f32 %v6600_v35, 0.0  ;;  %12823 = vmatmul.mubr.msk.bf16.gmra.mrb[168].mxu0 %vm4800_vm2, %v13236_v9  ;;  %12953 = vmatmul.mubr.msk.bf16.gmra.mrb[168].mxu1 %vm4800_vm2, %v13237_v13  ;;  %v13241_v29 = vld [vmem:[%s13927_s4 + $0x6b8] sm:$0xff]  }
 0x1f7   : > { %v14535_v51 = vmax.f32 %v5605_v26, %v6919_v42  ;;  %v5606_v20 = vmax.f32 %v5278_v34, 0.0  ;;  %v6920_v11 = vmax.f32 %v6592_v38, 0.0  ;;  %12826 = vmatprep.mubr.msk.bf16.mxu0 %vm4800_vm2, %v13238_v40  ;;  %12956 = vmatprep.mubr.msk.bf16.mxu1 %vm4800_vm2, %v13239_v28  ;;  %v13240_v34 = vld [vmem:[%s13927_s4 + $0x4b8] sm:$0xff]  }
 0x1f8   : > { %15476 = vst [vmem:[#allocation23_spill] sm:$0xff] %v14531_v31  ;;  %v14539_v25 = vmax.f32 %v5608_v27, %v6922_v32  ;;  %v13242_v32 = vld [vmem:[%s13927_s4 + $0x4c0] sm:$0xff]  }
 0x1f9   : > { %15477 = vst [vmem:[#allocation24_spill] sm:$0xff] %v14535_v51  ;;  %v14541_v48 = vmax.f32 %v5606_v20, %v6920_v11  ;;  %v12588_v39 = vpop.f32.mrb[64].mxu0  ;;  %v12718_v8 = vpop.f32.mrb[64].mxu1 }
 0x1fa   : > { %15478 = vst [vmem:[#allocation25_spill] sm:$0xff] %v14539_v25  ;;  %v5299_v9 = vadd.f32 %v14469_v22, %v12588_v39  ;;  %v6613_v13 = vadd.f32 %v14469_v22, %v12718_v8  ;;  %v5290_v42 = vpop.f32.mrb[65].mxu0  ;;  %v6604_v1 = vpop.f32.mrb[65].mxu1 }
 0x1fb   : > { %15479 = vst [vmem:[#allocation26_spill] sm:$0xff] %v14541_v48  ;;  %v5291_v40 = vadd.f32 %v14469_v22, %v5290_v42  ;;  %v6605_v35 = vadd.f32 %v14469_v22, %v6604_v1  ;;  %v12589_v28 = vpop.f32.mrb[66].mxu0  ;;  %v12719_v52 = vpop.f32.mrb[66].mxu1 }
 0x1fc   : > { %v5611_v26 = vmax.f32 %v5299_v9, 0.0  ;;  %v6925_v38 = vmax.f32 %v6613_v13, 0.0  ;;  %v5302_v27 = vadd.f32 %v14469_v22, %v12589_v28  ;;  %v6616_v20 = vadd.f32 %v14469_v22, %v12719_v52  ;;  %v5293_v11 = vpop.f32.mrb[67].mxu0  ;;  %v6607_v39 = vpop.f32.mrb[67].mxu1 }
 0x1fd   : > { %v5609_v8 = vmax.f32 %v5291_v40, 0.0  ;;  %v6923_v48 = vmax.f32 %v6605_v35, 0.0  ;;  %v5294_v25 = vadd.f32 %v14469_v22, %v5293_v11  ;;  %v6608_v42 = vadd.f32 %v14469_v22, %v6607_v39  ;;  %v13247_v39 = vld [vmem:[%s13927_s4 + $0x6d0] sm:$0xff]  }
 0x1fe   : > { %v14555_v51 = vmax.f32 %v5611_v26, %v6925_v38  ;;  %v5612_v1 = vmax.f32 %v5302_v27, 0.0  ;;  %v6926_v31 = vmax.f32 %v6616_v20, 0.0  ;;  %12827 = vmatmul.mubr.msk.bf16.gmra.mrb[172].mxu0 %vm4800_vm2, %v13240_v34  ;;  %12957 = vmatmul.mubr.msk.bf16.gmra.mrb[172].mxu1 %vm4800_vm2, %v13241_v29  ;;  %v13245_v27 = vld [vmem:[%s13927_s4 + $0x6c8] sm:$0xff]  }
 0x1ff   : > { %v14559_v9 = vmax.f32 %v5609_v8, %v6923_v48  ;;  %v5610_v13 = vmax.f32 %v5294_v25, 0.0  ;;  %v6924_v28 = vmax.f32 %v6608_v42, 0.0  ;;  %12830 = vmatprep.mubr.msk.bf16.mxu0 %vm4800_vm2, %v13242_v32  ;;  %12960 = vmatprep.mubr.msk.bf16.mxu1 %vm4800_vm2, %v13243_v4  ;;  %v13244_v25 = vld [vmem:[%s13927_s4 + $0x4c8] sm:$0xff]  }
 0x200   : > { %15480 = vst [vmem:[#allocation27_spill] sm:$0xff] %v14555_v51  ;;  %v14563_v40 = vmax.f32 %v5612_v1, %v6926_v31  ;;  %v13246_v31 = vld [vmem:[%s13927_s4 + $0x4d0] sm:$0xff]  }
 0x201   : > { %15481 = vst [vmem:[#allocation28_spill] sm:$0xff] %v14559_v9  ;;  %v14565_v35 = vmax.f32 %v5610_v13, %v6924_v28  ;;  %v12592_v52 = vpop.f32.mrb[68].mxu0  ;;  %v12722_v26 = vpop.f32.mrb[68].mxu1 }
 0x202   : > { %15482 = vst [vmem:[#allocation29_spill] sm:$0xff] %v14563_v40  ;;  %v5315_v34 = vadd.f32 %v14469_v22, %v12592_v52  ;;  %v6629_v29 = vadd.f32 %v14469_v22, %v12722_v26  ;;  %v5306_v48 = vpop.f32.mrb[69].mxu0  ;;  %v6620_v38 = vpop.f32.mrb[69].mxu1 }
 0x203   : > { %15483 = vst [vmem:[#allocation30_spill] sm:$0xff] %v14565_v35  ;;  %v5307_v32 = vadd.f32 %v14469_v22, %v5306_v48  ;;  %v6621_v20 = vadd.f32 %v14469_v22, %v6620_v38  ;;  %v12593_v4 = vpop.f32.mrb[70].mxu0  ;;  %v12723_v11 = vpop.f32.mrb[70].mxu1 }
 0x204   : > { %v5615_v8 = vmax.f32 %v5315_v34, 0.0  ;;  %v6929_v42 = vmax.f32 %v6629_v29, 0.0  ;;  %v5318_v1 = vadd.f32 %v14469_v22, %v12593_v4  ;;  %v6632_v13 = vadd.f32 %v14469_v22, %v12723_v11  ;;  %v5309_v28 = vpop.f32.mrb[71].mxu0  ;;  %v6623_v52 = vpop.f32.mrb[71].mxu1 }
 0x205   : > { %v5613_v26 = vmax.f32 %v5307_v32, 0.0  ;;  %v6927_v35 = vmax.f32 %v6621_v20, 0.0  ;;  %v5310_v40 = vadd.f32 %v14469_v22, %v5309_v28  ;;  %v6624_v48 = vadd.f32 %v14469_v22, %v6623_v52  ;;  %v13251_v52 = vld [vmem:[%s13927_s4 + $0x6e0] sm:$0xff]  }
 0x206   : > { %v14579_v9 = vmax.f32 %v5615_v8, %v6929_v42  ;;  %v5616_v38 = vmax.f32 %v5318_v1, 0.0  ;;  %v6930_v51 = vmax.f32 %v6632_v13, 0.0  ;;  %12831 = vmatmul.mubr.msk.bf16.gmra.mrb[176].mxu0 %vm4800_vm2, %v13244_v25  ;;  %12961 = vmatmul.mubr.msk.bf16.gmra.mrb[176].mxu1 %vm4800_vm2, %v13245_v27  ;;  %v13249_v1 = vld [vmem:[%s13927_s4 + $0x6d8] sm:$0xff]  }
 0x207   : > { %v14583_v34 = vmax.f32 %v5613_v26, %v6927_v35  ;;  %v5614_v29 = vmax.f32 %v5310_v40, 0.0  ;;  %v6928_v4 = vmax.f32 %v6624_v48, 0.0  ;;  %12834 = vmatprep.mubr.msk.bf16.mxu0 %vm4800_vm2, %v13246_v31  ;;  %12964 = vmatprep.mubr.msk.bf16.mxu1 %vm4800_vm2, %v13247_v39  ;;  %v13248_v40 = vld [vmem:[%s13927_s4 + $0x4d8] sm:$0xff]  }
 0x208   : > { %15484 = vst [vmem:[#allocation31_spill] sm:$0xff] %v14579_v9  ;;  %v14587_v32 = vmax.f32 %v5616_v38, %v6930_v51  ;;  %v13250_v51 = vld [vmem:[%s13927_s4 + $0x4e0] sm:$0xff]  }
 0x209   : > { %15485 = vst [vmem:[#allocation32_spill] sm:$0xff] %v14583_v34  ;;  %v14589_v20 = vmax.f32 %v5614_v29, %v6928_v4  ;;  %v12596_v11 = vpop.f32.mrb[72].mxu0  ;;  %v12726_v8 = vpop.f32.mrb[72].mxu1 }
 0x20a   : > { %15486 = vst [vmem:[#allocation33_spill] sm:$0xff] %v14587_v32  ;;  %v5331_v25 = vadd.f32 %v14469_v22, %v12596_v11  ;;  %v6645_v27 = vadd.f32 %v14469_v22, %v12726_v8  ;;  %v5322_v35 = vpop.f32.mrb[73].mxu0  ;;  %v6636_v42 = vpop.f32.mrb[73].mxu1 }
 0x20b   : > { %15487 = vst [vmem:[#allocation34_spill] sm:$0xff] %v14589_v20  ;;  %v5323_v31 = vadd.f32 %v14469_v22, %v5322_v35  ;;  %v6637_v13 = vadd.f32 %v14469_v22, %v6636_v42  ;;  %v12597_v39 = vpop.f32.mrb[74].mxu0  ;;  %v12727_v28 = vpop.f32.mrb[74].mxu1 }
 0x20c   : > { %v5619_v26 = vmax.f32 %v5331_v25, 0.0  ;;  %v6933_v48 = vmax.f32 %v6645_v27, 0.0  ;;  %v5334_v38 = vadd.f32 %v14469_v22, %v12597_v39  ;;  %v6648_v29 = vadd.f32 %v14469_v22, %v12727_v28  ;;  %v5325_v4 = vpop.f32.mrb[75].mxu0  ;;  %v6639_v11 = vpop.f32.mrb[75].mxu1 }
 0x20d   : > { %v5617_v8 = vmax.f32 %v5323_v31, 0.0  ;;  %v6931_v20 = vmax.f32 %v6637_v13, 0.0  ;;  %v5326_v32 = vadd.f32 %v14469_v22, %v5325_v4  ;;  %v6640_v35 = vadd.f32 %v14469_v22, %v6639_v11  ;;  %v13255_v11 = vld [vmem:[%s13927_s4 + $0x6f0] sm:$0xff]  }
 0x20e   : > { %v14603_v34 = vmax.f32 %v5619_v26, %v6933_v48  ;;  %v5620_v42 = vmax.f32 %v5334_v38, 0.0  ;;  %v6934_v9 = vmax.f32 %v6648_v29, 0.0  ;;  %12835 = vmatmul.mubr.msk.bf16.gmra.mrb[180].mxu0 %vm4800_vm2, %v13248_v40  ;;  %12965 = vmatmul.mubr.msk.bf16.gmra.mrb[180].mxu1 %vm4800_vm2, %v13249_v1  ;;  %v13253_v38 = vld [vmem:[%s13927_s4 + $0x6e8] sm:$0xff]  }
 0x20f   : > { %v14607_v25 = vmax.f32 %v5617_v8, %v6931_v20  ;;  %v5618_v27 = vmax.f32 %v5326_v32, 0.0  ;;  %v6932_v39 = vmax.f32 %v6640_v35, 0.0  ;;  %12838 = vmatprep.mubr.msk.bf16.mxu0 %vm4800_vm2, %v13250_v51  ;;  %12968 = vmatprep.mubr.msk.bf16.mxu1 %vm4800_vm2, %v13251_v52  ;;  %v13252_v32 = vld [vmem:[%s13927_s4 + $0x4e8] sm:$0xff]  }
 0x210   : > { %15488 = vst [vmem:[#allocation35_spill] sm:$0xff] %v14603_v34  ;;  %v14611_v31 = vmax.f32 %v5620_v42, %v6934_v9  ;;  %v13254_v9 = vld [vmem:[%s13927_s4 + $0x4f0] sm:$0xff]  }
 0x211   : > { %15489 = vst [vmem:[#allocation36_spill] sm:$0xff] %v14607_v25  ;;  %v14613_v13 = vmax.f32 %v5618_v27, %v6932_v39  ;;  %v12600_v28 = vpop.f32.mrb[76].mxu0  ;;  %v12730_v26 = vpop.f32.mrb[76].mxu1 }
 0x212   : > { %15490 = vst [vmem:[#allocation37_spill] sm:$0xff] %v14611_v31  ;;  %v5347_v40 = vadd.f32 %v14469_v22, %v12600_v28  ;;  %v6661_v1 = vadd.f32 %v14469_v22, %v12730_v26  ;;  %v5338_v20 = vpop.f32.mrb[77].mxu0  ;;  %v6652_v48 = vpop.f32.mrb[77].mxu1 }
 0x213   : > { %15491 = vst [vmem:[#allocation38_spill] sm:$0xff] %v14613_v13  ;;  %v5339_v51 = vadd.f32 %v14469_v22, %v5338_v20  ;;  %v6653_v29 = vadd.f32 %v14469_v22, %v6652_v48  ;;  %v12601_v52 = vpop.f32.mrb[78].mxu0  ;;  %v12731_v4 = vpop.f32.mrb[78].mxu1 }
 0x214   : > { %v5623_v8 = vmax.f32 %v5347_v40, 0.0  ;;  %v6937_v35 = vmax.f32 %v6661_v1, 0.0  ;;  %v5350_v42 = vadd.f32 %v14469_v22, %v12601_v52  ;;  %v6664_v27 = vadd.f32 %v14469_v22, %v12731_v4  ;;  %v5341_v39 = vpop.f32.mrb[79].mxu0  ;;  %v6655_v28 = vpop.f32.mrb[79].mxu1 }
 0x215   : > { %v5621_v26 = vmax.f32 %v5339_v51, 0.0  ;;  %v6935_v13 = vmax.f32 %v6653_v29, 0.0  ;;  %v5342_v31 = vadd.f32 %v14469_v22, %v5341_v39  ;;  %v6656_v20 = vadd.f32 %v14469_v22, %v6655_v28  ;;  %v13259_v28 = vld [vmem:[%s13927_s4 + $0x700] sm:$0xff]  }
 0x216   : > { %v14627_v25 = vmax.f32 %v5623_v8, %v6937_v35  ;;  %v5624_v48 = vmax.f32 %v5350_v42, 0.0  ;;  %v6938_v34 = vmax.f32 %v6664_v27, 0.0  ;;  %12839 = vmatmul.mubr.msk.bf16.gmra.mrb[184].mxu0 %vm4800_vm2, %v13252_v32  ;;  %12969 = vmatmul.mubr.msk.bf16.gmra.mrb[184].mxu1 %vm4800_vm2, %v13253_v38  ;;  %v13257_v42 = vld [vmem:[%s13927_s4 + $0x6f8] sm:$0xff]  }
 0x217   : > { %v14631_v40 = vmax.f32 %v5621_v26, %v6935_v13  ;;  %v5622_v1 = vmax.f32 %v5342_v31, 0.0  ;;  %v6936_v52 = vmax.f32 %v6656_v20, 0.0  ;;  %12842 = vmatprep.mubr.msk.bf16.mxu0 %vm4800_vm2, %v13254_v9  ;;  %12972 = vmatprep.mubr.msk.bf16.mxu1 %vm4800_vm2, %v13255_v11  ;;  %v13256_v31 = vld [vmem:[%s13927_s4 + $0x4f8] sm:$0xff]  }
 0x218   : > { %15492 = vst [vmem:[#allocation39_spill] sm:$0xff] %v14627_v25  ;;  %v14635_v51 = vmax.f32 %v5624_v48, %v6938_v34  ;;  %v13258_v34 = vld [vmem:[%s13927_s4 + $0x500] sm:$0xff]  }
 0x219   : > { %15493 = vst [vmem:[#allocation40_spill] sm:$0xff] %v14631_v40  ;;  %v14637_v29 = vmax.f32 %v5622_v1, %v6936_v52  ;;  %v12604_v4 = vpop.f32.mrb[80].mxu0  ;;  %v12734_v8 = vpop.f32.mrb[80].mxu1 }
 0x21a   : > { %15494 = vst [vmem:[#allocation41_spill] sm:$0xff] %v14635_v51  ;;  %v5363_v32 = vadd.f32 %v14469_v22, %v12604_v4  ;;  %v6677_v38 = vadd.f32 %v14469_v22, %v12734_v8  ;;  %v5354_v13 = vpop.f32.mrb[81].mxu0  ;;  %v6668_v35 = vpop.f32.mrb[81].mxu1 }
 0x21b   : > { %15495 = vst [vmem:[#allocation42_spill] sm:$0xff] %v14637_v29  ;;  %v5355_v9 = vadd.f32 %v14469_v22, %v5354_v13  ;;  %v6669_v27 = vadd.f32 %v14469_v22, %v6668_v35  ;;  %v12605_v11 = vpop.f32.mrb[82].mxu0  ;;  %v12735_v39 = vpop.f32.mrb[82].mxu1 }
 0x21c   : > { %v5627_v26 = vmax.f32 %v5363_v32, 0.0  ;;  %v6941_v20 = vmax.f32 %v6677_v38, 0.0  ;;  %v5366_v48 = vadd.f32 %v14469_v22, %v12605_v11  ;;  %v6680_v1 = vadd.f32 %v14469_v22, %v12735_v39  ;;  %v5357_v52 = vpop.f32.mrb[83].mxu0  ;;  %v6671_v4 = vpop.f32.mrb[83].mxu1 }
 0x21d   : > { %v5625_v8 = vmax.f32 %v5355_v9, 0.0  ;;  %v6939_v29 = vmax.f32 %v6669_v27, 0.0  ;;  %v5358_v51 = vadd.f32 %v14469_v22, %v5357_v52  ;;  %v6672_v13 = vadd.f32 %v14469_v22, %v6671_v4  ;;  %v13263_v4 = vld [vmem:[%s13927_s4 + $0x710] sm:$0xff]  }
 0x21e   : > { %v14651_v40 = vmax.f32 %v5627_v26, %v6941_v20  ;;  %v5628_v35 = vmax.f32 %v5366_v48, 0.0  ;;  %v6942_v25 = vmax.f32 %v6680_v1, 0.0  ;;  %12843 = vmatmul.mubr.msk.bf16.gmra.mrb[188].mxu0 %vm4800_vm2, %v13256_v31  ;;  %12973 = vmatmul.mubr.msk.bf16.gmra.mrb[188].mxu1 %vm4800_vm2, %v13257_v42  ;;  %v13261_v48 = vld [vmem:[%s13927_s4 + $0x708] sm:$0xff]  }
 0x21f   : > { %v14655_v32 = vmax.f32 %v5625_v8, %v6939_v29  ;;  %v5626_v38 = vmax.f32 %v5358_v51, 0.0  ;;  %v6940_v11 = vmax.f32 %v6672_v13, 0.0  ;;  %12846 = vmatprep.mubr.msk.bf16.mxu0 %vm4800_vm2, %v13258_v34  ;;  %12976 = vmatprep.mubr.msk.bf16.mxu1 %vm4800_vm2, %v13259_v28  ;;  %v13260_v51 = vld [vmem:[%s13927_s4 + $0x508] sm:$0xff]  }
 0x220   : > { %15496 = vst [vmem:[#allocation43_spill] sm:$0xff] %v14651_v40  ;;  %v14659_v9 = vmax.f32 %v5628_v35, %v6942_v25  ;;  %v13262_v25 = vld [vmem:[%s13927_s4 + $0x510] sm:$0xff]  }
 0x221   : > { %15497 = vst [vmem:[#allocation44_spill] sm:$0xff] %v14655_v32  ;;  %v14661_v27 = vmax.f32 %v5626_v38, %v6940_v11  ;;  %v12608_v39 = vpop.f32.mrb[84].mxu0  ;;  %v12738_v26 = vpop.f32.mrb[84].mxu1 }
 0x222   : > { %15498 = vst [vmem:[#allocation45_spill] sm:$0xff] %v14659_v9  ;;  %v5379_v31 = vadd.f32 %v14469_v22, %v12608_v39  ;;  %v6693_v42 = vadd.f32 %v14469_v22, %v12738_v26  ;;  %v5370_v29 = vpop.f32.mrb[85].mxu0  ;;  %v6684_v20 = vpop.f32.mrb[85].mxu1 }
 0x223   : > { %15499 = vst [vmem:[#allocation46_spill] sm:$0xff] %v14661_v27  ;;  %v5371_v34 = vadd.f32 %v14469_v22, %v5370_v29  ;;  %v6685_v1 = vadd.f32 %v14469_v22, %v6684_v20  ;;  %v12609_v28 = vpop.f32.mrb[86].mxu0  ;;  %v12739_v52 = vpop.f32.mrb[86].mxu1 }
 0x224   : > { %v5631_v8 = vmax.f32 %v5379_v31, 0.0  ;;  %v6945_v13 = vmax.f32 %v6693_v42, 0.0  ;;  %v5382_v35 = vadd.f32 %v14469_v22, %v12609_v28  ;;  %v6696_v38 = vadd.f32 %v14469_v22, %v12739_v52  ;;  %v5373_v11 = vpop.f32.mrb[87].mxu0  ;;  %v6687_v39 = vpop.f32.mrb[87].mxu1 }
 0x225   : > { %v5629_v26 = vmax.f32 %v5371_v34, 0.0  ;;  %v6943_v27 = vmax.f32 %v6685_v1, 0.0  ;;  %v5374_v9 = vadd.f32 %v14469_v22, %v5373_v11  ;;  %v6688_v29 = vadd.f32 %v14469_v22, %v6687_v39  ;;  %v13267_v39 = vld [vmem:[%s13927_s4 + $0x720] sm:$0xff]  }
 0x226   : > { %v14675_v32 = vmax.f32 %v5631_v8, %v6945_v13  ;;  %v5632_v20 = vmax.f32 %v5382_v35, 0.0  ;;  %v6946_v40 = vmax.f32 %v6696_v38, 0.0  ;;  %12847 = vmatmul.mubr.msk.bf16.gmra.mrb[192].mxu0 %vm4800_vm2, %v13260_v51  ;;  %12977 = vmatmul.mubr.msk.bf16.gmra.mrb[192].mxu1 %vm4800_vm2, %v13261_v48  ;;  %v13265_v35 = vld [vmem:[%s13927_s4 + $0x718] sm:$0xff]  }
 0x227   : > { %v14679_v31 = vmax.f32 %v5629_v26, %v6943_v27  ;;  %v5630_v42 = vmax.f32 %v5374_v9, 0.0  ;;  %v6944_v28 = vmax.f32 %v6688_v29, 0.0  ;;  %12850 = vmatprep.mubr.msk.bf16.mxu0 %vm4800_vm2, %v13262_v25  ;;  %12980 = vmatprep.mubr.msk.bf16.mxu1 %vm4800_vm2, %v13263_v4  ;;  %v13264_v9 = vld [vmem:[%s13927_s4 + $0x518] sm:$0xff]  }
 0x228   : > { %15500 = vst [vmem:[#allocation47_spill] sm:$0xff] %v14675_v32  ;;  %v14683_v34 = vmax.f32 %v5632_v20, %v6946_v40  ;;  %v13266_v40 = vld [vmem:[%s13927_s4 + $0x520] sm:$0xff]  }
 0x229   : > { %15501 = vst [vmem:[#allocation48_spill] sm:$0xff] %v14679_v31  ;;  %v14685_v1 = vmax.f32 %v5630_v42, %v6944_v28  ;;  %v12612_v52 = vpop.f32.mrb[88].mxu0  ;;  %v12742_v8 = vpop.f32.mrb[88].mxu1 }
 0x22a   : > { %15502 = vst [vmem:[#allocation49_spill] sm:$0xff] %v14683_v34  ;;  %v5395_v51 = vadd.f32 %v14469_v22, %v12612_v52  ;;  %v6709_v48 = vadd.f32 %v14469_v22, %v12742_v8  ;;  %v5386_v27 = vpop.f32.mrb[89].mxu0  ;;  %v6700_v13 = vpop.f32.mrb[89].mxu1 }
 0x22b   : > { %15503 = vst [vmem:[#allocation50_spill] sm:$0xff] %v14685_v1  ;;  %v5387_v25 = vadd.f32 %v14469_v22, %v5386_v27  ;;  %v6701_v38 = vadd.f32 %v14469_v22, %v6700_v13  ;;  %v12613_v4 = vpop.f32.mrb[90].mxu0  ;;  %v12743_v11 = vpop.f32.mrb[90].mxu1 }
 0x22c   : > { %v5635_v26 = vmax.f32 %v5395_v51, 0.0  ;;  %v6949_v29 = vmax.f32 %v6709_v48, 0.0  ;;  %v5398_v20 = vadd.f32 %v14469_v22, %v12613_v4  ;;  %v6712_v42 = vadd.f32 %v14469_v22, %v12743_v11  ;;  %v5389_v28 = vpop.f32.mrb[91].mxu0  ;;  %v6703_v52 = vpop.f32.mrb[91].mxu1 }
 0x22d   : > { %v5633_v8 = vmax.f32 %v5387_v25, 0.0  ;;  %v6947_v1 = vmax.f32 %v6701_v38, 0.0  ;;  %v5390_v34 = vadd.f32 %v14469_v22, %v5389_v28  ;;  %v6704_v27 = vadd.f32 %v14469_v22, %v6703_v52  ;;  %v13271_v52 = vld [vmem:[%s13927_s4 + $0x730] sm:$0xff]  }
 0x22e   : > { %v14699_v31 = vmax.f32 %v5635_v26, %v6949_v29  ;;  %v5636_v13 = vmax.f32 %v5398_v20, 0.0  ;;  %v6950_v32 = vmax.f32 %v6712_v42, 0.0  ;;  %12851 = vmatmul.mubr.msk.bf16.gmra.mrb[196].mxu0 %vm4800_vm2, %v13264_v9  ;;  %12981 = vmatmul.mubr.msk.bf16.gmra.mrb[196].mxu1 %vm4800_vm2, %v13265_v35  ;;  %v13269_v20 = vld [vmem:[%s13927_s4 + $0x728] sm:$0xff]  }
 0x22f   : > { %v14703_v51 = vmax.f32 %v5633_v8, %v6947_v1  ;;  %v5634_v48 = vmax.f32 %v5390_v34, 0.0  ;;  %v6948_v4 = vmax.f32 %v6704_v27, 0.0  ;;  %12854 = vmatprep.mubr.msk.bf16.mxu0 %vm4800_vm2, %v13266_v40  ;;  %12984 = vmatprep.mubr.msk.bf16.mxu1 %vm4800_vm2, %v13267_v39  ;;  %v13268_v34 = vld [vmem:[%s13927_s4 + $0x528] sm:$0xff]  }
 0x230   : > { %15504 = vst [vmem:[#allocation51_spill] sm:$0xff] %v14699_v31  ;;  %v14707_v25 = vmax.f32 %v5636_v13, %v6950_v32  ;;  %v13270_v32 = vld [vmem:[%s13927_s4 + $0x530] sm:$0xff]  }
 0x231   : > { %15505 = vst [vmem:[#allocation52_spill] sm:$0xff] %v14703_v51  ;;  %v14709_v38 = vmax.f32 %v5634_v48, %v6948_v4  ;;  %v12616_v11 = vpop.f32.mrb[92].mxu0  ;;  %v12746_v26 = vpop.f32.mrb[92].mxu1 }
 0x232   : > { %15506 = vst [vmem:[#allocation53_spill] sm:$0xff] %v14707_v25  ;;  %v5411_v9 = vadd.f32 %v14469_v22, %v12616_v11  ;;  %v6725_v35 = vadd.f32 %v14469_v22, %v12746_v26  ;;  %v5402_v1 = vpop.f32.mrb[93].mxu0  ;;  %v6716_v29 = vpop.f32.mrb[93].mxu1 }
 0x233   : > { %15507 = vst [vmem:[#allocation54_spill] sm:$0xff] %v14709_v38  ;;  %v5403_v40 = vadd.f32 %v14469_v22, %v5402_v1  ;;  %v6717_v42 = vadd.f32 %v14469_v22, %v6716_v29  ;;  %v12617_v39 = vpop.f32.mrb[94].mxu0  ;;  %v12747_v28 = vpop.f32.mrb[94].mxu1 }
 0x234   : > { %v5639_v8 = vmax.f32 %v5411_v9, 0.0  ;;  %v6953_v27 = vmax.f32 %v6725_v35, 0.0  ;;  %v5414_v13 = vadd.f32 %v14469_v22, %v12617_v39  ;;  %v6728_v48 = vadd.f32 %v14469_v22, %v12747_v28  ;;  %v5405_v4 = vpop.f32.mrb[95].mxu0  ;;  %v6719_v11 = vpop.f32.mrb[95].mxu1 }
 0x235   : > { %v5637_v26 = vmax.f32 %v5403_v40, 0.0  ;;  %v6951_v38 = vmax.f32 %v6717_v42, 0.0  ;;  %v5406_v25 = vadd.f32 %v14469_v22, %v5405_v4  ;;  %v6720_v1 = vadd.f32 %v14469_v22, %v6719_v11  ;;  %v13275_v11 = vld [vmem:[%s13927_s4 + $0x740] sm:$0xff]  }
 0x236   : > { %v14723_v51 = vmax.f32 %v5639_v8, %v6953_v27  ;;  %v5640_v29 = vmax.f32 %v5414_v13, 0.0  ;;  %v6954_v31 = vmax.f32 %v6728_v48, 0.0  ;;  %12855 = vmatmul.mubr.msk.bf16.gmra.mrb[200].mxu0 %vm4800_vm2, %v13268_v34  ;;  %12985 = vmatmul.mubr.msk.bf16.gmra.mrb[200].mxu1 %vm4800_vm2, %v13269_v20  ;;  %v13273_v13 = vld [vmem:[%s13927_s4 + $0x738] sm:$0xff]  }
 0x237   : > { %v14727_v9 = vmax.f32 %v5637_v26, %v6951_v38  ;;  %v5638_v35 = vmax.f32 %v5406_v25, 0.0  ;;  %v6952_v39 = vmax.f32 %v6720_v1, 0.0  ;;  %12858 = vmatprep.mubr.msk.bf16.mxu0 %vm4800_vm2, %v13270_v32  ;;  %12988 = vmatprep.mubr.msk.bf16.mxu1 %vm4800_vm2, %v13271_v52  ;;  %v13272_v25 = vld [vmem:[%s13927_s4 + $0x538] sm:$0xff]  }
 0x238   : > { %15508 = vst [vmem:[#allocation55_spill] sm:$0xff] %v14723_v51  ;;  %v14731_v40 = vmax.f32 %v5640_v29, %v6954_v31  ;;  %v13274_v31 = vld [vmem:[%s13927_s4 + $0x540] sm:$0xff]  }
 0x239   : > { %15509 = vst [vmem:[#allocation56_spill] sm:$0xff] %v14727_v9  ;;  %v14733_v42 = vmax.f32 %v5638_v35, %v6952_v39  ;;  %v12620_v28 = vpop.f32.mrb[96].mxu0  ;;  %v12750_v8 = vpop.f32.mrb[96].mxu1 }
 0x23a   : > { %15510 = vst [vmem:[#allocation57_spill] sm:$0xff] %v14731_v40  ;;  %v5427_v34 = vadd.f32 %v14469_v22, %v12620_v28  ;;  %v6741_v20 = vadd.f32 %v14469_v22, %v12750_v8  ;;  %v5418_v38 = vpop.f32.mrb[97].mxu0  ;;  %v6732_v27 = vpop.f32.mrb[97].mxu1 }
 0x23b   : > { %15511 = vst [vmem:[#allocation58_spill] sm:$0xff] %v14733_v42  ;;  %v5419_v32 = vadd.f32 %v14469_v22, %v5418_v38  ;;  %v6733_v48 = vadd.f32 %v14469_v22, %v6732_v27  ;;  %v12621_v52 = vpop.f32.mrb[98].mxu0  ;;  %v12751_v4 = vpop.f32.mrb[98].mxu1 }
 0x23c   : > { %v5643_v26 = vmax.f32 %v5427_v34, 0.0  ;;  %v6957_v1 = vmax.f32 %v6741_v20, 0.0  ;;  %v5430_v29 = vadd.f32 %v14469_v22, %v12621_v52  ;;  %v6744_v35 = vadd.f32 %v14469_v22, %v12751_v4  ;;  %v5421_v39 = vpop.f32.mrb[99].mxu0  ;;  %v6735_v28 = vpop.f32.mrb[99].mxu1 }
 0x23d   : > { %v5641_v8 = vmax.f32 %v5419_v32, 0.0  ;;  %v6955_v42 = vmax.f32 %v6733_v48, 0.0  ;;  %v5422_v40 = vadd.f32 %v14469_v22, %v5421_v39  ;;  %v6736_v38 = vadd.f32 %v14469_v22, %v6735_v28  ;;  %v13279_v28 = vld [vmem:[%s13927_s4 + $0x750] sm:$0xff]  }
 0x23e   : > { %v14747_v9 = vmax.f32 %v5643_v26, %v6957_v1  ;;  %v5644_v27 = vmax.f32 %v5430_v29, 0.0  ;;  %v6958_v51 = vmax.f32 %v6744_v35, 0.0  ;;  %12859 = vmatmul.mubr.msk.bf16.gmra.mrb[204].mxu0 %vm4800_vm2, %v13272_v25  ;;  %12989 = vmatmul.mubr.msk.bf16.gmra.mrb[204].mxu1 %vm4800_vm2, %v13273_v13  ;;  %v13277_v29 = vld [vmem:[%s13927_s4 + $0x748] sm:$0xff]  }
 0x23f   : > { %v14751_v34 = vmax.f32 %v5641_v8, %v6955_v42  ;;  %v5642_v20 = vmax.f32 %v5422_v40, 0.0  ;;  %v6956_v52 = vmax.f32 %v6736_v38, 0.0  ;;  %12862 = vmatprep.mubr.msk.bf16.mxu0 %vm4800_vm2, %v13274_v31  ;;  %12992 = vmatprep.mubr.msk.bf16.mxu1 %vm4800_vm2, %v13275_v11  ;;  %v13276_v40 = vld [vmem:[%s13927_s4 + $0x548] sm:$0xff]  }
 0x240   : > { %15512 = vst [vmem:[#allocation59_spill] sm:$0xff] %v14747_v9  ;;  %v14755_v32 = vmax.f32 %v5644_v27, %v6958_v51  ;;  %v13278_v51 = vld [vmem:[%s13927_s4 + $0x550] sm:$0xff]  }
 0x241   : > { %15513 = vst [vmem:[#allocation60_spill] sm:$0xff] %v14751_v34  ;;  %v14757_v48 = vmax.f32 %v5642_v20, %v6956_v52  ;;  %v12624_v4 = vpop.f32.mrb[100].mxu0  ;;  %v12754_v26 = vpop.f32.mrb[100].mxu1 }
 0x242   : > { %15514 = vst [vmem:[#allocation61_spill] sm:$0xff] %v14755_v32  ;;  %v5443_v25 = vadd.f32 %v14469_v22, %v12624_v4  ;;  %v6757_v13 = vadd.f32 %v14469_v22, %v12754_v26  ;;  %v5434_v42 = vpop.f32.mrb[101].mxu0  ;;  %v6748_v1 = vpop.f32.mrb[101].mxu1 }
 0x243   : > { %15515 = vst [vmem:[#allocation62_spill] sm:$0xff] %v14757_v48  ;;  %v5435_v31 = vadd.f32 %v14469_v22, %v5434_v42  ;;  %v6749_v35 = vadd.f32 %v14469_v22, %v6748_v1  ;;  %v12625_v11 = vpop.f32.mrb[102].mxu0  ;;  %v12755_v39 = vpop.f32.mrb[102].mxu1 }
 0x244   : > { %v5647_v8 = vmax.f32 %v5443_v25, 0.0  ;;  %v6961_v38 = vmax.f32 %v6757_v13, 0.0  ;;  %v5446_v27 = vadd.f32 %v14469_v22, %v12625_v11  ;;  %v6760_v20 = vadd.f32 %v14469_v22, %v12755_v39  ;;  %v5437_v52 = vpop.f32.mrb[103].mxu0  ;;  %v6751_v4 = vpop.f32.mrb[103].mxu1 }
 0x245   : > { %v5645_v26 = vmax.f32 %v5435_v31, 0.0  ;;  %v6959_v48 = vmax.f32 %v6749_v35, 0.0  ;;  %v5438_v32 = vadd.f32 %v14469_v22, %v5437_v52  ;;  %v6752_v42 = vadd.f32 %v14469_v22, %v6751_v4  ;;  %v13283_v4 = vld [vmem:[%s13927_s4 + $0x760] sm:$0xff]  }
 0x246   : > { %v14771_v34 = vmax.f32 %v5647_v8, %v6961_v38  ;;  %v5648_v1 = vmax.f32 %v5446_v27, 0.0  ;;  %v6962_v9 = vmax.f32 %v6760_v20, 0.0  ;;  %12863 = vmatmul.mubr.msk.bf16.gmra.mrb[208].mxu0 %vm4800_vm2, %v13276_v40  ;;  %12993 = vmatmul.mubr.msk.bf16.gmra.mrb[208].mxu1 %vm4800_vm2, %v13277_v29  ;;  %v13281_v27 = vld [vmem:[%s13927_s4 + $0x758] sm:$0xff]  }
 0x247   : > { %v14775_v25 = vmax.f32 %v5645_v26, %v6959_v48  ;;  %v5646_v13 = vmax.f32 %v5438_v32, 0.0  ;;  %v6960_v11 = vmax.f32 %v6752_v42, 0.0  ;;  %12866 = vmatprep.mubr.msk.bf16.mxu0 %vm4800_vm2, %v13278_v51  ;;  %12996 = vmatprep.mubr.msk.bf16.mxu1 %vm4800_vm2, %v13279_v28  ;;  %v13280_v32 = vld [vmem:[%s13927_s4 + $0x558] sm:$0xff]  }
 0x248   : > { %15516 = vst [vmem:[#allocation63_spill] sm:$0xff] %v14771_v34  ;;  %v14779_v31 = vmax.f32 %v5648_v1, %v6962_v9  ;;  %v13282_v9 = vld [vmem:[%s13927_s4 + $0x560] sm:$0xff]  }
 0x249   : > { %15517 = vst [vmem:[#allocation64_spill] sm:$0xff] %v14775_v25  ;;  %v14781_v35 = vmax.f32 %v5646_v13, %v6960_v11  ;;  %v12628_v39 = vpop.f32.mrb[104].mxu0  ;;  %v12758_v8 = vpop.f32.mrb[104].mxu1 }
 0x24a   : > { %15518 = vst [vmem:[#allocation65_spill] sm:$0xff] %v14779_v31  ;;  %v5459_v40 = vadd.f32 %v14469_v22, %v12628_v39  ;;  %v6773_v29 = vadd.f32 %v14469_v22, %v12758_v8  ;;  %v5450_v48 = vpop.f32.mrb[105].mxu0  ;;  %v6764_v38 = vpop.f32.mrb[105].mxu1 }
 0x24b   : > { %15519 = vst [vmem:[#allocation66_spill] sm:$0xff] %v14781_v35  ;;  %v5451_v51 = vadd.f32 %v14469_v22, %v5450_v48  ;;  %v6765_v20 = vadd.f32 %v14469_v22, %v6764_v38  ;;  %v12629_v28 = vpop.f32.mrb[106].mxu0  ;;  %v12759_v52 = vpop.f32.mrb[106].mxu1 }
 0x24c   : > { %v5651_v26 = vmax.f32 %v5459_v40, 0.0  ;;  %v6965_v42 = vmax.f32 %v6773_v29, 0.0  ;;  %v5462_v1 = vadd.f32 %v14469_v22, %v12629_v28  ;;  %v6776_v13 = vadd.f32 %v14469_v22, %v12759_v52  ;;  %v5453_v11 = vpop.f32.mrb[107].mxu0  ;;  %v6767_v39 = vpop.f32.mrb[107].mxu1 }
 0x24d   : > { %v5649_v8 = vmax.f32 %v5451_v51, 0.0  ;;  %v6963_v35 = vmax.f32 %v6765_v20, 0.0  ;;  %v5454_v31 = vadd.f32 %v14469_v22, %v5453_v11  ;;  %v6768_v48 = vadd.f32 %v14469_v22, %v6767_v39  ;;  %v13287_v39 = vld [vmem:[%s13927_s4 + $0x770] sm:$0xff]  }
 0x24e   : > { %v14795_v25 = vmax.f32 %v5651_v26, %v6965_v42  ;;  %v5652_v38 = vmax.f32 %v5462_v1, 0.0  ;;  %v6966_v34 = vmax.f32 %v6776_v13, 0.0  ;;  %12867 = vmatmul.mubr.msk.bf16.gmra.mrb[212].mxu0 %vm4800_vm2, %v13280_v32  ;;  %12997 = vmatmul.mubr.msk.bf16.gmra.mrb[212].mxu1 %vm4800_vm2, %v13281_v27  ;;  %v13285_v1 = vld [vmem:[%s13927_s4 + $0x768] sm:$0xff]  }
 0x24f   : > { %v14799_v40 = vmax.f32 %v5649_v8, %v6963_v35  ;;  %v5650_v29 = vmax.f32 %v5454_v31, 0.0  ;;  %v6964_v28 = vmax.f32 %v6768_v48, 0.0  ;;  %12870 = vmatprep.mubr.msk.bf16.mxu0 %vm4800_vm2, %v13282_v9  ;;  %13000 = vmatprep.mubr.msk.bf16.mxu1 %vm4800_vm2, %v13283_v4  ;;  %v13284_v31 = vld [vmem:[%s13927_s4 + $0x568] sm:$0xff]  }
 0x250   : > { %15520 = vst [vmem:[#allocation67_spill] sm:$0xff] %v14795_v25  ;;  %v14803_v51 = vmax.f32 %v5652_v38, %v6966_v34  ;;  %v13286_v34 = vld [vmem:[%s13927_s4 + $0x570] sm:$0xff]   ;;  %v14818_v38 = vld [vmem:[%s15454_s2] ss:$0 sm:$0xff] }
 0x251   : > { %15521 = vst [vmem:[#allocation68_spill] sm:$0xff] %v14799_v40  ;;  %v14805_v20 = vmax.f32 %v5650_v29, %v6964_v28  ;;  %v12632_v52 = vpop.f32.mrb[108].mxu0  ;;  %v12762_v26 = vpop.f32.mrb[108].mxu1 }
 0x252   : > { %15522 = vst [vmem:[#allocation69_spill] sm:$0xff] %v14803_v51  ;;  %v5475_v32 = vadd.f32 %v14469_v22, %v12632_v52  ;;  %v6789_v27 = vadd.f32 %v14469_v22, %v12762_v26  ;;  %v5466_v35 = vpop.f32.mrb[109].mxu0  ;;  %v6780_v42 = vpop.f32.mrb[109].mxu1 }
 0x253   : > { %15523 = vst [vmem:[#allocation70_spill] sm:$0xff] %v14805_v20  ;;  %v5467_v9 = vadd.f32 %v14469_v22, %v5466_v35  ;;  %v6781_v13 = vadd.f32 %v14469_v22, %v6780_v42  ;;  %v12633_v4 = vpop.f32.mrb[110].mxu0  ;;  %v12763_v11 = vpop.f32.mrb[110].mxu1 }
 0x254   : > { %v5655_v8 = vmax.f32 %v5475_v32, 0.0  ;;  %v6969_v48 = vmax.f32 %v6789_v27, 0.0  ;;  %v5478_v29 = vadd.f32 %v14818_v38, %v12633_v4  ;;  %v6792_v28 = vadd.f32 %v14818_v38, %v12763_v11  ;;  %v5469_v52 = vpop.f32.mrb[111].mxu0  ;;  %v6783_v26 = vpop.f32.mrb[111].mxu1 }
 0x255   : > { %v5653_v35 = vmax.f32 %v5467_v9, 0.0  ;;  %v6967_v20 = vmax.f32 %v6781_v13, 0.0  ;;  %v5470_v22 = vadd.f32 %v14818_v38, %v5469_v52  ;;  %v6784_v42 = vadd.f32 %v14818_v38, %v6783_v26  ;;  %v13289_v52 = vld [vmem:[%s13927_s4 + $0x778] sm:$0xff]  }
 0x256   : > { %v14824_v51 = vmax.f32 %v5655_v8, %v6969_v48  ;;  %v5656_v32 = vmax.f32 %v5478_v29, 0.0  ;;  %v6970_v27 = vmax.f32 %v6792_v28, 0.0  ;;  %12871 = vmatmul.mubr.msk.bf16.gmra.mrb[216].mxu0 %vm4800_vm2, %v13284_v31  ;;  %13001 = vmatmul.mubr.msk.bf16.gmra.mrb[216].mxu1 %vm4800_vm2, %v13285_v1  ;;  %v13288_v28 = vld [vmem:[%s13927_s4 + $0x578] sm:$0xff]  }
 0x257   : > { %v14828_v4 = vmax.f32 %v5653_v35, %v6967_v20  ;;  %v5654_v11 = vmax.f32 %v5470_v22, 0.0  ;;  %v6968_v40 = vmax.f32 %v6784_v42, 0.0  ;;  %12874 = vmatprep.mubr.msk.bf16.mxu0 %vm4800_vm2, %v13286_v34  ;;  %13004 = vmatprep.mubr.msk.bf16.mxu1 %vm4800_vm2, %v13287_v39  ;;  %v13290_v22 = vld [vmem:[%s13927_s4 + $0x580] sm:$0xff]  }
 0x258   : > { %15524 = vst [vmem:[#allocation71_spill] sm:$0xff] %v14824_v51  ;;  %v14832_v9 = vmax.f32 %v5656_v32, %v6970_v27  ;;  %v13291_v42 = vld [vmem:[%s13927_s4 + $0x780] sm:$0xff]  }
 0x259   : > { %15525 = vst [vmem:[#allocation72_spill] sm:$0xff] %v14828_v4  ;;  %v14834_v13 = vmax.f32 %v5654_v11, %v6968_v40  ;;  %v12636_v8 = vpop.f32.mrb[112].mxu0  ;;  %v12766_v48 = vpop.f32.mrb[112].mxu1 }
 0x25a   : > { %15526 = vst [vmem:[#allocation73_spill] sm:$0xff] %v14832_v9  ;;  %v5491_v31 = vadd.f32 %v14818_v38, %v12636_v8  ;;  %v6805_v1 = vadd.f32 %v14818_v38, %v12766_v48  ;;  %v5482_v20 = vpop.f32.mrb[113].mxu0  ;;  %v6796_v29 = vpop.f32.mrb[113].mxu1 }
 0x25b   : > { %15527 = vst [vmem:[#allocation74_spill] sm:$0xff] %v14834_v13  ;;  %v5483_v34 = vadd.f32 %v14818_v38, %v5482_v20  ;;  %v6797_v26 = vadd.f32 %v14818_v38, %v6796_v29  ;;  %v12637_v39 = vpop.f32.mrb[114].mxu0  ;;  %v12767_v35 = vpop.f32.mrb[114].mxu1 }
 0x25c   : > { %v5659_v40 = vmax.f32 %v5491_v31, 0.0  ;;  %v6973_v32 = vmax.f32 %v6805_v1, 0.0  ;;  %v5494_v27 = vadd.f32 %v14818_v38, %v12637_v39  ;;  %v6808_v11 = vadd.f32 %v14818_v38, %v12767_v35  ;;  %v5485_v8 = vpop.f32.mrb[115].mxu0  ;;  %v6799_v48 = vpop.f32.mrb[115].mxu1 }
 0x25d   : > { %v5657_v13 = vmax.f32 %v5483_v34, 0.0  ;;  %v6971_v9 = vmax.f32 %v6797_v26, 0.0  ;;  %v5486_v4 = vadd.f32 %v14818_v38, %v5485_v8  ;;  %v6800_v20 = vadd.f32 %v14818_v38, %v6799_v48  ;;  %v13295_v8 = vld [vmem:[%s13927_s4 + $0x790] sm:$0xff]  }
 0x25e   : > { %v14848_v51 = vmax.f32 %v5659_v40, %v6973_v32  ;;  %v5660_v29 = vmax.f32 %v5494_v27, 0.0  ;;  %v6974_v25 = vmax.f32 %v6808_v11, 0.0  ;;  %12875 = vmatmul.mubr.msk.bf16.gmra.mrb[220].mxu0 %vm4800_vm2, %v13288_v28  ;;  %13005 = vmatmul.mubr.msk.bf16.gmra.mrb[220].mxu1 %vm4800_vm2, %v13289_v52  ;;  %v13293_v32 = vld [vmem:[%s13927_s4 + $0x788] sm:$0xff]  }
 0x25f   : > { %v14852_v31 = vmax.f32 %v5657_v13, %v6971_v9  ;;  %v5658_v1 = vmax.f32 %v5486_v4, 0.0  ;;  %v6972_v39 = vmax.f32 %v6800_v20, 0.0  ;;  %12878 = vmatprep.mubr.msk.bf16.mxu0 %vm4800_vm2, %v13290_v22  ;;  %13008 = vmatprep.mubr.msk.bf16.mxu1 %vm4800_vm2, %v13291_v42  ;;  %v13292_v4 = vld [vmem:[%s13927_s4 + $0x588] sm:$0xff]  }
 0x260   : > { %15528 = vst [vmem:[#allocation75_spill] sm:$0xff] %v14848_v51  ;;  %v14856_v34 = vmax.f32 %v5660_v29, %v6974_v25  ;;  %v13294_v25 = vld [vmem:[%s13927_s4 + $0x590] sm:$0xff]  }
 0x261   : > { %15529 = vst [vmem:[#allocation76_spill] sm:$0xff] %v14852_v31  ;;  %v14858_v26 = vmax.f32 %v5658_v1, %v6972_v39  ;;  %v12640_v35 = vpop.f32.mrb[116].mxu0  ;;  %v12770_v40 = vpop.f32.mrb[116].mxu1 }
 0x262   : > { %15530 = vst [vmem:[#allocation77_spill] sm:$0xff] %v14856_v34  ;;  %v5507_v28 = vadd.f32 %v14818_v38, %v12640_v35  ;;  %v6821_v52 = vadd.f32 %v14818_v38, %v12770_v40  ;;  %v5498_v9 = vpop.f32.mrb[117].mxu0  ;;  %v6812_v13 = vpop.f32.mrb[117].mxu1 }
 0x263   : > { %15531 = vst [vmem:[#allocation78_spill] sm:$0xff] %v14858_v26  ;;  %v5499_v22 = vadd.f32 %v14818_v38, %v5498_v9  ;;  %v6813_v27 = vadd.f32 %v14818_v38, %v6812_v13  ;;  %v12641_v42 = vpop.f32.mrb[118].mxu0  ;;  %v12771_v11 = vpop.f32.mrb[118].mxu1 }
 0x264   : > { %v5663_v48 = vmax.f32 %v5507_v28, 0.0  ;;  %v6977_v20 = vmax.f32 %v6821_v52, 0.0  ;;  %v5510_v29 = vadd.f32 %v14818_v38, %v12641_v42  ;;  %v6824_v1 = vadd.f32 %v14818_v38, %v12771_v11  ;;  %v5501_v39 = vpop.f32.mrb[119].mxu0  ;;  %v6815_v35 = vpop.f32.mrb[119].mxu1 }
 0x265   : > { %v5661_v40 = vmax.f32 %v5499_v22, 0.0  ;;  %v6975_v26 = vmax.f32 %v6813_v27, 0.0  ;;  %v5502_v34 = vadd.f32 %v14818_v38, %v5501_v39  ;;  %v6816_v9 = vadd.f32 %v14818_v38, %v6815_v35  ;;  %v13299_v35 = vld [vmem:[%s13927_s4 + $0x7a0] sm:$0xff]  }
 0x266   : > { %v14872_v31 = vmax.f32 %v5663_v48, %v6977_v20  ;;  %v5664_v13 = vmax.f32 %v5510_v29, 0.0  ;;  %v6978_v51 = vmax.f32 %v6824_v1, 0.0  ;;  %12879 = vmatmul.mubr.msk.bf16.gmra.mrb[224].mxu0 %vm4800_vm2, %v13292_v4  ;;  %13009 = vmatmul.mubr.msk.bf16.gmra.mrb[224].mxu1 %vm4800_vm2, %v13293_v32  ;;  %v13297_v29 = vld [vmem:[%s13927_s4 + $0x798] sm:$0xff]  }
 0x267   : > { %v14876_v28 = vmax.f32 %v5661_v40, %v6975_v26  ;;  %v5662_v52 = vmax.f32 %v5502_v34, 0.0  ;;  %v6976_v42 = vmax.f32 %v6816_v9, 0.0  ;;  %12882 = vmatprep.mubr.msk.bf16.mxu0 %vm4800_vm2, %v13294_v25  ;;  %13012 = vmatprep.mubr.msk.bf16.mxu1 %vm4800_vm2, %v13295_v8  ;;  %v13296_v34 = vld [vmem:[%s13927_s4 + $0x598] sm:$0xff]  }
 0x268   : > { %15532 = vst [vmem:[#allocation79_spill] sm:$0xff] %v14872_v31  ;;  %v14880_v22 = vmax.f32 %v5664_v13, %v6978_v51  ;;  %v13298_v51 = vld [vmem:[%s13927_s4 + $0x5a0] sm:$0xff]  }
 0x269   : > { %15533 = vst [vmem:[#allocation80_spill] sm:$0xff] %v14876_v28  ;;  %v14882_v27 = vmax.f32 %v5662_v52, %v6976_v42  ;;  %v12644_v11 = vpop.f32.mrb[120].mxu0  ;;  %v12774_v48 = vpop.f32.mrb[120].mxu1 }
 0x26a   : > { %15534 = vst [vmem:[#allocation81_spill] sm:$0xff] %v14880_v22  ;;  %v5523_v4 = vadd.f32 %v14818_v38, %v12644_v11  ;;  %v6837_v32 = vadd.f32 %v14818_v38, %v12774_v48  ;;  %v5514_v26 = vpop.f32.mrb[121].mxu0  ;;  %v6828_v20 = vpop.f32.mrb[121].mxu1 }
 0x26b   : > { %15535 = vst [vmem:[#allocation82_spill] sm:$0xff] %v14882_v27  ;;  %v5515_v25 = vadd.f32 %v14818_v38, %v5514_v26  ;;  %v6829_v1 = vadd.f32 %v14818_v38, %v6828_v20  ;;  %v12645_v8 = vpop.f32.mrb[122].mxu0  ;;  %v12775_v39 = vpop.f32.mrb[122].mxu1 }
 0x26c   : > { %v5667_v40 = vmax.f32 %v5523_v4, 0.0  ;;  %v6981_v9 = vmax.f32 %v6837_v32, 0.0  ;;  %v5526_v13 = vadd.f32 %v14818_v38, %v12645_v8  ;;  %v6840_v52 = vadd.f32 %v14818_v38, %v12775_v39  ;;  %v5517_v42 = vpop.f32.mrb[123].mxu0  ;;  %v6831_v11 = vpop.f32.mrb[123].mxu1 }
 0x26d   : > { %v5665_v48 = vmax.f32 %v5515_v25, 0.0  ;;  %v6979_v27 = vmax.f32 %v6829_v1, 0.0  ;;  %v5518_v22 = vadd.f32 %v14818_v38, %v5517_v42  ;;  %v6832_v26 = vadd.f32 %v14818_v38, %v6831_v11  ;;  %v13302_v42 = vld [vmem:[%s13927_s4 + $0x5b0] sm:$0xff]  }
 0x26e   : > { %v14896_v28 = vmax.f32 %v5667_v40, %v6981_v9  ;;  %v5668_v20 = vmax.f32 %v5526_v13, 0.0  ;;  %v6982_v31 = vmax.f32 %v6840_v52, 0.0  ;;  %12883 = vmatmul.mubr.msk.bf16.gmra.mrb[228].mxu0 %vm4800_vm2, %v13296_v34  ;;  %13013 = vmatmul.mubr.msk.bf16.gmra.mrb[228].mxu1 %vm4800_vm2, %v13297_v29  ;;  %v13301_v13 = vld [vmem:[%s13927_s4 + $0x7a8] sm:$0xff]   ;;  %v13303_v11 = vld [vmem:[%s13927_s4 + $0x7b0] sm:$0xff]  }
 0x26f   : > { %v14900_v4 = vmax.f32 %v5665_v48, %v6979_v27  ;;  %v5666_v32 = vmax.f32 %v5518_v22, 0.0  ;;  %v6980_v8 = vmax.f32 %v6832_v26, 0.0  ;;  %12886 = vmatprep.mubr.msk.bf16.mxu0 %vm4800_vm2, %v13298_v51  ;;  %13016 = vmatprep.mubr.msk.bf16.mxu1 %vm4800_vm2, %v13299_v35  ;;  %v13300_v22 = vld [vmem:[%s13927_s4 + $0x5a8] sm:$0xff]  }
 0x270   : > { %15536 = vst [vmem:[#allocation83_spill] sm:$0xff] %v14896_v28  ;;  %v14904_v25 = vmax.f32 %v5668_v20, %v6982_v31 }
 0x271   : > { %15537 = vst [vmem:[#allocation84_spill] sm:$0xff] %v14900_v4  ;;  %v14906_v1 = vmax.f32 %v5666_v32, %v6980_v8  ;;  %v12648_v39 = vpop.f32.mrb[124].mxu0  ;;  %v12778_v40 = vpop.f32.mrb[124].mxu1 }
 0x272   : > { %15538 = vst [vmem:[#allocation85_spill] sm:$0xff] %v14904_v25  ;;  %v5539_v34 = vadd.f32 %v14818_v38, %v12648_v39  ;;  %v6853_v29 = vadd.f32 %v14818_v38, %v12778_v40  ;;  %v5530_v27 = vpop.f32.mrb[125].mxu0  ;;  %v6844_v9 = vpop.f32.mrb[125].mxu1 }
 0x273   : > { %15539 = vst [vmem:[#allocation86_spill] sm:$0xff] %v14906_v1  ;;  %v5531_v51 = vadd.f32 %v14818_v38, %v5530_v27  ;;  %v6845_v35 = vadd.f32 %v14818_v38, %v6844_v9  ;;  %v12649_v52 = vpop.f32.mrb[126].mxu0  ;;  %v12779_v31 = vpop.f32.mrb[126].mxu1 }
 0x274   : > { %v5671_v48 = vmax.f32 %v5539_v34, 0.0  ;;  %v6985_v26 = vmax.f32 %v6853_v29, 0.0  ;;  %v5542_v20 = vadd.f32 %v14818_v38, %v12649_v52  ;;  %v6856_v32 = vadd.f32 %v14818_v38, %v12779_v31  ;;  %v5533_v8 = vpop.f32.mrb[127].mxu0  ;;  %v6847_v39 = vpop.f32.mrb[127].mxu1 }
 0x275   : > { %v5669_v40 = vmax.f32 %v5531_v51, 0.0  ;;  %v6983_v1 = vmax.f32 %v6845_v35, 0.0  ;;  %v5534_v25 = vadd.f32 %v14818_v38, %v5533_v8  ;;  %v6848_v27 = vadd.f32 %v14818_v38, %v6847_v39 }
 0x276   : > { %v14924_v9 = vmax.f32 %v5671_v48, %v6985_v26  ;;  %v5672_v34 = vmax.f32 %v5542_v20, 0.0  ;;  %v6986_v29 = vmax.f32 %v6856_v32, 0.0  ;;  %12887 = vmatmul.mubr.msk.bf16.gmra.mrb[232].mxu0 %vm4800_vm2, %v13300_v22  ;;  %13017 = vmatmul.mubr.msk.bf16.gmra.mrb[232].mxu1 %vm4800_vm2, %v13301_v13  ;;  %v13305_v32 = vld [vmem:[%s13927_s4 + $0x7b8] sm:$0xff]  }
 0x277   : > { %v14928_v51 = vmax.f32 %v5669_v40, %v6983_v1  ;;  %v5670_v35 = vmax.f32 %v5534_v25, 0.0  ;;  %v6984_v52 = vmax.f32 %v6848_v27, 0.0  ;;  %12890 = vmatprep.mubr.msk.bf16.mxu0 %vm4800_vm2, %v13302_v42  ;;  %13020 = vmatprep.mubr.msk.bf16.mxu1 %vm4800_vm2, %v13303_v11  ;;  %v13304_v42 = vld [vmem:[%s13927_s4 + $0x5b8] sm:$0xff]   ;;  %v13306_v27 = vld [vmem:[%s13927_s4 + $0x5c0] sm:$0xff]  }
 0x278   : > { %15540 = vst [vmem:[#allocation87_spill] sm:$0xff] %v14924_v9  ;;  %v14932_v31 = vmax.f32 %v5672_v34, %v6986_v29  ;;  %v13307_v34 = vld [vmem:[%s13927_s4 + $0x7c0] sm:$0xff]  }
 0x279   : > { %15541 = vst [vmem:[#allocation88_spill] sm:$0xff] %v14928_v51  ;;  %v14935_v48 = vmax.f32 %v5670_v35, %v6984_v52  ;;  %v12784_v22 = vpop.f32.mrb[128].mxu0  ;;  %v12914_v26 = vpop.f32.mrb[128].mxu1 }
 0x27a   : > { %15542 = vst [vmem:[#allocation89_spill] sm:$0xff] %v14932_v31  ;;  %v7799_v1 = vadd.f32 %v14818_v38, %v12784_v22  ;;  %v9241_v25 = vadd.f32 %v14818_v38, %v12914_v26  ;;  %v7790_v13 = vpop.f32.mrb[129].mxu0  ;;  %v9232_v20 = vpop.f32.mrb[129].mxu1 }
 0x27b   : > { %15543 = vst [vmem:[#allocation90_spill] sm:$0xff] %v14935_v48  ;;  %v7791_v11 = vadd.f32 %v14818_v38, %v7790_v13  ;;  %v9233_v8 = vadd.f32 %v14818_v38, %v9232_v20  ;;  %v12785_v39 = vpop.f32.mrb[130].mxu0  ;;  %v12915_v40 = vpop.f32.mrb[130].mxu1 }
 0x27c   : > { %v8303_v29 = vmax.f32 %v7799_v1, 0.0  ;;  %v9745_v35 = vmax.f32 %v9241_v25, 0.0  ;;  %v7802_v52 = vadd.f32 %v14818_v38, %v12785_v39  ;;  %v9244_v22 = vadd.f32 %v14818_v38, %v12915_v40  ;;  %v7793_v26 = vpop.f32.mrb[131].mxu0  ;;  %v9235_v48 = vpop.f32.mrb[131].mxu1 }
 0x27d   : > { %v8301_v31 = vmax.f32 %v7791_v11, 0.0  ;;  %v9743_v13 = vmax.f32 %v9233_v8, 0.0  ;;  %v7794_v20 = vadd.f32 %v14818_v38, %v7793_v26  ;;  %v9236_v51 = vadd.f32 %v14818_v38, %v9235_v48 }
 0x27e   : > { %v8431_v9 = vmax.f32 %v14166_v12, %v8303_v29  ;;  %v8304_v1 = vmax.f32 %v7802_v52, 0.0  ;;  %12891 = vmatmul.mubr.msk.bf16.gmra.mrb[236].mxu0 %vm4800_vm2, %v13304_v42  ;;  %13021 = vmatmul.mubr.msk.bf16.gmra.mrb[236].mxu1 %vm4800_vm2, %v13305_v32  ;;  %v9746_v48 = vmax.f32 %v9244_v22, 0.0 }
 0x27f   : > { %v8429_v25 = vmax.f32 %v14170_v15, %v8301_v31  ;;  %v8302_v39 = vmax.f32 %v7794_v20, 0.0  ;;  %12894 = vmatprep.mubr.msk.bf16.mxu0 %vm4800_vm2, %v13306_v27  ;;  %13024 = vmatprep.mubr.msk.bf16.mxu1 %vm4800_vm2, %v13307_v34  ;;  %v9744_v42 = vmax.f32 %v9236_v51, 0.0  ;;  %v13311_v20 = vld [vmem:[%s13927_s4 + $0x7d0] sm:$0xff]  }
 0x280   : > { %v9873_v11 = vmax.f32 %v8431_v9, %v9745_v35  ;;  %v8432_v8 = vmax.f32 %v14174_v18, %v8304_v1  ;;  %v13308_v9 = vld [vmem:[%s13927_s4 + $0x5c8] sm:$0xff]  }
 0x281   : > { %v9871_v12 = vmax.f32 %v8429_v25, %v9743_v13  ;;  %v8430_v40 = vmax.f32 %v14178_v21, %v8302_v39  ;;  %v12788_v32 = vpop.f32.mrb[132].mxu0  ;;  %v12918_v15 = vpop.f32.mrb[132].mxu1  ;;  %v13309_v35 = vld [vmem:[%s13927_s4 + $0x7c8] sm:$0xff]   ;;  %v13310_v13 = vld [vmem:[%s13927_s4 + $0x5d0] sm:$0xff]  }
 0x282   : > { %v9874_v31 = vmax.f32 %v8432_v8, %v9746_v48  ;;  %v7815_v27 = vadd.f32 %v14818_v38, %v12788_v32  ;;  %v9257_v29 = vadd.f32 %v14818_v38, %v12918_v15  ;;  %v7806_v34 = vpop.f32.mrb[133].mxu0  ;;  %v9248_v52 = vpop.f32.mrb[133].mxu1 }
 0x283   : > { %v9872_v18 = vmax.f32 %v8430_v40, %v9744_v42  ;;  %v7807_v21 = vadd.f32 %v14818_v38, %v7806_v34  ;;  %v9249_v51 = vadd.f32 %v14818_v38, %v9248_v52  ;;  %v12789_v22 = vpop.f32.mrb[134].mxu0  ;;  %v12919_v26 = vpop.f32.mrb[134].mxu1 }
 0x284   : > { %v11885_v1 = vpack.c.bf16 %v9874_v31, %v9873_v11  ;;  %v8307_v25 = vmax.f32 %v7815_v27, 0.0  ;;  %v9749_v39 = vmax.f32 %v9257_v29, 0.0  ;;  %v7818_v8 = vadd.f32 %v14818_v38, %v12789_v22  ;;  %v7809_v48 = vpop.f32.mrb[135].mxu0  ;;  %v9251_v32 = vpop.f32.mrb[135].mxu1 }
 0x285   : > { %v11880_v15 = vpack.c.bf16 %v9872_v18, %v9871_v12  ;;  %v8305_v4 = vmax.f32 %v7807_v21, 0.0  ;;  %v9747_v40 = vmax.f32 %v9249_v51, 0.0  ;;  %v9260_v42 = vadd.f32 %v14818_v38, %v12919_v26 }
 0x286   : > { %12197 = vst [vmem:[%s14970_s17 + $0x8] sm:$0xff] %v11885_v1   ;;  %v8435_v34 = vmax.f32 %v14190_v44, %v8307_v25  ;;  %v8308_v52 = vmax.f32 %v7818_v8, 0.0  ;;  %v7810_v28 = vadd.f32 %v14818_v38, %v7809_v48  ;;  %v9252_v11 = vadd.f32 %v14818_v38, %v9251_v32  ;;  %12895 = vmatmul.mubr.msk.bf16.gmra.mrb[240].mxu0 %vm4800_vm2, %v13308_v9  ;;  %v13314_v8 = vld [vmem:[%s13927_s4 + $0x5e0] sm:$0xff]  }
 0x287   : > { %13025 = vmatmul.mubr.msk.bf16.gmra.mrb[240].mxu1 %vm4800_vm2, %v13309_v35  ;;  %11881 = vst [vmem:[%s14970_s17] sm:$0xff] %v11880_v15   ;;  %v8433_v31 = vmax.f32 %v14194_v47, %v8305_v4  ;;  %12898 = vmatprep.mubr.msk.bf16.mxu0 %vm4800_vm2, %v13310_v13  ;;  %v9750_v27 = vmax.f32 %v9260_v42, 0.0 }
 0x288   : > { %13028 = vmatprep.mubr.msk.bf16.mxu1 %vm4800_vm2, %v13311_v20  ;;  %v9877_v12 = vmax.f32 %v8435_v34, %v9749_v39  ;;  %v8436_v44 = vmax.f32 %v14198_v50, %v8308_v52  ;;  %v8306_v29 = vmax.f32 %v7810_v28, 0.0  ;;  %v9748_v21 = vmax.f32 %v9252_v11, 0.0  ;;  %v13312_v20 = vld [vmem:[%s13927_s4 + $0x5d8] sm:$0xff]   ;;  %v13315_v34 = vld [vmem:[%s13927_s4 + $0x7e0] sm:$0xff]  }
 0x289   : > { %v9875_v18 = vmax.f32 %v8433_v31, %v9747_v40  ;;  %v12792_v9 = vpop.f32.mrb[136].mxu0  ;;  %v12922_v51 = vpop.f32.mrb[136].mxu1  ;;  %v13313_v39 = vld [vmem:[%s13927_s4 + $0x7d8] sm:$0xff]  }
 0x28a   : > { %v9878_v35 = vmax.f32 %v8436_v44, %v9750_v27  ;;  %v8434_v22 = vmax.f32 %v14202_v54, %v8306_v29  ;;  %v7831_v47 = vadd.f32 %v14818_v38, %v12792_v9  ;;  %v9273_v4 = vadd.f32 %v14818_v38, %v12922_v51  ;;  %v7822_v26 = vpop.f32.mrb[137].mxu0  ;;  %v9264_v13 = vpop.f32.mrb[137].mxu1 }
 0x28b   : > { %v7823_v50 = vadd.f32 %v14818_v38, %v7822_v26  ;;  %v9265_v28 = vadd.f32 %v14818_v38, %v9264_v13  ;;  %v12793_v1 = vpop.f32.mrb[138].mxu0  ;;  %v12923_v25 = vpop.f32.mrb[138].mxu1 }
 0x28c   : > { %v11895_v48 = vpack.c.bf16 %v9878_v35, %v9877_v12  ;;  %v9876_v32 = vmax.f32 %v8434_v22, %v9748_v21  ;;  %v8311_v54 = vmax.f32 %v7831_v47, 0.0  ;;  %v9753_v15 = vmax.f32 %v9273_v4, 0.0  ;;  %v7825_v40 = vpop.f32.mrb[139].mxu0  ;;  %v9267_v42 = vpop.f32.mrb[139].mxu1 }
 0x28d   : > { %v8309_v52 = vmax.f32 %v7823_v50, 0.0  ;;  %v9751_v11 = vmax.f32 %v9265_v28, 0.0  ;;  %v7834_v31 = vadd.f32 %v14818_v38, %v12793_v1  ;;  %v9276_v44 = vadd.f32 %v14818_v38, %v12923_v25  ;;  %v13316_v25 = vld [vmem:[%s13927_s4 + $0x5e8] sm:$0xff]  }
 0x28e   : > { %12199 = vst [vmem:[%s14970_s17 + $0x18] sm:$0xff] %v11895_v48   ;;  %v11890_v27 = vpack.c.bf16 %v9876_v32, %v9875_v18  ;;  %v8439_v29 = vmax.f32 %v14214_v14, %v8311_v54  ;;  %v7826_v9 = vadd.f32 %v14818_v38, %v7825_v40  ;;  %v9268_v12 = vadd.f32 %v14818_v38, %v9267_v42  ;;  %v13317_v54 = vld [vmem:[%s13927_s4 + $0x7e8] sm:$0xff]  }
 0x28f   : > { %12899 = vmatmul.mubr.msk.bf16.gmra.mrb[244].mxu0 %vm4800_vm2, %v13312_v20  ;;  %v8437_v21 = vmax.f32 %v14218_v19, %v8309_v52  ;;  %v8312_v51 = vmax.f32 %v7834_v31, 0.0  ;;  %13029 = vmatmul.mubr.msk.bf16.gmra.mrb[244].mxu1 %vm4800_vm2, %v13313_v39  ;;  %v9754_v47 = vmax.f32 %v9276_v44, 0.0  ;;  %v13319_v31 = vld [vmem:[%s13927_s4 + $0x7f0] sm:$0xff]  }
 0x290   : > { %12902 = vmatprep.mubr.msk.bf16.mxu0 %vm4800_vm2, %v13314_v8  ;;  %12198 = vst [vmem:[%s14970_s17 + $0x10] sm:$0xff] %v11890_v27   ;;  %v9881_v35 = vmax.f32 %v8439_v29, %v9753_v15  ;;  %v8310_v22 = vmax.f32 %v7826_v9, 0.0  ;;  %13032 = vmatprep.mubr.msk.bf16.mxu1 %vm4800_vm2, %v13315_v34  ;;  %v9752_v13 = vmax.f32 %v9268_v12, 0.0  ;;  %v13318_v15 = vld [vmem:[%s13927_s4 + $0x5f0] sm:$0xff]  }
 0x291   : > { %v9879_v14 = vmax.f32 %v8437_v21, %v9751_v11  ;;  %v8440_v18 = vmax.f32 %v14222_v23, %v8312_v51  ;;  %v12796_v4 = vpop.f32.mrb[140].mxu0  ;;  %v12926_v26 = vpop.f32.mrb[140].mxu1 }
 0x292   : > { %v8438_v19 = vmax.f32 %v14224_v24, %v8310_v22  ;;  %v7847_v20 = vadd.f32 %v14818_v38, %v12796_v4  ;;  %v9289_v50 = vadd.f32 %v14818_v38, %v12926_v26  ;;  %v7838_v28 = vpop.f32.mrb[141].mxu0  ;;  %v9280_v1 = vpop.f32.mrb[141].mxu1 }
 0x293   : > { %v9882_v39 = vmax.f32 %v8440_v18, %v9754_v47  ;;  %v7839_v8 = vadd.f32 %v14818_v38, %v7838_v28  ;;  %v9281_v23 = vadd.f32 %v14818_v38, %v9280_v1  ;;  %v12797_v48 = vpop.f32.mrb[142].mxu0  ;;  %v12927_v32 = vpop.f32.mrb[142].mxu1 }
 0x294   : > { %v9880_v40 = vmax.f32 %v8438_v19, %v9752_v13  ;;  %v8315_v24 = vmax.f32 %v7847_v20, 0.0  ;;  %v9757_v42 = vmax.f32 %v9289_v50, 0.0  ;;  %v7850_v34 = vadd.f32 %v14818_v38, %v12797_v48  ;;  %v7841_v52 = vpop.f32.mrb[143].mxu0  ;;  %v9283_v11 = vpop.f32.mrb[143].mxu1 }
 0x295   : > { %v11905_v44 = vpack.c.bf16 %v9882_v39, %v9881_v35  ;;  %v8313_v27 = vmax.f32 %v7839_v8, 0.0  ;;  %v9755_v29 = vmax.f32 %v9281_v23, 0.0  ;;  %v9292_v9 = vadd.f32 %v14818_v38, %v12927_v32  ;;  %v13320_v8 = vld [vmem:[%s13927_s4 + $0x5f8] sm:$0xff]  }
 0x296   : > { %v11900_v12 = vpack.c.bf16 %v9880_v40, %v9879_v14  ;;  %v8443_v21 = vmax.f32 %v14238_v53, %v8315_v24  ;;  %v8316_v51 = vmax.f32 %v7850_v34, 0.0  ;;  %v7842_v22 = vadd.f32 %v14818_v38, %v7841_v52 }
 0x297   : > { %12903 = vmatmul.mubr.msk.bf16.gmra.mrb[248].mxu0 %vm4800_vm2, %v13316_v25  ;;  %12201 = vst [vmem:[%s14970_s17 + $0x28] sm:$0xff] %v11905_v44   ;;  %v8441_v18 = vmax.f32 %v14242_v57, %v8313_v27  ;;  %v9284_v47 = vadd.f32 %v14818_v38, %v9283_v11  ;;  %13033 = vmatmul.mubr.msk.bf16.gmra.mrb[248].mxu1 %vm4800_vm2, %v13317_v54  ;;  %v9758_v53 = vmax.f32 %v9292_v9, 0.0  ;;  %v13321_v54 = vld [vmem:[%s13927_s4 + $0x7f8] sm:$0xff]  }
 0x298   : > { %12906 = vmatprep.mubr.msk.bf16.mxu0 %vm4800_vm2, %v13318_v15  ;;  %12200 = vst [vmem:[%s14970_s17 + $0x20] sm:$0xff] %v11900_v12   ;;  %v9885_v35 = vmax.f32 %v8443_v21, %v9757_v42  ;;  %v8444_v14 = vmax.f32 %v14246_v60, %v8316_v51  ;;  %v8314_v4 = vmax.f32 %v7842_v22, 0.0  ;;  %13036 = vmatprep.mubr.msk.bf16.mxu1 %vm4800_vm2, %v13319_v31 }
 0x299   : > { %v9883_v26 = vmax.f32 %v8441_v18, %v9755_v29  ;;  %v9756_v19 = vmax.f32 %v9284_v47, 0.0  ;;  %v12800_v13 = vpop.f32.mrb[144].mxu0  ;;  %v12930_v57 = vpop.f32.mrb[144].mxu1 }
 0x29a   : > { %v9886_v20 = vmax.f32 %v8444_v14, %v9758_v53  ;;  %v8442_v50 = vmax.f32 %v14248_v61, %v8314_v4  ;;  %v7863_v28 = vadd.f32 %v14818_v38, %v12800_v13  ;;  %v9305_v1 = vadd.f32 %v14818_v38, %v12930_v57  ;;  %v7854_v25 = vpop.f32.mrb[145].mxu0  ;;  %v9296_v39 = vpop.f32.mrb[145].mxu1 }
 0x29b   : > { %v7855_v60 = vadd.f32 %v14818_v38, %v7854_v25  ;;  %v9297_v23 = vadd.f32 %v14818_v38, %v9296_v39  ;;  %v12801_v48 = vpop.f32.mrb[146].mxu0  ;;  %v12931_v32 = vpop.f32.mrb[146].mxu1 }
 0x29c   : > { %v11915_v15 = vpack.c.bf16 %v9886_v20, %v9885_v35  ;;  %v9884_v40 = vmax.f32 %v8442_v50, %v9756_v19  ;;  %v8319_v24 = vmax.f32 %v7863_v28, 0.0  ;;  %v9761_v42 = vmax.f32 %v9305_v1, 0.0  ;;  %v7857_v61 = vpop.f32.mrb[147].mxu0  ;;  %v9299_v34 = vpop.f32.mrb[147].mxu1 }
 0x29d   : > { %v8317_v52 = vmax.f32 %v7855_v60, 0.0  ;;  %v9759_v11 = vmax.f32 %v9297_v23, 0.0  ;;  %v7866_v31 = vadd.f32 %v14818_v38, %v12801_v48  ;;  %v9308_v44 = vadd.f32 %v14818_v38, %v12931_v32 }
 0x29e   : > { %12203 = vst [vmem:[%s14970_s17 + $0x38] sm:$0xff] %v11915_v15   ;;  %v11910_v27 = vpack.c.bf16 %v9884_v40, %v9883_v26  ;;  %v8447_v29 = vmax.f32 %v14262_v30, %v8319_v24  ;;  %v7858_v9 = vadd.f32 %v14818_v38, %v7857_v61  ;;  %v9300_v12 = vadd.f32 %v14818_v38, %v9299_v34 }
 0x29f   : > { %12907 = vmatmul.mubr.msk.bf16.gmra.mrb[252].mxu0 %vm4800_vm2, %v13320_v8  ;;  %v8445_v21 = vmax.f32 %v14266_v33, %v8317_v52  ;;  %v8320_v51 = vmax.f32 %v7866_v31, 0.0  ;;  %13037 = vmatmul.mubr.msk.bf16.gmra.mrb[252].mxu1 %vm4800_vm2, %v13321_v54  ;;  %v9762_v14 = vmax.f32 %v9308_v44, 0.0 }
 0x2a0   : > { %12202 = vst [vmem:[%s14970_s17 + $0x30] sm:$0xff] %v11910_v27   ;;  %v9889_v22 = vmax.f32 %v8447_v29, %v9761_v42  ;;  %v8318_v18 = vmax.f32 %v7858_v9, 0.0  ;;  %v9760_v26 = vmax.f32 %v9300_v12, 0.0 }
 0x2a1   : > { %v9887_v47 = vmax.f32 %v8445_v21, %v9759_v11  ;;  %v8448_v35 = vmax.f32 %v14270_v36, %v8320_v51  ;;  %v12804_v53 = vpop.f32.mrb[148].mxu0  ;;  %v12934_v30 = vpop.f32.mrb[148].mxu1 }
 0x2a2   : > { %v8446_v4 = vmax.f32 %v14272_v37, %v8318_v18  ;;  %v7879_v19 = vadd.f32 %v14818_v38, %v12804_v53  ;;  %v9321_v13 = vadd.f32 %v14818_v38, %v12934_v30  ;;  %v7870_v33 = vpop.f32.mrb[149].mxu0  ;;  %v9312_v57 = vpop.f32.mrb[149].mxu1 }
 0x2a3   : > { %v9890_v20 = vmax.f32 %v8448_v35, %v9762_v14  ;;  %v7871_v50 = vadd.f32 %v14818_v38, %v7870_v33  ;;  %v9313_v28 = vadd.f32 %v14818_v38, %v9312_v57  ;;  %v12805_v1 = vpop.f32.mrb[150].mxu0  ;;  %v12935_v36 = vpop.f32.mrb[150].mxu1 }
 0x2a4   : > { %v9888_v25 = vmax.f32 %v8446_v4, %v9760_v26  ;;  %v8323_v39 = vmax.f32 %v7879_v19, 0.0  ;;  %v9765_v8 = vmax.f32 %v9321_v13, 0.0  ;;  %v7882_v37 = vadd.f32 %v14818_v38, %v12805_v1  ;;  %v7873_v60 = vpop.f32.mrb[151].mxu0  ;;  %v9315_v23 = vpop.f32.mrb[151].mxu1 }
 0x2a5   : > { %v11925_v48 = vpack.c.bf16 %v9890_v20, %v9889_v22  ;;  %v8321_v32 = vmax.f32 %v7871_v50, 0.0  ;;  %v9763_v54 = vmax.f32 %v9313_v28, 0.0  ;;  %v9324_v15 = vadd.f32 %v14818_v38, %v12935_v36 }
 0x2a6   : > { %v11920_v40 = vpack.c.bf16 %v9888_v25, %v9887_v47  ;;  %v8451_v24 = vmax.f32 %v14286_v7, %v8323_v39  ;;  %v8324_v42 = vmax.f32 %v7882_v37, 0.0  ;;  %v7874_v61 = vadd.f32 %v14818_v38, %v7873_v60 }
 0x2a7   : > { %12205 = vst [vmem:[%s14970_s17 + $0x48] sm:$0xff] %v11925_v48   ;;  %v8449_v34 = vmax.f32 %v14290_v10, %v8321_v32  ;;  %v9316_v52 = vadd.f32 %v14818_v38, %v9315_v23  ;;  %v9766_v44 = vmax.f32 %v9324_v15, 0.0 }
 0x2a8   : > { %12204 = vst [vmem:[%s14970_s17 + $0x40] sm:$0xff] %v11920_v40   ;;  %v9893_v11 = vmax.f32 %v8451_v24, %v9765_v8  ;;  %v8452_v31 = vmax.f32 %v14294_v16, %v8324_v42  ;;  %v8322_v27 = vmax.f32 %v7874_v61, 0.0 }
 0x2a9   : > { %v9891_v29 = vmax.f32 %v8449_v34, %v9763_v54  ;;  %v9764_v9 = vmax.f32 %v9316_v52, 0.0  ;;  %v12808_v12 = vpop.f32.mrb[152].mxu0  ;;  %v12938_v21 = vpop.f32.mrb[152].mxu1 }
 0x2aa   : > { %v9894_v51 = vmax.f32 %v8452_v31, %v9766_v44  ;;  %v8450_v7 = vmax.f32 %v14296_v17, %v8322_v27  ;;  %v7895_v22 = vadd.f32 %v14818_v38, %v12808_v12  ;;  %v9337_v18 = vadd.f32 %v14818_v38, %v12938_v21  ;;  %v7886_v10 = vpop.f32.mrb[153].mxu0  ;;  %v9328_v47 = vpop.f32.mrb[153].mxu1 }
 0x2ab   : > { %v7887_v35 = vadd.f32 %v14818_v38, %v7886_v10  ;;  %v9329_v16 = vadd.f32 %v14818_v38, %v9328_v47  ;;  %v12809_v14 = vpop.f32.mrb[154].mxu0  ;;  %v12939_v53 = vpop.f32.mrb[154].mxu1 }
 0x2ac   : > { %v11935_v30 = vpack.c.bf16 %v9894_v51, %v9893_v11  ;;  %v9892_v4 = vmax.f32 %v8450_v7, %v9764_v9  ;;  %v8327_v26 = vmax.f32 %v7895_v22, 0.0  ;;  %v9769_v19 = vmax.f32 %v9337_v18, 0.0  ;;  %v7889_v13 = vpop.f32.mrb[155].mxu0  ;;  %v9331_v17 = vpop.f32.mrb[155].mxu1 }
 0x2ad   : > { %v8325_v33 = vmax.f32 %v7887_v35, 0.0  ;;  %v9767_v57 = vmax.f32 %v9329_v16, 0.0  ;;  %v7898_v20 = vadd.f32 %v14818_v38, %v12809_v14  ;;  %v9340_v50 = vadd.f32 %v14818_v38, %v12939_v53 }
 0x2ae   : > { %12207 = vst [vmem:[%s14970_s17 + $0x58] sm:$0xff] %v11935_v30   ;;  %v11930_v28 = vpack.c.bf16 %v9892_v4, %v9891_v29  ;;  %v8455_v1 = vmax.f32 %v14310_v58, %v8327_v26  ;;  %v7890_v36 = vadd.f32 %v14818_v38, %v7889_v13  ;;  %v9332_v25 = vadd.f32 %v14818_v38, %v9331_v17 }
 0x2af   : > { %v8453_v39 = vmax.f32 %v14314_v63, %v8325_v33  ;;  %v8328_v8 = vmax.f32 %v7898_v20, 0.0  ;;  %v9770_v32 = vmax.f32 %v9340_v50, 0.0 }
 0x2b0   : > { %12206 = vst [vmem:[%s14970_s17 + $0x50] sm:$0xff] %v11930_v28   ;;  %v9897_v37 = vmax.f32 %v8455_v1, %v9769_v19  ;;  %v8326_v60 = vmax.f32 %v7890_v36, 0.0  ;;  %v9768_v24 = vmax.f32 %v9332_v25, 0.0 }
 0x2b1   : > { %v9895_v23 = vmax.f32 %v8453_v39, %v9767_v57  ;;  %v8456_v48 = vmax.f32 %v14318_v2, %v8328_v8  ;;  %v12812_v54 = vpop.f32.mrb[156].mxu0  ;;  %v12942_v15 = vpop.f32.mrb[156].mxu1 }
 0x2b2   : > { %v8454_v40 = vmax.f32 %v14320_v3, %v8326_v60  ;;  %v7911_v58 = vadd.f32 %v14818_v38, %v12812_v54  ;;  %v9353_v42 = vadd.f32 %v14818_v38, %v12942_v15  ;;  %v7902_v61 = vpop.f32.mrb[157].mxu0  ;;  %v9344_v34 = vpop.f32.mrb[157].mxu1 }
 0x2b3   : > { %v9898_v63 = vmax.f32 %v8456_v48, %v9770_v32  ;;  %v7903_v52 = vadd.f32 %v14818_v38, %v7902_v61  ;;  %v9345_v11 = vadd.f32 %v14818_v38, %v9344_v34  ;;  %v12813_v31 = vpop.f32.mrb[158].mxu0  ;;  %v12943_v2 = vpop.f32.mrb[158].mxu1 }
 0x2b4   : > { %v9896_v44 = vmax.f32 %v8454_v40, %v9768_v24  ;;  %v8331_v27 = vmax.f32 %v7911_v58, 0.0  ;;  %v9773_v29 = vmax.f32 %v9353_v42, 0.0  ;;  %v7914_v3 = vadd.f32 %v14818_v38, %v12813_v31  ;;  %v7905_v9 = vpop.f32.mrb[159].mxu0  ;;  %v9347_v12 = vpop.f32.mrb[159].mxu1  ;;  %v15106_v42 = vld [vmem:[%s15454_s2] ss:$0 sm:$0xff] }
 0x2b5   : > { %v11945_v21 = vpack.c.bf16 %v9898_v63, %v9897_v37  ;;  %v8329_v51 = vmax.f32 %v7903_v52, 0.0  ;;  %v9771_v7 = vmax.f32 %v9345_v11, 0.0  ;;  %v9356_v22 = vadd.f32 %v14818_v38, %v12943_v2 }
 0x2b6   : > { %v11940_v18 = vpack.c.bf16 %v9896_v44, %v9895_v23  ;;  %v8459_v10 = vmax.f32 %v14334_v45, %v8331_v27  ;;  %v8332_v47 = vmax.f32 %v7914_v3, 0.0  ;;  %v7906_v35 = vadd.f32 %v14818_v38, %v7905_v9 }
 0x2b7   : > { %12209 = vst [vmem:[%s14970_s17 + $0x68] sm:$0xff] %v11945_v21   ;;  %v8457_v16 = vmax.f32 %v14338_v49, %v8329_v51  ;;  %v9348_v14 = vadd.f32 %v14818_v38, %v9347_v12  ;;  %v9774_v4 = vmax.f32 %v9356_v22, 0.0 }
 0x2b8   : > { %12208 = vst [vmem:[%s14970_s17 + $0x60] sm:$0xff] %v11940_v18   ;;  %v9901_v53 = vmax.f32 %v8459_v10, %v9773_v29  ;;  %v8460_v30 = vmax.f32 %v14342_v56, %v8332_v47  ;;  %v8330_v26 = vmax.f32 %v7906_v35, 0.0 }
 0x2b9   : > { %v9899_v19 = vmax.f32 %v8457_v16, %v9771_v7  ;;  %v9772_v13 = vmax.f32 %v9348_v14, 0.0  ;;  %v12816_v17 = vpop.f32.mrb[160].mxu0  ;;  %v12946_v33 = vpop.f32.mrb[160].mxu1 }
 0x2ba   : > { %v9902_v57 = vmax.f32 %v8460_v30, %v9774_v4  ;;  %v8458_v45 = vmax.f32 %v14344_v59, %v8330_v26  ;;  %v7927_v20 = vadd.f32 %v14818_v38, %v12816_v17  ;;  %v9369_v50 = vadd.f32 %v14818_v38, %v12946_v33  ;;  %v7918_v49 = vpop.f32.mrb[161].mxu0  ;;  %v9360_v28 = vpop.f32.mrb[161].mxu1 }
 0x2bb   : > { %v7919_v1 = vadd.f32 %v14818_v38, %v7918_v49  ;;  %v9361_v56 = vadd.f32 %v14818_v38, %v9360_v28  ;;  %v12817_v36 = vpop.f32.mrb[162].mxu0  ;;  %v12947_v25 = vpop.f32.mrb[162].mxu1 }
 0x2bc   : > { %v11955_v39 = vpack.c.bf16 %v9902_v57, %v9901_v53  ;;  %v9900_v8 = vmax.f32 %v8458_v45, %v9772_v13  ;;  %v8335_v37 = vmax.f32 %v7927_v20, 0.0  ;;  %v9777_v60 = vmax.f32 %v9369_v50, 0.0  ;;  %v7921_v23 = vpop.f32.mrb[163].mxu0  ;;  %v9363_v59 = vpop.f32.mrb[163].mxu1 }
 0x2bd   : > { %v8333_v48 = vmax.f32 %v7919_v1, 0.0  ;;  %v9775_v32 = vmax.f32 %v9361_v56, 0.0  ;;  %v7930_v54 = vadd.f32 %v14818_v38, %v12817_v36  ;;  %v9372_v15 = vadd.f32 %v14818_v38, %v12947_v25 }
 0x2be   : > { %12211 = vst [vmem:[%s14970_s17 + $0x78] sm:$0xff] %v11955_v39   ;;  %v11950_v40 = vpack.c.bf16 %v9900_v8, %v9899_v19  ;;  %v8463_v24 = vmax.f32 %v14358_v41, %v8335_v37  ;;  %v7922_v58 = vadd.f32 %v14818_v38, %v7921_v23  ;;  %v9364_v61 = vadd.f32 %v15106_v42, %v9363_v59 }
 0x2bf   : > { %v8461_v34 = vmax.f32 %v14362_v46, %v8333_v48  ;;  %v8336_v63 = vmax.f32 %v7930_v54, 0.0  ;;  %v9778_v44 = vmax.f32 %v9372_v15, 0.0 }
 0x2c0   : > { %12210 = vst [vmem:[%s14970_s17 + $0x70] sm:$0xff] %v11950_v40   ;;  %v9905_v52 = vmax.f32 %v8463_v24, %v9777_v60  ;;  %v8334_v11 = vmax.f32 %v7922_v58, 0.0  ;;  %v9776_v29 = vmax.f32 %v9364_v61, 0.0 }
 0x2c1   : > { %v9903_v31 = vmax.f32 %v8461_v34, %v9775_v32  ;;  %v8464_v2 = vmax.f32 %v14366_v55, %v8336_v63  ;;  %v12820_v41 = vpop.f32.mrb[164].mxu0  ;;  %v12950_v27 = vpop.f32.mrb[164].mxu1 }
 0x2c2   : > { %v8462_v38 = vmax.f32 %v14368_v62, %v8334_v11  ;;  %v7943_v3 = vadd.f32 %v15106_v42, %v12820_v41  ;;  %v9385_v9 = vadd.f32 %v15106_v42, %v12950_v27  ;;  %v7934_v12 = vpop.f32.mrb[165].mxu0  ;;  %v9376_v21 = vpop.f32.mrb[165].mxu1 }
 0x2c3   : > { %v9906_v46 = vmax.f32 %v8464_v2, %v9778_v44  ;;  %v7935_v51 = vadd.f32 %v15106_v42, %v7934_v12  ;;  %v9377_v7 = vadd.f32 %v15106_v42, %v9376_v21  ;;  %v12821_v22 = vpop.f32.mrb[166].mxu0  ;;  %v12951_v55 = vpop.f32.mrb[166].mxu1  ;;  %v15545_v44 = vld [vmem:[#allocation4_spill] sm:$0xff] }
 0x2c4   : > { %v9904_v18 = vmax.f32 %v8462_v38, %v9776_v29  ;;  %v8339_v10 = vmax.f32 %v7943_v3, 0.0  ;;  %v9781_v47 = vmax.f32 %v9385_v9, 0.0  ;;  %v7946_v62 = vadd.f32 %v15106_v42, %v12821_v22  ;;  %v7937_v35 = vpop.f32.mrb[167].mxu0  ;;  %v9379_v16 = vpop.f32.mrb[167].mxu1  ;;  %v15546_v9 = vld [vmem:[#allocation5_spill] sm:$0xff] }
 0x2c5   : > { %v11965_v14 = vpack.c.bf16 %v9906_v46, %v9905_v52  ;;  %v8337_v53 = vmax.f32 %v7935_v51, 0.0  ;;  %v9779_v30 = vmax.f32 %v9377_v7, 0.0  ;;  %v9388_v4 = vadd.f32 %v15106_v42, %v12951_v55  ;;  %v15544_v52 = vld [vmem:[#allocation3_spill] sm:$0xff]  ;;  %v15547_v7 = vld [vmem:[#allocation6_spill] sm:$0xff] }
 0x2c6   : > { %v11960_v26 = vpack.c.bf16 %v9904_v18, %v9903_v31  ;;  %v8467_v19 = vmax.f32 %v14382_v43, %v8339_v10  ;;  %v8340_v13 = vmax.f32 %v7946_v62, 0.0  ;;  %v7938_v17 = vadd.f32 %v15106_v42, %v7937_v35 }
 0x2c7   : > { %12213 = vst [vmem:[%s14970_s17 + $0x88] sm:$0xff] %v11965_v14   ;;  %v8465_v33 = vmax.f32 %v14386_v0, %v8337_v53  ;;  %v9380_v57 = vadd.f32 %v15106_v42, %v9379_v16  ;;  %v9782_v50 = vmax.f32 %v9388_v4, 0.0 }
 0x2c8   : > { %12212 = vst [vmem:[%s14970_s17 + $0x80] sm:$0xff] %v11960_v26   ;;  %v9909_v45 = vmax.f32 %v8467_v19, %v9781_v47  ;;  %v8468_v20 = vmax.f32 %v14390_v5, %v8340_v13  ;;  %v8338_v49 = vmax.f32 %v7938_v17, 0.0 }
 0x2c9   : > { %v9907_v28 = vmax.f32 %v8465_v33, %v9779_v30  ;;  %v9780_v1 = vmax.f32 %v9380_v57, 0.0  ;;  %v12824_v56 = vpop.f32.mrb[168].mxu0  ;;  %v12954_v36 = vpop.f32.mrb[168].mxu1 }
 0x2ca   : > { %v9910_v25 = vmax.f32 %v8468_v20, %v9782_v50  ;;  %v8466_v43 = vmax.f32 %v14392_v6, %v8338_v49  ;;  %v7959_v39 = vadd.f32 %v15106_v42, %v12824_v56  ;;  %v9401_v8 = vadd.f32 %v15106_v42, %v12954_v36  ;;  %v7950_v0 = vpop.f32.mrb[169].mxu0  ;;  %v9392_v37 = vpop.f32.mrb[169].mxu1 }
 0x2cb   : > { %v7951_v60 = vadd.f32 %v15106_v42, %v7950_v0  ;;  %v9393_v5 = vadd.f32 %v15106_v42, %v9392_v37  ;;  %v12825_v23 = vpop.f32.mrb[170].mxu0  ;;  %v12955_v59 = vpop.f32.mrb[170].mxu1  ;;  %v15550_v0 = vld [vmem:[#allocation9_spill] sm:$0xff] }
 0x2cc   : > { %v11975_v48 = vpack.c.bf16 %v9910_v25, %v9909_v45  ;;  %v9908_v32 = vmax.f32 %v8466_v43, %v9780_v1  ;;  %v8343_v54 = vmax.f32 %v7959_v39, 0.0  ;;  %v9785_v15 = vmax.f32 %v9401_v8, 0.0  ;;  %v7953_v40 = vpop.f32.mrb[171].mxu0  ;;  %v9395_v6 = vpop.f32.mrb[171].mxu1  ;;  %v15549_v25 = vld [vmem:[#allocation8_spill] sm:$0xff] }
 0x2cd   : > { %v8341_v24 = vmax.f32 %v7951_v60, 0.0  ;;  %v9783_v58 = vmax.f32 %v9393_v5, 0.0  ;;  %v7962_v61 = vadd.f32 %v15106_v42, %v12825_v23  ;;  %v9404_v34 = vadd.f32 %v15106_v42, %v12955_v59 }
 0x2ce   : > { %12215 = vst [vmem:[%s14970_s17 + $0x98] sm:$0xff] %v11975_v48   ;;  %v11970_v63 = vpack.c.bf16 %v9908_v32, %v9907_v28  ;;  %v8471_v11 = vmax.f32 %v15544_v52, %v8343_v54  ;;  %v7954_v31 = vadd.f32 %v15106_v42, %v7953_v40  ;;  %v9396_v2 = vadd.f32 %v15106_v42, %v9395_v6  ;;  %v15548_v28 = vld [vmem:[#allocation7_spill] sm:$0xff] }
 0x2cf   : > { %v8469_v41 = vmax.f32 %v15545_v44, %v8341_v24  ;;  %v8344_v27 = vmax.f32 %v7962_v61, 0.0  ;;  %v9786_v21 = vmax.f32 %v9404_v34, 0.0 }
 0x2d0   : > { %12214 = vst [vmem:[%s14970_s17 + $0x90] sm:$0xff] %v11970_v63   ;;  %v9913_v38 = vmax.f32 %v8471_v11, %v9785_v15  ;;  %v8342_v29 = vmax.f32 %v7954_v31, 0.0  ;;  %v9784_v55 = vmax.f32 %v9396_v2, 0.0  ;;  %v15551_v15 = vld [vmem:[#allocation10_spill] sm:$0xff] }
 0x2d1   : > { %v9911_v3 = vmax.f32 %v8469_v41, %v9783_v58  ;;  %v8472_v12 = vmax.f32 %v15546_v9, %v8344_v27  ;;  %v12828_v46 = vpop.f32.mrb[172].mxu0  ;;  %v12958_v51 = vpop.f32.mrb[172].mxu1 }
 0x2d2   : > { %v8470_v22 = vmax.f32 %v15547_v7, %v8342_v29  ;;  %v7975_v18 = vadd.f32 %v15106_v42, %v12828_v46  ;;  %v9417_v10 = vadd.f32 %v15106_v42, %v12958_v51  ;;  %v7966_v47 = vpop.f32.mrb[173].mxu0  ;;  %v9408_v62 = vpop.f32.mrb[173].mxu1  ;;  %v15552_v46 = vld [vmem:[#allocation11_spill] sm:$0xff] }
 0x2d3   : > { %v9914_v35 = vmax.f32 %v8472_v12, %v9786_v21  ;;  %v7967_v16 = vadd.f32 %v15106_v42, %v7966_v47  ;;  %v9409_v14 = vadd.f32 %v15106_v42, %v9408_v62  ;;  %v12829_v53 = vpop.f32.mrb[174].mxu0  ;;  %v12959_v30 = vpop.f32.mrb[174].mxu1 }
 0x2d4   : > { %v9912_v4 = vmax.f32 %v8470_v22, %v9784_v55  ;;  %v8347_v26 = vmax.f32 %v7975_v18, 0.0  ;;  %v9789_v19 = vmax.f32 %v9417_v10, 0.0  ;;  %v7978_v13 = vadd.f32 %v15106_v42, %v12829_v53  ;;  %v7969_v17 = vpop.f32.mrb[175].mxu0  ;;  %v9411_v33 = vpop.f32.mrb[175].mxu1  ;;  %v15553_v55 = vld [vmem:[#allocation12_spill] sm:$0xff] }
 0x2d5   : > { %v11985_v57 = vpack.c.bf16 %v9914_v35, %v9913_v38  ;;  %v8345_v45 = vmax.f32 %v7967_v16, 0.0  ;;  %v9787_v20 = vmax.f32 %v9409_v14, 0.0  ;;  %v9420_v50 = vadd.f32 %v15106_v42, %v12959_v30  ;;  %v15554_v16 = vld [vmem:[#allocation13_spill] sm:$0xff] }
 0x2d6   : > { %v11980_v49 = vpack.c.bf16 %v9912_v4, %v9911_v3  ;;  %v8475_v1 = vmax.f32 %v15548_v28, %v8347_v26  ;;  %v8348_v56 = vmax.f32 %v7978_v13, 0.0  ;;  %v7970_v36 = vadd.f32 %v15106_v42, %v7969_v17  ;;  %v15555_v26 = vld [vmem:[#allocation14_spill] sm:$0xff] }
 0x2d7   : > { %12217 = vst [vmem:[%s14970_s17 + $0xa8] sm:$0xff] %v11985_v57   ;;  %v8473_v43 = vmax.f32 %v15549_v25, %v8345_v45  ;;  %v9412_v39 = vadd.f32 %v15106_v42, %v9411_v33  ;;  %v9790_v60 = vmax.f32 %v9420_v50, 0.0 }
 0x2d8   : > { %12216 = vst [vmem:[%s14970_s17 + $0xa0] sm:$0xff] %v11980_v49   ;;  %v9917_v8 = vmax.f32 %v8475_v1, %v9789_v19  ;;  %v8476_v37 = vmax.f32 %v15550_v0, %v8348_v56  ;;  %v8346_v5 = vmax.f32 %v7970_v36, 0.0 }
 0x2d9   : > { %v9915_v23 = vmax.f32 %v8473_v43, %v9787_v20  ;;  %v9788_v59 = vmax.f32 %v9412_v39, 0.0  ;;  %v12832_v48 = vpop.f32.mrb[176].mxu0  ;;  %v12962_v32 = vpop.f32.mrb[176].mxu1 }
 0x2da   : > { %v9918_v54 = vmax.f32 %v8476_v37, %v9790_v60  ;;  %v8474_v40 = vmax.f32 %v15551_v15, %v8346_v5  ;;  %v7991_v6 = vadd.f32 %v15106_v42, %v12832_v48  ;;  %v9433_v24 = vadd.f32 %v15106_v42, %v12962_v32  ;;  %v7982_v58 = vpop.f32.mrb[177].mxu0  ;;  %v9424_v61 = vpop.f32.mrb[177].mxu1  ;;  %v15557_v15 = vld [vmem:[#allocation16_spill] sm:$0xff] }
 0x2db   : > { %v7983_v34 = vadd.f32 %v15106_v42, %v7982_v58  ;;  %v9425_v63 = vadd.f32 %v15106_v42, %v9424_v61  ;;  %v12833_v52 = vpop.f32.mrb[178].mxu0  ;;  %v12963_v11 = vpop.f32.mrb[178].mxu1  ;;  %v15558_v58 = vld [vmem:[#allocation17_spill] sm:$0xff] }
 0x2dc   : > { %v11995_v31 = vpack.c.bf16 %v9918_v54, %v9917_v8  ;;  %v9916_v2 = vmax.f32 %v8474_v40, %v9788_v59  ;;  %v8351_v44 = vmax.f32 %v7991_v6, 0.0  ;;  %v9793_v41 = vmax.f32 %v9433_v24, 0.0  ;;  %v7985_v27 = vpop.f32.mrb[179].mxu0  ;;  %v9427_v38 = vpop.f32.mrb[179].mxu1  ;;  %v15556_v59 = vld [vmem:[#allocation15_spill] sm:$0xff] }
 0x2dd   : > { %v8349_v29 = vmax.f32 %v7983_v34, 0.0  ;;  %v9791_v3 = vmax.f32 %v9425_v63, 0.0  ;;  %v7994_v9 = vadd.f32 %v15106_v42, %v12833_v52  ;;  %v9436_v12 = vadd.f32 %v15106_v42, %v12963_v11 }
 0x2de   : > { %12219 = vst [vmem:[%s14970_s17 + $0xb8] sm:$0xff] %v11995_v31   ;;  %v11990_v21 = vpack.c.bf16 %v9916_v2, %v9915_v23  ;;  %v8479_v51 = vmax.f32 %v15552_v46, %v8351_v44  ;;  %v7986_v7 = vadd.f32 %v15106_v42, %v7985_v27  ;;  %v9428_v22 = vadd.f32 %v15106_v42, %v9427_v38 }
 0x2df   : > { %v8477_v18 = vmax.f32 %v15553_v55, %v8349_v29  ;;  %v8352_v10 = vmax.f32 %v7994_v9, 0.0  ;;  %v9794_v53 = vmax.f32 %v9436_v12, 0.0 }
 0x2e0   : > { %12218 = vst [vmem:[%s14970_s17 + $0xb0] sm:$0xff] %v11990_v21   ;;  %v9921_v47 = vmax.f32 %v8479_v51, %v9793_v41  ;;  %v8350_v62 = vmax.f32 %v7986_v7, 0.0  ;;  %v9792_v13 = vmax.f32 %v9428_v22, 0.0  ;;  %v15559_v41 = vld [vmem:[#allocation18_spill] sm:$0xff] }
 0x2e1   : > { %v9919_v35 = vmax.f32 %v8477_v18, %v9791_v3  ;;  %v8480_v14 = vmax.f32 %v15554_v16, %v8352_v10  ;;  %v12836_v30 = vpop.f32.mrb[180].mxu0  ;;  %v12966_v4 = vpop.f32.mrb[180].mxu1 }
 0x2e2   : > { %v8478_v19 = vmax.f32 %v15555_v26, %v8350_v62  ;;  %v8007_v17 = vadd.f32 %v15106_v42, %v12836_v30  ;;  %v9449_v33 = vadd.f32 %v15106_v42, %v12966_v4  ;;  %v7998_v57 = vpop.f32.mrb[181].mxu0  ;;  %v9440_v45 = vpop.f32.mrb[181].mxu1  ;;  %v15560_v30 = vld [vmem:[#allocation19_spill] sm:$0xff] }
 0x2e3   : > { %v9922_v20 = vmax.f32 %v8480_v14, %v9794_v53  ;;  %v7999_v50 = vadd.f32 %v15106_v42, %v7998_v57  ;;  %v9441_v49 = vadd.f32 %v15106_v42, %v9440_v45  ;;  %v12837_v28 = vpop.f32.mrb[182].mxu0  ;;  %v12967_v1 = vpop.f32.mrb[182].mxu1 }
 0x2e4   : > { %v9920_v56 = vmax.f32 %v8478_v19, %v9792_v13  ;;  %v8355_v36 = vmax.f32 %v8007_v17, 0.0  ;;  %v9797_v25 = vmax.f32 %v9449_v33, 0.0  ;;  %v8010_v43 = vadd.f32 %v15106_v42, %v12837_v28  ;;  %v8001_v39 = vpop.f32.mrb[183].mxu0  ;;  %v9443_v8 = vpop.f32.mrb[183].mxu1  ;;  %v15561_v13 = vld [vmem:[#allocation20_spill] sm:$0xff] }
 0x2e5   : > { %v12005_v0 = vpack.c.bf16 %v9922_v20, %v9921_v47  ;;  %v8353_v37 = vmax.f32 %v7999_v50, 0.0  ;;  %v9795_v60 = vmax.f32 %v9441_v49, 0.0  ;;  %v9452_v5 = vadd.f32 %v15106_v42, %v12967_v1  ;;  %v15562_v50 = vld [vmem:[#allocation21_spill] sm:$0xff] }
 0x2e6   : > { %v12000_v23 = vpack.c.bf16 %v9920_v56, %v9919_v35  ;;  %v8483_v48 = vmax.f32 %v15556_v59, %v8355_v36  ;;  %v8356_v32 = vmax.f32 %v8010_v43, 0.0  ;;  %v8002_v54 = vadd.f32 %v15106_v42, %v8001_v39  ;;  %v15563_v36 = vld [vmem:[#allocation22_spill] sm:$0xff] }
 0x2e7   : > { %12221 = vst [vmem:[%s14970_s17 + $0xc8] sm:$0xff] %v12005_v0   ;;  %v8481_v40 = vmax.f32 %v15557_v15, %v8353_v37  ;;  %v9444_v6 = vadd.f32 %v15106_v42, %v9443_v8  ;;  %v9798_v34 = vmax.f32 %v9452_v5, 0.0 }
 0x2e8   : > { %12220 = vst [vmem:[%s14970_s17 + $0xc0] sm:$0xff] %v12000_v23   ;;  %v9925_v24 = vmax.f32 %v8483_v48, %v9797_v25  ;;  %v8484_v61 = vmax.f32 %v15558_v58, %v8356_v32  ;;  %v8354_v63 = vmax.f32 %v8002_v54, 0.0 }
 0x2e9   : > { %v9923_v52 = vmax.f32 %v8481_v40, %v9795_v60  ;;  %v9796_v11 = vmax.f32 %v9444_v6, 0.0  ;;  %v12840_v31 = vpop.f32.mrb[184].mxu0  ;;  %v12970_v2 = vpop.f32.mrb[184].mxu1 }
 0x2ea   : > { %v9926_v44 = vmax.f32 %v8484_v61, %v9798_v34  ;;  %v8482_v27 = vmax.f32 %v15559_v41, %v8354_v63  ;;  %v8023_v38 = vadd.f32 %v15106_v42, %v12840_v31  ;;  %v9465_v29 = vadd.f32 %v15106_v42, %v12970_v2  ;;  %v8014_v3 = vpop.f32.mrb[185].mxu0  ;;  %v9456_v9 = vpop.f32.mrb[185].mxu1  ;;  %v15565_v41 = vld [vmem:[#allocation24_spill] sm:$0xff] }
 0x2eb   : > { %v8015_v12 = vadd.f32 %v15106_v42, %v8014_v3  ;;  %v9457_v21 = vadd.f32 %v15106_v42, %v9456_v9  ;;  %v12841_v46 = vpop.f32.mrb[186].mxu0  ;;  %v12971_v51 = vpop.f32.mrb[186].mxu1  ;;  %v15566_v3 = vld [vmem:[#allocation25_spill] sm:$0xff] }
 0x2ec   : > { %v12015_v7 = vpack.c.bf16 %v9926_v44, %v9925_v24  ;;  %v9924_v22 = vmax.f32 %v8482_v27, %v9796_v11  ;;  %v8359_v55 = vmax.f32 %v8023_v38, 0.0  ;;  %v9801_v18 = vmax.f32 %v9465_v29, 0.0  ;;  %v8017_v10 = vpop.f32.mrb[187].mxu0  ;;  %v9459_v47 = vpop.f32.mrb[187].mxu1  ;;  %v15564_v11 = vld [vmem:[#allocation23_spill] sm:$0xff] }
 0x2ed   : > { %v8357_v62 = vmax.f32 %v8015_v12, 0.0  ;;  %v9799_v35 = vmax.f32 %v9457_v21, 0.0  ;;  %v8026_v16 = vadd.f32 %v15106_v42, %v12841_v46  ;;  %v9468_v14 = vadd.f32 %v15106_v42, %v12971_v51 }
 0x2ee   : > { %12223 = vst [vmem:[%s14970_s17 + $0xd8] sm:$0xff] %v12015_v7   ;;  %v12010_v53 = vpack.c.bf16 %v9924_v22, %v9923_v52  ;;  %v8487_v4 = vmax.f32 %v15560_v30, %v8359_v55  ;;  %v8018_v26 = vadd.f32 %v15106_v42, %v8017_v10  ;;  %v9460_v19 = vadd.f32 %v15106_v42, %v9459_v47 }
 0x2ef   : > { %v8485_v17 = vmax.f32 %v15561_v13, %v8357_v62  ;;  %v8360_v33 = vmax.f32 %v8026_v16, 0.0  ;;  %v9802_v28 = vmax.f32 %v9468_v14, 0.0 }
 0x2f0   : > { %12222 = vst [vmem:[%s14970_s17 + $0xd0] sm:$0xff] %v12010_v53   ;;  %v9929_v57 = vmax.f32 %v8487_v4, %v9801_v18  ;;  %v8358_v45 = vmax.f32 %v8018_v26, 0.0  ;;  %v9800_v43 = vmax.f32 %v9460_v19, 0.0  ;;  %v15567_v18 = vld [vmem:[#allocation26_spill] sm:$0xff] }
 0x2f1   : > { %v9927_v20 = vmax.f32 %v8485_v17, %v9799_v35  ;;  %v8488_v49 = vmax.f32 %v15562_v50, %v8360_v33  ;;  %v12844_v1 = vpop.f32.mrb[188].mxu0  ;;  %v12974_v56 = vpop.f32.mrb[188].mxu1 }
 0x2f2   : > { %v8486_v25 = vmax.f32 %v15563_v36, %v8358_v45  ;;  %v8039_v39 = vadd.f32 %v15106_v42, %v12844_v1  ;;  %v9481_v8 = vadd.f32 %v15106_v42, %v12974_v56  ;;  %v8030_v0 = vpop.f32.mrb[189].mxu0  ;;  %v9472_v37 = vpop.f32.mrb[189].mxu1  ;;  %v15568_v1 = vld [vmem:[#allocation27_spill] sm:$0xff] }
 0x2f3   : > { %v9930_v60 = vmax.f32 %v8488_v49, %v9802_v28  ;;  %v8031_v5 = vadd.f32 %v15106_v42, %v8030_v0  ;;  %v9473_v23 = vadd.f32 %v15106_v42, %v9472_v37  ;;  %v12845_v59 = vpop.f32.mrb[190].mxu0  ;;  %v12975_v48 = vpop.f32.mrb[190].mxu1 }
 0x2f4   : > { %v9928_v32 = vmax.f32 %v8486_v25, %v9800_v43  ;;  %v8363_v54 = vmax.f32 %v8039_v39, 0.0  ;;  %v9805_v15 = vmax.f32 %v9481_v8, 0.0  ;;  %v8042_v40 = vadd.f32 %v15106_v42, %v12845_v59  ;;  %v8033_v6 = vpop.f32.mrb[191].mxu0  ;;  %v9475_v24 = vpop.f32.mrb[191].mxu1  ;;  %v15569_v43 = vld [vmem:[#allocation28_spill] sm:$0xff] }
 0x2f5   : > { %v12025_v58 = vpack.c.bf16 %v9930_v60, %v9929_v57  ;;  %v8361_v61 = vmax.f32 %v8031_v5, 0.0  ;;  %v9803_v34 = vmax.f32 %v9473_v23, 0.0  ;;  %v9484_v63 = vadd.f32 %v15106_v42, %v12975_v48  ;;  %v15570_v5 = vld [vmem:[#allocation29_spill] sm:$0xff] }
 0x2f6   : > { %v12020_v52 = vpack.c.bf16 %v9928_v32, %v9927_v20  ;;  %v8491_v31 = vmax.f32 %v15564_v11, %v8363_v54  ;;  %v8364_v2 = vmax.f32 %v8042_v40, 0.0  ;;  %v8034_v44 = vadd.f32 %v15106_v42, %v8033_v6  ;;  %v15571_v54 = vld [vmem:[#allocation30_spill] sm:$0xff] }
 0x2f7   : > { %12225 = vst [vmem:[%s14970_s17 + $0xe8] sm:$0xff] %v12025_v58   ;;  %v8489_v27 = vmax.f32 %v15565_v41, %v8361_v61  ;;  %v9476_v38 = vadd.f32 %v15106_v42, %v9475_v24  ;;  %v9806_v12 = vmax.f32 %v9484_v63, 0.0 }
 0x2f8   : > { %12224 = vst [vmem:[%s14970_s17 + $0xe0] sm:$0xff] %v12020_v52   ;;  %v9933_v29 = vmax.f32 %v8491_v31, %v9805_v15  ;;  %v8492_v9 = vmax.f32 %v15566_v3, %v8364_v2  ;;  %v8362_v21 = vmax.f32 %v8034_v44, 0.0 }
 0x2f9   : > { %v9931_v46 = vmax.f32 %v8489_v27, %v9803_v34  ;;  %v9804_v51 = vmax.f32 %v9476_v38, 0.0  ;;  %v12848_v7 = vpop.f32.mrb[192].mxu0  ;;  %v12978_v22 = vpop.f32.mrb[192].mxu1 }
 0x2fa   : > { %v9934_v55 = vmax.f32 %v8492_v9, %v9806_v12  ;;  %v8490_v10 = vmax.f32 %v15567_v18, %v8362_v21  ;;  %v8055_v47 = vadd.f32 %v15106_v42, %v12848_v7  ;;  %v9497_v62 = vadd.f32 %v15106_v42, %v12978_v22  ;;  %v8046_v35 = vpop.f32.mrb[193].mxu0  ;;  %v9488_v16 = vpop.f32.mrb[193].mxu1  ;;  %v15573_v18 = vld [vmem:[#allocation32_spill] sm:$0xff] }
 0x2fb   : > { %v8047_v14 = vadd.f32 %v15106_v42, %v8046_v35  ;;  %v9489_v53 = vadd.f32 %v15106_v42, %v9488_v16  ;;  %v12849_v30 = vpop.f32.mrb[194].mxu0  ;;  %v12979_v4 = vpop.f32.mrb[194].mxu1  ;;  %v15574_v35 = vld [vmem:[#allocation33_spill] sm:$0xff] }
 0x2fc   : > { %v12035_v26 = vpack.c.bf16 %v9934_v55, %v9933_v29  ;;  %v9932_v19 = vmax.f32 %v8490_v10, %v9804_v51  ;;  %v8367_v13 = vmax.f32 %v8055_v47, 0.0  ;;  %v9809_v17 = vmax.f32 %v9497_v62, 0.0  ;;  %v8049_v33 = vpop.f32.mrb[195].mxu0  ;;  %v9491_v57 = vpop.f32.mrb[195].mxu1  ;;  %v15572_v51 = vld [vmem:[#allocation31_spill] sm:$0xff] }
 0x2fd   : > { %v8365_v45 = vmax.f32 %v8047_v14, 0.0  ;;  %v9807_v20 = vmax.f32 %v9489_v53, 0.0  ;;  %v8058_v50 = vadd.f32 %v15106_v42, %v12849_v30  ;;  %v9500_v49 = vadd.f32 %v15106_v42, %v12979_v4 }
 0x2fe   : > { %12227 = vst [vmem:[%s14970_s17 + $0xf8] sm:$0xff] %v12035_v26   ;;  %v12030_v28 = vpack.c.bf16 %v9932_v19, %v9931_v46  ;;  %v8495_v56 = vmax.f32 %v15568_v1, %v8367_v13  ;;  %v8050_v36 = vadd.f32 %v15106_v42, %v8049_v33  ;;  %v9492_v25 = vadd.f32 %v15106_v42, %v9491_v57 }
 0x2ff   : > { %v8493_v39 = vmax.f32 %v15569_v43, %v8365_v45  ;;  %v8368_v8 = vmax.f32 %v8058_v50, 0.0  ;;  %v9810_v59 = vmax.f32 %v9500_v49, 0.0 }
 0x300   : > { %12226 = vst [vmem:[%s14970_s17 + $0xf0] sm:$0xff] %v12030_v28   ;;  %v9937_v0 = vmax.f32 %v8495_v56, %v9809_v17  ;;  %v8366_v37 = vmax.f32 %v8050_v36, 0.0  ;;  %v9808_v40 = vmax.f32 %v9492_v25, 0.0  ;;  %v15575_v17 = vld [vmem:[#allocation34_spill] sm:$0xff] }
 0x301   : > { %v9935_v60 = vmax.f32 %v8493_v39, %v9807_v20  ;;  %v8496_v23 = vmax.f32 %v15570_v5, %v8368_v8  ;;  %v12852_v48 = vpop.f32.mrb[196].mxu0  ;;  %v12982_v32 = vpop.f32.mrb[196].mxu1 }
 0x302   : > { %v8494_v15 = vmax.f32 %v15571_v54, %v8366_v37  ;;  %v8071_v6 = vadd.f32 %v15106_v42, %v12852_v48  ;;  %v9513_v24 = vadd.f32 %v15106_v42, %v12982_v32  ;;  %v8062_v58 = vpop.f32.mrb[197].mxu0  ;;  %v9504_v61 = vpop.f32.mrb[197].mxu1  ;;  %v15576_v48 = vld [vmem:[#allocation35_spill] sm:$0xff] }
 0x303   : > { %v9938_v34 = vmax.f32 %v8496_v23, %v9810_v59  ;;  %v8063_v63 = vadd.f32 %v15106_v42, %v8062_v58  ;;  %v9505_v52 = vadd.f32 %v15106_v42, %v9504_v61  ;;  %v12853_v11 = vpop.f32.mrb[198].mxu0  ;;  %v12983_v31 = vpop.f32.mrb[198].mxu1 }
 0x304   : > { %v9936_v2 = vmax.f32 %v8494_v15, %v9808_v40  ;;  %v8371_v44 = vmax.f32 %v8071_v6, 0.0  ;;  %v9813_v41 = vmax.f32 %v9513_v24, 0.0  ;;  %v8074_v27 = vadd.f32 %v15106_v42, %v12853_v11  ;;  %v8065_v38 = vpop.f32.mrb[199].mxu0  ;;  %v9507_v29 = vpop.f32.mrb[199].mxu1  ;;  %v15577_v40 = vld [vmem:[#allocation36_spill] sm:$0xff] }
 0x305   : > { %v12045_v3 = vpack.c.bf16 %v9938_v34, %v9937_v0  ;;  %v8369_v9 = vmax.f32 %v8063_v63, 0.0  ;;  %v9811_v12 = vmax.f32 %v9505_v52, 0.0  ;;  %v9516_v21 = vadd.f32 %v15106_v42, %v12983_v31  ;;  %v15578_v63 = vld [vmem:[#allocation37_spill] sm:$0xff] }
 0x306   : > { %v12040_v46 = vpack.c.bf16 %v9936_v2, %v9935_v60  ;;  %v8499_v7 = vmax.f32 %v15572_v51, %v8371_v44  ;;  %v8372_v22 = vmax.f32 %v8074_v27, 0.0  ;;  %v8066_v55 = vadd.f32 %v15106_v42, %v8065_v38  ;;  %v15579_v44 = vld [vmem:[#allocation38_spill] sm:$0xff] }
 0x307   : > { %12229 = vst [vmem:[%s14970_s17 + $0x108] sm:$0xff] %v12045_v3   ;;  %v8497_v10 = vmax.f32 %v15573_v18, %v8369_v9  ;;  %v9508_v47 = vadd.f32 %v15106_v42, %v9507_v29  ;;  %v9814_v14 = vmax.f32 %v9516_v21, 0.0 }
 0x308   : > { %12228 = vst [vmem:[%s14970_s17 + $0x100] sm:$0xff] %v12040_v46   ;;  %v9941_v62 = vmax.f32 %v8499_v7, %v9813_v41  ;;  %v8500_v16 = vmax.f32 %v15574_v35, %v8372_v22  ;;  %v8370_v53 = vmax.f32 %v8066_v55, 0.0 }
 0x309   : > { %v9939_v30 = vmax.f32 %v8497_v10, %v9811_v12  ;;  %v9812_v4 = vmax.f32 %v9508_v47, 0.0  ;;  %v12856_v26 = vpop.f32.mrb[200].mxu0  ;;  %v12986_v19 = vpop.f32.mrb[200].mxu1 }
 0x30a   : > { %v9942_v13 = vmax.f32 %v8500_v16, %v9814_v14  ;;  %v8498_v33 = vmax.f32 %v15575_v17, %v8370_v53  ;;  %v8087_v57 = vadd.f32 %v15106_v42, %v12856_v26  ;;  %v9529_v45 = vadd.f32 %v15106_v42, %v12986_v19  ;;  %v8078_v20 = vpop.f32.mrb[201].mxu0  ;;  %v9520_v50 = vpop.f32.mrb[201].mxu1  ;;  %v15581_v17 = vld [vmem:[#allocation40_spill] sm:$0xff] }
 0x30b   : > { %v8079_v49 = vadd.f32 %v15106_v42, %v8078_v20  ;;  %v9521_v28 = vadd.f32 %v15106_v42, %v9520_v50  ;;  %v12857_v1 = vpop.f32.mrb[202].mxu0  ;;  %v12987_v56 = vpop.f32.mrb[202].mxu1  ;;  %v15582_v20 = vld [vmem:[#allocation41_spill] sm:$0xff] }
 0x30c   : > { %v12055_v36 = vpack.c.bf16 %v9942_v13, %v9941_v62  ;;  %v9940_v25 = vmax.f32 %v8498_v33, %v9812_v4  ;;  %v8375_v43 = vmax.f32 %v8087_v57, 0.0  ;;  %v9817_v39 = vmax.f32 %v9529_v45, 0.0  ;;  %v8081_v8 = vpop.f32.mrb[203].mxu0  ;;  %v9523_v0 = vpop.f32.mrb[203].mxu1  ;;  %v15580_v4 = vld [vmem:[#allocation39_spill] sm:$0xff] }
 0x30d   : > { %v8373_v37 = vmax.f32 %v8079_v49, 0.0  ;;  %v9815_v60 = vmax.f32 %v9521_v28, 0.0  ;;  %v8090_v5 = vadd.f32 %v15106_v42, %v12857_v1  ;;  %v9532_v23 = vadd.f32 %v15106_v42, %v12987_v56 }
 0x30e   : > { %12231 = vst [vmem:[%s14970_s17 + $0x118] sm:$0xff] %v12055_v36   ;;  %v12050_v59 = vpack.c.bf16 %v9940_v25, %v9939_v30  ;;  %v8503_v32 = vmax.f32 %v15576_v48, %v8375_v43  ;;  %v8082_v54 = vadd.f32 %v15106_v42, %v8081_v8  ;;  %v9524_v15 = vadd.f32 %v15106_v42, %v9523_v0 }
 0x30f   : > { %v8501_v6 = vmax.f32 %v15577_v40, %v8373_v37  ;;  %v8376_v24 = vmax.f32 %v8090_v5, 0.0  ;;  %v9818_v11 = vmax.f32 %v9532_v23, 0.0 }
 0x310   : > { %12230 = vst [vmem:[%s14970_s17 + $0x110] sm:$0xff] %v12050_v59   ;;  %v9945_v58 = vmax.f32 %v8503_v32, %v9817_v39  ;;  %v8374_v61 = vmax.f32 %v8082_v54, 0.0  ;;  %v9816_v27 = vmax.f32 %v9524_v15, 0.0  ;;  %v15583_v39 = vld [vmem:[#allocation42_spill] sm:$0xff] }
 0x311   : > { %v9943_v34 = vmax.f32 %v8501_v6, %v9815_v60  ;;  %v8504_v52 = vmax.f32 %v15578_v63, %v8376_v24  ;;  %v12860_v31 = vpop.f32.mrb[204].mxu0  ;;  %v12990_v2 = vpop.f32.mrb[204].mxu1 }
 0x312   : > { %v8502_v41 = vmax.f32 %v15579_v44, %v8374_v61  ;;  %v8103_v38 = vadd.f32 %v15106_v42, %v12860_v31  ;;  %v9545_v29 = vadd.f32 %v15106_v42, %v12990_v2  ;;  %v8094_v3 = vpop.f32.mrb[205].mxu0  ;;  %v9536_v9 = vpop.f32.mrb[205].mxu1  ;;  %v15584_v31 = vld [vmem:[#allocation43_spill] sm:$0xff] }
 0x313   : > { %v9946_v12 = vmax.f32 %v8504_v52, %v9818_v11  ;;  %v8095_v21 = vadd.f32 %v15106_v42, %v8094_v3  ;;  %v9537_v46 = vadd.f32 %v15106_v42, %v9536_v9  ;;  %v12861_v51 = vpop.f32.mrb[206].mxu0  ;;  %v12991_v7 = vpop.f32.mrb[206].mxu1 }
 0x314   : > { %v9944_v22 = vmax.f32 %v8502_v41, %v9816_v27  ;;  %v8379_v55 = vmax.f32 %v8103_v38, 0.0  ;;  %v9821_v18 = vmax.f32 %v9545_v29, 0.0  ;;  %v8106_v10 = vadd.f32 %v15106_v42, %v12861_v51  ;;  %v8097_v47 = vpop.f32.mrb[207].mxu0  ;;  %v9539_v62 = vpop.f32.mrb[207].mxu1  ;;  %v15585_v27 = vld [vmem:[#allocation44_spill] sm:$0xff] }
 0x315   : > { %v12065_v35 = vpack.c.bf16 %v9946_v12, %v9945_v58  ;;  %v8377_v16 = vmax.f32 %v8095_v21, 0.0  ;;  %v9819_v14 = vmax.f32 %v9537_v46, 0.0  ;;  %v9548_v53 = vadd.f32 %v15106_v42, %v12991_v7  ;;  %v15586_v21 = vld [vmem:[#allocation45_spill] sm:$0xff] }
 0x316   : > { %v12060_v30 = vpack.c.bf16 %v9944_v22, %v9943_v34  ;;  %v8507_v26 = vmax.f32 %v15580_v4, %v8379_v55  ;;  %v8380_v19 = vmax.f32 %v8106_v10, 0.0  ;;  %v8098_v13 = vadd.f32 %v15106_v42, %v8097_v47  ;;  %v15587_v55 = vld [vmem:[#allocation46_spill] sm:$0xff] }
 0x317   : > { %12233 = vst [vmem:[%s14970_s17 + $0x128] sm:$0xff] %v12065_v35   ;;  %v8505_v33 = vmax.f32 %v15581_v17, %v8377_v16  ;;  %v9540_v57 = vadd.f32 %v15106_v42, %v9539_v62  ;;  %v9822_v49 = vmax.f32 %v9548_v53, 0.0 }
 0x318   : > { %12232 = vst [vmem:[%s14970_s17 + $0x120] sm:$0xff] %v12060_v30   ;;  %v9949_v45 = vmax.f32 %v8507_v26, %v9821_v18  ;;  %v8508_v50 = vmax.f32 %v15582_v20, %v8380_v19  ;;  %v8378_v28 = vmax.f32 %v8098_v13, 0.0 }
 0x319   : > { %v9947_v1 = vmax.f32 %v8505_v33, %v9819_v14  ;;  %v9820_v56 = vmax.f32 %v9540_v57, 0.0  ;;  %v12864_v36 = vpop.f32.mrb[208].mxu0  ;;  %v12994_v25 = vpop.f32.mrb[208].mxu1 }
 0x31a   : > { %v9950_v43 = vmax.f32 %v8508_v50, %v9822_v49  ;;  %v8506_v8 = vmax.f32 %v15583_v39, %v8378_v28  ;;  %v8119_v0 = vadd.f32 %v15106_v42, %v12864_v36  ;;  %v9561_v37 = vadd.f32 %v15106_v42, %v12994_v25  ;;  %v8110_v60 = vpop.f32.mrb[209].mxu0  ;;  %v9552_v5 = vpop.f32.mrb[209].mxu1  ;;  %v15589_v39 = vld [vmem:[#allocation48_spill] sm:$0xff] }
 0x31b   : > { %v8111_v23 = vadd.f32 %v15106_v42, %v8110_v60  ;;  %v9553_v59 = vadd.f32 %v15106_v42, %v9552_v5  ;;  %v12865_v48 = vpop.f32.mrb[210].mxu0  ;;  %v12995_v32 = vpop.f32.mrb[210].mxu1  ;;  %v15590_v60 = vld [vmem:[#allocation49_spill] sm:$0xff] }
 0x31c   : > { %v12075_v54 = vpack.c.bf16 %v9950_v43, %v9949_v45  ;;  %v9948_v15 = vmax.f32 %v8506_v8, %v9820_v56  ;;  %v8383_v40 = vmax.f32 %v8119_v0, 0.0  ;;  %v9825_v6 = vmax.f32 %v9561_v37, 0.0  ;;  %v8113_v24 = vpop.f32.mrb[211].mxu0  ;;  %v9555_v58 = vpop.f32.mrb[211].mxu1  ;;  %v15588_v56 = vld [vmem:[#allocation47_spill] sm:$0xff] }
 0x31d   : > { %v8381_v61 = vmax.f32 %v8111_v23, 0.0  ;;  %v9823_v34 = vmax.f32 %v9553_v59, 0.0  ;;  %v8122_v63 = vadd.f32 %v15106_v42, %v12865_v48  ;;  %v9564_v52 = vadd.f32 %v15106_v42, %v12995_v32 }
 0x31e   : > { %12235 = vst [vmem:[%s14970_s17 + $0x138] sm:$0xff] %v12075_v54   ;;  %v12070_v11 = vpack.c.bf16 %v9948_v15, %v9947_v1  ;;  %v8511_v2 = vmax.f32 %v15584_v31, %v8383_v40  ;;  %v8114_v44 = vadd.f32 %v15106_v42, %v8113_v24  ;;  %v9556_v41 = vadd.f32 %v15106_v42, %v9555_v58 }
 0x31f   : > { %v8509_v38 = vmax.f32 %v15585_v27, %v8381_v61  ;;  %v8384_v29 = vmax.f32 %v8122_v63, 0.0  ;;  %v9826_v51 = vmax.f32 %v9564_v52, 0.0 }
 0x320   : > { %12234 = vst [vmem:[%s14970_s17 + $0x130] sm:$0xff] %v12070_v11   ;;  %v9953_v3 = vmax.f32 %v8511_v2, %v9825_v6  ;;  %v8382_v9 = vmax.f32 %v8114_v44, 0.0  ;;  %v9824_v10 = vmax.f32 %v9556_v41, 0.0  ;;  %v15591_v6 = vld [vmem:[#allocation50_spill] sm:$0xff] }
 0x321   : > { %v9951_v12 = vmax.f32 %v8509_v38, %v9823_v34  ;;  %v8512_v46 = vmax.f32 %v15586_v21, %v8384_v29  ;;  %v12868_v7 = vpop.f32.mrb[212].mxu0  ;;  %v12998_v22 = vpop.f32.mrb[212].mxu1 }
 0x322   : > { %v8510_v18 = vmax.f32 %v15587_v55, %v8382_v9  ;;  %v8135_v47 = vadd.f32 %v15106_v42, %v12868_v7  ;;  %v9577_v62 = vadd.f32 %v15106_v42, %v12998_v22  ;;  %v8126_v35 = vpop.f32.mrb[213].mxu0  ;;  %v9568_v16 = vpop.f32.mrb[213].mxu1  ;;  %v15592_v7 = vld [vmem:[#allocation51_spill] sm:$0xff] }
 0x323   : > { %v9954_v14 = vmax.f32 %v8512_v46, %v9826_v51  ;;  %v8127_v53 = vadd.f32 %v15106_v42, %v8126_v35  ;;  %v9569_v30 = vadd.f32 %v15106_v42, %v9568_v16  ;;  %v12869_v4 = vpop.f32.mrb[214].mxu0  ;;  %v12999_v26 = vpop.f32.mrb[214].mxu1 }
 0x324   : > { %v9952_v19 = vmax.f32 %v8510_v18, %v9824_v10  ;;  %v8387_v13 = vmax.f32 %v8135_v47, 0.0  ;;  %v9829_v17 = vmax.f32 %v9577_v62, 0.0  ;;  %v8138_v33 = vadd.f32 %v15106_v42, %v12869_v4  ;;  %v8129_v57 = vpop.f32.mrb[215].mxu0  ;;  %v9571_v45 = vpop.f32.mrb[215].mxu1  ;;  %v15593_v10 = vld [vmem:[#allocation52_spill] sm:$0xff] }
 0x325   : > { %v12085_v20 = vpack.c.bf16 %v9954_v14, %v9953_v3  ;;  %v8385_v50 = vmax.f32 %v8127_v53, 0.0  ;;  %v9827_v49 = vmax.f32 %v9569_v30, 0.0  ;;  %v9580_v28 = vadd.f32 %v15106_v42, %v12999_v26  ;;  %v15594_v53 = vld [vmem:[#allocation53_spill] sm:$0xff] }
 0x326   : > { %v12080_v1 = vpack.c.bf16 %v9952_v19, %v9951_v12  ;;  %v8515_v36 = vmax.f32 %v15588_v56, %v8387_v13  ;;  %v8388_v25 = vmax.f32 %v8138_v33, 0.0  ;;  %v8130_v43 = vadd.f32 %v15106_v42, %v8129_v57  ;;  %v15595_v13 = vld [vmem:[#allocation54_spill] sm:$0xff]  ;;  %v15312_v57 = vld [vmem:[%s15454_s2] ss:$0 sm:$0xff] }
 0x327   : > { %12237 = vst [vmem:[%s14970_s17 + $0x148] sm:$0xff] %v12085_v20   ;;  %v8513_v8 = vmax.f32 %v15589_v39, %v8385_v50  ;;  %v9572_v0 = vadd.f32 %v15106_v42, %v9571_v45  ;;  %v9830_v23 = vmax.f32 %v9580_v28, 0.0 }
 0x328   : > { %12236 = vst [vmem:[%s14970_s17 + $0x140] sm:$0xff] %v12080_v1   ;;  %v9957_v37 = vmax.f32 %v8515_v36, %v9829_v17  ;;  %v8516_v5 = vmax.f32 %v15590_v60, %v8388_v25  ;;  %v8386_v59 = vmax.f32 %v8130_v43, 0.0 }
 0x329   : > { %v9955_v48 = vmax.f32 %v8513_v8, %v9827_v49  ;;  %v9828_v32 = vmax.f32 %v9572_v0, 0.0  ;;  %v12872_v54 = vpop.f32.mrb[216].mxu0  ;;  %v13002_v15 = vpop.f32.mrb[216].mxu1 }
 0x32a   : > { %v9958_v40 = vmax.f32 %v8516_v5, %v9830_v23  ;;  %v8514_v24 = vmax.f32 %v15591_v6, %v8386_v59  ;;  %v8151_v58 = vadd.f32 %v15106_v42, %v12872_v54  ;;  %v9593_v61 = vadd.f32 %v15106_v42, %v13002_v15  ;;  %v8142_v34 = vpop.f32.mrb[217].mxu0  ;;  %v9584_v63 = vpop.f32.mrb[217].mxu1  ;;  %v15597_v6 = vld [vmem:[#allocation56_spill] sm:$0xff] }
 0x32b   : > { %v8143_v52 = vadd.f32 %v15106_v42, %v8142_v34  ;;  %v9585_v11 = vadd.f32 %v15106_v42, %v9584_v63  ;;  %v12873_v31 = vpop.f32.mrb[218].mxu0  ;;  %v13003_v2 = vpop.f32.mrb[218].mxu1  ;;  %v15598_v34 = vld [vmem:[#allocation57_spill] sm:$0xff] }
 0x32c   : > { %v12095_v44 = vpack.c.bf16 %v9958_v40, %v9957_v37  ;;  %v9956_v41 = vmax.f32 %v8514_v24, %v9828_v32  ;;  %v8391_v27 = vmax.f32 %v8151_v58, 0.0  ;;  %v9833_v38 = vmax.f32 %v9593_v61, 0.0  ;;  %v8145_v29 = vpop.f32.mrb[219].mxu0  ;;  %v9587_v3 = vpop.f32.mrb[219].mxu1  ;;  %v15596_v32 = vld [vmem:[#allocation55_spill] sm:$0xff] }
 0x32d   : > { %v8389_v9 = vmax.f32 %v8143_v52, 0.0  ;;  %v9831_v12 = vmax.f32 %v9585_v11, 0.0  ;;  %v8154_v21 = vadd.f32 %v15106_v42, %v12873_v31  ;;  %v9596_v46 = vadd.f32 %v15106_v42, %v13003_v2 }
 0x32e   : > { %12239 = vst [vmem:[%s14970_s17 + $0x158] sm:$0xff] %v12095_v44   ;;  %v12090_v51 = vpack.c.bf16 %v9956_v41, %v9955_v48  ;;  %v8519_v22 = vmax.f32 %v15592_v7, %v8391_v27  ;;  %v8146_v55 = vadd.f32 %v15106_v42, %v8145_v29  ;;  %v9588_v18 = vadd.f32 %v15106_v42, %v9587_v3 }
 0x32f   : > { %v8517_v47 = vmax.f32 %v15593_v10, %v8389_v9  ;;  %v8392_v62 = vmax.f32 %v8154_v21, 0.0  ;;  %v9834_v4 = vmax.f32 %v9596_v46, 0.0 }
 0x330   : > { %12238 = vst [vmem:[%s14970_s17 + $0x150] sm:$0xff] %v12090_v51   ;;  %v9961_v35 = vmax.f32 %v8519_v22, %v9833_v38  ;;  %v8390_v16 = vmax.f32 %v8146_v55, 0.0  ;;  %v9832_v33 = vmax.f32 %v9588_v18, 0.0  ;;  %v15599_v38 = vld [vmem:[#allocation58_spill] sm:$0xff] }
 0x331   : > { %v9959_v14 = vmax.f32 %v8517_v47, %v9831_v12  ;;  %v8520_v30 = vmax.f32 %v15594_v53, %v8392_v62  ;;  %v12876_v26 = vpop.f32.mrb[220].mxu0  ;;  %v13006_v19 = vpop.f32.mrb[220].mxu1 }
 0x332   : > { %v8518_v17 = vmax.f32 %v15595_v13, %v8390_v16  ;;  %v8167_v42 = vadd.f32 %v15312_v57, %v12876_v26  ;;  %v9609_v45 = vadd.f32 %v15312_v57, %v13006_v19  ;;  %v8158_v20 = vpop.f32.mrb[221].mxu0  ;;  %v9600_v50 = vpop.f32.mrb[221].mxu1  ;;  %v15600_v26 = vld [vmem:[#allocation59_spill] sm:$0xff] }
 0x333   : > { %v9962_v49 = vmax.f32 %v8520_v30, %v9834_v4  ;;  %v8159_v28 = vadd.f32 %v15312_v57, %v8158_v20  ;;  %v9601_v1 = vadd.f32 %v15312_v57, %v9600_v50  ;;  %v12877_v56 = vpop.f32.mrb[222].mxu0  ;;  %v13007_v36 = vpop.f32.mrb[222].mxu1 }
 0x334   : > { %v9960_v25 = vmax.f32 %v8518_v17, %v9832_v33  ;;  %v8395_v43 = vmax.f32 %v8167_v42, 0.0  ;;  %v9837_v39 = vmax.f32 %v9609_v45, 0.0  ;;  %v8170_v8 = vadd.f32 %v15312_v57, %v12877_v56  ;;  %v8161_v0 = vpop.f32.mrb[223].mxu0  ;;  %v9603_v37 = vpop.f32.mrb[223].mxu1  ;;  %v15601_v33 = vld [vmem:[#allocation60_spill] sm:$0xff] }
 0x335   : > { %v12105_v60 = vpack.c.bf16 %v9962_v49, %v9961_v35  ;;  %v8393_v5 = vmax.f32 %v8159_v28, 0.0  ;;  %v9835_v23 = vmax.f32 %v9601_v1, 0.0  ;;  %v9612_v59 = vadd.f32 %v15312_v57, %v13007_v36  ;;  %v15602_v28 = vld [vmem:[#allocation61_spill] sm:$0xff] }
 0x336   : > { %v12100_v48 = vpack.c.bf16 %v9960_v25, %v9959_v14  ;;  %v8523_v54 = vmax.f32 %v15596_v32, %v8395_v43  ;;  %v8396_v15 = vmax.f32 %v8170_v8, 0.0  ;;  %v8162_v40 = vadd.f32 %v15312_v57, %v8161_v0  ;;  %v15603_v43 = vld [vmem:[#allocation62_spill] sm:$0xff] }
 0x337   : > { %12241 = vst [vmem:[%s14970_s17 + $0x168] sm:$0xff] %v12105_v60   ;;  %v8521_v24 = vmax.f32 %v15597_v6, %v8393_v5  ;;  %v9604_v58 = vadd.f32 %v15312_v57, %v9603_v37  ;;  %v9838_v52 = vmax.f32 %v9612_v59, 0.0 }
 0x338   : > { %12240 = vst [vmem:[%s14970_s17 + $0x160] sm:$0xff] %v12100_v48   ;;  %v9965_v61 = vmax.f32 %v8523_v54, %v9837_v39  ;;  %v8524_v63 = vmax.f32 %v15598_v34, %v8396_v15  ;;  %v8394_v11 = vmax.f32 %v8162_v40, 0.0 }
 0x339   : > { %v9963_v31 = vmax.f32 %v8521_v24, %v9835_v23  ;;  %v9836_v2 = vmax.f32 %v9604_v58, 0.0  ;;  %v12880_v44 = vpop.f32.mrb[224].mxu0  ;;  %v13010_v41 = vpop.f32.mrb[224].mxu1 }
 0x33a   : > { %v9966_v27 = vmax.f32 %v8524_v63, %v9838_v52  ;;  %v8522_v29 = vmax.f32 %v15599_v38, %v8394_v11  ;;  %v8183_v3 = vadd.f32 %v15312_v57, %v12880_v44  ;;  %v9625_v9 = vadd.f32 %v15312_v57, %v13010_v41  ;;  %v8174_v12 = vpop.f32.mrb[225].mxu0  ;;  %v9616_v21 = vpop.f32.mrb[225].mxu1  ;;  %v15605_v38 = vld [vmem:[#allocation64_spill] sm:$0xff] }
 0x33b   : > { %v8175_v46 = vadd.f32 %v15312_v57, %v8174_v12  ;;  %v9617_v51 = vadd.f32 %v15312_v57, %v9616_v21  ;;  %v12881_v7 = vpop.f32.mrb[226].mxu0  ;;  %v13011_v22 = vpop.f32.mrb[226].mxu1  ;;  %v15606_v12 = vld [vmem:[#allocation65_spill] sm:$0xff] }
 0x33c   : > { %v12115_v55 = vpack.c.bf16 %v9966_v27, %v9965_v61  ;;  %v9964_v18 = vmax.f32 %v8522_v29, %v9836_v2  ;;  %v8399_v10 = vmax.f32 %v8183_v3, 0.0  ;;  %v9841_v47 = vmax.f32 %v9625_v9, 0.0  ;;  %v8177_v62 = vpop.f32.mrb[227].mxu0  ;;  %v9619_v35 = vpop.f32.mrb[227].mxu1  ;;  %v15604_v2 = vld [vmem:[#allocation63_spill] sm:$0xff] }
 0x33d   : > { %v8397_v16 = vmax.f32 %v8175_v46, 0.0  ;;  %v9839_v14 = vmax.f32 %v9617_v51, 0.0  ;;  %v8186_v53 = vadd.f32 %v15312_v57, %v12881_v7  ;;  %v9628_v30 = vadd.f32 %v15312_v57, %v13011_v22 }
 0x33e   : > { %12243 = vst [vmem:[%s14970_s17 + $0x178] sm:$0xff] %v12115_v55   ;;  %v12110_v4 = vpack.c.bf16 %v9964_v18, %v9963_v31  ;;  %v8527_v19 = vmax.f32 %v15600_v26, %v8399_v10  ;;  %v8178_v13 = vadd.f32 %v15312_v57, %v8177_v62  ;;  %v9620_v17 = vadd.f32 %v15312_v57, %v9619_v35 }
 0x33f   : > { %v8525_v42 = vmax.f32 %v15601_v33, %v8397_v16  ;;  %v8400_v45 = vmax.f32 %v8186_v53, 0.0  ;;  %v9842_v56 = vmax.f32 %v9628_v30, 0.0 }
 0x340   : > { %12242 = vst [vmem:[%s14970_s17 + $0x170] sm:$0xff] %v12110_v4   ;;  %v9969_v20 = vmax.f32 %v8527_v19, %v9841_v47  ;;  %v8398_v50 = vmax.f32 %v8178_v13, 0.0  ;;  %v9840_v8 = vmax.f32 %v9620_v17, 0.0  ;;  %v15607_v47 = vld [vmem:[#allocation66_spill] sm:$0xff] }
 0x341   : > { %v9967_v49 = vmax.f32 %v8525_v42, %v9839_v14  ;;  %v8528_v1 = vmax.f32 %v15602_v28, %v8400_v45  ;;  %v12884_v36 = vpop.f32.mrb[228].mxu0  ;;  %v13014_v25 = vpop.f32.mrb[228].mxu1 }
 0x342   : > { %v8526_v39 = vmax.f32 %v15603_v43, %v8398_v50  ;;  %v8199_v0 = vadd.f32 %v15312_v57, %v12884_v36  ;;  %v9641_v37 = vadd.f32 %v15312_v57, %v13014_v25  ;;  %v8190_v60 = vpop.f32.mrb[229].mxu0  ;;  %v9632_v5 = vpop.f32.mrb[229].mxu1  ;;  %v15608_v36 = vld [vmem:[#allocation67_spill] sm:$0xff] }
 0x343   : > { %v9970_v23 = vmax.f32 %v8528_v1, %v9842_v56  ;;  %v8191_v59 = vadd.f32 %v15312_v57, %v8190_v60  ;;  %v9633_v48 = vadd.f32 %v15312_v57, %v9632_v5  ;;  %v12885_v32 = vpop.f32.mrb[230].mxu0  ;;  %v13015_v54 = vpop.f32.mrb[230].mxu1 }
 0x344   : > { %v9968_v15 = vmax.f32 %v8526_v39, %v9840_v8  ;;  %v8403_v40 = vmax.f32 %v8199_v0, 0.0  ;;  %v9845_v6 = vmax.f32 %v9641_v37, 0.0  ;;  %v8202_v24 = vadd.f32 %v15312_v57, %v12885_v32  ;;  %v8193_v58 = vpop.f32.mrb[231].mxu0  ;;  %v9635_v61 = vpop.f32.mrb[231].mxu1  ;;  %v15609_v8 = vld [vmem:[#allocation68_spill] sm:$0xff] }
 0x345   : > { %v12125_v34 = vpack.c.bf16 %v9970_v23, %v9969_v20  ;;  %v8401_v63 = vmax.f32 %v8191_v59, 0.0  ;;  %v9843_v52 = vmax.f32 %v9633_v48, 0.0  ;;  %v9644_v11 = vadd.f32 %v15312_v57, %v13015_v54  ;;  %v15610_v59 = vld [vmem:[#allocation69_spill] sm:$0xff] }
 0x346   : > { %v12120_v31 = vpack.c.bf16 %v9968_v15, %v9967_v49  ;;  %v8531_v44 = vmax.f32 %v15604_v2, %v8403_v40  ;;  %v8404_v41 = vmax.f32 %v8202_v24, 0.0  ;;  %v8194_v27 = vadd.f32 %v15312_v57, %v8193_v58  ;;  %v15611_v40 = vld [vmem:[#allocation70_spill] sm:$0xff] }
 0x347   : > { %12245 = vst [vmem:[%s14970_s17 + $0x188] sm:$0xff] %v12125_v34   ;;  %v8529_v29 = vmax.f32 %v15605_v38, %v8401_v63  ;;  %v9636_v3 = vadd.f32 %v15312_v57, %v9635_v61  ;;  %v9846_v46 = vmax.f32 %v9644_v11, 0.0 }
 0x348   : > { %12244 = vst [vmem:[%s14970_s17 + $0x180] sm:$0xff] %v12120_v31   ;;  %v9973_v9 = vmax.f32 %v8531_v44, %v9845_v6  ;;  %v8532_v21 = vmax.f32 %v15606_v12, %v8404_v41  ;;  %v8402_v51 = vmax.f32 %v8194_v27, 0.0 }
 0x349   : > { %v9971_v7 = vmax.f32 %v8529_v29, %v9843_v52  ;;  %v9844_v22 = vmax.f32 %v9636_v3, 0.0  ;;  %v12888_v55 = vpop.f32.mrb[232].mxu0  ;;  %v13018_v18 = vpop.f32.mrb[232].mxu1 }
 0x34a   : > { %v9974_v10 = vmax.f32 %v8532_v21, %v9846_v46  ;;  %v8530_v62 = vmax.f32 %v15607_v47, %v8402_v51  ;;  %v8215_v35 = vadd.f32 %v15312_v57, %v12888_v55  ;;  %v9657_v16 = vadd.f32 %v15312_v57, %v13018_v18  ;;  %v8206_v14 = vpop.f32.mrb[233].mxu0  ;;  %v9648_v53 = vpop.f32.mrb[233].mxu1  ;;  %v15613_v47 = vld [vmem:[#allocation72_spill] sm:$0xff] }
 0x34b   : > { %v8207_v30 = vadd.f32 %v15312_v57, %v8206_v14  ;;  %v9649_v4 = vadd.f32 %v15312_v57, %v9648_v53  ;;  %v12889_v26 = vpop.f32.mrb[234].mxu0  ;;  %v13019_v19 = vpop.f32.mrb[234].mxu1  ;;  %v15614_v14 = vld [vmem:[#allocation73_spill] sm:$0xff] }
 0x34c   : > { %v12135_v13 = vpack.c.bf16 %v9974_v10, %v9973_v9  ;;  %v9972_v17 = vmax.f32 %v8530_v62, %v9844_v22  ;;  %v8407_v33 = vmax.f32 %v8215_v35, 0.0  ;;  %v9849_v42 = vmax.f32 %v9657_v16, 0.0  ;;  %v8209_v45 = vpop.f32.mrb[235].mxu0  ;;  %v9651_v20 = vpop.f32.mrb[235].mxu1  ;;  %v15612_v22 = vld [vmem:[#allocation71_spill] sm:$0xff] }
 0x34d   : > { %v8405_v50 = vmax.f32 %v8207_v30, 0.0  ;;  %v9847_v49 = vmax.f32 %v9649_v4, 0.0  ;;  %v8218_v28 = vadd.f32 %v15312_v57, %v12889_v26  ;;  %v9660_v1 = vadd.f32 %v15312_v57, %v13019_v19 }
 0x34e   : > { %12247 = vst [vmem:[%s14970_s17 + $0x198] sm:$0xff] %v12135_v13   ;;  %v12130_v56 = vpack.c.bf16 %v9972_v17, %v9971_v7  ;;  %v8535_v25 = vmax.f32 %v15608_v36, %v8407_v33  ;;  %v8210_v43 = vadd.f32 %v15312_v57, %v8209_v45  ;;  %v9652_v39 = vadd.f32 %v15312_v57, %v9651_v20 }
 0x34f   : > { %v8533_v0 = vmax.f32 %v15609_v8, %v8405_v50  ;;  %v8408_v37 = vmax.f32 %v8218_v28, 0.0  ;;  %v9850_v32 = vmax.f32 %v9660_v1, 0.0 }
 0x350   : > { %12246 = vst [vmem:[%s14970_s17 + $0x190] sm:$0xff] %v12130_v56   ;;  %v9977_v60 = vmax.f32 %v8535_v25, %v9849_v42  ;;  %v8406_v5 = vmax.f32 %v8210_v43, 0.0  ;;  %v9848_v24 = vmax.f32 %v9652_v39, 0.0  ;;  %v15615_v42 = vld [vmem:[#allocation74_spill] sm:$0xff] }
 0x351   : > { %v9975_v23 = vmax.f32 %v8533_v0, %v9847_v49  ;;  %v8536_v48 = vmax.f32 %v15610_v59, %v8408_v37  ;;  %v12892_v54 = vpop.f32.mrb[236].mxu0  ;;  %v13022_v15 = vpop.f32.mrb[236].mxu1 }
 0x352   : > { %v8534_v6 = vmax.f32 %v15611_v40, %v8406_v5  ;;  %v8231_v58 = vadd.f32 %v15312_v57, %v12892_v54  ;;  %v9673_v61 = vadd.f32 %v15312_v57, %v13022_v15  ;;  %v8222_v34 = vpop.f32.mrb[237].mxu0  ;;  %v9664_v63 = vpop.f32.mrb[237].mxu1  ;;  %v15616_v54 = vld [vmem:[#allocation75_spill] sm:$0xff] }
 0x353   : > { %v9978_v52 = vmax.f32 %v8536_v48, %v9850_v32  ;;  %v8223_v11 = vadd.f32 %v15312_v57, %v8222_v34  ;;  %v9665_v31 = vadd.f32 %v15312_v57, %v9664_v63  ;;  %v12893_v2 = vpop.f32.mrb[238].mxu0  ;;  %v13023_v44 = vpop.f32.mrb[238].mxu1 }
 0x354   : > { %v9976_v41 = vmax.f32 %v8534_v6, %v9848_v24  ;;  %v8411_v27 = vmax.f32 %v8231_v58, 0.0  ;;  %v9853_v38 = vmax.f32 %v9673_v61, 0.0  ;;  %v8234_v29 = vadd.f32 %v15312_v57, %v12893_v2  ;;  %v8225_v3 = vpop.f32.mrb[239].mxu0  ;;  %v9667_v9 = vpop.f32.mrb[239].mxu1  ;;  %v15617_v24 = vld [vmem:[#allocation76_spill] sm:$0xff] }
 0x355   : > { %v12145_v12 = vpack.c.bf16 %v9978_v52, %v9977_v60  ;;  %v8409_v21 = vmax.f32 %v8223_v11, 0.0  ;;  %v9851_v46 = vmax.f32 %v9665_v31, 0.0  ;;  %v9676_v51 = vadd.f32 %v15312_v57, %v13023_v44  ;;  %v15618_v11 = vld [vmem:[#allocation77_spill] sm:$0xff] }
 0x356   : > { %v12140_v7 = vpack.c.bf16 %v9976_v41, %v9975_v23  ;;  %v8539_v55 = vmax.f32 %v15612_v22, %v8411_v27  ;;  %v8412_v18 = vmax.f32 %v8234_v29, 0.0  ;;  %v8226_v10 = vadd.f32 %v15312_v57, %v8225_v3  ;;  %v15619_v41 = vld [vmem:[#allocation78_spill] sm:$0xff] }
 0x357   : > { %12249 = vst [vmem:[%s14970_s17 + $0x1a8] sm:$0xff] %v12145_v12   ;;  %v8537_v62 = vmax.f32 %v15613_v47, %v8409_v21  ;;  %v9668_v35 = vadd.f32 %v15312_v57, %v9667_v9  ;;  %v9854_v30 = vmax.f32 %v9676_v51, 0.0 }
 0x358   : > { %12248 = vst [vmem:[%s14970_s17 + $0x1a0] sm:$0xff] %v12140_v7   ;;  %v9981_v16 = vmax.f32 %v8539_v55, %v9853_v38  ;;  %v8540_v53 = vmax.f32 %v15614_v14, %v8412_v18  ;;  %v8410_v4 = vmax.f32 %v8226_v10, 0.0 }
 0x359   : > { %v9979_v26 = vmax.f32 %v8537_v62, %v9851_v46  ;;  %v9852_v19 = vmax.f32 %v9668_v35, 0.0  ;;  %v12896_v13 = vpop.f32.mrb[240].mxu0 }
 0x35a   : > { %v13026_v17 = vpop.f32.mrb[240].mxu1  ;;  %v9982_v33 = vmax.f32 %v8540_v53, %v9854_v30  ;;  %v8538_v45 = vmax.f32 %v15615_v42, %v8410_v4  ;;  %v8247_v20 = vadd.f32 %v15312_v57, %v12896_v13  ;;  %v8238_v49 = vpop.f32.mrb[241].mxu0 }
 0x35b   : > { %v9689_v50 = vadd.f32 %v15312_v57, %v13026_v17  ;;  %v9680_v28 = vpop.f32.mrb[241].mxu1  ;;  %v8239_v1 = vadd.f32 %v15312_v57, %v8238_v49  ;;  %v12897_v36 = vpop.f32.mrb[242].mxu0  ;;  %v15622_v49 = vld [vmem:[#allocation81_spill] sm:$0xff] }
 0x35c   : > { %v9681_v56 = vadd.f32 %v15312_v57, %v9680_v28  ;;  %v13027_v25 = vpop.f32.mrb[242].mxu1  ;;  %v12155_v43 = vpack.c.bf16 %v9982_v33, %v9981_v16  ;;  %v9980_v39 = vmax.f32 %v8538_v45, %v9852_v19  ;;  %v8415_v8 = vmax.f32 %v8247_v20, 0.0  ;;  %v8241_v37 = vpop.f32.mrb[243].mxu0  ;;  %v15621_v33 = vld [vmem:[#allocation80_spill] sm:$0xff] }
 0x35d   : > { %v9857_v0 = vmax.f32 %v9689_v50, 0.0  ;;  %v9683_v60 = vpop.f32.mrb[243].mxu1  ;;  %v8413_v5 = vmax.f32 %v8239_v1, 0.0  ;;  %v8250_v59 = vadd.f32 %v15312_v57, %v12897_v36  ;;  %v9692_v48 = vadd.f32 %v15312_v57, %v13027_v25 }
 0x35e   : > { %v9855_v23 = vmax.f32 %v9681_v56, 0.0  ;;  %12251 = vst [vmem:[%s14970_s17 + $0x1b8] sm:$0xff] %v12155_v43   ;;  %v12150_v32 = vpack.c.bf16 %v9980_v39, %v9979_v26  ;;  %v8543_v15 = vmax.f32 %v15616_v54, %v8415_v8  ;;  %v8242_v40 = vadd.f32 %v15312_v57, %v8241_v37  ;;  %v15620_v26 = vld [vmem:[#allocation79_spill] sm:$0xff]  ;;  %v15623_v37 = vld [vmem:[#allocation82_spill] sm:$0xff] }
 0x35f   : > { %v9684_v6 = vadd.f32 %v15312_v57, %v9683_v60  ;;  %v8541_v58 = vmax.f32 %v15617_v24, %v8413_v5  ;;  %v8416_v61 = vmax.f32 %v8250_v59, 0.0  ;;  %v9858_v2 = vmax.f32 %v9692_v48, 0.0 }
 0x360   : > { %12250 = vst [vmem:[%s14970_s17 + $0x1b0] sm:$0xff] %v12150_v32   ;;  %v9985_v34 = vmax.f32 %v8543_v15, %v9857_v0  ;;  %v8414_v63 = vmax.f32 %v8242_v40, 0.0 }
 0x361   : > { %v9983_v52 = vmax.f32 %v8541_v58, %v9855_v23  ;;  %v8544_v31 = vmax.f32 %v15618_v11, %v8416_v61  ;;  %v9856_v38 = vmax.f32 %v9684_v6, 0.0 }
 0x362   : > { %v12900_v44 = vpop.f32.mrb[244].mxu0  ;;  %v8542_v27 = vmax.f32 %v15619_v41, %v8414_v63  ;;  %v13030_v3 = vpop.f32.mrb[244].mxu1 }
 0x363   : > { %v8263_v29 = vadd.f32 %v15312_v57, %v12900_v44  ;;  %v8254_v9 = vpop.f32.mrb[245].mxu0  ;;  %v9986_v12 = vmax.f32 %v8544_v31, %v9858_v2  ;;  %v9705_v21 = vadd.f32 %v15312_v57, %v13030_v3  ;;  %v9696_v51 = vpop.f32.mrb[245].mxu1  ;;  %v15624_v31 = vld [vmem:[#allocation83_spill] sm:$0xff] }
 0x364   : > { %v8255_v46 = vadd.f32 %v15312_v57, %v8254_v9  ;;  %v12901_v7 = vpop.f32.mrb[246].mxu0  ;;  %v9984_v22 = vmax.f32 %v8542_v27, %v9856_v38  ;;  %v9697_v18 = vadd.f32 %v15312_v57, %v9696_v51  ;;  %v13031_v47 = vpop.f32.mrb[246].mxu1 }
 0x365   : > { %v8419_v55 = vmax.f32 %v8263_v29, 0.0  ;;  %v8266_v10 = vadd.f32 %v15312_v57, %v12901_v7  ;;  %v8257_v62 = vpop.f32.mrb[247].mxu0  ;;  %v12165_v35 = vpack.c.bf16 %v9986_v12, %v9985_v34  ;;  %v9861_v16 = vmax.f32 %v9705_v21, 0.0  ;;  %v9699_v30 = vpop.f32.mrb[247].mxu1  ;;  %v15625_v29 = vld [vmem:[#allocation84_spill] sm:$0xff]  ;;  %v15626_v21 = vld [vmem:[#allocation85_spill] sm:$0xff] }
 0x366   : > { %v8417_v14 = vmax.f32 %v8255_v46, 0.0  ;;  %v9708_v53 = vadd.f32 %v15312_v57, %v13031_v47  ;;  %v12160_v4 = vpack.c.bf16 %v9984_v22, %v9983_v52  ;;  %v9859_v13 = vmax.f32 %v9697_v18, 0.0 }
 0x367   : > { %v8547_v19 = vmax.f32 %v15620_v26, %v8419_v55  ;;  %v8420_v17 = vmax.f32 %v8266_v10, 0.0  ;;  %12253 = vst [vmem:[%s14970_s17 + $0x1c8] sm:$0xff] %v12165_v35   ;;  %v8258_v45 = vadd.f32 %v15312_v57, %v8257_v62  ;;  %v9700_v20 = vadd.f32 %v15312_v57, %v9699_v30  ;;  %v15627_v10 = vld [vmem:[#allocation86_spill] sm:$0xff] }
 0x368   : > { %v8545_v42 = vmax.f32 %v15621_v33, %v8417_v14  ;;  %12252 = vst [vmem:[%s14970_s17 + $0x1c0] sm:$0xff] %v12160_v4   ;;  %v9862_v1 = vmax.f32 %v9708_v53, 0.0 }
 0x369   : > { %v9989_v50 = vmax.f32 %v8547_v19, %v9861_v16  ;;  %v8548_v28 = vmax.f32 %v15622_v49, %v8420_v17  ;;  %v8418_v36 = vmax.f32 %v8258_v45, 0.0  ;;  %v9860_v5 = vmax.f32 %v9700_v20, 0.0 }
 0x36a   : > { %v9987_v56 = vmax.f32 %v8545_v42, %v9859_v13  ;;  %v12904_v25 = vpop.f32.mrb[248].mxu0  ;;  %v13034_v8 = vpop.f32.mrb[248].mxu1 }
 0x36b   : > { %v9990_v43 = vmax.f32 %v8548_v28, %v9862_v1  ;;  %v8279_v39 = vadd.f32 %v15312_v57, %v12904_v25  ;;  %v8270_v0 = vpop.f32.mrb[249].mxu0  ;;  %v8546_v60 = vmax.f32 %v15623_v37, %v8418_v36  ;;  %v9721_v23 = vadd.f32 %v15312_v57, %v13034_v8  ;;  %v9712_v48 = vpop.f32.mrb[249].mxu1  ;;  %v15628_v36 = vld [vmem:[#allocation87_spill] sm:$0xff]  ;;  %v15629_v8 = vld [vmem:[#allocation88_spill] sm:$0xff] }
 0x36c   : > { %v8271_v59 = vadd.f32 %v15312_v57, %v8270_v0  ;;  %v12905_v32 = vpop.f32.mrb[250].mxu0  ;;  %v9713_v40 = vadd.f32 %v15312_v57, %v9712_v48  ;;  %v13035_v24 = vpop.f32.mrb[250].mxu1  ;;  %v15630_v48 = vld [vmem:[#allocation89_spill] sm:$0xff] }
 0x36d   : > { %v12175_v54 = vpack.c.bf16 %v9990_v43, %v9989_v50  ;;  %v8423_v15 = vmax.f32 %v8279_v39, 0.0  ;;  %v8282_v6 = vadd.f32 %v15312_v57, %v12905_v32  ;;  %v8273_v58 = vpop.f32.mrb[251].mxu0  ;;  %v9988_v61 = vmax.f32 %v8546_v60, %v9860_v5  ;;  %v9715_v11 = vpop.f32.mrb[251].mxu1 }
 0x36e   : > { %v9865_v34 = vmax.f32 %v9721_v23, 0.0  ;;  %v8421_v63 = vmax.f32 %v8271_v59, 0.0  ;;  %v9724_v52 = vadd.f32 %v15312_v57, %v13035_v24  ;;  %v9863_v44 = vmax.f32 %v9713_v40, 0.0 }
 0x36f   : > { %12255 = vst [vmem:[%s14970_s17 + $0x1d8] sm:$0xff] %v12175_v54   ;;  %v8551_v2 = vmax.f32 %v15624_v31, %v8423_v15  ;;  %v8424_v41 = vmax.f32 %v8282_v6, 0.0  ;;  %v8274_v27 = vadd.f32 %v15312_v57, %v8273_v58  ;;  %v12170_v38 = vpack.c.bf16 %v9988_v61, %v9987_v56  ;;  %v15631_v15 = vld [vmem:[#allocation90_spill] sm:$0xff] }
 0x370   : > { %v8549_v3 = vmax.f32 %v15625_v29, %v8421_v63  ;;  %v9716_v9 = vadd.f32 %v15312_v57, %v9715_v11  ;;  %v9866_v51 = vmax.f32 %v9724_v52, 0.0 }
 0x371   : > { %v9993_v12 = vmax.f32 %v8551_v2, %v9865_v34  ;;  %v8552_v46 = vmax.f32 %v15626_v21, %v8424_v41  ;;  %v8422_v7 = vmax.f32 %v8274_v27, 0.0  ;;  %12254 = vst [vmem:[%s14970_s17 + $0x1d0] sm:$0xff] %v12170_v38  }
 0x372   : > { %v9991_v22 = vmax.f32 %v8549_v3, %v9863_v44  ;;  %v12908_v55 = vpop.f32.mrb[252].mxu0  ;;  %v9864_v62 = vmax.f32 %v9716_v9, 0.0  ;;  %v13038_v16 = vpop.f32.mrb[252].mxu1 }
 0x373   : > { %v9994_v18 = vmax.f32 %v8552_v46, %v9866_v51  ;;  %v8550_v47 = vmax.f32 %v15627_v10, %v8422_v7  ;;  %v8295_v35 = vadd.f32 %v15312_v57, %v12908_v55  ;;  %v8286_v14 = vpop.f32.mrb[253].mxu0  ;;  %v9737_v53 = vadd.f32 %v15312_v57, %v13038_v16  ;;  %v9728_v4 = vpop.f32.mrb[253].mxu1 }
 0x374   : > { %v8287_v30 = vadd.f32 %v15312_v57, %v8286_v14  ;;  %v12909_v26 = vpop.f32.mrb[254].mxu0  ;;  %v9729_v33 = vadd.f32 %v15312_v57, %v9728_v4  ;;  %v13039_v42 = vpop.f32.mrb[254].mxu1 }
 0x375   : > { %v12185_v19 = vpack.c.bf16 %v9994_v18, %v9993_v12  ;;  %v9992_v13 = vmax.f32 %v8550_v47, %v9864_v62  ;;  %v8427_v17 = vmax.f32 %v8295_v35, 0.0  ;;  %v8289_v45 = vpop.f32.mrb[255].mxu0  ;;  %v9869_v20 = vmax.f32 %v9737_v53, 0.0  ;;  %v9731_v1 = vpop.f32.mrb[255].mxu1 }
 0x376   : > { %v8425_v50 = vmax.f32 %v8287_v30, 0.0  ;;  %v8298_v49 = vadd.f32 %v15312_v57, %v12909_v26  ;;  %v9740_v28 = vadd.f32 %v15312_v57, %v13039_v42  ;;  %v9867_v43 = vmax.f32 %v9729_v33, 0.0 }
 0x377   : > { %12257 = vst [vmem:[%s14970_s17 + $0x1e8] sm:$0xff] %v12185_v19   ;;  %v12180_v56 = vpack.c.bf16 %v9992_v13, %v9991_v22  ;;  %v8555_v25 = vmax.f32 %v15628_v36, %v8427_v17  ;;  %v8290_v39 = vadd.f32 %v15312_v57, %v8289_v45  ;;  %v9732_v60 = vadd.f32 %v15312_v57, %v9731_v1 }
 0x378   : > { %v8553_v0 = vmax.f32 %v15629_v8, %v8425_v50  ;;  %v8428_v37 = vmax.f32 %v8298_v49, 0.0  ;;  %v9870_v54 = vmax.f32 %v9740_v28, 0.0 }
 0x379   : > { %12256 = vst [vmem:[%s14970_s17 + $0x1e0] sm:$0xff] %v12180_v56   ;;  %v9997_v5 = vmax.f32 %v8555_v25, %v9869_v20  ;;  %v8426_v23 = vmax.f32 %v8290_v39, 0.0  ;;  %v9868_v6 = vmax.f32 %v9732_v60, 0.0 }
 0x37a   : > { %v9995_v59 = vmax.f32 %v8553_v0, %v9867_v43  ;;  %v8556_v32 = vmax.f32 %v15630_v48, %v8428_v37 }
 0x37b   : > { %v8554_v40 = vmax.f32 %v15631_v15, %v8426_v23 }
 0x37c   : > { %v9998_v24 = vmax.f32 %v8556_v32, %v9870_v54 }
 0x37d   : > { %v9996_v58 = vmax.f32 %v8554_v40, %v9868_v6 }
 0x37e   : > { %v12195_v61 = vpack.c.bf16 %v9998_v24, %v9997_v5 }
 0x37f   : > { %v12190_v34 = vpack.c.bf16 %v9996_v58, %v9995_v59 }
 0x380   : > { %12259 = vst [vmem:[%s14970_s17 + $0x1f8] sm:$0xff] %v12195_v61  }
 0x381   : > { %12258 = vst [vmem:[%s14970_s17 + $0x1f0] sm:$0xff] %v12190_v34  }
 0x382 PF: > { %p10_p9 = scmp.ge.s32.totalorder %s13388_s16, 4   ;;  %s15632_s12 = smov %s13344_s13 }
 0x383   : > { %s15633_s13 = smov %s13397_s19  ;;  %s15634_s14 = smov %s13388_s16 }
 0x384   :  { %12 = sbr.rel (!%p10_p9) target bundleno = 2 (0x2), region = 126 }

// kernel: cnn_forward.5
= control target key start
LH: loop header
LB: loop body
LE: loop exit
PB: predicated region body
PF: predicated region fallthrough
CT: control target
= control target key end

     0   :  { %v4638_v0 = vmov 0   ;;  %vm237_vm0 = vcmask 130048   ;;  %s6348_s1 = inlined_call_operand.vmem [shape: bf16[144,128], index: 1, kind: input, shape index: {}]   ;;  %s6349_s0 = inlined_call_operand.vmem [shape: bf16[9,208,144], index: 0, kind: input, shape index: {}]   ;;  %s6350_s2 = inlined_call_operand.vmem [shape: f32[1,128], index: 2, kind: input, shape index: {}]   ;;  %s6351_s3 = inlined_call_operand.vmem [shape: bf16[208,128], index: 3, kind: output, shape index: {}]  }
   0x1   :  { %277 = vmatprep.subr.bf16.mxu0 %v4638_v0  ;;  %4248 = vmatprep.subr.bf16.mxu1 %v4638_v0  ;;  %v4664_v1 = vld [vmem:[%s6348_s1] sm:$0xff]   ;;  %v4671_v2 = vld [vmem:[%s6348_s1 + $0x8] sm:$0xff]   ;;  %v4680_v3 = vld [vmem:[%s6348_s1 + $0x10] sm:$0xff]  }
   0x2   :  { %278 = vmatpush1.bf16.msra.mxu0 %v4664_v1  ;;  %4257 = vmatpush1.bf16.msra.mxu1 %v4664_v1  ;;  %v4687_v4 = vld [vmem:[%s6348_s1 + $0x18] sm:$0xff]   ;;  %v4278_v5 = vld [vmem:[%s6349_s0 + $0x4] ss:$8 sps:$4 sm:$0xff]   ;;  %v4724_v9 = vld [vmem:[%s6348_s1 + $0x30] sm:$0xff]  }
   0x3   :  { %279 = vmatprep.subr.bf16.mxu0 %v4638_v0  ;;  %4249 = vmatprep.subr.bf16.mxu1 %v4638_v0  ;;  %v4281_v6 = vld [vmem:[%s6349_s0 + $0x74] ss:$8 sps:$4 sm:$0xff]   ;;  %v4706_v7 = vld [vmem:[%s6348_s1 + $0x20] sm:$0xff]   ;;  %v4715_v8 = vld [vmem:[%s6348_s1 + $0x28] sm:$0xff]  }
   0x4   :  { %3586 = vmatprep.mubr.msk.bf16.mxu0 %vm237_vm0, %v4278_v5  ;;  %3593 = vmatprep.mubr.msk.bf16.mxu1 %vm237_vm0, %v4281_v6  ;;  %v4733_v10 = vld [vmem:[%s6348_s1 + $0x38] sm:$0xff]   ;;  %v4742_v11 = vld [vmem:[%s6348_s1 + $0x40] sm:$0xff]  }
   0x5   :  { %v4276_v12 = vld [vmem:[%s6349_s0] ss:$8 sps:$4 sm:$0xff]   ;;  %v4279_v13 = vld [vmem:[%s6349_s0 + $0x70] ss:$8 sps:$4 sm:$0xff]   ;;  %v4282_v14 = vld [vmem:[%s6349_s0 + $0x14] ss:$8 sps:$4 sm:$0xff]  }
   0x6   :  { %280 = vmatpush1.bf16.msra.mxu0 %v4671_v2  ;;  %4258 = vmatpush1.bf16.msra.mxu1 %v4671_v2  ;;  %v4284_v15 = vld [vmem:[%s6349_s0 + $0x84] ss:$8 sps:$4 sm:$0xff]   ;;  %v4286_v16 = vld [vmem:[%s6349_s0 + $0x10] ss:$8 sps:$4 sm:$0xff]   ;;  %v4287_v17 = vld [vmem:[%s6349_s0 + $0x80] ss:$8 sps:$4 sm:$0xff]  }
   0x7   :  { %281 = vmatprep.subr.bf16.mxu0 %v4638_v0  ;;  %4250 = vmatprep.subr.bf16.mxu1 %v4638_v0  ;;  %v4288_v18 = vld [vmem:[%s6349_s0 + $0x24] ss:$8 sps:$4 sm:$0xff]   ;;  %v4290_v19 = vld [vmem:[%s6349_s0 + $0x94] ss:$8 sps:$4 sm:$0xff]   ;;  %v4292_v20 = vld [vmem:[%s6349_s0 + $0x20] ss:$8 sps:$4 sm:$0xff]  }
   0x8   :  { %v4293_v21 = vld [vmem:[%s6349_s0 + $0x90] ss:$8 sps:$4 sm:$0xff]   ;;  %v4294_v22 = vld [vmem:[%s6349_s0 + $0x34] ss:$8 sps:$4 sm:$0xff]   ;;  %v4296_v23 = vld [vmem:[%s6349_s0 + $0xa4] ss:$8 sps:$4 sm:$0xff]  }
   0x9   :  { %v4298_v24 = vld [vmem:[%s6349_s0 + $0x30] ss:$8 sps:$4 sm:$0xff]   ;;  %v4299_v25 = vld [vmem:[%s6349_s0 + $0xa0] ss:$8 sps:$4 sm:$0xff]   ;;  %v4300_v26 = vld [vmem:[%s6349_s0 + $0x44] ss:$8 sps:$4 sm:$0xff]  }
   0xa   :  { %282 = vmatpush1.bf16.msra.mxu0 %v4680_v3  ;;  %4259 = vmatpush1.bf16.msra.mxu1 %v4680_v3  ;;  %v4302_v27 = vld [vmem:[%s6349_s0 + $0xb4] ss:$8 sps:$4 sm:$0xff]   ;;  %v4304_v28 = vld [vmem:[%s6349_s0 + $0x40] ss:$8 sps:$4 sm:$0xff]   ;;  %v4305_v29 = vld [vmem:[%s6349_s0 + $0xb0] ss:$8 sps:$4 sm:$0xff]  }
   0xb   :  { %283 = vmatprep.subr.bf16.mxu0 %v4638_v0  ;;  %4251 = vmatprep.subr.bf16.mxu1 %v4638_v0  ;;  %v4306_v30 = vld [vmem:[%s6349_s0 + $0x54] ss:$8 sps:$4 sm:$0xff]   ;;  %v4308_v31 = vld [vmem:[%s6349_s0 + $0xc4] ss:$8 sps:$4 sm:$0xff]   ;;  %v4310_v32 = vld [vmem:[%s6349_s0 + $0x50] ss:$8 sps:$4 sm:$0xff]  }
   0xc   :  { %v4311_v33 = vld [vmem:[%s6349_s0 + $0xc0] ss:$8 sps:$4 sm:$0xff]   ;;  %v4312_v34 = vld [vmem:[%s6349_s0 + $0x64] ss:$8 sps:$4 sm:$0xff]   ;;  %v4316_v35 = vld [vmem:[%s6349_s0 + $0xd4] ss:$8 sps:$4 sm:$0xff]  }
   0xd   :  { %v4314_v36 = vld [vmem:[%s6349_s0 + $0xd0] ss:$8 sps:$4 sm:$0xff]   ;;  %v4317_v37 = vld [vmem:[%s6349_s0 + $0x60] ss:$8 sps:$4 sm:$0xff]   ;;  %v4318_v38 = vld [vmem:[%s6349_s0 + $0xe4] ss:$8 sps:$4 sm:$0xff]  }
   0xe   :  { %284 = vmatpush1.bf16.msra.mxu0 %v4687_v4  ;;  %4260 = vmatpush1.bf16.msra.mxu1 %v4687_v4  ;;  %v4322_v39 = vld [vmem:[%s6349_s0 + $0x1a4] ss:$8 sps:$4 sm:$0xff]   ;;  %v4320_v40 = vld [vmem:[%s6349_s0 + $0x1a0] ss:$8 sps:$4 sm:$0xff]   ;;  %v4324_v42 = vld [vmem:[%s6349_s0 + $0xf4] ss:$8 sps:$4 sm:$0xff]  }
   0xf   :  { %285 = vmatprep.subr.bf16.mxu0 %v4638_v0  ;;  %4252 = vmatprep.subr.bf16.mxu1 %v4638_v0  ;;  %v4323_v41 = vld [vmem:[%s6349_s0 + $0xe0] ss:$8 sps:$4 sm:$0xff]   ;;  %v4326_v43 = vld [vmem:[%s6349_s0 + $0x1b4] ss:$8 sps:$4 sm:$0xff]   ;;  %v4328_v44 = vld [vmem:[%s6349_s0 + $0xf0] ss:$8 sps:$4 sm:$0xff]  }
  0x10   :  { %v4329_v45 = vld [vmem:[%s6349_s0 + $0x1b0] ss:$8 sps:$4 sm:$0xff]   ;;  %v4330_v46 = vld [vmem:[%s6349_s0 + $0x104] ss:$8 sps:$4 sm:$0xff]   ;;  %v4334_v48 = vld [vmem:[%s6349_s0 + $0x100] ss:$8 sps:$4 sm:$0xff]  }
  0x11   :  { %v4332_v47 = vld [vmem:[%s6349_s0 + $0x1c4] ss:$8 sps:$4 sm:$0xff]   ;;  %v4335_v49 = vld [vmem:[%s6349_s0 + $0x1c0] ss:$8 sps:$4 sm:$0xff]   ;;  %v4336_v50 = vld [vmem:[%s6349_s0 + $0x114] ss:$8 sps:$4 sm:$0xff]  }
  0x12   :  { %286 = vmatpush1.bf16.msra.mxu0 %v4706_v7  ;;  %4261 = vmatpush1.bf16.msra.mxu1 %v4706_v7  ;;  %v4338_v51 = vld [vmem:[%s6349_s0 + $0x1d4] ss:$8 sps:$4 sm:$0xff]   ;;  %v4340_v52 = vld [vmem:[%s6349_s0 + $0x110] ss:$8 sps:$4 sm:$0xff]   ;;  %v4342_v54 = vld [vmem:[%s6349_s0 + $0x124] ss:$8 sps:$4 sm:$0xff]  }
  0x13   :  { %287 = vmatprep.subr.bf16.mxu0 %v4638_v0  ;;  %4253 = vmatprep.subr.bf16.mxu1 %v4638_v0  ;;  %v4341_v53 = vld [vmem:[%s6349_s0 + $0x1d0] ss:$8 sps:$4 sm:$0xff]   ;;  %v4344_v55 = vld [vmem:[%s6349_s0 + $0x1e4] ss:$8 sps:$4 sm:$0xff]   ;;  %v4346_v56 = vld [vmem:[%s6349_s0 + $0x120] ss:$8 sps:$4 sm:$0xff]  }
  0x14   :  { %v4347_v57 = vld [vmem:[%s6349_s0 + $0x1e0] ss:$8 sps:$4 sm:$0xff]   ;;  %v4348_v58 = vld [vmem:[%s6349_s0 + $0x134] ss:$8 sps:$4 sm:$0xff]   ;;  %v4352_v60 = vld [vmem:[%s6349_s0 + $0x130] ss:$8 sps:$4 sm:$0xff]  }
  0x15   :  { %v4350_v59 = vld [vmem:[%s6349_s0 + $0x1f4] ss:$8 sps:$4 sm:$0xff]   ;;  %v4353_v61 = vld [vmem:[%s6349_s0 + $0x1f0] ss:$8 sps:$4 sm:$0xff]   ;;  %v4354_v62 = vld [vmem:[%s6349_s0 + $0x144] ss:$8 sps:$4 sm:$0xff]  }
  0x16   :  { %288 = vmatpush1.bf16.msra.mxu0 %v4715_v8  ;;  %4262 = vmatpush1.bf16.msra.mxu1 %v4715_v8  ;;  %v4356_v63 = vld [vmem:[%s6349_s0 + $0x204] ss:$8 sps:$4 sm:$0xff]   ;;  %v4364_v5 = vld [vmem:[%s6349_s0 + $0x150] ss:$8 sps:$4 sm:$0xff]  }
  0x17   :  { %289 = vmatprep.subr.bf16.mxu0 %v4638_v0  ;;  %4254 = vmatprep.subr.bf16.mxu1 %v4638_v0  ;;  %v4365_v6 = vld [vmem:[%s6349_s0 + $0x210] ss:$8 sps:$4 sm:$0xff]  }
  0x1a   :  { %290 = vmatpush1.bf16.msra.mxu0 %v4724_v9  ;;  %4263 = vmatpush1.bf16.msra.mxu1 %v4724_v9 }
  0x1b   :  { %291 = vmatprep.subr.bf16.mxu0 %v4638_v0  ;;  %4255 = vmatprep.subr.bf16.mxu1 %v4638_v0 }
  0x1e   :  { %292 = vmatpush1.bf16.msra.mxu0 %v4733_v10  ;;  %4264 = vmatpush1.bf16.msra.mxu1 %v4733_v10 }
  0x1f   :  { %293 = vmatprep.subr.bf16.mxu0 %v4638_v0  ;;  %4256 = vmatprep.subr.bf16.mxu1 %v4638_v0 }
  0x22   :  { %294 = vmatpush1.bf16.msra.mxu0 %v4742_v11  ;;  %4265 = vmatpush1.bf16.msra.mxu1 %v4742_v11 }
  0x23   :  { %995 = vmatprep.subr.bf16.mxu0 %v4638_v0  ;;  %623 = vmatprep.subr.bf16.mxu1 %v4638_v0 }
  0x25   :  { %310 = vmatmul.mubr.bf16.vlgmr.msra.gmra.mrb[0].mxu0 %v4276_v12  ;;  %366 = vmatmul.mubr.bf16.vlgmr.msra.gmra.mrb[0].mxu1 %v4279_v13  ;;  %v4370_v12 = vld [vmem:[%s6349_s0 + $0x160] ss:$8 sps:$4 sm:$0xff]  }
  0x26   :  { %996 = vmatpush1.bf16.msra.mxu0 %v4664_v1  ;;  %3587 = vmatprep.mubr.msk.bf16.mxu0 %vm237_vm0, %v4282_v14  ;;  %v4371_v13 = vld [vmem:[%s6349_s0 + $0x220] ss:$8 sps:$4 sm:$0xff]   ;;  %v4372_v14 = vld [vmem:[%s6349_s0 + $0x174] ss:$8 sps:$4 sm:$0xff]  }
  0x27   :  { %3594 = vmatprep.mubr.msk.bf16.mxu1 %vm237_vm0, %v4284_v15  ;;  %624 = vmatpush1.bf16.msra.mxu1 %v4664_v1  ;;  %v4374_v15 = vld [vmem:[%s6349_s0 + $0x234] ss:$8 sps:$4 sm:$0xff]  }
  0x28   :  { %997 = vmatprep.subr.bf16.mxu0 %v4638_v0  ;;  %625 = vmatprep.subr.bf16.mxu1 %v4638_v0 }
  0x2a   :  { %998 = vmatpush1.bf16.msra.mxu0 %v4671_v2 }
  0x2b   :  { %626 = vmatpush1.bf16.msra.mxu1 %v4671_v2  ;;  %999 = vmatprep.subr.bf16.mxu0 %v4638_v0 }
  0x2c   :  { %627 = vmatprep.subr.bf16.mxu1 %v4638_v0 }
  0x2d   :  { %318 = vmatmul.mubr.bf16.gmra.mrb[4].mxu0 %v4286_v16  ;;  %374 = vmatmul.mubr.bf16.gmra.mrb[4].mxu1 %v4287_v17  ;;  %v4376_v16 = vld [vmem:[%s6349_s0 + $0x170] ss:$8 sps:$4 sm:$0xff]  }
  0x2e   :  { %1000 = vmatpush1.bf16.msra.mxu0 %v4680_v3  ;;  %3588 = vmatprep.mubr.msk.bf16.mxu0 %vm237_vm0, %v4288_v18  ;;  %v4377_v17 = vld [vmem:[%s6349_s0 + $0x230] ss:$8 sps:$4 sm:$0xff]   ;;  %v4378_v18 = vld [vmem:[%s6349_s0 + $0x184] ss:$8 sps:$4 sm:$0xff]  }
  0x2f   :  { %3595 = vmatprep.mubr.msk.bf16.mxu1 %vm237_vm0, %v4290_v19  ;;  %628 = vmatpush1.bf16.msra.mxu1 %v4680_v3  ;;  %v4380_v19 = vld [vmem:[%s6349_s0 + $0x244] ss:$8 sps:$4 sm:$0xff]  }
  0x30   :  { %1001 = vmatprep.subr.bf16.mxu0 %v4638_v0  ;;  %629 = vmatprep.subr.bf16.mxu1 %v4638_v0 }
  0x32   :  { %1002 = vmatpush1.bf16.msra.mxu0 %v4687_v4 }
  0x33   :  { %630 = vmatpush1.bf16.msra.mxu1 %v4687_v4  ;;  %1003 = vmatprep.subr.bf16.mxu0 %v4638_v0 }
  0x34   :  { %631 = vmatprep.subr.bf16.mxu1 %v4638_v0 }
  0x35   :  { %326 = vmatmul.mubr.bf16.gmra.mrb[8].mxu0 %v4292_v20  ;;  %382 = vmatmul.mubr.bf16.gmra.mrb[8].mxu1 %v4293_v21  ;;  %v4382_v20 = vld [vmem:[%s6349_s0 + $0x180] ss:$8 sps:$4 sm:$0xff]  }
  0x36   :  { %3589 = vmatprep.mubr.msk.bf16.mxu0 %vm237_vm0, %v4294_v22  ;;  %3596 = vmatprep.mubr.msk.bf16.mxu1 %vm237_vm0, %v4296_v23  ;;  %v4383_v21 = vld [vmem:[%s6349_s0 + $0x240] ss:$8 sps:$4 sm:$0xff]   ;;  %v4384_v22 = vld [vmem:[%s6349_s0 + $0x194] ss:$8 sps:$4 sm:$0xff]  }
  0x37   :  { %1004 = vmatpush1.bf16.msra.mxu0 %v4706_v7  ;;  %632 = vmatpush1.bf16.msra.mxu1 %v4706_v7  ;;  %v4386_v23 = vld [vmem:[%s6349_s0 + $0x254] ss:$8 sps:$4 sm:$0xff]  }
  0x38   :  { %633 = vmatprep.subr.bf16.mxu1 %v4638_v0  ;;  %1005 = vmatprep.subr.bf16.mxu0 %v4638_v0 }
  0x3b   :  { %634 = vmatpush1.bf16.msra.mxu1 %v4715_v8  ;;  %1006 = vmatpush1.bf16.msra.mxu0 %v4715_v8 }
  0x3c   :  { %635 = vmatprep.subr.bf16.mxu1 %v4638_v0  ;;  %1007 = vmatprep.subr.bf16.mxu0 %v4638_v0 }
  0x3d   :  { %334 = vmatmul.mubr.bf16.gmra.mrb[12].mxu0 %v4298_v24  ;;  %390 = vmatmul.mubr.bf16.gmra.mrb[12].mxu1 %v4299_v25  ;;  %v4388_v24 = vld [vmem:[%s6349_s0 + $0x190] ss:$8 sps:$4 sm:$0xff]  }
  0x3e   :  { %3590 = vmatprep.mubr.msk.bf16.mxu0 %vm237_vm0, %v4300_v26  ;;  %3597 = vmatprep.mubr.msk.bf16.mxu1 %vm237_vm0, %v4302_v27  ;;  %v4389_v25 = vld [vmem:[%s6349_s0 + $0x250] ss:$8 sps:$4 sm:$0xff]   ;;  %v4390_v26 = vld [vmem:[%s6349_s0 + $0x264] ss:$8 sps:$4 sm:$0xff]   ;;  %v4394_v27 = vld [vmem:[%s6349_s0 + $0x274] ss:$8 sps:$4 sm:$0xff]  }
  0x3f   :  { %636 = vmatpush1.bf16.msra.mxu1 %v4724_v9  ;;  %1008 = vmatpush1.bf16.msra.mxu0 %v4724_v9 }
  0x40   :  { %637 = vmatprep.subr.bf16.mxu1 %v4638_v0  ;;  %1009 = vmatprep.subr.bf16.mxu0 %v4638_v0 }
  0x43   :  { %638 = vmatpush1.bf16.msra.mxu1 %v4733_v10  ;;  %1010 = vmatpush1.bf16.msra.mxu0 %v4733_v10 }
  0x44   :  { %639 = vmatprep.subr.bf16.mxu1 %v4638_v0  ;;  %1011 = vmatprep.subr.bf16.mxu0 %v4638_v0 }
  0x45   :  { %342 = vmatmul.mubr.bf16.gmra.mrb[16].mxu0 %v4304_v28  ;;  %398 = vmatmul.mubr.bf16.gmra.mrb[16].mxu1 %v4305_v29  ;;  %v4392_v28 = vld [vmem:[%s6349_s0 + $0x270] ss:$8 sps:$4 sm:$0xff]   ;;  %v4395_v29 = vld [vmem:[%s6349_s0 + $0x260] ss:$8 sps:$4 sm:$0xff]  }
  0x46   :  { %3591 = vmatprep.mubr.msk.bf16.mxu0 %vm237_vm0, %v4306_v30  ;;  %3598 = vmatprep.mubr.msk.bf16.mxu1 %vm237_vm0, %v4308_v31  ;;  %v4396_v30 = vld [vmem:[%s6349_s0 + $0x284] ss:$8 sps:$4 sm:$0xff]  }
  0x47   :  { %640 = vmatpush1.bf16.msra.mxu1 %v4742_v11  ;;  %1012 = vmatpush1.bf16.msra.mxu0 %v4742_v11  ;;  %v4400_v31 = vld [vmem:[%s6349_s0 + $0x344] ss:$8 sps:$4 sm:$0xff]  }
  0x48   :  { %1367 = vmatprep.subr.bf16.mxu1 %v4638_v0  ;;  %1739 = vmatprep.subr.bf16.mxu0 %v4638_v0 }
  0x4d   :  { %350 = vmatmul.mubr.bf16.gmra.mrb[20].mxu0 %v4310_v32  ;;  %406 = vmatmul.mubr.bf16.gmra.mrb[20].mxu1 %v4311_v33  ;;  %v5105_v32 = vld [vmem:[%s6348_s1] sm:$0xff]  }
  0x4e   :  { %3592 = vmatprep.mubr.msk.bf16.mxu0 %vm237_vm0, %v4312_v34  ;;  %3651 = vmatprep.mubr.msk.bf16.mxu1 %vm237_vm0, %v4316_v35  ;;  %v4398_v33 = vld [vmem:[%s6349_s0 + $0x340] ss:$8 sps:$4 sm:$0xff]   ;;  %v4402_v35 = vld [vmem:[%s6349_s0 + $0x294] ss:$8 sps:$4 sm:$0xff]  }
  0x4f   :  { %v4401_v34 = vld [vmem:[%s6349_s0 + $0x280] ss:$8 sps:$4 sm:$0xff]  }
  0x55   :  { %358 = vmatmul.mubr.bf16.gmra.mrb[24].mxu0 %v4317_v37  ;;  %656 = vmatmul.mubr.bf16.vlgmr.msra.gmra.mrb[24].mxu1 %v4314_v36  ;;  %v4404_v36 = vld [vmem:[%s6349_s0 + $0x354] ss:$8 sps:$4 sm:$0xff]   ;;  %v5124_v37 = vld [vmem:[%s6348_s1 + $0x8] sm:$0xff]  }
  0x56   :  { %3652 = vmatprep.mubr.msk.bf16.mxu1 %vm237_vm0, %v4318_v38  ;;  %3716 = vmatprep.mubr.msk.bf16.mxu0 %vm237_vm0, %v4322_v39  ;;  %v5135_v38 = vld [vmem:[%s6348_s1 + $0x10] sm:$0xff]  }
  0x57   :  { %1368 = vmatpush1.bf16.msra.mxu1 %v4664_v1  ;;  %v4406_v39 = vld [vmem:[%s6349_s0 + $0x290] ss:$8 sps:$4 sm:$0xff]  }
  0x58   :  { %1369 = vmatprep.subr.bf16.mxu1 %v4638_v0 }
  0x5b   :  { %1370 = vmatpush1.bf16.msra.mxu1 %v4671_v2 }
  0x5c   :  { %1371 = vmatprep.subr.bf16.mxu1 %v4638_v0 }
  0x5d   :  { %664 = vmatmul.mubr.bf16.gmra.mrb[28].mxu1 %v4323_v41  ;;  %1028 = vmatmul.mubr.bf16.vlgmr.msra.gmra.mrb[28].mxu0 %v4320_v40  ;;  %v4407_v40 = vld [vmem:[%s6349_s0 + $0x350] ss:$8 sps:$4 sm:$0xff]   ;;  %v4408_v41 = vld [vmem:[%s6349_s0 + $0x2a4] ss:$8 sps:$4 sm:$0xff]  }
  0x5e   :  { %1740 = vmatpush1.bf16.msra.mxu0 %v4664_v1  ;;  %3653 = vmatprep.mubr.msk.bf16.mxu1 %vm237_vm0, %v4324_v42  ;;  %v4358_v1 = vld [vmem:[%s6349_s0 + $0x140] ss:$8 sps:$4 sm:$0xff]   ;;  %v4410_v42 = vld [vmem:[%s6349_s0 + $0x364] ss:$8 sps:$4 sm:$0xff]  }
  0x5f   :  { %3717 = vmatprep.mubr.msk.bf16.mxu0 %vm237_vm0, %v4326_v43  ;;  %1741 = vmatprep.subr.bf16.mxu0 %v4638_v0  ;;  %v5156_v43 = vld [vmem:[%s6348_s1 + $0x18] sm:$0xff]  }
  0x60   :  { %1372 = vmatpush1.bf16.msra.mxu1 %v4680_v3 }
  0x61   :  { %1373 = vmatprep.subr.bf16.mxu1 %v4638_v0 }
  0x62   :  { %1742 = vmatpush1.bf16.msra.mxu0 %v4671_v2  ;;  %v4359_v2 = vld [vmem:[%s6349_s0 + $0x200] ss:$8 sps:$4 sm:$0xff]  }
  0x63   :  { %1743 = vmatprep.subr.bf16.mxu0 %v4638_v0 }
  0x64   :  { %1374 = vmatpush1.bf16.msra.mxu1 %v4687_v4 }
  0x65   :  { %672 = vmatmul.mubr.bf16.gmra.mrb[32].mxu1 %v4328_v44  ;;  %1036 = vmatmul.mubr.bf16.gmra.mrb[32].mxu0 %v4329_v45  ;;  %v5167_v44 = vld [vmem:[%s6348_s1 + $0x20] sm:$0xff]  }
  0x66   :  { %3654 = vmatprep.mubr.msk.bf16.mxu1 %vm237_vm0, %v4330_v46  ;;  %3718 = vmatprep.mubr.msk.bf16.mxu0 %vm237_vm0, %v4332_v47  ;;  %v4412_v45 = vld [vmem:[%s6349_s0 + $0x2a0] ss:$8 sps:$4 sm:$0xff]   ;;  %v4414_v47 = vld [vmem:[%s6349_s0 + $0x2b4] ss:$8 sps:$4 sm:$0xff]  }
  0x67   :  { %1744 = vmatpush1.bf16.msra.mxu0 %v4680_v3  ;;  %1375 = vmatprep.subr.bf16.mxu1 %v4638_v0  ;;  %v4360_v3 = vld [vmem:[%s6349_s0 + $0x154] ss:$8 sps:$4 sm:$0xff]   ;;  %v4413_v46 = vld [vmem:[%s6349_s0 + $0x360] ss:$8 sps:$4 sm:$0xff]  }
  0x68   :  { %1745 = vmatprep.subr.bf16.mxu0 %v4638_v0  ;;  %1376 = vmatpush1.bf16.msra.mxu1 %v4706_v7 }
  0x69   :  { %1377 = vmatprep.subr.bf16.mxu1 %v4638_v0 }
  0x6b   :  { %1746 = vmatpush1.bf16.msra.mxu0 %v4687_v4  ;;  %v4362_v4 = vld [vmem:[%s6349_s0 + $0x214] ss:$8 sps:$4 sm:$0xff]  }
  0x6c   :  { %1747 = vmatprep.subr.bf16.mxu0 %v4638_v0  ;;  %1378 = vmatpush1.bf16.msra.mxu1 %v4715_v8 }
  0x6d   :  { %680 = vmatmul.mubr.bf16.gmra.mrb[36].mxu1 %v4334_v48  ;;  %1044 = vmatmul.mubr.bf16.gmra.mrb[36].mxu0 %v4335_v49  ;;  %v4416_v48 = vld [vmem:[%s6349_s0 + $0x374] ss:$8 sps:$4 sm:$0xff]   ;;  %v5188_v49 = vld [vmem:[%s6348_s1 + $0x28] sm:$0xff]  }
  0x6e   :  { %3655 = vmatprep.mubr.msk.bf16.mxu1 %vm237_vm0, %v4336_v50  ;;  %3719 = vmatprep.mubr.msk.bf16.mxu0 %vm237_vm0, %v4338_v51  ;;  %v4418_v50 = vld [vmem:[%s6349_s0 + $0x2b0] ss:$8 sps:$4 sm:$0xff]  }
  0x6f   :  { %1748 = vmatpush1.bf16.msra.mxu0 %v4706_v7  ;;  %1379 = vmatprep.subr.bf16.mxu1 %v4638_v0  ;;  %v4366_v7 = vld [vmem:[%s6349_s0 + $0x164] ss:$8 sps:$4 sm:$0xff]   ;;  %v4419_v51 = vld [vmem:[%s6349_s0 + $0x370] ss:$8 sps:$4 sm:$0xff]  }
  0x70   :  { %1749 = vmatprep.subr.bf16.mxu0 %v4638_v0  ;;  %1380 = vmatpush1.bf16.msra.mxu1 %v4724_v9 }
  0x71   :  { %1381 = vmatprep.subr.bf16.mxu1 %v4638_v0 }
  0x73   :  { %1750 = vmatpush1.bf16.msra.mxu0 %v4715_v8  ;;  %v4368_v8 = vld [vmem:[%s6349_s0 + $0x224] ss:$8 sps:$4 sm:$0xff]  }
  0x74   :  { %1751 = vmatprep.subr.bf16.mxu0 %v4638_v0  ;;  %1382 = vmatpush1.bf16.msra.mxu1 %v4733_v10 }
  0x75   :  { %688 = vmatmul.mubr.bf16.gmra.mrb[40].mxu1 %v4340_v52  ;;  %1052 = vmatmul.mubr.bf16.gmra.mrb[40].mxu0 %v4341_v53  ;;  %v4420_v52 = vld [vmem:[%s6349_s0 + $0x2c4] ss:$8 sps:$4 sm:$0xff]  }
  0x76   :  { %3656 = vmatprep.mubr.msk.bf16.mxu1 %vm237_vm0, %v4342_v54  ;;  %3720 = vmatprep.mubr.msk.bf16.mxu0 %vm237_vm0, %v4344_v55  ;;  %v4422_v53 = vld [vmem:[%s6349_s0 + $0x384] ss:$8 sps:$4 sm:$0xff]   ;;  %v4425_v54 = vld [vmem:[%s6349_s0 + $0x380] ss:$8 sps:$4 sm:$0xff]   ;;  %v4426_v55 = vld [vmem:[%s6349_s0 + $0x2d4] ss:$8 sps:$4 sm:$0xff]  }
  0x77   :  { %1752 = vmatpush1.bf16.msra.mxu0 %v4724_v9  ;;  %1383 = vmatprep.subr.bf16.mxu1 %v4638_v0 }
  0x78   :  { %1753 = vmatprep.subr.bf16.mxu0 %v4638_v0  ;;  %1384 = vmatpush1.bf16.msra.mxu1 %v4742_v11 }
  0x79   :  { %2111 = vmatprep.subr.bf16.mxu1 %v4638_v0 }
  0x7b   :  { %1754 = vmatpush1.bf16.msra.mxu0 %v4733_v10 }
  0x7c   :  { %1755 = vmatprep.subr.bf16.mxu0 %v4638_v0 }
  0x7d   :  { %696 = vmatmul.mubr.bf16.gmra.mrb[44].mxu1 %v4346_v56  ;;  %1060 = vmatmul.mubr.bf16.gmra.mrb[44].mxu0 %v4347_v57  ;;  %v4428_v56 = vld [vmem:[%s6349_s0 + $0x394] ss:$8 sps:$4 sm:$0xff]   ;;  %v5249_v57 = vld [vmem:[%s6348_s1 + $0x40] sm:$0xff]  }
  0x7e   :  { %3657 = vmatprep.mubr.msk.bf16.mxu1 %vm237_vm0, %v4348_v58  ;;  %3721 = vmatprep.mubr.msk.bf16.mxu0 %vm237_vm0, %v4350_v59  ;;  %v4430_v58 = vld [vmem:[%s6349_s0 + $0x2d0] ss:$8 sps:$4 sm:$0xff]  }
  0x7f   :  { %1756 = vmatpush1.bf16.msra.mxu0 %v4742_v11  ;;  %v4431_v59 = vld [vmem:[%s6349_s0 + $0x390] ss:$8 sps:$4 sm:$0xff]  }
  0x80   :  { %2483 = vmatprep.subr.bf16.mxu0 %v4638_v0 }
  0x85   :  { %704 = vmatmul.mubr.bf16.gmra.mrb[48].mxu1 %v4352_v60  ;;  %1068 = vmatmul.mubr.bf16.gmra.mrb[48].mxu0 %v4353_v61  ;;  %v4432_v60 = vld [vmem:[%s6349_s0 + $0x2e4] ss:$8 sps:$4 sm:$0xff]  }
  0x86   :  { %3658 = vmatprep.mubr.msk.bf16.mxu1 %vm237_vm0, %v4354_v62  ;;  %3722 = vmatprep.mubr.msk.bf16.mxu0 %vm237_vm0, %v4356_v63  ;;  %v4434_v61 = vld [vmem:[%s6349_s0 + $0x3a4] ss:$8 sps:$4 sm:$0xff]   ;;  %v4436_v62 = vld [vmem:[%s6349_s0 + $0x2e0] ss:$8 sps:$4 sm:$0xff]  }
  0x87   :  { %v4437_v63 = vld [vmem:[%s6349_s0 + $0x3a0] ss:$8 sps:$4 sm:$0xff]  }
  0x8d   :  { %712 = vmatmul.mubr.bf16.gmra.mrb[52].mxu1 %v4358_v1  ;;  %1076 = vmatmul.mubr.bf16.gmra.mrb[52].mxu0 %v4359_v2  ;;  %v4438_v1 = vld [vmem:[%s6349_s0 + $0x2f4] ss:$8 sps:$4 sm:$0xff]  }
  0x8e   :  { %3659 = vmatprep.mubr.msk.bf16.mxu1 %vm237_vm0, %v4360_v3  ;;  %3723 = vmatprep.mubr.msk.bf16.mxu0 %vm237_vm0, %v4362_v4  ;;  %v4440_v2 = vld [vmem:[%s6349_s0 + $0x3b4] ss:$8 sps:$4 sm:$0xff]  }
  0x95   :  { %720 = vmatmul.mubr.bf16.gmra.mrb[56].mxu1 %v4364_v5  ;;  %1084 = vmatmul.mubr.bf16.gmra.mrb[56].mxu0 %v4365_v6 }
  0x96   :  { %3660 = vmatprep.mubr.msk.bf16.mxu1 %vm237_vm0, %v4366_v7  ;;  %3724 = vmatprep.mubr.msk.bf16.mxu0 %vm237_vm0, %v4368_v8  ;;  %v4442_v7 = vld [vmem:[%s6349_s0 + $0x2f0] ss:$8 sps:$4 sm:$0xff]  }
  0x97   :  { %v4443_v8 = vld [vmem:[%s6349_s0 + $0x3b0] ss:$8 sps:$4 sm:$0xff]  }
  0x9d   :  { %728 = vmatmul.mubr.bf16.gmra.mrb[60].mxu1 %v4370_v12  ;;  %1092 = vmatmul.mubr.bf16.gmra.mrb[60].mxu0 %v4371_v13 }
  0x9e   :  { %3661 = vmatprep.mubr.msk.bf16.mxu1 %vm237_vm0, %v4372_v14  ;;  %3725 = vmatprep.mubr.msk.bf16.mxu0 %vm237_vm0, %v4374_v15  ;;  %v4444_v14 = vld [vmem:[%s6349_s0 + $0x304] ss:$8 sps:$4 sm:$0xff]  }
  0x9f   :  { %v4446_v15 = vld [vmem:[%s6349_s0 + $0x3c4] ss:$8 sps:$4 sm:$0xff]  }
  0xa5   :  { %736 = vmatmul.mubr.bf16.gmra.mrb[64].mxu1 %v4376_v16  ;;  %1100 = vmatmul.mubr.bf16.gmra.mrb[64].mxu0 %v4377_v17 }
  0xa6   :  { %3662 = vmatprep.mubr.msk.bf16.mxu1 %vm237_vm0, %v4378_v18  ;;  %3726 = vmatprep.mubr.msk.bf16.mxu0 %vm237_vm0, %v4380_v19 }
  0xad   :  { %744 = vmatmul.mubr.bf16.gmra.mrb[68].mxu1 %v4382_v20  ;;  %1108 = vmatmul.mubr.bf16.gmra.mrb[68].mxu0 %v4383_v21 }
  0xae   :  { %3663 = vmatprep.mubr.msk.bf16.mxu1 %vm237_vm0, %v4384_v22  ;;  %3727 = vmatprep.mubr.msk.bf16.mxu0 %vm237_vm0, %v4386_v23  ;;  %v4448_v22 = vld [vmem:[%s6349_s0 + $0x300] ss:$8 sps:$4 sm:$0xff]  }
  0xaf   :  { %v4449_v23 = vld [vmem:[%s6349_s0 + $0x3c0] ss:$8 sps:$4 sm:$0xff]  }
  0xb5   :  { %752 = vmatmul.mubr.bf16.gmra.mrb[72].mxu1 %v4388_v24  ;;  %1116 = vmatmul.mubr.bf16.gmra.mrb[72].mxu0 %v4389_v25 }
  0xb6   :  { %3728 = vmatprep.mubr.msk.bf16.mxu0 %vm237_vm0, %v4390_v26  ;;  %3781 = vmatprep.mubr.msk.bf16.mxu1 %vm237_vm0, %v4394_v27  ;;  %v4450_v26 = vld [vmem:[%s6349_s0 + $0x314] ss:$8 sps:$4 sm:$0xff]  }
  0xb7   :  { %v4452_v27 = vld [vmem:[%s6349_s0 + $0x3d4] ss:$8 sps:$4 sm:$0xff]  }
  0xbd   :  { %1124 = vmatmul.mubr.bf16.gmra.mrb[76].mxu0 %v4395_v29  ;;  %1400 = vmatmul.mubr.bf16.vlgmr.msra.gmra.mrb[76].mxu1 %v4392_v28 }
  0xbe   :  { %3782 = vmatprep.mubr.msk.bf16.mxu1 %vm237_vm0, %v4396_v30  ;;  %3846 = vmatprep.mubr.msk.bf16.mxu0 %vm237_vm0, %v4400_v31 }
  0xbf   :  { %2112 = vmatpush1.bf16.msra.mxu1 %v5105_v32 }
  0xc0   :  { %2113 = vmatprep.subr.bf16.mxu1 %v4638_v0 }
  0xc3   :  { %2114 = vmatpush1.bf16.msra.mxu1 %v5124_v37 }
  0xc4   :  { %2115 = vmatprep.subr.bf16.mxu1 %v4638_v0 }
  0xc5   :  { %1408 = vmatmul.mubr.bf16.gmra.mrb[80].mxu1 %v4401_v34  ;;  %1772 = vmatmul.mubr.bf16.vlgmr.msra.gmra.mrb[80].mxu0 %v4398_v33 }
  0xc6   :  { %2484 = vmatpush1.bf16.msra.mxu0 %v5105_v32  ;;  %3783 = vmatprep.mubr.msk.bf16.mxu1 %vm237_vm0, %v4402_v35  ;;  %v4454_v35 = vld [vmem:[%s6349_s0 + $0x310] ss:$8 sps:$4 sm:$0xff]  }
  0xc7   :  { %3847 = vmatprep.mubr.msk.bf16.mxu0 %vm237_vm0, %v4404_v36  ;;  %2485 = vmatprep.subr.bf16.mxu0 %v4638_v0  ;;  %v4455_v36 = vld [vmem:[%s6349_s0 + $0x3d0] ss:$8 sps:$4 sm:$0xff]  }
  0xc8   :  { %2116 = vmatpush1.bf16.msra.mxu1 %v5135_v38 }
  0xc9   :  { %2117 = vmatprep.subr.bf16.mxu1 %v4638_v0 }
  0xca   :  { %2486 = vmatpush1.bf16.msra.mxu0 %v5124_v37 }
  0xcb   :  { %2487 = vmatprep.subr.bf16.mxu0 %v4638_v0 }
  0xcc   :  { %2118 = vmatpush1.bf16.msra.mxu1 %v5156_v43 }
  0xcd   :  { %1416 = vmatmul.mubr.bf16.gmra.mrb[84].mxu1 %v4406_v39  ;;  %1780 = vmatmul.mubr.bf16.gmra.mrb[84].mxu0 %v4407_v40 }
  0xce   :  { %3784 = vmatprep.mubr.msk.bf16.mxu1 %vm237_vm0, %v4408_v41  ;;  %3848 = vmatprep.mubr.msk.bf16.mxu0 %vm237_vm0, %v4410_v42  ;;  %v4456_v41 = vld [vmem:[%s6349_s0 + $0x324] ss:$8 sps:$4 sm:$0xff]  }
  0xcf   :  { %2488 = vmatpush1.bf16.msra.mxu0 %v5135_v38  ;;  %2119 = vmatprep.subr.bf16.mxu1 %v4638_v0  ;;  %v4458_v42 = vld [vmem:[%s6349_s0 + $0x3e4] ss:$8 sps:$4 sm:$0xff]  }
  0xd0   :  { %2489 = vmatprep.subr.bf16.mxu0 %v4638_v0  ;;  %2120 = vmatpush1.bf16.msra.mxu1 %v5167_v44 }
  0xd1   :  { %2121 = vmatprep.subr.bf16.mxu1 %v4638_v0 }
  0xd3   :  { %2490 = vmatpush1.bf16.msra.mxu0 %v5156_v43 }
  0xd4   :  { %2491 = vmatprep.subr.bf16.mxu0 %v4638_v0  ;;  %2122 = vmatpush1.bf16.msra.mxu1 %v5188_v49 }
  0xd5   :  { %1424 = vmatmul.mubr.bf16.gmra.mrb[88].mxu1 %v4412_v45  ;;  %1788 = vmatmul.mubr.bf16.gmra.mrb[88].mxu0 %v4413_v46 }
  0xd6   :  { %3785 = vmatprep.mubr.msk.bf16.mxu1 %vm237_vm0, %v4414_v47  ;;  %3849 = vmatprep.mubr.msk.bf16.mxu0 %vm237_vm0, %v4416_v48 }
  0xd7   :  { %2492 = vmatpush1.bf16.msra.mxu0 %v5167_v44  ;;  %2123 = vmatprep.subr.bf16.mxu1 %v4638_v0 }
  0xd8   :  { %2493 = vmatprep.subr.bf16.mxu0 %v4638_v0  ;;  %2124 = vmatpush1.bf16.msra.mxu1 %v4724_v9  ;;  %v5218_v9 = vld [vmem:[%s6348_s1 + $0x30] sm:$0xff]  }
  0xd9   :  { %2125 = vmatprep.subr.bf16.mxu1 %v4638_v0 }
  0xdb   :  { %2494 = vmatpush1.bf16.msra.mxu0 %v5188_v49 }
  0xdc   :  { %2495 = vmatprep.subr.bf16.mxu0 %v4638_v0  ;;  %2126 = vmatpush1.bf16.msra.mxu1 %v4733_v10  ;;  %v4424_v10 = vld [vmem:[%s6349_s0 + $0x2c0] ss:$8 sps:$4 sm:$0xff]  }
  0xdd   :  { %1432 = vmatmul.mubr.bf16.gmra.mrb[92].mxu1 %v4418_v50  ;;  %1796 = vmatmul.mubr.bf16.gmra.mrb[92].mxu0 %v4419_v51 }
  0xde   :  { %3786 = vmatprep.mubr.msk.bf16.mxu1 %vm237_vm0, %v4420_v52  ;;  %3850 = vmatprep.mubr.msk.bf16.mxu0 %vm237_vm0, %v4422_v53  ;;  %v4460_v52 = vld [vmem:[%s6349_s0 + $0x320] ss:$8 sps:$4 sm:$0xff]  }
  0xdf   :  { %2496 = vmatpush1.bf16.msra.mxu0 %v5218_v9  ;;  %2127 = vmatprep.subr.bf16.mxu1 %v4638_v0  ;;  %v4461_v53 = vld [vmem:[%s6349_s0 + $0x3e0] ss:$8 sps:$4 sm:$0xff]  }
  0xe0   :  { %2497 = vmatprep.subr.bf16.mxu0 %v4638_v0  ;;  %2128 = vmatpush1.bf16.msra.mxu1 %v4742_v11  ;;  %v5240_v11 = vld [vmem:[%s6348_s1 + $0x38] sm:$0xff]  }
  0xe1   :  { %2855 = vmatprep.subr.bf16.mxu1 %v4638_v0 }
  0xe3   :  { %2498 = vmatpush1.bf16.msra.mxu0 %v5240_v11 }
  0xe4   :  { %2499 = vmatprep.subr.bf16.mxu0 %v4638_v0 }
  0xe5   :  { %1440 = vmatmul.mubr.bf16.gmra.mrb[96].mxu1 %v4424_v10  ;;  %1804 = vmatmul.mubr.bf16.gmra.mrb[96].mxu0 %v4425_v54 }
  0xe6   :  { %3787 = vmatprep.mubr.msk.bf16.mxu1 %vm237_vm0, %v4426_v55  ;;  %3851 = vmatprep.mubr.msk.bf16.mxu0 %vm237_vm0, %v4428_v56  ;;  %v4462_v55 = vld [vmem:[%s6349_s0 + $0x334] ss:$8 sps:$4 sm:$0xff]  }
  0xe7   :  { %2500 = vmatpush1.bf16.msra.mxu0 %v5249_v57  ;;  %v4464_v56 = vld [vmem:[%s6349_s0 + $0x3f4] ss:$8 sps:$4 sm:$0xff]  }
  0xe8   :  { %3227 = vmatprep.subr.bf16.mxu0 %v4638_v0 }
  0xed   :  { %1448 = vmatmul.mubr.bf16.gmra.mrb[100].mxu1 %v4430_v58  ;;  %1812 = vmatmul.mubr.bf16.gmra.mrb[100].mxu0 %v4431_v59 }
  0xee   :  { %3788 = vmatprep.mubr.msk.bf16.mxu1 %vm237_vm0, %v4432_v60  ;;  %3852 = vmatprep.mubr.msk.bf16.mxu0 %vm237_vm0, %v4434_v61 }
  0xf5   :  { %1456 = vmatmul.mubr.bf16.gmra.mrb[104].mxu1 %v4436_v62  ;;  %1820 = vmatmul.mubr.bf16.gmra.mrb[104].mxu0 %v4437_v63 }
  0xf6   :  { %3789 = vmatprep.mubr.msk.bf16.mxu1 %vm237_vm0, %v4438_v1  ;;  %3853 = vmatprep.mubr.msk.bf16.mxu0 %vm237_vm0, %v4440_v2  ;;  %v4466_v1 = vld [vmem:[%s6349_s0 + $0x330] ss:$8 sps:$4 sm:$0xff]  }
  0xf7   :  { %v4467_v2 = vld [vmem:[%s6349_s0 + $0x3f0] ss:$8 sps:$4 sm:$0xff]  }
  0xf8   :  { %v5281_v3 = vpop.f32.mrb[0].mxu0  ;;  %v5283_v4 = vpop.f32.mrb[0].mxu1 }
  0xf9   :  { %v313_v5 = vpop.f32.mrb[1].mxu0  ;;  %v369_v6 = vpop.f32.mrb[1].mxu1 }
  0xfa   :  { %v5291_v12 = vpop.f32.mrb[2].mxu0  ;;  %v5293_v13 = vpop.f32.mrb[2].mxu1 }
  0xfb   :  { %v316_v16 = vpop.f32.mrb[3].mxu0  ;;  %v372_v17 = vpop.f32.mrb[3].mxu1 }
  0xfd   :  { %1464 = vmatmul.mubr.bf16.gmra.mrb[108].mxu1 %v4442_v7  ;;  %1828 = vmatmul.mubr.bf16.gmra.mrb[108].mxu0 %v4443_v8  ;;  %v4468_v7 = vld [vmem:[%s6349_s0 + $0x404] ss:$8 sps:$4 sm:$0xff]   ;;  %v4472_v8 = vld [vmem:[%s6349_s0 + $0x414] ss:$8 sps:$4 sm:$0xff]  }
  0xfe   :  { %3790 = vmatprep.mubr.msk.bf16.mxu1 %vm237_vm0, %v4444_v14  ;;  %3854 = vmatprep.mubr.msk.bf16.mxu0 %vm237_vm0, %v4446_v15 }
 0x100   :  { %v5303_v18 = vpop.f32.mrb[4].mxu0  ;;  %v5305_v19 = vpop.f32.mrb[4].mxu1 }
 0x101   :  { %v321_v20 = vpop.f32.mrb[5].mxu0  ;;  %v377_v21 = vpop.f32.mrb[5].mxu1 }
 0x102   :  { %v5313_v24 = vpop.f32.mrb[6].mxu0  ;;  %v5315_v25 = vpop.f32.mrb[6].mxu1  ;;  %v4470_v21 = vld [vmem:[%s6349_s0 + $0x410] ss:$8 sps:$4 sm:$0xff]  }
 0x103   :  { %v324_v28 = vpop.f32.mrb[7].mxu0  ;;  %v380_v29 = vpop.f32.mrb[7].mxu1 }
 0x104   :  { %v4474_v28 = vld [vmem:[%s6349_s0 + $0x424] ss:$8 sps:$4 sm:$0xff]  }
 0x105   :  { %1472 = vmatmul.mubr.bf16.gmra.mrb[112].mxu1 %v4448_v22  ;;  %1836 = vmatmul.mubr.bf16.gmra.mrb[112].mxu0 %v4449_v23  ;;  %v4473_v23 = vld [vmem:[%s6349_s0 + $0x400] ss:$8 sps:$4 sm:$0xff]   ;;  %v4478_v29 = vld [vmem:[%s6349_s0 + $0x4e4] ss:$8 sps:$4 sm:$0xff]  }
 0x106   :  { %3791 = vmatprep.mubr.msk.bf16.mxu1 %vm237_vm0, %v4450_v26  ;;  %3855 = vmatprep.mubr.msk.bf16.mxu0 %vm237_vm0, %v4452_v27 }
 0x108   :  { %v5325_v30 = vpop.f32.mrb[8].mxu0  ;;  %v5327_v31 = vpop.f32.mrb[8].mxu1 }
 0x109   :  { %v329_v33 = vpop.f32.mrb[9].mxu0  ;;  %v385_v34 = vpop.f32.mrb[9].mxu1 }
 0x10a   :  { %v5335_v39 = vpop.f32.mrb[10].mxu0  ;;  %v5337_v40 = vpop.f32.mrb[10].mxu1 }
 0x10b   :  { %v332_v45 = vpop.f32.mrb[11].mxu0  ;;  %v388_v46 = vpop.f32.mrb[11].mxu1 }
 0x10d   :  { %1480 = vmatmul.mubr.bf16.gmra.mrb[116].mxu1 %v4454_v35  ;;  %1844 = vmatmul.mubr.bf16.gmra.mrb[116].mxu0 %v4455_v36  ;;  %v5414_v35 = vld [vmem:[%s6350_s2] ss:$0 sm:$0xff] }
 0x10e   :  { %3792 = vmatprep.mubr.msk.bf16.mxu1 %vm237_vm0, %v4456_v41  ;;  %3856 = vmatprep.mubr.msk.bf16.mxu0 %vm237_vm0, %v4458_v42  ;;  %v312_v36 = vadd.f32 %v5414_v35, %v5281_v3  ;;  %v315_v45 = vadd.f32 %v5414_v35, %v5291_v12  ;;  %v4479_v3 = vld [vmem:[%s6349_s0 + $0x420] ss:$8 sps:$4 sm:$0xff]  }
 0x110   :  { %v5347_v47 = vpop.f32.mrb[12].mxu0  ;;  %v5349_v48 = vpop.f32.mrb[12].mxu1  ;;  %v414_v12 = vmax.f32 %v312_v36, 0.0 }
 0x111   :  { %v337_v50 = vpop.f32.mrb[13].mxu0  ;;  %v393_v51 = vpop.f32.mrb[13].mxu1 }
 0x112   :  { %v5357_v10 = vpop.f32.mrb[14].mxu0  ;;  %v5359_v54 = vpop.f32.mrb[14].mxu1 }
 0x113   :  { %v340_v58 = vpop.f32.mrb[15].mxu0  ;;  %v396_v59 = vpop.f32.mrb[15].mxu1 }
 0x115   :  { %1488 = vmatmul.mubr.bf16.gmra.mrb[120].mxu1 %v4460_v52  ;;  %1852 = vmatmul.mubr.bf16.gmra.mrb[120].mxu0 %v4461_v53  ;;  %v4476_v52 = vld [vmem:[%s6349_s0 + $0x4e0] ss:$8 sps:$4 sm:$0xff]  }
 0x116   :  { %3793 = vmatprep.mubr.msk.bf16.mxu1 %vm237_vm0, %v4462_v55  ;;  %3857 = vmatprep.mubr.msk.bf16.mxu0 %vm237_vm0, %v4464_v56  ;;  %v4480_v56 = vld [vmem:[%s6349_s0 + $0x434] ss:$8 sps:$4 sm:$0xff]  }
 0x118   :  { %v5369_v60 = vpop.f32.mrb[16].mxu0  ;;  %v5371_v61 = vpop.f32.mrb[16].mxu1 }
 0x119   :  { %v345_v62 = vpop.f32.mrb[17].mxu0  ;;  %v401_v63 = vpop.f32.mrb[17].mxu1 }
 0x11a   :  { %v5379_v5 = vpop.f32.mrb[18].mxu0  ;;  %v5381_v6 = vpop.f32.mrb[18].mxu1 }
 0x11b   :  { %v348_v14 = vpop.f32.mrb[19].mxu0  ;;  %v404_v15 = vpop.f32.mrb[19].mxu1 }
 0x11c   :  { %v320_v14 = vadd.f32 %v5414_v35, %v5303_v18 }
 0x11d   :  { %1496 = vmatmul.mubr.bf16.gmra.mrb[124].mxu1 %v4466_v1  ;;  %1860 = vmatmul.mubr.bf16.gmra.mrb[124].mxu0 %v4467_v2  ;;  %v4482_v1 = vld [vmem:[%s6349_s0 + $0x4f4] ss:$8 sps:$4 sm:$0xff]   ;;  %v415_v2 = vmax.f32 %v315_v45, 0.0  ;;  %v4488_v45 = vld [vmem:[%s6349_s0 + $0x504] ss:$8 sps:$4 sm:$0xff]  }
 0x11e   :  { %3858 = vmatprep.mubr.msk.bf16.mxu0 %vm237_vm0, %v4468_v7  ;;  %3911 = vmatprep.mubr.msk.bf16.mxu1 %vm237_vm0, %v4472_v8 }
 0x120   :  { %v5391_v16 = vpop.f32.mrb[20].mxu0  ;;  %v5393_v17 = vpop.f32.mrb[20].mxu1 }
 0x121   :  { %v353_v20 = vpop.f32.mrb[21].mxu0  ;;  %v409_v22 = vpop.f32.mrb[21].mxu1 }
 0x122   :  { %v5401_v26 = vpop.f32.mrb[22].mxu0  ;;  %v5403_v27 = vpop.f32.mrb[22].mxu1  ;;  %v323_v20 = vadd.f32 %v5414_v35, %v5313_v24  ;;  %v4486_v24 = vld [vmem:[%s6349_s0 + $0x444] ss:$8 sps:$4 sm:$0xff]  }
 0x123   :  { %v356_v33 = vpop.f32.mrb[23].mxu0  ;;  %v412_v34 = vpop.f32.mrb[23].mxu1 }
 0x124   :  { %v4485_v33 = vld [vmem:[%s6349_s0 + $0x4f0] ss:$8 sps:$4 sm:$0xff]   ;;  %v416_v34 = vmax.f32 %v320_v14, 0.0 }
 0x125   :  { %1868 = vmatmul.mubr.bf16.gmra.mrb[128].mxu0 %v4473_v23  ;;  %2144 = vmatmul.mubr.bf16.vlgmr.msra.gmra.mrb[128].mxu1 %v4470_v21  ;;  %v4484_v23 = vld [vmem:[%s6349_s0 + $0x430] ss:$8 sps:$4 sm:$0xff]  }
 0x126   :  { %3912 = vmatprep.mubr.msk.bf16.mxu1 %vm237_vm0, %v4474_v28  ;;  %3976 = vmatprep.mubr.msk.bf16.mxu0 %vm237_vm0, %v4478_v29 }
 0x127   :  { %2856 = vmatpush1.bf16.msra.mxu1 %v5105_v32 }
 0x128   :  { %v5421_v41 = vpop.f32.mrb[24].mxu0  ;;  %v657_v42 = vpop.f32.mrb[24].mxu1  ;;  %2857 = vmatprep.subr.bf16.mxu1 %v4638_v0 }
 0x129   :  { %v658_v46 = vadd.f32 %v5414_v35, %v657_v42  ;;  %v361_v50 = vpop.f32.mrb[25].mxu0  ;;  %v659_v51 = vpop.f32.mrb[25].mxu1 }
 0x12a   :  { %v5433_v53 = vpop.f32.mrb[26].mxu0  ;;  %v660_v55 = vpop.f32.mrb[26].mxu1 }
 0x12b   :  { %v760_v58 = vmax.f32 %v658_v46, 0.0  ;;  %v661_v59 = vadd.f32 %v5414_v35, %v660_v55  ;;  %v364_v62 = vpop.f32.mrb[27].mxu0  ;;  %v662_v63 = vpop.f32.mrb[27].mxu1  ;;  %2858 = vmatpush1.bf16.msra.mxu1 %v5124_v37 }
 0x12c   :  { %2859 = vmatprep.subr.bf16.mxu1 %v4638_v0  ;;  %v328_v62 = vadd.f32 %v5414_v35, %v5325_v30  ;;  %v4490_v30 = vld [vmem:[%s6349_s0 + $0x440] ss:$8 sps:$4 sm:$0xff]  }
 0x12d   :  { %v786_v7 = vmax.f32 %v414_v12, %v760_v58  ;;  %v761_v8 = vmax.f32 %v661_v59, 0.0  ;;  %2152 = vmatmul.mubr.bf16.gmra.mrb[132].mxu1 %v4479_v3  ;;  %2516 = vmatmul.mubr.bf16.vlgmr.msra.gmra.mrb[132].mxu0 %v4476_v52 }
 0x12e   :  { %3228 = vmatpush1.bf16.msra.mxu0 %v5105_v32  ;;  %3913 = vmatprep.mubr.msk.bf16.mxu1 %vm237_vm0, %v4480_v56  ;;  %v417_v56 = vmax.f32 %v323_v20, 0.0 }
 0x12f   :  { %v787_v15 = vmax.f32 %v415_v2, %v761_v8  ;;  %3977 = vmatprep.mubr.msk.bf16.mxu0 %vm237_vm0, %v4482_v1  ;;  %3229 = vmatprep.subr.bf16.mxu0 %v4638_v0  ;;  %v331_v2 = vadd.f32 %v5414_v35, %v5335_v39  ;;  %v4491_v39 = vld [vmem:[%s6349_s0 + $0x500] ss:$8 sps:$4 sm:$0xff]  }
 0x130   :  { %v665_v21 = vpop.f32.mrb[28].mxu1  ;;  %v1029_v22 = vpop.f32.mrb[28].mxu0  ;;  %2860 = vmatpush1.bf16.msra.mxu1 %v5135_v38 }
 0x131   :  { %v666_v32 = vadd.f32 %v5414_v35, %v665_v21  ;;  %v1030_v18 = vadd.f32 %v5414_v35, %v1029_v22  ;;  %v667_v28 = vpop.f32.mrb[29].mxu1  ;;  %v1031_v29 = vpop.f32.mrb[29].mxu0  ;;  %2861 = vmatprep.subr.bf16.mxu1 %v4638_v0  ;;  %v4492_v21 = vld [vmem:[%s6349_s0 + $0x454] ss:$8 sps:$4 sm:$0xff]   ;;  %v418_v22 = vmax.f32 %v328_v62, 0.0 }
 0x132   :  { %v668_v36 = vpop.f32.mrb[30].mxu1  ;;  %v1032_v42 = vpop.f32.mrb[30].mxu0  ;;  %3230 = vmatpush1.bf16.msra.mxu0 %v5124_v37 }
 0x133   :  { %v762_v46 = vmax.f32 %v666_v32, 0.0  ;;  %v1132_v50 = vmax.f32 %v1030_v18, 0.0  ;;  %v669_v51 = vadd.f32 %v5414_v35, %v668_v36  ;;  %v1033_v52 = vadd.f32 %v5414_v35, %v1032_v42  ;;  %v1034_v3 = vpop.f32.mrb[31].mxu0  ;;  %v670_v55 = vpop.f32.mrb[31].mxu1  ;;  %3231 = vmatprep.subr.bf16.mxu0 %v4638_v0  ;;  %v4494_v18 = vld [vmem:[%s6349_s0 + $0x514] ss:$8 sps:$4 sm:$0xff]  }
 0x134   :  { %2862 = vmatpush1.bf16.msra.mxu1 %v5156_v43  ;;  %v419_v42 = vmax.f32 %v331_v2, 0.0  ;;  %v339_v55 = vadd.f32 %v5414_v35, %v5357_v10  ;;  %v4497_v10 = vld [vmem:[%s6349_s0 + $0x510] ss:$8 sps:$4 sm:$0xff]  }
 0x135   :  { %v788_v12 = vmax.f32 %v416_v34, %v762_v46  ;;  %v5473_v58 = vmax.f32 %v786_v7, %v1132_v50  ;;  %v763_v37 = vmax.f32 %v669_v51, 0.0  ;;  %v1133_v59 = vmax.f32 %v1033_v52, 0.0  ;;  %2160 = vmatmul.mubr.bf16.gmra.mrb[136].mxu1 %v4484_v23  ;;  %2524 = vmatmul.mubr.bf16.gmra.mrb[136].mxu0 %v4485_v33 }
 0x136   :  { %3914 = vmatprep.mubr.msk.bf16.mxu1 %vm237_vm0, %v4486_v24  ;;  %3978 = vmatprep.mubr.msk.bf16.mxu0 %vm237_vm0, %v4488_v45  ;;  %v336_v52 = vadd.f32 %v5414_v35, %v5347_v47  ;;  %v4496_v47 = vld [vmem:[%s6349_s0 + $0x450] ss:$8 sps:$4 sm:$0xff]  }
 0x137   :  { %v789_v63 = vmax.f32 %v417_v56, %v763_v37  ;;  %v5479_v1 = vmax.f32 %v787_v15, %v1133_v59  ;;  %3232 = vmatpush1.bf16.msra.mxu0 %v5135_v38  ;;  %2863 = vmatprep.subr.bf16.mxu1 %v4638_v0 }
 0x138   :  { %v673_v7 = vpop.f32.mrb[32].mxu1  ;;  %v1037_v8 = vpop.f32.mrb[32].mxu0  ;;  %3233 = vmatprep.subr.bf16.mxu0 %v4638_v0  ;;  %2864 = vmatpush1.bf16.msra.mxu1 %v5167_v44  ;;  %v420_v2 = vmax.f32 %v336_v52, 0.0 }
 0x139   :  { %v674_v14 = vadd.f32 %v5414_v35, %v673_v7  ;;  %v1038_v15 = vadd.f32 %v5414_v35, %v1037_v8  ;;  %v675_v38 = vpop.f32.mrb[33].mxu1  ;;  %v1039_v20 = vpop.f32.mrb[33].mxu0  ;;  %2865 = vmatprep.subr.bf16.mxu1 %v4638_v0 }
 0x13a   :  { %v676_v23 = vpop.f32.mrb[34].mxu1  ;;  %v1040_v32 = vpop.f32.mrb[34].mxu0 }
 0x13b   :  { %v764_v28 = vmax.f32 %v674_v14, 0.0  ;;  %v1134_v29 = vmax.f32 %v1038_v15, 0.0  ;;  %v677_v33 = vadd.f32 %v5414_v35, %v676_v23  ;;  %v1041_v24 = vadd.f32 %v5414_v35, %v1040_v32  ;;  %v1042_v34 = vpop.f32.mrb[35].mxu0  ;;  %v678_v36 = vpop.f32.mrb[35].mxu1  ;;  %3234 = vmatpush1.bf16.msra.mxu0 %v5156_v43 }
 0x13c   :  { %3235 = vmatprep.subr.bf16.mxu0 %v4638_v0  ;;  %2866 = vmatpush1.bf16.msra.mxu1 %v5188_v49 }
 0x13d   :  { %v790_v45 = vmax.f32 %v418_v22, %v764_v28  ;;  %v5507_v46 = vmax.f32 %v788_v12, %v1134_v29  ;;  %v765_v50 = vmax.f32 %v677_v33, 0.0  ;;  %v1135_v51 = vmax.f32 %v1041_v24, 0.0  ;;  %2168 = vmatmul.mubr.bf16.gmra.mrb[140].mxu1 %v4490_v30  ;;  %2532 = vmatmul.mubr.bf16.gmra.mrb[140].mxu0 %v4491_v39  ;;  %v4500_v30 = vld [vmem:[%s6349_s0 + $0x524] ss:$8 sps:$4 sm:$0xff]  }
 0x13e   :  { %3915 = vmatprep.mubr.msk.bf16.mxu1 %vm237_vm0, %v4492_v21  ;;  %3979 = vmatprep.mubr.msk.bf16.mxu0 %vm237_vm0, %v4494_v18  ;;  %v421_v22 = vmax.f32 %v339_v55, 0.0  ;;  %v344_v29 = vadd.f32 %v5414_v35, %v5369_v60  ;;  %v347_v24 = vadd.f32 %v5414_v35, %v5379_v5  ;;  %v4502_v60 = vld [vmem:[%s6349_s0 + $0x460] ss:$8 sps:$4 sm:$0xff]  }
 0x13f   :  { %v791_v43 = vmax.f32 %v419_v42, %v765_v50  ;;  %v5513_v3 = vmax.f32 %v789_v63, %v1135_v51  ;;  %3236 = vmatpush1.bf16.msra.mxu0 %v5167_v44  ;;  %2867 = vmatprep.subr.bf16.mxu1 %v4638_v0  ;;  %v4498_v63 = vld [vmem:[%s6349_s0 + $0x464] ss:$8 sps:$4 sm:$0xff]   ;;  %v4503_v5 = vld [vmem:[%s6349_s0 + $0x520] ss:$8 sps:$4 sm:$0xff]   ;;  %v4504_v51 = vld [vmem:[%s6349_s0 + $0x474] ss:$8 sps:$4 sm:$0xff]  }
 0x140   :  { %v681_v56 = vpop.f32.mrb[36].mxu1  ;;  %v1045_v12 = vpop.f32.mrb[36].mxu0  ;;  %3237 = vmatprep.subr.bf16.mxu0 %v4638_v0  ;;  %2868 = vmatpush1.bf16.msra.mxu1 %v5218_v9  ;;  %v422_v52 = vmax.f32 %v344_v29, 0.0  ;;  %v4512_v29 = vld [vmem:[%s6349_s0 + $0x544] ss:$8 sps:$4 sm:$0xff]  }
 0x141   :  { %v682_v37 = vadd.f32 %v5414_v35, %v681_v56  ;;  %v1046_v59 = vadd.f32 %v5414_v35, %v1045_v12  ;;  %v683_v44 = vpop.f32.mrb[37].mxu1  ;;  %v1047_v62 = vpop.f32.mrb[37].mxu0  ;;  %2869 = vmatprep.subr.bf16.mxu1 %v4638_v0  ;;  %v4506_v56 = vld [vmem:[%s6349_s0 + $0x534] ss:$8 sps:$4 sm:$0xff]  }
 0x142   :  { %v684_v7 = vpop.f32.mrb[38].mxu1  ;;  %v1048_v8 = vpop.f32.mrb[38].mxu0 }
 0x143   :  { %v766_v14 = vmax.f32 %v682_v37, 0.0  ;;  %v1136_v15 = vmax.f32 %v1046_v59, 0.0  ;;  %v685_v38 = vadd.f32 %v5414_v35, %v684_v7  ;;  %v1049_v20 = vadd.f32 %v5414_v35, %v1048_v8  ;;  %v1050_v39 = vpop.f32.mrb[39].mxu0  ;;  %v686_v21 = vpop.f32.mrb[39].mxu1  ;;  %3238 = vmatpush1.bf16.msra.mxu0 %v5188_v49 }
 0x144   :  { %3239 = vmatprep.subr.bf16.mxu0 %v4638_v0  ;;  %2870 = vmatpush1.bf16.msra.mxu1 %v5240_v11 }
 0x145   :  { %v792_v23 = vmax.f32 %v420_v2, %v766_v14  ;;  %v5541_v32 = vmax.f32 %v790_v45, %v1136_v15  ;;  %v767_v18 = vmax.f32 %v685_v38, 0.0  ;;  %v1137_v28 = vmax.f32 %v1049_v20, 0.0  ;;  %2176 = vmatmul.mubr.bf16.gmra.mrb[144].mxu1 %v4496_v47  ;;  %2540 = vmatmul.mubr.bf16.gmra.mrb[144].mxu0 %v4497_v10  ;;  %v4508_v20 = vld [vmem:[%s6349_s0 + $0x470] ss:$8 sps:$4 sm:$0xff]  }
 0x146   :  { %3916 = vmatprep.mubr.msk.bf16.mxu1 %vm237_vm0, %v4498_v63  ;;  %3980 = vmatprep.mubr.msk.bf16.mxu0 %vm237_vm0, %v4500_v30  ;;  %v423_v10 = vmax.f32 %v347_v24, 0.0  ;;  %v352_v30 = vadd.f32 %v5414_v35, %v5391_v16 }
 0x147   :  { %v793_v49 = vmax.f32 %v421_v22, %v767_v18  ;;  %v5547_v33 = vmax.f32 %v791_v43, %v1137_v28  ;;  %3240 = vmatpush1.bf16.msra.mxu0 %v5218_v9  ;;  %2871 = vmatprep.subr.bf16.mxu1 %v4638_v0 }
 0x148   :  { %v689_v34 = vpop.f32.mrb[40].mxu1  ;;  %v1053_v36 = vpop.f32.mrb[40].mxu0  ;;  %3241 = vmatprep.subr.bf16.mxu0 %v4638_v0  ;;  %2872 = vmatpush1.bf16.msra.mxu1 %v5249_v57 }
 0x149   :  { %v690_v42 = vadd.f32 %v5414_v35, %v689_v34  ;;  %v1054_v45 = vadd.f32 %v5414_v35, %v1053_v36  ;;  %v691_v9 = vpop.f32.mrb[41].mxu1  ;;  %v1055_v50 = vpop.f32.mrb[41].mxu0 }
 0x14a   :  { %v692_v43 = vpop.f32.mrb[42].mxu1  ;;  %v1056_v55 = vpop.f32.mrb[42].mxu0 }
 0x14b   :  { %v768_v12 = vmax.f32 %v690_v42, 0.0  ;;  %v1138_v47 = vmax.f32 %v1054_v45, 0.0  ;;  %v693_v37 = vadd.f32 %v5414_v35, %v692_v43  ;;  %v1057_v59 = vadd.f32 %v5414_v35, %v1056_v55  ;;  %v1058_v44 = vpop.f32.mrb[43].mxu0  ;;  %v694_v62 = vpop.f32.mrb[43].mxu1  ;;  %3242 = vmatpush1.bf16.msra.mxu0 %v5240_v11 }
 0x14c   :  { %3243 = vmatprep.subr.bf16.mxu0 %v4638_v0  ;;  %v355_v0 = vadd.f32 %v5414_v35, %v5401_v26  ;;  %v424_v26 = vmax.f32 %v352_v30, 0.0  ;;  %v4518_v30 = vld [vmem:[%s6349_s0 + $0x554] ss:$8 sps:$4 sm:$0xff]  }
 0x14d   :  { %v794_v63 = vmax.f32 %v422_v52, %v768_v12  ;;  %v5573_v2 = vmax.f32 %v792_v23, %v1138_v47  ;;  %v769_v7 = vmax.f32 %v693_v37, 0.0  ;;  %v1139_v8 = vmax.f32 %v1057_v59, 0.0  ;;  %2184 = vmatmul.mubr.bf16.gmra.mrb[148].mxu1 %v4502_v60  ;;  %2548 = vmatmul.mubr.bf16.gmra.mrb[148].mxu0 %v4503_v5  ;;  %v4509_v23 = vld [vmem:[%s6349_s0 + $0x530] ss:$8 sps:$4 sm:$0xff]   ;;  %v4514_v37 = vld [vmem:[%s6349_s0 + $0x480] ss:$8 sps:$4 sm:$0xff]  }
 0x14e   :  { %3917 = vmatprep.mubr.msk.bf16.mxu1 %vm237_vm0, %v4504_v51  ;;  %3981 = vmatprep.mubr.msk.bf16.mxu0 %vm237_vm0, %v4506_v56  ;;  %v425_v45 = vmax.f32 %v355_v0, 0.0  ;;  %v360_v52 = vadd.f32 %v5414_v35, %v5421_v41  ;;  %v363_v56 = vadd.f32 %v5414_v35, %v5433_v53  ;;  %v4516_v53 = vld [vmem:[%s6349_s0 + $0x494] ss:$8 sps:$4 sm:$0xff]  }
 0x14f   :  { %v795_v14 = vmax.f32 %v423_v10, %v769_v7  ;;  %v5579_v15 = vmax.f32 %v793_v49, %v1139_v8  ;;  %3244 = vmatpush1.bf16.msra.mxu0 %v5249_v57  ;;  %v4510_v57 = vld [vmem:[%s6349_s0 + $0x484] ss:$8 sps:$4 sm:$0xff]   ;;  %v4515_v10 = vld [vmem:[%s6349_s0 + $0x540] ss:$8 sps:$4 sm:$0xff]  }
 0x150   :  { %v697_v11 = vpop.f32.mrb[44].mxu1  ;;  %v1061_v38 = vpop.f32.mrb[44].mxu0 }
 0x151   :  { %v698_v16 = vadd.f32 %v5414_v35, %v697_v11  ;;  %v1062_v39 = vadd.f32 %v5414_v35, %v1061_v38  ;;  %v699_v21 = vpop.f32.mrb[45].mxu1  ;;  %v1063_v22 = vpop.f32.mrb[45].mxu0 }
 0x152   :  { %v700_v18 = vpop.f32.mrb[46].mxu1  ;;  %v1064_v28 = vpop.f32.mrb[46].mxu0 }
 0x153   :  { %v770_v49 = vmax.f32 %v698_v16, 0.0  ;;  %v1140_v24 = vmax.f32 %v1062_v39, 0.0  ;;  %v701_v34 = vadd.f32 %v5414_v35, %v700_v18  ;;  %v1065_v36 = vadd.f32 %v5414_v35, %v1064_v28  ;;  %v1066_v60 = vpop.f32.mrb[47].mxu0  ;;  %v702_v42 = vpop.f32.mrb[47].mxu1 }
 0x154   :  { %v427_v39 = vmax.f32 %v363_v56, 0.0 }
 0x155   :  { %v796_v9 = vmax.f32 %v424_v26, %v770_v49  ;;  %v5600_v50 = vmax.f32 %v794_v63, %v1140_v24  ;;  %v771_v5 = vmax.f32 %v701_v34, 0.0  ;;  %v1141_v51 = vmax.f32 %v1065_v36, 0.0  ;;  %2192 = vmatmul.mubr.bf16.gmra.mrb[152].mxu1 %v4508_v20  ;;  %2556 = vmatmul.mubr.bf16.gmra.mrb[152].mxu0 %v4509_v23  ;;  %v4520_v34 = vld [vmem:[%s6349_s0 + $0x490] ss:$8 sps:$4 sm:$0xff]  }
 0x156   :  { %3918 = vmatprep.mubr.msk.bf16.mxu1 %vm237_vm0, %v4510_v57  ;;  %3982 = vmatprep.mubr.msk.bf16.mxu0 %vm237_vm0, %v4512_v29  ;;  %v426_v63 = vmax.f32 %v360_v52, 0.0  ;;  %v368_v26 = vadd.f32 %v5414_v35, %v5283_v4  ;;  %v371_v29 = vadd.f32 %v5414_v35, %v5293_v13  ;;  %v4522_v13 = vld [vmem:[%s6349_s0 + $0x4a4] ss:$8 sps:$4 sm:$0xff]  }
 0x157   :  { %v797_v43 = vmax.f32 %v425_v45, %v771_v5  ;;  %v5606_v55 = vmax.f32 %v795_v14, %v1141_v51  ;;  %v4521_v45 = vld [vmem:[%s6349_s0 + $0x550] ss:$8 sps:$4 sm:$0xff]   ;;  %v4524_v52 = vld [vmem:[%s6349_s0 + $0x564] ss:$8 sps:$4 sm:$0xff]  }
 0x158   :  { %v705_v12 = vpop.f32.mrb[48].mxu1  ;;  %v1069_v47 = vpop.f32.mrb[48].mxu0 }
 0x159   :  { %v706_v59 = vadd.f32 %v5414_v35, %v705_v12  ;;  %v1070_v41 = vadd.f32 %v5414_v35, %v1069_v47  ;;  %v707_v44 = vpop.f32.mrb[49].mxu1  ;;  %v1071_v62 = vpop.f32.mrb[49].mxu0 }
 0x15a   :  { %v708_v7 = vpop.f32.mrb[50].mxu1  ;;  %v1072_v8 = vpop.f32.mrb[50].mxu0 }
 0x15b   :  { %v772_v14 = vmax.f32 %v706_v59, 0.0  ;;  %v1142_v0 = vmax.f32 %v1070_v41, 0.0  ;;  %v709_v11 = vadd.f32 %v5414_v35, %v708_v7  ;;  %v1073_v38 = vadd.f32 %v5414_v35, %v1072_v8  ;;  %v1074_v20 = vpop.f32.mrb[51].mxu0  ;;  %v710_v16 = vpop.f32.mrb[51].mxu1 }
 0x15c   :  { %v429_v41 = vmax.f32 %v371_v29, 0.0 }
 0x15d   :  { %v798_v21 = vmax.f32 %v426_v63, %v772_v14  ;;  %v5626_v22 = vmax.f32 %v796_v9, %v1142_v0  ;;  %v773_v23 = vmax.f32 %v709_v11, 0.0  ;;  %v1143_v57 = vmax.f32 %v1073_v38, 0.0  ;;  %2200 = vmatmul.mubr.bf16.gmra.mrb[156].mxu1 %v4514_v37  ;;  %2564 = vmatmul.mubr.bf16.gmra.mrb[156].mxu0 %v4515_v10  ;;  %v4526_v11 = vld [vmem:[%s6349_s0 + $0x4a0] ss:$8 sps:$4 sm:$0xff]  }
 0x15e   :  { %3919 = vmatprep.mubr.msk.bf16.mxu1 %vm237_vm0, %v4516_v53  ;;  %3983 = vmatprep.mubr.msk.bf16.mxu0 %vm237_vm0, %v4518_v30  ;;  %v428_v9 = vmax.f32 %v368_v26, 0.0  ;;  %v376_v63 = vadd.f32 %v5414_v35, %v5305_v19  ;;  %v379_v30 = vadd.f32 %v5414_v35, %v5315_v25  ;;  %v4528_v25 = vld [vmem:[%s6349_s0 + $0x4b4] ss:$8 sps:$4 sm:$0xff]  }
 0x15f   :  { %v799_v18 = vmax.f32 %v427_v39, %v773_v23  ;;  %v5632_v28 = vmax.f32 %v797_v43, %v1143_v57  ;;  %v4527_v39 = vld [vmem:[%s6349_s0 + $0x560] ss:$8 sps:$4 sm:$0xff]   ;;  %v4530_v26 = vld [vmem:[%s6349_s0 + $0x574] ss:$8 sps:$4 sm:$0xff]  }
 0x160   :  { %v713_v49 = vpop.f32.mrb[52].mxu1  ;;  %v1077_v24 = vpop.f32.mrb[52].mxu0 }
 0x161   :  { %v714_v36 = vadd.f32 %v5414_v35, %v713_v49  ;;  %v1078_v4 = vadd.f32 %v5414_v35, %v1077_v24  ;;  %v715_v60 = vpop.f32.mrb[53].mxu1  ;;  %v1079_v42 = vpop.f32.mrb[53].mxu0 }
 0x162   :  { %v716_v5 = vpop.f32.mrb[54].mxu1  ;;  %v1080_v51 = vpop.f32.mrb[54].mxu0 }
 0x163   :  { %v774_v43 = vmax.f32 %v714_v36, 0.0  ;;  %v1144_v56 = vmax.f32 %v1078_v4, 0.0  ;;  %v717_v12 = vadd.f32 %v5414_v35, %v716_v5  ;;  %v1081_v47 = vadd.f32 %v5414_v35, %v1080_v51  ;;  %v1082_v37 = vpop.f32.mrb[55].mxu0  ;;  %v718_v59 = vpop.f32.mrb[55].mxu1 }
 0x164   :  { %v431_v4 = vmax.f32 %v379_v30, 0.0 }
 0x165   :  { %v800_v44 = vmax.f32 %v428_v9, %v774_v43  ;;  %v5652_v62 = vmax.f32 %v798_v21, %v1144_v56  ;;  %v775_v10 = vmax.f32 %v717_v12, 0.0  ;;  %v1145_v53 = vmax.f32 %v1081_v47, 0.0  ;;  %2208 = vmatmul.mubr.bf16.gmra.mrb[160].mxu1 %v4520_v34  ;;  %2572 = vmatmul.mubr.bf16.gmra.mrb[160].mxu0 %v4521_v45  ;;  %v4532_v12 = vld [vmem:[%s6349_s0 + $0x4b0] ss:$8 sps:$4 sm:$0xff]  }
 0x166   :  { %3920 = vmatprep.mubr.msk.bf16.mxu1 %vm237_vm0, %v4522_v13  ;;  %3984 = vmatprep.mubr.msk.bf16.mxu0 %vm237_vm0, %v4524_v52  ;;  %v430_v21 = vmax.f32 %v376_v63, 0.0  ;;  %v384_v9 = vadd.f32 %v5414_v35, %v5327_v31  ;;  %v387_v52 = vadd.f32 %v5414_v35, %v5337_v40  ;;  %v4534_v40 = vld [vmem:[%s6349_s0 + $0x4c4] ss:$8 sps:$4 sm:$0xff]  }
 0x167   :  { %v801_v7 = vmax.f32 %v429_v41, %v775_v10  ;;  %v5658_v8 = vmax.f32 %v799_v18, %v1145_v53  ;;  %v4533_v41 = vld [vmem:[%s6349_s0 + $0x570] ss:$8 sps:$4 sm:$0xff]   ;;  %v4536_v63 = vld [vmem:[%s6349_s0 + $0x584] ss:$8 sps:$4 sm:$0xff]  }
 0x168   :  { %v721_v14 = vpop.f32.mrb[56].mxu1  ;;  %v1085_v0 = vpop.f32.mrb[56].mxu0 }
 0x169   :  { %v722_v38 = vadd.f32 %v5414_v35, %v721_v14  ;;  %v1086_v19 = vadd.f32 %v5414_v35, %v1085_v0  ;;  %v723_v20 = vpop.f32.mrb[57].mxu1  ;;  %v1087_v16 = vpop.f32.mrb[57].mxu0 }
 0x16a   :  { %v724_v23 = vpop.f32.mrb[58].mxu1  ;;  %v1088_v57 = vpop.f32.mrb[58].mxu0 }
 0x16b   :  { %v776_v18 = vmax.f32 %v722_v38, 0.0  ;;  %v1146_v29 = vmax.f32 %v1086_v19, 0.0  ;;  %v725_v49 = vadd.f32 %v5414_v35, %v724_v23  ;;  %v1089_v24 = vadd.f32 %v5414_v35, %v1088_v57  ;;  %v1090_v34 = vpop.f32.mrb[59].mxu0  ;;  %v726_v36 = vpop.f32.mrb[59].mxu1 }
 0x16c   :  { %v433_v19 = vmax.f32 %v387_v52, 0.0 }
 0x16d   :  { %v802_v60 = vmax.f32 %v430_v21, %v776_v18  ;;  %v5678_v42 = vmax.f32 %v800_v44, %v1146_v29  ;;  %v777_v45 = vmax.f32 %v725_v49, 0.0  ;;  %v1147_v13 = vmax.f32 %v1089_v24, 0.0  ;;  %2216 = vmatmul.mubr.bf16.gmra.mrb[164].mxu1 %v4526_v11  ;;  %2580 = vmatmul.mubr.bf16.gmra.mrb[164].mxu0 %v4527_v39  ;;  %v4538_v49 = vld [vmem:[%s6349_s0 + $0x4c0] ss:$8 sps:$4 sm:$0xff]  }
 0x16e   :  { %3921 = vmatprep.mubr.msk.bf16.mxu1 %vm237_vm0, %v4528_v25  ;;  %3985 = vmatprep.mubr.msk.bf16.mxu0 %vm237_vm0, %v4530_v26  ;;  %v432_v44 = vmax.f32 %v384_v9, 0.0  ;;  %v392_v21 = vadd.f32 %v5414_v35, %v5349_v48  ;;  %v395_v26 = vadd.f32 %v5414_v35, %v5359_v54  ;;  %v4540_v54 = vld [vmem:[%s6349_s0 + $0x4d4] ss:$8 sps:$4 sm:$0xff]  }
 0x16f   :  { %v803_v5 = vmax.f32 %v431_v4, %v777_v45  ;;  %v5684_v51 = vmax.f32 %v801_v7, %v1147_v13  ;;  %v4539_v4 = vld [vmem:[%s6349_s0 + $0x580] ss:$8 sps:$4 sm:$0xff]   ;;  %v4542_v9 = vld [vmem:[%s6349_s0 + $0x594] ss:$8 sps:$4 sm:$0xff]  }
 0x170   :  { %v729_v43 = vpop.f32.mrb[60].mxu1  ;;  %v1093_v56 = vpop.f32.mrb[60].mxu0 }
 0x171   :  { %v730_v47 = vadd.f32 %v5414_v35, %v729_v43  ;;  %v1094_v31 = vadd.f32 %v5414_v35, %v1093_v56  ;;  %v731_v37 = vpop.f32.mrb[61].mxu1  ;;  %v1095_v59 = vpop.f32.mrb[61].mxu0 }
 0x172   :  { %v732_v10 = vpop.f32.mrb[62].mxu1  ;;  %v1096_v53 = vpop.f32.mrb[62].mxu0 }
 0x173   :  { %v778_v7 = vmax.f32 %v730_v47, 0.0  ;;  %v1148_v30 = vmax.f32 %v1094_v31, 0.0  ;;  %v733_v14 = vadd.f32 %v5414_v35, %v732_v10  ;;  %v1097_v0 = vadd.f32 %v5414_v35, %v1096_v53  ;;  %v1098_v11 = vpop.f32.mrb[63].mxu0  ;;  %v734_v38 = vpop.f32.mrb[63].mxu1 }
 0x174   :  { %v435_v31 = vmax.f32 %v395_v26, 0.0 }
 0x175   :  { %v804_v20 = vmax.f32 %v432_v44, %v778_v7  ;;  %v5704_v16 = vmax.f32 %v802_v60, %v1148_v30  ;;  %v779_v39 = vmax.f32 %v733_v14, 0.0  ;;  %v1149_v25 = vmax.f32 %v1097_v0, 0.0  ;;  %2224 = vmatmul.mubr.bf16.gmra.mrb[168].mxu1 %v4532_v12  ;;  %2588 = vmatmul.mubr.bf16.gmra.mrb[168].mxu0 %v4533_v41  ;;  %v4544_v14 = vld [vmem:[%s6349_s0 + $0x4d0] ss:$8 sps:$4 sm:$0xff]  }
 0x176   :  { %3922 = vmatprep.mubr.msk.bf16.mxu1 %vm237_vm0, %v4534_v40  ;;  %3986 = vmatprep.mubr.msk.bf16.mxu0 %vm237_vm0, %v4536_v63  ;;  %v434_v60 = vmax.f32 %v392_v21, 0.0  ;;  %v400_v44 = vadd.f32 %v5414_v35, %v5371_v61  ;;  %v403_v63 = vadd.f32 %v5414_v35, %v5381_v6  ;;  %v4546_v6 = vld [vmem:[%s6349_s0 + $0x5a4] ss:$8 sps:$4 sm:$0xff]   ;;  %v4550_v21 = vld [vmem:[%s6349_s0 + $0x5b4] ss:$8 sps:$4 sm:$0xff]  }
 0x177   :  { %v805_v23 = vmax.f32 %v433_v19, %v779_v39  ;;  %v5710_v57 = vmax.f32 %v803_v5, %v1149_v25  ;;  %v4545_v19 = vld [vmem:[%s6349_s0 + $0x590] ss:$8 sps:$4 sm:$0xff]  }
 0x178   :  { %v737_v18 = vpop.f32.mrb[64].mxu1  ;;  %v1101_v29 = vpop.f32.mrb[64].mxu0 }
 0x179   :  { %v738_v24 = vadd.f32 %v5414_v35, %v737_v18  ;;  %v1102_v48 = vadd.f32 %v5414_v35, %v1101_v29  ;;  %v739_v34 = vpop.f32.mrb[65].mxu1  ;;  %v1103_v36 = vpop.f32.mrb[65].mxu0 }
 0x17a   :  { %v740_v45 = vpop.f32.mrb[66].mxu1  ;;  %v1104_v13 = vpop.f32.mrb[66].mxu0 }
 0x17b   :  { %v780_v5 = vmax.f32 %v738_v24, 0.0  ;;  %v1150_v52 = vmax.f32 %v1102_v48, 0.0  ;;  %v741_v43 = vadd.f32 %v5414_v35, %v740_v45  ;;  %v1105_v56 = vadd.f32 %v5414_v35, %v1104_v13  ;;  %v1106_v12 = vpop.f32.mrb[67].mxu0  ;;  %v742_v47 = vpop.f32.mrb[67].mxu1 }
 0x17c   :  { %v437_v48 = vmax.f32 %v403_v63, 0.0 }
 0x17d   :  { %v806_v37 = vmax.f32 %v434_v60, %v780_v5  ;;  %v5730_v59 = vmax.f32 %v804_v20, %v1150_v52  ;;  %v781_v41 = vmax.f32 %v741_v43, 0.0  ;;  %v1151_v40 = vmax.f32 %v1105_v56, 0.0  ;;  %2232 = vmatmul.mubr.bf16.gmra.mrb[172].mxu1 %v4538_v49  ;;  %2596 = vmatmul.mubr.bf16.gmra.mrb[172].mxu0 %v4539_v4  ;;  %v4548_v43 = vld [vmem:[%s6349_s0 + $0x5b0] ss:$8 sps:$4 sm:$0xff]  }
 0x17e   :  { %3923 = vmatprep.mubr.msk.bf16.mxu1 %vm237_vm0, %v4540_v54  ;;  %3987 = vmatprep.mubr.msk.bf16.mxu0 %vm237_vm0, %v4542_v9  ;;  %v436_v20 = vmax.f32 %v400_v44, 0.0  ;;  %v408_v60 = vadd.f32 %v5414_v35, %v5393_v17  ;;  %v411_v9 = vadd.f32 %v5414_v35, %v5403_v27  ;;  %v4552_v27 = vld [vmem:[%s6349_s0 + $0x5c4] ss:$8 sps:$4 sm:$0xff]  }
 0x17f   :  { %v807_v10 = vmax.f32 %v435_v31, %v781_v41  ;;  %v5736_v53 = vmax.f32 %v805_v23, %v1151_v40  ;;  %v4551_v31 = vld [vmem:[%s6349_s0 + $0x5a0] ss:$8 sps:$4 sm:$0xff]   ;;  %v4556_v44 = vld [vmem:[%s6349_s0 + $0x684] ss:$8 sps:$4 sm:$0xff]  }
 0x180   :  { %v745_v7 = vpop.f32.mrb[68].mxu1  ;;  %v1109_v30 = vpop.f32.mrb[68].mxu0 }
 0x181   :  { %v746_v0 = vadd.f32 %v5414_v35, %v745_v7  ;;  %v1110_v61 = vadd.f32 %v5414_v35, %v1109_v30  ;;  %v747_v11 = vpop.f32.mrb[69].mxu1  ;;  %v1111_v38 = vpop.f32.mrb[69].mxu0 }
 0x182   :  { %v748_v39 = vpop.f32.mrb[70].mxu1  ;;  %v1112_v25 = vpop.f32.mrb[70].mxu0 }
 0x183   :  { %v782_v23 = vmax.f32 %v746_v0, 0.0  ;;  %v1152_v26 = vmax.f32 %v1110_v61, 0.0  ;;  %v749_v18 = vadd.f32 %v5414_v35, %v748_v39  ;;  %v1113_v29 = vadd.f32 %v5414_v35, %v1112_v25  ;;  %v1114_v49 = vpop.f32.mrb[71].mxu0  ;;  %v750_v24 = vpop.f32.mrb[71].mxu1 }
 0x184   :  { %v439_v61 = vmax.f32 %v411_v9, 0.0  ;;  %v4554_v49 = vld [vmem:[%s6349_s0 + $0x680] ss:$8 sps:$4 sm:$0xff]  }
 0x185   :  { %v808_v34 = vmax.f32 %v436_v20, %v782_v23  ;;  %v5756_v36 = vmax.f32 %v806_v37, %v1152_v26  ;;  %v783_v4 = vmax.f32 %v749_v18, 0.0  ;;  %v1153_v54 = vmax.f32 %v1113_v29, 0.0  ;;  %2240 = vmatmul.mubr.bf16.gmra.mrb[176].mxu1 %v4544_v14  ;;  %2604 = vmatmul.mubr.bf16.gmra.mrb[176].mxu0 %v4545_v19  ;;  %v4557_v24 = vld [vmem:[%s6349_s0 + $0x5c0] ss:$8 sps:$4 sm:$0xff]  }
 0x186   :  { %3988 = vmatprep.mubr.msk.bf16.mxu0 %vm237_vm0, %v4546_v6  ;;  %4041 = vmatprep.mubr.msk.bf16.mxu1 %vm237_vm0, %v4550_v21  ;;  %v438_v37 = vmax.f32 %v408_v60, 0.0 }
 0x187   :  { %v809_v45 = vmax.f32 %v437_v48, %v783_v4  ;;  %v5762_v13 = vmax.f32 %v807_v10, %v1153_v54  ;;  %v4558_v4 = vld [vmem:[%s6349_s0 + $0x5d4] ss:$8 sps:$4 sm:$0xff]  }
 0x188   :  { %v753_v5 = vpop.f32.mrb[72].mxu1  ;;  %v1117_v52 = vpop.f32.mrb[72].mxu0  ;;  %v4560_v54 = vld [vmem:[%s6349_s0 + $0x694] ss:$8 sps:$4 sm:$0xff]  }
 0x189   :  { %v754_v56 = vadd.f32 %v5414_v35, %v753_v5  ;;  %v1118_v17 = vadd.f32 %v5414_v35, %v1117_v52  ;;  %v755_v12 = vpop.f32.mrb[73].mxu1  ;;  %v1119_v47 = vpop.f32.mrb[73].mxu0 }
 0x18a   :  { %v756_v41 = vpop.f32.mrb[74].mxu1  ;;  %v1120_v40 = vpop.f32.mrb[74].mxu0 }
 0x18b   :  { %v784_v10 = vmax.f32 %v754_v56, 0.0  ;;  %v1154_v63 = vmax.f32 %v1118_v17, 0.0  ;;  %v757_v7 = vadd.f32 %v5414_v35, %v756_v41  ;;  %v1121_v30 = vadd.f32 %v5414_v35, %v1120_v40  ;;  %v1122_v14 = vpop.f32.mrb[75].mxu0  ;;  %v758_v0 = vpop.f32.mrb[75].mxu1 }
 0x18c   :  { %v4566_v0 = vld [vmem:[%s6349_s0 + $0x6a4] ss:$8 sps:$4 sm:$0xff]  }
 0x18d   :  { %v810_v11 = vmax.f32 %v438_v37, %v784_v10  ;;  %v5782_v38 = vmax.f32 %v808_v34, %v1154_v63  ;;  %v785_v19 = vmax.f32 %v757_v7, 0.0  ;;  %v1155_v6 = vmax.f32 %v1121_v30, 0.0  ;;  %2612 = vmatmul.mubr.bf16.gmra.mrb[180].mxu0 %v4551_v31  ;;  %2888 = vmatmul.mubr.bf16.vlgmr.msra.gmra.mrb[180].mxu1 %v4548_v43  ;;  %v4562_v63 = vld [vmem:[%s6349_s0 + $0x5d0] ss:$8 sps:$4 sm:$0xff]  }
 0x18e   :  { %4042 = vmatprep.mubr.msk.bf16.mxu1 %vm237_vm0, %v4552_v27  ;;  %4106 = vmatprep.mubr.msk.bf16.mxu0 %vm237_vm0, %v4556_v44  ;;  %v4563_v7 = vld [vmem:[%s6349_s0 + $0x690] ss:$8 sps:$4 sm:$0xff]  }
 0x18f   :  { %v811_v20 = vmax.f32 %v439_v61, %v785_v19  ;;  %v5786_v39 = vmax.f32 %v809_v45, %v1155_v6 }
 0x190   :  { %v1125_v25 = vpop.f32.mrb[76].mxu0  ;;  %v1401_v21 = vpop.f32.mrb[76].mxu1 }
 0x191   :  { %v1126_v23 = vadd.f32 %v5414_v35, %v1125_v25  ;;  %v1402_v26 = vadd.f32 %v5414_v35, %v1401_v21  ;;  %v1127_v18 = vpop.f32.mrb[77].mxu0  ;;  %v1403_v29 = vpop.f32.mrb[77].mxu1 }
 0x192   :  { %v1128_v48 = vpop.f32.mrb[78].mxu0  ;;  %v1404_v34 = vpop.f32.mrb[78].mxu1 }
 0x193   :  { %v1156_v60 = vmax.f32 %v1126_v23, 0.0  ;;  %v1504_v45 = vmax.f32 %v1402_v26, 0.0  ;;  %v1129_v9 = vadd.f32 %v5414_v35, %v1128_v48  ;;  %v1405_v5 = vadd.f32 %v5414_v35, %v1404_v34  ;;  %v1130_v52 = vpop.f32.mrb[79].mxu0  ;;  %v1406_v43 = vpop.f32.mrb[79].mxu1 }
 0x195   :  { %v5804_v56 = vmax.f32 %v810_v11, %v1156_v60  ;;  %v1530_v17 = vmax.f32 %v5473_v58, %v1504_v45  ;;  %v1157_v12 = vmax.f32 %v1129_v9, 0.0  ;;  %v1505_v47 = vmax.f32 %v1405_v5, 0.0  ;;  %2896 = vmatmul.mubr.bf16.gmra.mrb[184].mxu1 %v4557_v24  ;;  %3260 = vmatmul.mubr.bf16.vlgmr.msra.gmra.mrb[184].mxu0 %v4554_v49  ;;  %v4568_v60 = vld [vmem:[%s6349_s0 + $0x5e0] ss:$8 sps:$4 sm:$0xff]   ;;  %v4570_v5 = vld [vmem:[%s6349_s0 + $0x5f4] ss:$8 sps:$4 sm:$0xff]  }
 0x196   :  { %4043 = vmatprep.mubr.msk.bf16.mxu1 %vm237_vm0, %v4558_v4  ;;  %4107 = vmatprep.mubr.msk.bf16.mxu0 %vm237_vm0, %v4560_v54  ;;  %v4569_v45 = vld [vmem:[%s6349_s0 + $0x6a0] ss:$8 sps:$4 sm:$0xff]  }
 0x197   :  { %v5809_v31 = vmax.f32 %v811_v20, %v1157_v12  ;;  %v1531_v27 = vmax.f32 %v5479_v1, %v1505_v47  ;;  %v4564_v1 = vld [vmem:[%s6349_s0 + $0x5e4] ss:$8 sps:$4 sm:$0xff]  }
 0x198   :  { %v1409_v37 = vpop.f32.mrb[80].mxu1  ;;  %v1773_v41 = vpop.f32.mrb[80].mxu0 }
 0x199   :  { %v1410_v40 = vadd.f32 %v5414_v35, %v1409_v37  ;;  %v1774_v44 = vadd.f32 %v5414_v35, %v1773_v41  ;;  %v1411_v10 = vpop.f32.mrb[81].mxu1  ;;  %v1775_v58 = vpop.f32.mrb[81].mxu0 }
 0x19a   :  { %v1412_v30 = vpop.f32.mrb[82].mxu1  ;;  %v1776_v14 = vpop.f32.mrb[82].mxu0 }
 0x19b   :  { %v1506_v61 = vmax.f32 %v1410_v40, 0.0  ;;  %v1876_v11 = vmax.f32 %v1774_v44, 0.0  ;;  %v1413_v19 = vadd.f32 %v5414_v35, %v1412_v30  ;;  %v1777_v6 = vadd.f32 %v5414_v35, %v1776_v14  ;;  %v1778_v20 = vpop.f32.mrb[83].mxu0  ;;  %v1414_v25 = vpop.f32.mrb[83].mxu1 }
 0x19c   :  { %v4578_v20 = vld [vmem:[%s6349_s0 + $0x6c4] ss:$8 sps:$4 sm:$0xff]  }
 0x19d   :  { %v1532_v21 = vmax.f32 %v5507_v46, %v1506_v61  ;;  %v5829_v23 = vmax.f32 %v1530_v17, %v1876_v11  ;;  %v1507_v26 = vmax.f32 %v1413_v19, 0.0  ;;  %v1877_v18 = vmax.f32 %v1777_v6, 0.0  ;;  %2904 = vmatmul.mubr.bf16.gmra.mrb[188].mxu1 %v4562_v63  ;;  %3268 = vmatmul.mubr.bf16.gmra.mrb[188].mxu0 %v4563_v7  ;;  %v5853_v17 = vld [vmem:[%s6350_s2] ss:$0 sm:$0xff]  ;;  %v4574_v61 = vld [vmem:[%s6349_s0 + $0x5f0] ss:$8 sps:$4 sm:$0xff]  }
 0x19e   :  { %4044 = vmatprep.mubr.msk.bf16.mxu1 %vm237_vm0, %v4564_v1  ;;  %4108 = vmatprep.mubr.msk.bf16.mxu0 %vm237_vm0, %v4566_v0  ;;  %v4575_v11 = vld [vmem:[%s6349_s0 + $0x6b0] ss:$8 sps:$4 sm:$0xff]   ;;  %v4576_v6 = vld [vmem:[%s6349_s0 + $0x604] ss:$8 sps:$4 sm:$0xff]  }
 0x19f   :  { %v1533_v29 = vmax.f32 %v5513_v3, %v1507_v26  ;;  %v5834_v49 = vmax.f32 %v1531_v27, %v1877_v18 }
 0x1a0   :  { %v1417_v24 = vpop.f32.mrb[84].mxu1  ;;  %v1781_v48 = vpop.f32.mrb[84].mxu0 }
 0x1a1   :  { %v1418_v34 = vadd.f32 %v5414_v35, %v1417_v24  ;;  %v1782_v46 = vadd.f32 %v5414_v35, %v1781_v48  ;;  %v1419_v4 = vpop.f32.mrb[85].mxu1  ;;  %v1783_v54 = vpop.f32.mrb[85].mxu0  ;;  %v4572_v35 = vld [vmem:[%s6349_s0 + $0x6b4] ss:$8 sps:$4 sm:$0xff]  }
 0x1a2   :  { %v1420_v9 = vpop.f32.mrb[86].mxu1  ;;  %v1784_v3 = vpop.f32.mrb[86].mxu0 }
 0x1a3   :  { %v1508_v52 = vmax.f32 %v1418_v34, 0.0  ;;  %v1878_v43 = vmax.f32 %v1782_v46, 0.0  ;;  %v1421_v12 = vadd.f32 %v5853_v17, %v1420_v9  ;;  %v1785_v47 = vadd.f32 %v5853_v17, %v1784_v3  ;;  %v1786_v27 = vpop.f32.mrb[87].mxu0  ;;  %v1422_v37 = vpop.f32.mrb[87].mxu1 }
 0x1a4   :  { %v4584_v27 = vld [vmem:[%s6349_s0 + $0x6d4] ss:$8 sps:$4 sm:$0xff]  }
 0x1a5   :  { %v1534_v41 = vmax.f32 %v5541_v32, %v1508_v52  ;;  %v5858_v40 = vmax.f32 %v1532_v21, %v1878_v43  ;;  %v1509_v44 = vmax.f32 %v1421_v12, 0.0  ;;  %v1879_v10 = vmax.f32 %v1785_v47, 0.0  ;;  %2912 = vmatmul.mubr.bf16.gmra.mrb[192].mxu1 %v4568_v60  ;;  %3276 = vmatmul.mubr.bf16.gmra.mrb[192].mxu0 %v4569_v45  ;;  %v4580_v52 = vld [vmem:[%s6349_s0 + $0x600] ss:$8 sps:$4 sm:$0xff]   ;;  %v4582_v47 = vld [vmem:[%s6349_s0 + $0x614] ss:$8 sps:$4 sm:$0xff]  }
 0x1a6   :  { %4045 = vmatprep.mubr.msk.bf16.mxu1 %vm237_vm0, %v4570_v5  ;;  %4109 = vmatprep.mubr.msk.bf16.mxu0 %vm237_vm0, %v4572_v35  ;;  %v4581_v43 = vld [vmem:[%s6349_s0 + $0x6c0] ss:$8 sps:$4 sm:$0xff]  }
 0x1a7   :  { %v1535_v58 = vmax.f32 %v5547_v33, %v1509_v44  ;;  %v5863_v63 = vmax.f32 %v1533_v29, %v1879_v10 }
 0x1a8   :  { %v1425_v7 = vpop.f32.mrb[88].mxu1  ;;  %v1789_v30 = vpop.f32.mrb[88].mxu0 }
 0x1a9   :  { %v1426_v14 = vadd.f32 %v5853_v17, %v1425_v7  ;;  %v1790_v32 = vadd.f32 %v5853_v17, %v1789_v30  ;;  %v1427_v1 = vpop.f32.mrb[89].mxu1  ;;  %v1791_v0 = vpop.f32.mrb[89].mxu0 }
 0x1aa   :  { %v1428_v19 = vpop.f32.mrb[90].mxu1  ;;  %v1792_v33 = vpop.f32.mrb[90].mxu0 }
 0x1ab   :  { %v1510_v25 = vmax.f32 %v1426_v14, 0.0  ;;  %v1880_v21 = vmax.f32 %v1790_v32, 0.0  ;;  %v1429_v26 = vadd.f32 %v5853_v17, %v1428_v19  ;;  %v1793_v18 = vadd.f32 %v5853_v17, %v1792_v33  ;;  %v1794_v29 = vpop.f32.mrb[91].mxu0  ;;  %v1430_v24 = vpop.f32.mrb[91].mxu1 }
 0x1ac   :  { %v4590_v29 = vld [vmem:[%s6349_s0 + $0x6e4] ss:$8 sps:$4 sm:$0xff]  }
 0x1ad   :  { %v1536_v48 = vmax.f32 %v5573_v2, %v1510_v25  ;;  %v5882_v34 = vmax.f32 %v1534_v41, %v1880_v21  ;;  %v1511_v46 = vmax.f32 %v1429_v26, 0.0  ;;  %v1881_v4 = vmax.f32 %v1793_v18, 0.0  ;;  %2920 = vmatmul.mubr.bf16.gmra.mrb[196].mxu1 %v4574_v61  ;;  %3284 = vmatmul.mubr.bf16.gmra.mrb[196].mxu0 %v4575_v11  ;;  %v4586_v25 = vld [vmem:[%s6349_s0 + $0x610] ss:$8 sps:$4 sm:$0xff]   ;;  %v4588_v18 = vld [vmem:[%s6349_s0 + $0x624] ss:$8 sps:$4 sm:$0xff]  }
 0x1ae   :  { %4046 = vmatprep.mubr.msk.bf16.mxu1 %vm237_vm0, %v4576_v6  ;;  %4110 = vmatprep.mubr.msk.bf16.mxu0 %vm237_vm0, %v4578_v20  ;;  %v4587_v21 = vld [vmem:[%s6349_s0 + $0x6d0] ss:$8 sps:$4 sm:$0xff]  }
 0x1af   :  { %v1537_v54 = vmax.f32 %v5579_v15, %v1511_v46  ;;  %v5887_v60 = vmax.f32 %v1535_v58, %v1881_v4 }
 0x1b0   :  { %v1433_v45 = vpop.f32.mrb[92].mxu1  ;;  %v1797_v9 = vpop.f32.mrb[92].mxu0 }
 0x1b1   :  { %v1434_v3 = vadd.f32 %v5853_v17, %v1433_v45  ;;  %v1798_v2 = vadd.f32 %v5853_v17, %v1797_v9  ;;  %v1435_v5 = vpop.f32.mrb[93].mxu1  ;;  %v1799_v35 = vpop.f32.mrb[93].mxu0 }
 0x1b2   :  { %v1436_v12 = vpop.f32.mrb[94].mxu1  ;;  %v1800_v15 = vpop.f32.mrb[94].mxu0 }
 0x1b3   :  { %v1512_v37 = vmax.f32 %v1434_v3, 0.0  ;;  %v1882_v41 = vmax.f32 %v1798_v2, 0.0  ;;  %v1437_v44 = vadd.f32 %v5853_v17, %v1436_v12  ;;  %v1801_v10 = vadd.f32 %v5853_v17, %v1800_v15  ;;  %v1802_v58 = vpop.f32.mrb[95].mxu0  ;;  %v1438_v7 = vpop.f32.mrb[95].mxu1 }
 0x1b4   :  { %v4596_v58 = vld [vmem:[%s6349_s0 + $0x6f4] ss:$8 sps:$4 sm:$0xff]  }
 0x1b5   :  { %v1538_v30 = vmax.f32 %v5600_v50, %v1512_v37  ;;  %v5906_v14 = vmax.f32 %v1536_v48, %v1882_v41  ;;  %v1513_v32 = vmax.f32 %v1437_v44, 0.0  ;;  %v1883_v1 = vmax.f32 %v1801_v10, 0.0  ;;  %2928 = vmatmul.mubr.bf16.gmra.mrb[200].mxu1 %v4580_v52  ;;  %3292 = vmatmul.mubr.bf16.gmra.mrb[200].mxu0 %v4581_v43  ;;  %v4592_v37 = vld [vmem:[%s6349_s0 + $0x620] ss:$8 sps:$4 sm:$0xff]   ;;  %v4594_v10 = vld [vmem:[%s6349_s0 + $0x634] ss:$8 sps:$4 sm:$0xff]  }
 0x1b6   :  { %4047 = vmatprep.mubr.msk.bf16.mxu1 %vm237_vm0, %v4582_v47  ;;  %4111 = vmatprep.mubr.msk.bf16.mxu0 %vm237_vm0, %v4584_v27  ;;  %v4593_v41 = vld [vmem:[%s6349_s0 + $0x6e0] ss:$8 sps:$4 sm:$0xff]  }
 0x1b7   :  { %v1539_v0 = vmax.f32 %v5606_v55, %v1513_v32  ;;  %v5911_v61 = vmax.f32 %v1537_v54, %v1883_v1 }
 0x1b8   :  { %v1441_v11 = vpop.f32.mrb[96].mxu1  ;;  %v1805_v19 = vpop.f32.mrb[96].mxu0 }
 0x1b9   :  { %v1442_v33 = vadd.f32 %v5853_v17, %v1441_v11  ;;  %v1806_v50 = vadd.f32 %v5853_v17, %v1805_v19  ;;  %v1443_v6 = vpop.f32.mrb[97].mxu1  ;;  %v1807_v20 = vpop.f32.mrb[97].mxu0 }
 0x1ba   :  { %v1444_v26 = vpop.f32.mrb[98].mxu1  ;;  %v1808_v55 = vpop.f32.mrb[98].mxu0 }
 0x1bb   :  { %v1514_v24 = vmax.f32 %v1442_v33, 0.0  ;;  %v1884_v48 = vmax.f32 %v1806_v50, 0.0  ;;  %v1445_v46 = vadd.f32 %v5853_v17, %v1444_v26  ;;  %v1809_v4 = vadd.f32 %v5853_v17, %v1808_v55  ;;  %v1810_v54 = vpop.f32.mrb[99].mxu0  ;;  %v1446_v45 = vpop.f32.mrb[99].mxu1 }
 0x1bc   :  { %v4602_v54 = vld [vmem:[%s6349_s0 + $0x704] ss:$8 sps:$4 sm:$0xff]  }
 0x1bd   :  { %v1540_v9 = vmax.f32 %v5626_v22, %v1514_v24  ;;  %v5930_v3 = vmax.f32 %v1538_v30, %v1884_v48  ;;  %v1515_v2 = vmax.f32 %v1445_v46, 0.0  ;;  %v1885_v5 = vmax.f32 %v1809_v4, 0.0  ;;  %2936 = vmatmul.mubr.bf16.gmra.mrb[204].mxu1 %v4586_v25  ;;  %3300 = vmatmul.mubr.bf16.gmra.mrb[204].mxu0 %v4587_v21  ;;  %v4598_v24 = vld [vmem:[%s6349_s0 + $0x630] ss:$8 sps:$4 sm:$0xff]   ;;  %v4600_v4 = vld [vmem:[%s6349_s0 + $0x644] ss:$8 sps:$4 sm:$0xff]  }
 0x1be   :  { %4048 = vmatprep.mubr.msk.bf16.mxu1 %vm237_vm0, %v4588_v18  ;;  %4112 = vmatprep.mubr.msk.bf16.mxu0 %vm237_vm0, %v4590_v29  ;;  %v4599_v48 = vld [vmem:[%s6349_s0 + $0x6f0] ss:$8 sps:$4 sm:$0xff]  }
 0x1bf   :  { %v1541_v35 = vmax.f32 %v5632_v28, %v1515_v2  ;;  %v5935_v52 = vmax.f32 %v1539_v0, %v1885_v5 }
 0x1c0   :  { %v1449_v43 = vpop.f32.mrb[100].mxu1  ;;  %v1813_v12 = vpop.f32.mrb[100].mxu0 }
 0x1c1   :  { %v1450_v15 = vadd.f32 %v5853_v17, %v1449_v43  ;;  %v1814_v22 = vadd.f32 %v5853_v17, %v1813_v12  ;;  %v1451_v47 = vpop.f32.mrb[101].mxu1  ;;  %v1815_v27 = vpop.f32.mrb[101].mxu0 }
 0x1c2   :  { %v1452_v44 = vpop.f32.mrb[102].mxu1  ;;  %v1816_v28 = vpop.f32.mrb[102].mxu0 }
 0x1c3   :  { %v1516_v7 = vmax.f32 %v1450_v15, 0.0  ;;  %v1886_v30 = vmax.f32 %v1814_v22, 0.0  ;;  %v1453_v32 = vadd.f32 %v5853_v17, %v1452_v44  ;;  %v1817_v1 = vadd.f32 %v5853_v17, %v1816_v28  ;;  %v1818_v0 = vpop.f32.mrb[103].mxu0  ;;  %v1454_v11 = vpop.f32.mrb[103].mxu1 }
 0x1c4   :  { %v4608_v0 = vld [vmem:[%s6349_s0 + $0x714] ss:$8 sps:$4 sm:$0xff]  }
 0x1c5   :  { %v1542_v19 = vmax.f32 %v5652_v62, %v1516_v7  ;;  %v5954_v33 = vmax.f32 %v1540_v9, %v1886_v30  ;;  %v1517_v50 = vmax.f32 %v1453_v32, 0.0  ;;  %v1887_v6 = vmax.f32 %v1817_v1, 0.0  ;;  %2944 = vmatmul.mubr.bf16.gmra.mrb[208].mxu1 %v4592_v37  ;;  %3308 = vmatmul.mubr.bf16.gmra.mrb[208].mxu0 %v4593_v41  ;;  %v4604_v7 = vld [vmem:[%s6349_s0 + $0x640] ss:$8 sps:$4 sm:$0xff]   ;;  %v4606_v1 = vld [vmem:[%s6349_s0 + $0x654] ss:$8 sps:$4 sm:$0xff]  }
 0x1c6   :  { %4049 = vmatprep.mubr.msk.bf16.mxu1 %vm237_vm0, %v4594_v10  ;;  %4113 = vmatprep.mubr.msk.bf16.mxu0 %vm237_vm0, %v4596_v58  ;;  %v4605_v30 = vld [vmem:[%s6349_s0 + $0x700] ss:$8 sps:$4 sm:$0xff]  }
 0x1c7   :  { %v1543_v20 = vmax.f32 %v5658_v8, %v1517_v50  ;;  %v5959_v25 = vmax.f32 %v1541_v35, %v1887_v6 }
 0x1c8   :  { %v1457_v21 = vpop.f32.mrb[104].mxu1  ;;  %v1821_v26 = vpop.f32.mrb[104].mxu0 }
 0x1c9   :  { %v1458_v55 = vadd.f32 %v5853_v17, %v1457_v21  ;;  %v1822_v62 = vadd.f32 %v5853_v17, %v1821_v26  ;;  %v1459_v18 = vpop.f32.mrb[105].mxu1  ;;  %v1823_v29 = vpop.f32.mrb[105].mxu0 }
 0x1ca   :  { %v1460_v46 = vpop.f32.mrb[106].mxu1  ;;  %v1824_v8 = vpop.f32.mrb[106].mxu0 }
 0x1cb   :  { %v1518_v45 = vmax.f32 %v1458_v55, 0.0  ;;  %v1888_v9 = vmax.f32 %v1822_v62, 0.0  ;;  %v1461_v2 = vadd.f32 %v5853_v17, %v1460_v46  ;;  %v1825_v5 = vadd.f32 %v5853_v17, %v1824_v8  ;;  %v1826_v35 = vpop.f32.mrb[107].mxu0  ;;  %v1462_v43 = vpop.f32.mrb[107].mxu1 }
 0x1cc   :  { %v4614_v35 = vld [vmem:[%s6349_s0 + $0x724] ss:$8 sps:$4 sm:$0xff]  }
 0x1cd   :  { %v1544_v12 = vmax.f32 %v5678_v42, %v1518_v45  ;;  %v5978_v15 = vmax.f32 %v1542_v19, %v1888_v9  ;;  %v1519_v22 = vmax.f32 %v1461_v2, 0.0  ;;  %v1889_v47 = vmax.f32 %v1825_v5, 0.0  ;;  %2952 = vmatmul.mubr.bf16.gmra.mrb[212].mxu1 %v4598_v24  ;;  %3316 = vmatmul.mubr.bf16.gmra.mrb[212].mxu0 %v4599_v48  ;;  %v4610_v45 = vld [vmem:[%s6349_s0 + $0x650] ss:$8 sps:$4 sm:$0xff]   ;;  %v4612_v5 = vld [vmem:[%s6349_s0 + $0x664] ss:$8 sps:$4 sm:$0xff]  }
 0x1ce   :  { %4050 = vmatprep.mubr.msk.bf16.mxu1 %vm237_vm0, %v4600_v4  ;;  %4114 = vmatprep.mubr.msk.bf16.mxu0 %vm237_vm0, %v4602_v54  ;;  %v4611_v9 = vld [vmem:[%s6349_s0 + $0x710] ss:$8 sps:$4 sm:$0xff]  }
 0x1cf   :  { %v1545_v27 = vmax.f32 %v5684_v51, %v1519_v22  ;;  %v5983_v37 = vmax.f32 %v1543_v20, %v1889_v47 }
 0x1d0   :  { %v1465_v41 = vpop.f32.mrb[108].mxu1  ;;  %v1829_v44 = vpop.f32.mrb[108].mxu0 }
 0x1d1   :  { %v1466_v28 = vadd.f32 %v5853_v17, %v1465_v41  ;;  %v1830_v42 = vadd.f32 %v5853_v17, %v1829_v44  ;;  %v1467_v10 = vpop.f32.mrb[109].mxu1  ;;  %v1831_v58 = vpop.f32.mrb[109].mxu0 }
 0x1d2   :  { %v1468_v32 = vpop.f32.mrb[110].mxu1  ;;  %v1832_v51 = vpop.f32.mrb[110].mxu0 }
 0x1d3   :  { %v1520_v11 = vmax.f32 %v1466_v28, 0.0  ;;  %v1890_v19 = vmax.f32 %v1830_v42, 0.0  ;;  %v1469_v50 = vadd.f32 %v5853_v17, %v1468_v32  ;;  %v1833_v6 = vadd.f32 %v5853_v17, %v1832_v51  ;;  %v1834_v20 = vpop.f32.mrb[111].mxu0  ;;  %v1470_v21 = vpop.f32.mrb[111].mxu1 }
 0x1d4   :  { %v4620_v20 = vld [vmem:[%s6349_s0 + $0x734] ss:$8 sps:$4 sm:$0xff]  }
 0x1d5   :  { %v1546_v26 = vmax.f32 %v5704_v16, %v1520_v11  ;;  %v6002_v55 = vmax.f32 %v1544_v12, %v1890_v19  ;;  %v1521_v62 = vmax.f32 %v1469_v50, 0.0  ;;  %v1891_v18 = vmax.f32 %v1833_v6, 0.0  ;;  %2960 = vmatmul.mubr.bf16.gmra.mrb[216].mxu1 %v4604_v7  ;;  %3324 = vmatmul.mubr.bf16.gmra.mrb[216].mxu0 %v4605_v30  ;;  %v4616_v11 = vld [vmem:[%s6349_s0 + $0x660] ss:$8 sps:$4 sm:$0xff]   ;;  %v4618_v6 = vld [vmem:[%s6349_s0 + $0x674] ss:$8 sps:$4 sm:$0xff]  }
 0x1d6   :  { %4051 = vmatprep.mubr.msk.bf16.mxu1 %vm237_vm0, %v4606_v1  ;;  %4115 = vmatprep.mubr.msk.bf16.mxu0 %vm237_vm0, %v4608_v0  ;;  %v4617_v19 = vld [vmem:[%s6349_s0 + $0x720] ss:$8 sps:$4 sm:$0xff]  }
 0x1d7   :  { %v1547_v29 = vmax.f32 %v5710_v57, %v1521_v62  ;;  %v6007_v24 = vmax.f32 %v1545_v27, %v1891_v18 }
 0x1d8   :  { %v1473_v48 = vpop.f32.mrb[112].mxu1  ;;  %v1837_v46 = vpop.f32.mrb[112].mxu0 }
 0x1d9   :  { %v1474_v8 = vadd.f32 %v5853_v17, %v1473_v48  ;;  %v1838_v16 = vadd.f32 %v5853_v17, %v1837_v46  ;;  %v1475_v4 = vpop.f32.mrb[113].mxu1  ;;  %v1839_v54 = vpop.f32.mrb[113].mxu0 }
 0x1da   :  { %v1476_v2 = vpop.f32.mrb[114].mxu1  ;;  %v1840_v57 = vpop.f32.mrb[114].mxu0 }
 0x1db   :  { %v1522_v43 = vmax.f32 %v1474_v8, 0.0  ;;  %v1892_v12 = vmax.f32 %v1838_v16, 0.0  ;;  %v1477_v22 = vadd.f32 %v5853_v17, %v1476_v2  ;;  %v1841_v47 = vadd.f32 %v5853_v17, %v1840_v57  ;;  %v1842_v27 = vpop.f32.mrb[115].mxu0  ;;  %v1478_v41 = vpop.f32.mrb[115].mxu1 }
 0x1dd   :  { %v1548_v44 = vmax.f32 %v5730_v59, %v1522_v43  ;;  %v6026_v28 = vmax.f32 %v1546_v26, %v1892_v12  ;;  %v1523_v42 = vmax.f32 %v1477_v22, 0.0  ;;  %v1893_v10 = vmax.f32 %v1841_v47, 0.0  ;;  %2968 = vmatmul.mubr.bf16.gmra.mrb[220].mxu1 %v4610_v45  ;;  %3332 = vmatmul.mubr.bf16.gmra.mrb[220].mxu0 %v4611_v9  ;;  %v4622_v43 = vld [vmem:[%s6349_s0 + $0x670] ss:$8 sps:$4 sm:$0xff]   ;;  %v4624_v47 = vld [vmem:[%s6349_s0 + $0x744] ss:$8 sps:$4 sm:$0xff]  }
 0x1de   :  { %4052 = vmatprep.mubr.msk.bf16.mxu1 %vm237_vm0, %v4612_v5  ;;  %4116 = vmatprep.mubr.msk.bf16.mxu0 %vm237_vm0, %v4614_v35  ;;  %v4623_v12 = vld [vmem:[%s6349_s0 + $0x730] ss:$8 sps:$4 sm:$0xff]  }
 0x1df   :  { %v1549_v58 = vmax.f32 %v5736_v53, %v1523_v42  ;;  %v6031_v7 = vmax.f32 %v1547_v29, %v1893_v10 }
 0x1e0   :  { %v1481_v30 = vpop.f32.mrb[116].mxu1  ;;  %v1845_v32 = vpop.f32.mrb[116].mxu0 }
 0x1e1   :  { %v1482_v51 = vadd.f32 %v5853_v17, %v1481_v30  ;;  %v1846_v59 = vadd.f32 %v5853_v17, %v1845_v32  ;;  %v1483_v1 = vpop.f32.mrb[117].mxu1  ;;  %v1847_v0 = vpop.f32.mrb[117].mxu0 }
 0x1e2   :  { %v1484_v50 = vpop.f32.mrb[118].mxu1  ;;  %v1848_v53 = vpop.f32.mrb[118].mxu0 }
 0x1e3   :  { %v1524_v21 = vmax.f32 %v1482_v51, 0.0  ;;  %v1894_v26 = vmax.f32 %v1846_v59, 0.0  ;;  %v1485_v62 = vadd.f32 %v5853_v17, %v1484_v50  ;;  %v1849_v18 = vadd.f32 %v5853_v17, %v1848_v53  ;;  %v1850_v29 = vpop.f32.mrb[119].mxu0  ;;  %v1486_v48 = vpop.f32.mrb[119].mxu1 }
 0x1e5   :  { %v1550_v46 = vmax.f32 %v5756_v36, %v1524_v21  ;;  %v6050_v8 = vmax.f32 %v1548_v44, %v1894_v26  ;;  %v1525_v16 = vmax.f32 %v1485_v62, 0.0  ;;  %v1895_v4 = vmax.f32 %v1849_v18, 0.0  ;;  %2976 = vmatmul.mubr.bf16.gmra.mrb[224].mxu1 %v4616_v11  ;;  %3340 = vmatmul.mubr.bf16.gmra.mrb[224].mxu0 %v4617_v19 }
 0x1e6   :  { %4053 = vmatprep.mubr.msk.bf16.mxu1 %vm237_vm0, %v4618_v6  ;;  %4117 = vmatprep.mubr.msk.bf16.mxu0 %vm237_vm0, %v4620_v20  ;;  %v4626_v20 = vld [vmem:[%s6349_s0 + $0x740] ss:$8 sps:$4 sm:$0xff]  }
 0x1e7   :  { %v1551_v54 = vmax.f32 %v5762_v13, %v1525_v16  ;;  %v6055_v45 = vmax.f32 %v1549_v58, %v1895_v4 }
 0x1e8   :  { %v1489_v9 = vpop.f32.mrb[120].mxu1  ;;  %v1853_v2 = vpop.f32.mrb[120].mxu0 }
 0x1e9   :  { %v1490_v57 = vadd.f32 %v5853_v17, %v1489_v9  ;;  %v1854_v36 = vadd.f32 %v5853_v17, %v1853_v2  ;;  %v1491_v5 = vpop.f32.mrb[121].mxu1  ;;  %v1855_v35 = vpop.f32.mrb[121].mxu0 }
 0x1ea   :  { %v1492_v22 = vpop.f32.mrb[122].mxu1  ;;  %v1856_v13 = vpop.f32.mrb[122].mxu0 }
 0x1eb   :  { %v1526_v27 = vmax.f32 %v1490_v57, 0.0  ;;  %v1896_v41 = vmax.f32 %v1854_v36, 0.0  ;;  %v1493_v44 = vadd.f32 %v5853_v17, %v1492_v22  ;;  %v1857_v42 = vadd.f32 %v5853_v17, %v1856_v13  ;;  %v1858_v10 = vpop.f32.mrb[123].mxu0  ;;  %v1494_v58 = vpop.f32.mrb[123].mxu1 }
 0x1ed   :  { %v1552_v30 = vmax.f32 %v5782_v38, %v1526_v27  ;;  %v6071_v32 = vmax.f32 %v1550_v46, %v1896_v41  ;;  %v1527_v51 = vmax.f32 %v1493_v44, 0.0  ;;  %v1897_v59 = vmax.f32 %v1857_v42, 0.0  ;;  %2984 = vmatmul.mubr.bf16.gmra.mrb[228].mxu1 %v4622_v43  ;;  %3348 = vmatmul.mubr.bf16.gmra.mrb[228].mxu0 %v4623_v12 }
 0x1ee   :  { %4118 = vmatprep.mubr.msk.bf16.mxu0 %vm237_vm0, %v4624_v47 }
 0x1ef   :  { %v1553_v1 = vmax.f32 %v5786_v39, %v1527_v51  ;;  %v6075_v0 = vmax.f32 %v1551_v54, %v1897_v59 }
 0x1f0   :  { %v1497_v11 = vpop.f32.mrb[124].mxu1  ;;  %v1861_v19 = vpop.f32.mrb[124].mxu0 }
 0x1f1   :  { %v1498_v50 = vadd.f32 %v5853_v17, %v1497_v11  ;;  %v1862_v53 = vadd.f32 %v5853_v17, %v1861_v19  ;;  %v1499_v6 = vpop.f32.mrb[125].mxu1  ;;  %v1863_v38 = vpop.f32.mrb[125].mxu0 }
 0x1f2   :  { %v1500_v21 = vpop.f32.mrb[126].mxu1  ;;  %v1864_v26 = vpop.f32.mrb[126].mxu0 }
 0x1f3   :  { %v1528_v62 = vmax.f32 %v1498_v50, 0.0  ;;  %v1898_v18 = vmax.f32 %v1862_v53, 0.0  ;;  %v1501_v39 = vadd.f32 %v5853_v17, %v1500_v21  ;;  %v1865_v29 = vadd.f32 %v5853_v17, %v1864_v26  ;;  %v1866_v48 = vpop.f32.mrb[127].mxu0  ;;  %v1502_v46 = vpop.f32.mrb[127].mxu1 }
 0x1f5   :  { %v1554_v16 = vmax.f32 %v5804_v56, %v1528_v62  ;;  %v6085_v4 = vmax.f32 %v1552_v30, %v1898_v18  ;;  %v1529_v54 = vmax.f32 %v1501_v39, 0.0  ;;  %v1899_v9 = vmax.f32 %v1865_v29, 0.0  ;;  %3356 = vmatmul.mubr.bf16.gmra.mrb[232].mxu0 %v4626_v20 }
 0x1f7   :  { %v1555_v2 = vmax.f32 %v5809_v31, %v1529_v54  ;;  %v6088_v57 = vmax.f32 %v1553_v1, %v1899_v9 }
 0x1f8   :  { %v1869_v36 = vpop.f32.mrb[128].mxu0  ;;  %v2145_v5 = vpop.f32.mrb[128].mxu1 }
 0x1f9   :  { %v1870_v35 = vadd.f32 %v5853_v17, %v1869_v36  ;;  %v2146_v43 = vadd.f32 %v5853_v17, %v2145_v5  ;;  %v1871_v12 = vpop.f32.mrb[129].mxu0  ;;  %v2147_v22 = vpop.f32.mrb[129].mxu1 }
 0x1fa   :  { %v1872_v13 = vpop.f32.mrb[130].mxu0  ;;  %v2148_v47 = vpop.f32.mrb[130].mxu1 }
 0x1fb   :  { %v1900_v56 = vmax.f32 %v1870_v35, 0.0  ;;  %v2248_v27 = vmax.f32 %v2146_v43, 0.0  ;;  %v1873_v41 = vadd.f32 %v5853_v17, %v1872_v13  ;;  %v2149_v44 = vadd.f32 %v5853_v17, %v2148_v47  ;;  %v1874_v42 = vpop.f32.mrb[131].mxu0  ;;  %v2150_v31 = vpop.f32.mrb[131].mxu1 }
 0x1fd   :  { %v6094_v10 = vmax.f32 %v1554_v16, %v1900_v56  ;;  %v2274_v58 = vmax.f32 %v5829_v23, %v2248_v27  ;;  %v1901_v30 = vmax.f32 %v1873_v41, 0.0  ;;  %v2249_v51 = vmax.f32 %v2149_v44, 0.0 }
 0x1ff   :  { %v6097_v59 = vmax.f32 %v1555_v2, %v1901_v30  ;;  %v2275_v1 = vmax.f32 %v5834_v49, %v2249_v51 }
 0x200   :  { %v2153_v11 = vpop.f32.mrb[132].mxu1  ;;  %v2517_v19 = vpop.f32.mrb[132].mxu0 }
 0x201   :  { %v2154_v50 = vadd.f32 %v5853_v17, %v2153_v11  ;;  %v2518_v53 = vadd.f32 %v5853_v17, %v2517_v19  ;;  %v2155_v6 = vpop.f32.mrb[133].mxu1  ;;  %v2519_v38 = vpop.f32.mrb[133].mxu0 }
 0x202   :  { %v2156_v20 = vpop.f32.mrb[134].mxu1  ;;  %v2520_v21 = vpop.f32.mrb[134].mxu0 }
 0x203   :  { %v2250_v26 = vmax.f32 %v2154_v50, 0.0  ;;  %v2620_v62 = vmax.f32 %v2518_v53, 0.0  ;;  %v2157_v23 = vadd.f32 %v5853_v17, %v2156_v20  ;;  %v2521_v18 = vadd.f32 %v5853_v17, %v2520_v21  ;;  %v2522_v39 = vpop.f32.mrb[135].mxu0  ;;  %v2158_v29 = vpop.f32.mrb[135].mxu1 }
 0x205   :  { %v2276_v49 = vmax.f32 %v5858_v40, %v2250_v26  ;;  %v6105_v48 = vmax.f32 %v2274_v58, %v2620_v62  ;;  %v2251_v46 = vmax.f32 %v2157_v23, 0.0  ;;  %v2621_v16 = vmax.f32 %v2521_v18, 0.0 }
 0x207   :  { %v2277_v54 = vmax.f32 %v5863_v63, %v2251_v46  ;;  %v6108_v9 = vmax.f32 %v2275_v1, %v2621_v16 }
 0x208   :  { %v2161_v2 = vpop.f32.mrb[136].mxu1  ;;  %v2525_v36 = vpop.f32.mrb[136].mxu0 }
 0x209   :  { %v2162_v5 = vadd.f32 %v5853_v17, %v2161_v2  ;;  %v2526_v35 = vadd.f32 %v5853_v17, %v2525_v36  ;;  %v2163_v43 = vpop.f32.mrb[137].mxu1  ;;  %v2527_v12 = vpop.f32.mrb[137].mxu0 }
 0x20a   :  { %v2164_v22 = vpop.f32.mrb[138].mxu1  ;;  %v2528_v13 = vpop.f32.mrb[138].mxu0 }
 0x20b   :  { %v2252_v47 = vmax.f32 %v2162_v5, 0.0  ;;  %v2622_v40 = vmax.f32 %v2526_v35, 0.0  ;;  %v2165_v56 = vadd.f32 %v5853_v17, %v2164_v22  ;;  %v2529_v27 = vadd.f32 %v5853_v17, %v2528_v13  ;;  %v2530_v41 = vpop.f32.mrb[139].mxu0  ;;  %v2166_v63 = vpop.f32.mrb[139].mxu1 }
 0x20d   :  { %v2278_v44 = vmax.f32 %v5882_v34, %v2252_v47  ;;  %v6115_v42 = vmax.f32 %v2276_v49, %v2622_v40  ;;  %v2253_v31 = vmax.f32 %v2165_v56, 0.0  ;;  %v2623_v58 = vmax.f32 %v2529_v27, 0.0 }
 0x20f   :  { %v2279_v30 = vmax.f32 %v5887_v60, %v2253_v31  ;;  %v6118_v51 = vmax.f32 %v2277_v54, %v2623_v58 }
 0x210   :  { %v2169_v1 = vpop.f32.mrb[140].mxu1  ;;  %v2533_v11 = vpop.f32.mrb[140].mxu0 }
 0x211   :  { %v2170_v19 = vadd.f32 %v5853_v17, %v2169_v1  ;;  %v2534_v50 = vadd.f32 %v5853_v17, %v2533_v11  ;;  %v2171_v53 = vpop.f32.mrb[141].mxu1  ;;  %v2535_v6 = vpop.f32.mrb[141].mxu0 }
 0x212   :  { %v2172_v38 = vpop.f32.mrb[142].mxu1  ;;  %v2536_v20 = vpop.f32.mrb[142].mxu0 }
 0x213   :  { %v2254_v21 = vmax.f32 %v2170_v19, 0.0  ;;  %v2624_v34 = vmax.f32 %v2534_v50, 0.0  ;;  %v2173_v26 = vadd.f32 %v5853_v17, %v2172_v38  ;;  %v2537_v62 = vadd.f32 %v5853_v17, %v2536_v20  ;;  %v2538_v23 = vpop.f32.mrb[143].mxu0  ;;  %v2174_v60 = vpop.f32.mrb[143].mxu1 }
 0x215   :  { %v2280_v18 = vmax.f32 %v5906_v14, %v2254_v21  ;;  %v6125_v39 = vmax.f32 %v2278_v44, %v2624_v34  ;;  %v2255_v29 = vmax.f32 %v2173_v26, 0.0  ;;  %v2625_v49 = vmax.f32 %v2537_v62, 0.0 }
 0x217   :  { %v2281_v46 = vmax.f32 %v5911_v61, %v2255_v29  ;;  %v6128_v16 = vmax.f32 %v2279_v30, %v2625_v49 }
 0x218   :  { %v2177_v54 = vpop.f32.mrb[144].mxu1  ;;  %v2541_v2 = vpop.f32.mrb[144].mxu0 }
 0x219   :  { %v2178_v36 = vadd.f32 %v5853_v17, %v2177_v54  ;;  %v2542_v5 = vadd.f32 %v5853_v17, %v2541_v2  ;;  %v2179_v35 = vpop.f32.mrb[145].mxu1  ;;  %v2543_v43 = vpop.f32.mrb[145].mxu0 }
 0x21a   :  { %v2180_v12 = vpop.f32.mrb[146].mxu1  ;;  %v2544_v22 = vpop.f32.mrb[146].mxu0 }
 0x21b   :  { %v2256_v13 = vmax.f32 %v2178_v36, 0.0  ;;  %v2626_v14 = vmax.f32 %v2542_v5, 0.0  ;;  %v2181_v47 = vadd.f32 %v5853_v17, %v2180_v12  ;;  %v2545_v40 = vadd.f32 %v5853_v17, %v2544_v22  ;;  %v2546_v56 = vpop.f32.mrb[147].mxu0  ;;  %v2182_v61 = vpop.f32.mrb[147].mxu1 }
 0x21d   :  { %v2282_v27 = vmax.f32 %v5930_v3, %v2256_v13  ;;  %v6135_v41 = vmax.f32 %v2280_v18, %v2626_v14  ;;  %v2257_v63 = vmax.f32 %v2181_v47, 0.0  ;;  %v2627_v44 = vmax.f32 %v2545_v40, 0.0 }
 0x21f   :  { %v2283_v31 = vmax.f32 %v5935_v52, %v2257_v63  ;;  %v6138_v58 = vmax.f32 %v2281_v46, %v2627_v44 }
 0x220   :  { %v2185_v30 = vpop.f32.mrb[148].mxu1  ;;  %v2549_v1 = vpop.f32.mrb[148].mxu0 }
 0x221   :  { %v2186_v11 = vadd.f32 %v5853_v17, %v2185_v30  ;;  %v2550_v19 = vadd.f32 %v5853_v17, %v2549_v1  ;;  %v2187_v50 = vpop.f32.mrb[149].mxu1  ;;  %v2551_v53 = vpop.f32.mrb[149].mxu0 }
 0x222   :  { %v2188_v6 = vpop.f32.mrb[150].mxu1  ;;  %v2552_v38 = vpop.f32.mrb[150].mxu0 }
 0x223   :  { %v2258_v20 = vmax.f32 %v2186_v11, 0.0  ;;  %v2628_v3 = vmax.f32 %v2550_v19, 0.0  ;;  %v2189_v21 = vadd.f32 %v5853_v17, %v2188_v6  ;;  %v2553_v34 = vadd.f32 %v5853_v17, %v2552_v38  ;;  %v2554_v26 = vpop.f32.mrb[151].mxu0  ;;  %v2190_v52 = vpop.f32.mrb[151].mxu1 }
 0x225   :  { %v2284_v62 = vmax.f32 %v5954_v33, %v2258_v20  ;;  %v6145_v23 = vmax.f32 %v2282_v27, %v2628_v3  ;;  %v2259_v60 = vmax.f32 %v2189_v21, 0.0  ;;  %v2629_v18 = vmax.f32 %v2553_v34, 0.0 }
 0x227   :  { %v2285_v29 = vmax.f32 %v5959_v25, %v2259_v60  ;;  %v6148_v49 = vmax.f32 %v2283_v31, %v2629_v18 }
 0x228   :  { %v2193_v46 = vpop.f32.mrb[152].mxu1  ;;  %v2557_v54 = vpop.f32.mrb[152].mxu0 }
 0x229   :  { %v2194_v2 = vadd.f32 %v5853_v17, %v2193_v46  ;;  %v2558_v36 = vadd.f32 %v5853_v17, %v2557_v54  ;;  %v2195_v5 = vpop.f32.mrb[153].mxu1  ;;  %v2559_v35 = vpop.f32.mrb[153].mxu0 }
 0x22a   :  { %v2196_v43 = vpop.f32.mrb[154].mxu1  ;;  %v2560_v12 = vpop.f32.mrb[154].mxu0 }
 0x22b   :  { %v2260_v22 = vmax.f32 %v2194_v2, 0.0  ;;  %v2630_v33 = vmax.f32 %v2558_v36, 0.0  ;;  %v2197_v13 = vadd.f32 %v5853_v17, %v2196_v43  ;;  %v2561_v14 = vadd.f32 %v5853_v17, %v2560_v12  ;;  %v2562_v47 = vpop.f32.mrb[155].mxu0  ;;  %v2198_v25 = vpop.f32.mrb[155].mxu1 }
 0x22d   :  { %v2286_v40 = vmax.f32 %v5978_v15, %v2260_v22  ;;  %v6155_v56 = vmax.f32 %v2284_v62, %v2630_v33  ;;  %v2261_v61 = vmax.f32 %v2197_v13, 0.0  ;;  %v2631_v27 = vmax.f32 %v2561_v14, 0.0 }
 0x22f   :  { %v2287_v63 = vmax.f32 %v5983_v37, %v2261_v61  ;;  %v6158_v44 = vmax.f32 %v2285_v29, %v2631_v27 }
 0x230   :  { %v2201_v31 = vpop.f32.mrb[156].mxu1  ;;  %v2565_v30 = vpop.f32.mrb[156].mxu0 }
 0x231   :  { %v2202_v1 = vadd.f32 %v5853_v17, %v2201_v31  ;;  %v2566_v11 = vadd.f32 %v5853_v17, %v2565_v30  ;;  %v2203_v19 = vpop.f32.mrb[157].mxu1  ;;  %v2567_v50 = vpop.f32.mrb[157].mxu0 }
 0x232   :  { %v2204_v53 = vpop.f32.mrb[158].mxu1  ;;  %v2568_v6 = vpop.f32.mrb[158].mxu0 }
 0x233   :  { %v2262_v38 = vmax.f32 %v2202_v1, 0.0  ;;  %v2632_v15 = vmax.f32 %v2566_v11, 0.0  ;;  %v2205_v20 = vadd.f32 %v5853_v17, %v2204_v53  ;;  %v2569_v3 = vadd.f32 %v5853_v17, %v2568_v6  ;;  %v2570_v21 = vpop.f32.mrb[159].mxu0  ;;  %v2206_v37 = vpop.f32.mrb[159].mxu1 }
 0x235   :  { %v2288_v34 = vmax.f32 %v6002_v55, %v2262_v38  ;;  %v6165_v26 = vmax.f32 %v2286_v40, %v2632_v15  ;;  %v2263_v52 = vmax.f32 %v2205_v20, 0.0  ;;  %v2633_v62 = vmax.f32 %v2569_v3, 0.0 }
 0x237   :  { %v2289_v60 = vmax.f32 %v6007_v24, %v2263_v52  ;;  %v6168_v18 = vmax.f32 %v2287_v63, %v2633_v62 }
 0x238   :  { %v2209_v29 = vpop.f32.mrb[160].mxu1  ;;  %v2573_v46 = vpop.f32.mrb[160].mxu0 }
 0x239   :  { %v2210_v54 = vadd.f32 %v5853_v17, %v2209_v29  ;;  %v2574_v2 = vadd.f32 %v5853_v17, %v2573_v46  ;;  %v2211_v36 = vpop.f32.mrb[161].mxu1  ;;  %v2575_v5 = vpop.f32.mrb[161].mxu0 }
 0x23a   :  { %v2212_v35 = vpop.f32.mrb[162].mxu1  ;;  %v2576_v43 = vpop.f32.mrb[162].mxu0 }
 0x23b   :  { %v2264_v12 = vmax.f32 %v2210_v54, 0.0  ;;  %v2634_v55 = vmax.f32 %v2574_v2, 0.0  ;;  %v2213_v22 = vadd.f32 %v5853_v17, %v2212_v35  ;;  %v2577_v33 = vadd.f32 %v5853_v17, %v2576_v43  ;;  %v2578_v13 = vpop.f32.mrb[163].mxu0  ;;  %v2214_v24 = vpop.f32.mrb[163].mxu1 }
 0x23d   :  { %v2290_v14 = vmax.f32 %v6026_v28, %v2264_v12  ;;  %v6175_v47 = vmax.f32 %v2288_v34, %v2634_v55  ;;  %v2265_v25 = vmax.f32 %v2213_v22, 0.0  ;;  %v2635_v40 = vmax.f32 %v2577_v33, 0.0 }
 0x23f   :  { %v2291_v61 = vmax.f32 %v6031_v7, %v2265_v25  ;;  %v6178_v27 = vmax.f32 %v2289_v60, %v2635_v40 }
 0x240   :  { %v2217_v63 = vpop.f32.mrb[164].mxu1  ;;  %v2581_v31 = vpop.f32.mrb[164].mxu0 }
 0x241   :  { %v2218_v30 = vadd.f32 %v5853_v17, %v2217_v63  ;;  %v2582_v1 = vadd.f32 %v5853_v17, %v2581_v31  ;;  %v2219_v11 = vpop.f32.mrb[165].mxu1  ;;  %v2583_v19 = vpop.f32.mrb[165].mxu0 }
 0x242   :  { %v2220_v50 = vpop.f32.mrb[166].mxu1  ;;  %v2584_v53 = vpop.f32.mrb[166].mxu0 }
 0x243   :  { %v2266_v6 = vmax.f32 %v2218_v30, 0.0  ;;  %v2636_v28 = vmax.f32 %v2582_v1, 0.0  ;;  %v2221_v38 = vadd.f32 %v5853_v17, %v2220_v50  ;;  %v2585_v15 = vadd.f32 %v5853_v17, %v2584_v53  ;;  %v2586_v20 = vpop.f32.mrb[167].mxu0  ;;  %v2222_v7 = vpop.f32.mrb[167].mxu1 }
 0x245   :  { %v2292_v3 = vmax.f32 %v6050_v8, %v2266_v6  ;;  %v6185_v21 = vmax.f32 %v2290_v14, %v2636_v28  ;;  %v2267_v37 = vmax.f32 %v2221_v38, 0.0  ;;  %v2637_v34 = vmax.f32 %v2585_v15, 0.0  ;;  %v6205_v6 = vld [vmem:[%s6350_s2] ss:$0 sm:$0xff] }
 0x247   :  { %v2293_v52 = vmax.f32 %v6055_v45, %v2267_v37  ;;  %v6188_v62 = vmax.f32 %v2291_v61, %v2637_v34 }
 0x248   :  { %v2225_v60 = vpop.f32.mrb[168].mxu1  ;;  %v2589_v29 = vpop.f32.mrb[168].mxu0 }
 0x249   :  { %v2226_v46 = vadd.f32 %v5853_v17, %v2225_v60  ;;  %v2590_v54 = vadd.f32 %v5853_v17, %v2589_v29  ;;  %v2227_v2 = vpop.f32.mrb[169].mxu1  ;;  %v2591_v36 = vpop.f32.mrb[169].mxu0 }
 0x24a   :  { %v2228_v5 = vpop.f32.mrb[170].mxu1  ;;  %v2592_v35 = vpop.f32.mrb[170].mxu0 }
 0x24b   :  { %v2268_v43 = vmax.f32 %v2226_v46, 0.0  ;;  %v2638_v8 = vmax.f32 %v2590_v54, 0.0  ;;  %v2229_v12 = vadd.f32 %v5853_v17, %v2228_v5  ;;  %v2593_v55 = vadd.f32 %v5853_v17, %v2592_v35  ;;  %v2594_v22 = vpop.f32.mrb[171].mxu0  ;;  %v2230_v45 = vpop.f32.mrb[171].mxu1 }
 0x24d   :  { %v2294_v33 = vmax.f32 %v6071_v32, %v2268_v43  ;;  %v6195_v13 = vmax.f32 %v2292_v3, %v2638_v8  ;;  %v2269_v24 = vmax.f32 %v2229_v12, 0.0  ;;  %v2639_v14 = vmax.f32 %v2593_v55, 0.0 }
 0x24f   :  { %v2295_v25 = vmax.f32 %v6075_v0, %v2269_v24  ;;  %v6198_v40 = vmax.f32 %v2293_v52, %v2639_v14 }
 0x250   :  { %v2233_v61 = vpop.f32.mrb[172].mxu1  ;;  %v2597_v63 = vpop.f32.mrb[172].mxu0 }
 0x251   :  { %v2234_v31 = vadd.f32 %v5853_v17, %v2233_v61  ;;  %v2598_v30 = vadd.f32 %v5853_v17, %v2597_v63  ;;  %v2235_v1 = vpop.f32.mrb[173].mxu1  ;;  %v2599_v11 = vpop.f32.mrb[173].mxu0 }
 0x252   :  { %v2236_v19 = vpop.f32.mrb[174].mxu1  ;;  %v2600_v50 = vpop.f32.mrb[174].mxu0 }
 0x253   :  { %v2270_v53 = vmax.f32 %v2234_v31, 0.0  ;;  %v2640_v32 = vmax.f32 %v2598_v30, 0.0  ;;  %v2237_v0 = vadd.f32 %v6205_v6, %v2236_v19  ;;  %v2601_v28 = vadd.f32 %v6205_v6, %v2600_v50  ;;  %v2602_v38 = vpop.f32.mrb[175].mxu0  ;;  %v2238_v15 = vpop.f32.mrb[175].mxu1 }
 0x255   :  { %v2296_v20 = vmax.f32 %v6085_v4, %v2270_v53  ;;  %v6210_v17 = vmax.f32 %v2294_v33, %v2640_v32  ;;  %v2271_v7 = vmax.f32 %v2237_v0, 0.0  ;;  %v2641_v3 = vmax.f32 %v2601_v28, 0.0 }
 0x257   :  { %v2297_v37 = vmax.f32 %v6088_v57, %v2271_v7  ;;  %v6213_v34 = vmax.f32 %v2295_v25, %v2641_v3 }
 0x258   :  { %v2241_v52 = vpop.f32.mrb[176].mxu1  ;;  %v2605_v60 = vpop.f32.mrb[176].mxu0 }
 0x259   :  { %v2242_v29 = vadd.f32 %v6205_v6, %v2241_v52  ;;  %v2606_v46 = vadd.f32 %v6205_v6, %v2605_v60  ;;  %v2243_v54 = vpop.f32.mrb[177].mxu1  ;;  %v2607_v2 = vpop.f32.mrb[177].mxu0 }
 0x25a   :  { %v2244_v36 = vpop.f32.mrb[178].mxu1  ;;  %v2608_v5 = vpop.f32.mrb[178].mxu0 }
 0x25b   :  { %v2272_v35 = vmax.f32 %v2242_v29, 0.0  ;;  %v2642_v4 = vmax.f32 %v2606_v46, 0.0  ;;  %v2245_v43 = vadd.f32 %v6205_v6, %v2244_v36  ;;  %v2609_v8 = vadd.f32 %v6205_v6, %v2608_v5  ;;  %v2610_v12 = vpop.f32.mrb[179].mxu0  ;;  %v2246_v57 = vpop.f32.mrb[179].mxu1 }
 0x25d   :  { %v2298_v55 = vmax.f32 %v6094_v10, %v2272_v35  ;;  %v6220_v22 = vmax.f32 %v2296_v20, %v2642_v4  ;;  %v2273_v45 = vmax.f32 %v2245_v43, 0.0  ;;  %v2643_v33 = vmax.f32 %v2609_v8, 0.0 }
 0x25f   :  { %v2299_v24 = vmax.f32 %v6097_v59, %v2273_v45  ;;  %v6223_v14 = vmax.f32 %v2297_v37, %v2643_v33 }
 0x260   :  { %v2613_v25 = vpop.f32.mrb[180].mxu0  ;;  %v2889_v61 = vpop.f32.mrb[180].mxu1 }
 0x261   :  { %v2614_v63 = vadd.f32 %v6205_v6, %v2613_v25  ;;  %v2890_v31 = vadd.f32 %v6205_v6, %v2889_v61  ;;  %v2615_v30 = vpop.f32.mrb[181].mxu0  ;;  %v2891_v1 = vpop.f32.mrb[181].mxu1 }
 0x262   :  { %v2616_v11 = vpop.f32.mrb[182].mxu0  ;;  %v2892_v19 = vpop.f32.mrb[182].mxu1 }
 0x263   :  { %v2644_v50 = vmax.f32 %v2614_v63, 0.0  ;;  %v2992_v10 = vmax.f32 %v2890_v31, 0.0  ;;  %v2617_v53 = vadd.f32 %v6205_v6, %v2616_v11  ;;  %v2893_v32 = vadd.f32 %v6205_v6, %v2892_v19  ;;  %v2618_v0 = vpop.f32.mrb[183].mxu0  ;;  %v2894_v59 = vpop.f32.mrb[183].mxu1 }
 0x265   :  { %v6229_v28 = vmax.f32 %v2298_v55, %v2644_v50  ;;  %v3018_v38 = vmax.f32 %v6105_v48, %v2992_v10  ;;  %v2645_v15 = vmax.f32 %v2617_v53, 0.0  ;;  %v2993_v20 = vmax.f32 %v2893_v32, 0.0 }
 0x267   :  { %v6232_v7 = vmax.f32 %v2299_v24, %v2645_v15  ;;  %v3019_v3 = vmax.f32 %v6108_v9, %v2993_v20 }
 0x268   :  { %v2897_v37 = vpop.f32.mrb[184].mxu1  ;;  %v3261_v52 = vpop.f32.mrb[184].mxu0 }
 0x269   :  { %v2898_v60 = vadd.f32 %v6205_v6, %v2897_v37  ;;  %v3262_v29 = vadd.f32 %v6205_v6, %v3261_v52  ;;  %v2899_v46 = vpop.f32.mrb[185].mxu1  ;;  %v3263_v54 = vpop.f32.mrb[185].mxu0 }
 0x26a   :  { %v2900_v2 = vpop.f32.mrb[186].mxu1  ;;  %v3264_v36 = vpop.f32.mrb[186].mxu0 }
 0x26b   :  { %v2994_v5 = vmax.f32 %v2898_v60, 0.0  ;;  %v3364_v35 = vmax.f32 %v3262_v29, 0.0  ;;  %v2901_v48 = vadd.f32 %v6205_v6, %v2900_v2  ;;  %v3265_v4 = vadd.f32 %v6205_v6, %v3264_v36  ;;  %v3266_v43 = vpop.f32.mrb[187].mxu0  ;;  %v2902_v8 = vpop.f32.mrb[187].mxu1 }
 0x26d   :  { %v3020_v9 = vmax.f32 %v6115_v42, %v2994_v5  ;;  %v3390_v12 = vmax.f32 %v3018_v38, %v3364_v35  ;;  %v2995_v57 = vmax.f32 %v2901_v48, 0.0  ;;  %v3365_v55 = vmax.f32 %v3265_v4, 0.0 }
 0x26f   :  { %v3021_v45 = vmax.f32 %v6118_v51, %v2995_v57  ;;  %v3391_v33 = vmax.f32 %v3019_v3, %v3365_v55 }
 0x270   :  { %v2905_v24 = vpop.f32.mrb[188].mxu1  ;;  %v3269_v25 = vpop.f32.mrb[188].mxu0 }
 0x271   :  { %v4174_v61 = vpack.c.bf16 %v3391_v33, %v3390_v12  ;;  %v2906_v63 = vadd.f32 %v6205_v6, %v2905_v24  ;;  %v3270_v31 = vadd.f32 %v6205_v6, %v3269_v25  ;;  %v2907_v30 = vpop.f32.mrb[189].mxu1  ;;  %v3271_v1 = vpop.f32.mrb[189].mxu0 }
 0x272   :  { %v2908_v11 = vpop.f32.mrb[190].mxu1  ;;  %v3272_v19 = vpop.f32.mrb[190].mxu0 }
 0x273   :  { %4175 = vst [vmem:[%s6351_s3] sm:$0xff] %v4174_v61   ;;  %v2996_v42 = vmax.f32 %v2906_v63, 0.0  ;;  %v3366_v50 = vmax.f32 %v3270_v31, 0.0  ;;  %v2909_v51 = vadd.f32 %v6205_v6, %v2908_v11  ;;  %v3273_v10 = vadd.f32 %v6205_v6, %v3272_v19  ;;  %v3274_v53 = vpop.f32.mrb[191].mxu0  ;;  %v2910_v32 = vpop.f32.mrb[191].mxu1 }
 0x275   :  { %v3022_v0 = vmax.f32 %v6125_v39, %v2996_v42  ;;  %v3392_v59 = vmax.f32 %v3020_v9, %v3366_v50  ;;  %v2997_v38 = vmax.f32 %v2909_v51, 0.0  ;;  %v3367_v15 = vmax.f32 %v3273_v10, 0.0 }
 0x277   :  { %v3023_v20 = vmax.f32 %v6128_v16, %v2997_v38  ;;  %v3393_v3 = vmax.f32 %v3021_v45, %v3367_v15 }
 0x278   :  { %v2913_v37 = vpop.f32.mrb[192].mxu1  ;;  %v3277_v52 = vpop.f32.mrb[192].mxu0 }
 0x279   :  { %v4179_v60 = vpack.c.bf16 %v3393_v3, %v3392_v59  ;;  %v2914_v29 = vadd.f32 %v6205_v6, %v2913_v37  ;;  %v3278_v46 = vadd.f32 %v6205_v6, %v3277_v52  ;;  %v2915_v54 = vpop.f32.mrb[193].mxu1  ;;  %v3279_v2 = vpop.f32.mrb[193].mxu0 }
 0x27a   :  { %v2916_v36 = vpop.f32.mrb[194].mxu1  ;;  %v3280_v5 = vpop.f32.mrb[194].mxu0 }
 0x27b   :  { %4236 = vst [vmem:[%s6351_s3 + $0x8] sm:$0xff] %v4179_v60   ;;  %v2998_v39 = vmax.f32 %v2914_v29, 0.0  ;;  %v3368_v35 = vmax.f32 %v3278_v46, 0.0  ;;  %v2917_v16 = vadd.f32 %v6205_v6, %v2916_v36  ;;  %v3281_v48 = vadd.f32 %v6205_v6, %v3280_v5  ;;  %v3282_v4 = vpop.f32.mrb[195].mxu0  ;;  %v2918_v43 = vpop.f32.mrb[195].mxu1 }
 0x27d   :  { %v3024_v8 = vmax.f32 %v6135_v41, %v2998_v39  ;;  %v3394_v9 = vmax.f32 %v3022_v0, %v3368_v35  ;;  %v2999_v12 = vmax.f32 %v2917_v16, 0.0  ;;  %v3369_v57 = vmax.f32 %v3281_v48, 0.0 }
 0x27f   :  { %v3025_v55 = vmax.f32 %v6138_v58, %v2999_v12  ;;  %v3395_v45 = vmax.f32 %v3023_v20, %v3369_v57 }
 0x280   :  { %v2921_v33 = vpop.f32.mrb[196].mxu1  ;;  %v3285_v24 = vpop.f32.mrb[196].mxu0 }
 0x281   :  { %v4184_v25 = vpack.c.bf16 %v3395_v45, %v3394_v9  ;;  %v2922_v61 = vadd.f32 %v6205_v6, %v2921_v33  ;;  %v3286_v63 = vadd.f32 %v6205_v6, %v3285_v24  ;;  %v2923_v31 = vpop.f32.mrb[197].mxu1  ;;  %v3287_v30 = vpop.f32.mrb[197].mxu0 }
 0x282   :  { %v2924_v1 = vpop.f32.mrb[198].mxu1  ;;  %v3288_v11 = vpop.f32.mrb[198].mxu0 }
 0x283   :  { %4237 = vst [vmem:[%s6351_s3 + $0x10] sm:$0xff] %v4184_v25   ;;  %v3000_v41 = vmax.f32 %v2922_v61, 0.0  ;;  %v3370_v19 = vmax.f32 %v3286_v63, 0.0  ;;  %v2925_v58 = vadd.f32 %v6205_v6, %v2924_v1  ;;  %v3289_v42 = vadd.f32 %v6205_v6, %v3288_v11  ;;  %v3290_v50 = vpop.f32.mrb[199].mxu0  ;;  %v2926_v51 = vpop.f32.mrb[199].mxu1 }
 0x285   :  { %v3026_v10 = vmax.f32 %v6145_v23, %v3000_v41  ;;  %v3396_v53 = vmax.f32 %v3024_v8, %v3370_v19  ;;  %v3001_v32 = vmax.f32 %v2925_v58, 0.0  ;;  %v3371_v0 = vmax.f32 %v3289_v42, 0.0 }
 0x287   :  { %v3027_v59 = vmax.f32 %v6148_v49, %v3001_v32  ;;  %v3397_v38 = vmax.f32 %v3025_v55, %v3371_v0 }
 0x288   :  { %v2929_v15 = vpop.f32.mrb[200].mxu1  ;;  %v3293_v20 = vpop.f32.mrb[200].mxu0 }
 0x289   :  { %v4189_v3 = vpack.c.bf16 %v3397_v38, %v3396_v53  ;;  %v2930_v37 = vadd.f32 %v6205_v6, %v2929_v15  ;;  %v3294_v52 = vadd.f32 %v6205_v6, %v3293_v20  ;;  %v2931_v60 = vpop.f32.mrb[201].mxu1  ;;  %v3295_v29 = vpop.f32.mrb[201].mxu0 }
 0x28a   :  { %v2932_v46 = vpop.f32.mrb[202].mxu1  ;;  %v3296_v54 = vpop.f32.mrb[202].mxu0 }
 0x28b   :  { %4238 = vst [vmem:[%s6351_s3 + $0x18] sm:$0xff] %v4189_v3   ;;  %v3002_v23 = vmax.f32 %v2930_v37, 0.0  ;;  %v3372_v2 = vmax.f32 %v3294_v52, 0.0  ;;  %v2933_v49 = vadd.f32 %v6205_v6, %v2932_v46  ;;  %v3297_v36 = vadd.f32 %v6205_v6, %v3296_v54  ;;  %v3298_v5 = vpop.f32.mrb[203].mxu0  ;;  %v2934_v39 = vpop.f32.mrb[203].mxu1 }
 0x28d   :  { %v3028_v35 = vmax.f32 %v6155_v56, %v3002_v23  ;;  %v3398_v16 = vmax.f32 %v3026_v10, %v3372_v2  ;;  %v3003_v48 = vmax.f32 %v2933_v49, 0.0  ;;  %v3373_v4 = vmax.f32 %v3297_v36, 0.0 }
 0x28f   :  { %v3029_v43 = vmax.f32 %v6158_v44, %v3003_v48  ;;  %v3399_v8 = vmax.f32 %v3027_v59, %v3373_v4 }
 0x290   :  { %v2937_v9 = vpop.f32.mrb[204].mxu1  ;;  %v3301_v12 = vpop.f32.mrb[204].mxu0 }
 0x291   :  { %v4194_v57 = vpack.c.bf16 %v3399_v8, %v3398_v16  ;;  %v2938_v55 = vadd.f32 %v6205_v6, %v2937_v9  ;;  %v3302_v45 = vadd.f32 %v6205_v6, %v3301_v12  ;;  %v2939_v33 = vpop.f32.mrb[205].mxu1  ;;  %v3303_v24 = vpop.f32.mrb[205].mxu0 }
 0x292   :  { %v2940_v25 = vpop.f32.mrb[206].mxu1  ;;  %v3304_v61 = vpop.f32.mrb[206].mxu0 }
 0x293   :  { %4239 = vst [vmem:[%s6351_s3 + $0x20] sm:$0xff] %v4194_v57   ;;  %v3004_v56 = vmax.f32 %v2938_v55, 0.0  ;;  %v3374_v63 = vmax.f32 %v3302_v45, 0.0  ;;  %v2941_v44 = vadd.f32 %v6205_v6, %v2940_v25  ;;  %v3305_v31 = vadd.f32 %v6205_v6, %v3304_v61  ;;  %v3306_v30 = vpop.f32.mrb[207].mxu0  ;;  %v2942_v1 = vpop.f32.mrb[207].mxu1 }
 0x295   :  { %v3030_v11 = vmax.f32 %v6165_v26, %v3004_v56  ;;  %v3400_v41 = vmax.f32 %v3028_v35, %v3374_v63  ;;  %v3005_v19 = vmax.f32 %v2941_v44, 0.0  ;;  %v3375_v58 = vmax.f32 %v3305_v31, 0.0 }
 0x297   :  { %v3031_v42 = vmax.f32 %v6168_v18, %v3005_v19  ;;  %v3401_v50 = vmax.f32 %v3029_v43, %v3375_v58 }
 0x298   :  { %v2945_v51 = vpop.f32.mrb[208].mxu1  ;;  %v3309_v10 = vpop.f32.mrb[208].mxu0 }
 0x299   :  { %v4199_v53 = vpack.c.bf16 %v3401_v50, %v3400_v41  ;;  %v2946_v32 = vadd.f32 %v6205_v6, %v2945_v51  ;;  %v3310_v0 = vadd.f32 %v6205_v6, %v3309_v10  ;;  %v2947_v59 = vpop.f32.mrb[209].mxu1  ;;  %v3311_v38 = vpop.f32.mrb[209].mxu0 }
 0x29a   :  { %v2948_v15 = vpop.f32.mrb[210].mxu1  ;;  %v3312_v20 = vpop.f32.mrb[210].mxu0 }
 0x29b   :  { %4240 = vst [vmem:[%s6351_s3 + $0x28] sm:$0xff] %v4199_v53   ;;  %v3006_v26 = vmax.f32 %v2946_v32, 0.0  ;;  %v3376_v3 = vmax.f32 %v3310_v0, 0.0  ;;  %v2949_v18 = vadd.f32 %v6205_v6, %v2948_v15  ;;  %v3313_v37 = vadd.f32 %v6205_v6, %v3312_v20  ;;  %v3314_v52 = vpop.f32.mrb[211].mxu0  ;;  %v2950_v60 = vpop.f32.mrb[211].mxu1 }
 0x29d   :  { %v3032_v29 = vmax.f32 %v6175_v47, %v3006_v26  ;;  %v3402_v46 = vmax.f32 %v3030_v11, %v3376_v3  ;;  %v3007_v54 = vmax.f32 %v2949_v18, 0.0  ;;  %v3377_v23 = vmax.f32 %v3313_v37, 0.0 }
 0x29f   :  { %v3033_v2 = vmax.f32 %v6178_v27, %v3007_v54  ;;  %v3403_v49 = vmax.f32 %v3031_v42, %v3377_v23 }
 0x2a0   :  { %v2953_v36 = vpop.f32.mrb[212].mxu1  ;;  %v3317_v5 = vpop.f32.mrb[212].mxu0 }
 0x2a1   :  { %v4204_v39 = vpack.c.bf16 %v3403_v49, %v3402_v46  ;;  %v2954_v35 = vadd.f32 %v6205_v6, %v2953_v36  ;;  %v3318_v16 = vadd.f32 %v6205_v6, %v3317_v5  ;;  %v2955_v48 = vpop.f32.mrb[213].mxu1  ;;  %v3319_v4 = vpop.f32.mrb[213].mxu0 }
 0x2a2   :  { %v2956_v43 = vpop.f32.mrb[214].mxu1  ;;  %v3320_v8 = vpop.f32.mrb[214].mxu0 }
 0x2a3   :  { %4241 = vst [vmem:[%s6351_s3 + $0x30] sm:$0xff] %v4204_v39   ;;  %v3008_v47 = vmax.f32 %v2954_v35, 0.0  ;;  %v3378_v9 = vmax.f32 %v3318_v16, 0.0  ;;  %v2957_v27 = vadd.f32 %v6205_v6, %v2956_v43  ;;  %v3321_v12 = vadd.f32 %v6205_v6, %v3320_v8  ;;  %v3322_v57 = vpop.f32.mrb[215].mxu0  ;;  %v2958_v55 = vpop.f32.mrb[215].mxu1 }
 0x2a5   :  { %v3034_v45 = vmax.f32 %v6185_v21, %v3008_v47  ;;  %v3404_v33 = vmax.f32 %v3032_v29, %v3378_v9  ;;  %v3009_v24 = vmax.f32 %v2957_v27, 0.0  ;;  %v3379_v25 = vmax.f32 %v3321_v12, 0.0 }
 0x2a7   :  { %v3035_v61 = vmax.f32 %v6188_v62, %v3009_v24  ;;  %v3405_v56 = vmax.f32 %v3033_v2, %v3379_v25 }
 0x2a8   :  { %v2961_v63 = vpop.f32.mrb[216].mxu1  ;;  %v3325_v44 = vpop.f32.mrb[216].mxu0 }
 0x2a9   :  { %v4209_v31 = vpack.c.bf16 %v3405_v56, %v3404_v33  ;;  %v2962_v30 = vadd.f32 %v6205_v6, %v2961_v63  ;;  %v3326_v1 = vadd.f32 %v6205_v6, %v3325_v44  ;;  %v2963_v11 = vpop.f32.mrb[217].mxu1  ;;  %v3327_v41 = vpop.f32.mrb[217].mxu0 }
 0x2aa   :  { %v2964_v19 = vpop.f32.mrb[218].mxu1  ;;  %v3328_v58 = vpop.f32.mrb[218].mxu0 }
 0x2ab   :  { %4242 = vst [vmem:[%s6351_s3 + $0x38] sm:$0xff] %v4209_v31   ;;  %v3010_v21 = vmax.f32 %v2962_v30, 0.0  ;;  %v3380_v42 = vmax.f32 %v3326_v1, 0.0  ;;  %v2965_v62 = vadd.f32 %v6205_v6, %v2964_v19  ;;  %v3329_v50 = vadd.f32 %v6205_v6, %v3328_v58  ;;  %v3330_v51 = vpop.f32.mrb[219].mxu0  ;;  %v2966_v10 = vpop.f32.mrb[219].mxu1 }
 0x2ad   :  { %v3036_v53 = vmax.f32 %v6195_v13, %v3010_v21  ;;  %v3406_v32 = vmax.f32 %v3034_v45, %v3380_v42  ;;  %v3011_v0 = vmax.f32 %v2965_v62, 0.0  ;;  %v3381_v59 = vmax.f32 %v3329_v50, 0.0 }
 0x2af   :  { %v3037_v38 = vmax.f32 %v6198_v40, %v3011_v0  ;;  %v3407_v15 = vmax.f32 %v3035_v61, %v3381_v59 }
 0x2b0   :  { %v2969_v20 = vpop.f32.mrb[220].mxu1  ;;  %v3333_v26 = vpop.f32.mrb[220].mxu0 }
 0x2b1   :  { %v4214_v3 = vpack.c.bf16 %v3407_v15, %v3406_v32  ;;  %v2970_v18 = vadd.f32 %v6205_v6, %v2969_v20  ;;  %v3334_v37 = vadd.f32 %v6205_v6, %v3333_v26  ;;  %v2971_v52 = vpop.f32.mrb[221].mxu1  ;;  %v3335_v60 = vpop.f32.mrb[221].mxu0 }
 0x2b2   :  { %v2972_v29 = vpop.f32.mrb[222].mxu1  ;;  %v3336_v46 = vpop.f32.mrb[222].mxu0 }
 0x2b3   :  { %4243 = vst [vmem:[%s6351_s3 + $0x40] sm:$0xff] %v4214_v3   ;;  %v3012_v13 = vmax.f32 %v2970_v18, 0.0  ;;  %v3382_v54 = vmax.f32 %v3334_v37, 0.0  ;;  %v2973_v40 = vadd.f32 %v6205_v6, %v2972_v29  ;;  %v3337_v23 = vadd.f32 %v6205_v6, %v3336_v46  ;;  %v3338_v2 = vpop.f32.mrb[223].mxu0  ;;  %v2974_v49 = vpop.f32.mrb[223].mxu1 }
 0x2b5   :  { %v3038_v36 = vmax.f32 %v6210_v17, %v3012_v13  ;;  %v3408_v5 = vmax.f32 %v3036_v53, %v3382_v54  ;;  %v3013_v39 = vmax.f32 %v2973_v40, 0.0  ;;  %v3383_v35 = vmax.f32 %v3337_v23, 0.0 }
 0x2b7   :  { %v3039_v16 = vmax.f32 %v6213_v34, %v3013_v39  ;;  %v3409_v48 = vmax.f32 %v3037_v38, %v3383_v35 }
 0x2b8   :  { %v2977_v4 = vpop.f32.mrb[224].mxu1  ;;  %v3341_v43 = vpop.f32.mrb[224].mxu0 }
 0x2b9   :  { %v4219_v8 = vpack.c.bf16 %v3409_v48, %v3408_v5  ;;  %v2978_v47 = vadd.f32 %v6205_v6, %v2977_v4  ;;  %v3342_v9 = vadd.f32 %v6205_v6, %v3341_v43  ;;  %v2979_v27 = vpop.f32.mrb[225].mxu1  ;;  %v3343_v12 = vpop.f32.mrb[225].mxu0 }
 0x2ba   :  { %v2980_v57 = vpop.f32.mrb[226].mxu1  ;;  %v3344_v55 = vpop.f32.mrb[226].mxu0 }
 0x2bb   :  { %4244 = vst [vmem:[%s6351_s3 + $0x48] sm:$0xff] %v4219_v8   ;;  %v3014_v17 = vmax.f32 %v2978_v47, 0.0  ;;  %v3384_v45 = vmax.f32 %v3342_v9, 0.0  ;;  %v2981_v34 = vadd.f32 %v6205_v6, %v2980_v57  ;;  %v3345_v33 = vadd.f32 %v6205_v6, %v3344_v55  ;;  %v3346_v24 = vpop.f32.mrb[227].mxu0  ;;  %v2982_v25 = vpop.f32.mrb[227].mxu1 }
 0x2bd   :  { %v3040_v61 = vmax.f32 %v6220_v22, %v3014_v17  ;;  %v3410_v56 = vmax.f32 %v3038_v36, %v3384_v45  ;;  %v3015_v63 = vmax.f32 %v2981_v34, 0.0  ;;  %v3385_v44 = vmax.f32 %v3345_v33, 0.0 }
 0x2bf   :  { %v3041_v31 = vmax.f32 %v6223_v14, %v3015_v63  ;;  %v3411_v30 = vmax.f32 %v3039_v16, %v3385_v44 }
 0x2c0   :  { %v2985_v1 = vpop.f32.mrb[228].mxu1  ;;  %v3349_v11 = vpop.f32.mrb[228].mxu0 }
 0x2c1   :  { %v4224_v41 = vpack.c.bf16 %v3411_v30, %v3410_v56  ;;  %v2986_v19 = vadd.f32 %v6205_v6, %v2985_v1  ;;  %v3350_v58 = vadd.f32 %v6205_v6, %v3349_v11  ;;  %v2987_v21 = vpop.f32.mrb[229].mxu1  ;;  %v3351_v42 = vpop.f32.mrb[229].mxu0 }
 0x2c2   :  { %v2988_v62 = vpop.f32.mrb[230].mxu1  ;;  %v3352_v50 = vpop.f32.mrb[230].mxu0 }
 0x2c3   :  { %4245 = vst [vmem:[%s6351_s3 + $0x50] sm:$0xff] %v4224_v41   ;;  %v3016_v22 = vmax.f32 %v2986_v19, 0.0  ;;  %v3386_v51 = vmax.f32 %v3350_v58, 0.0  ;;  %v2989_v14 = vadd.f32 %v6205_v6, %v2988_v62  ;;  %v3353_v10 = vadd.f32 %v6205_v6, %v3352_v50  ;;  %v3354_v53 = vpop.f32.mrb[231].mxu0  ;;  %v2990_v32 = vpop.f32.mrb[231].mxu1 }
 0x2c5   :  { %v3042_v0 = vmax.f32 %v6229_v28, %v3016_v22  ;;  %v3412_v59 = vmax.f32 %v3040_v61, %v3386_v51  ;;  %v3017_v38 = vmax.f32 %v2989_v14, 0.0  ;;  %v3387_v15 = vmax.f32 %v3353_v10, 0.0 }
 0x2c7   :  { %v3043_v20 = vmax.f32 %v6232_v7, %v3017_v38  ;;  %v3413_v26 = vmax.f32 %v3041_v31, %v3387_v15 }
 0x2c8   :  { %v3357_v3 = vpop.f32.mrb[232].mxu0 }
 0x2c9   :  { %v4229_v18 = vpack.c.bf16 %v3413_v26, %v3412_v59  ;;  %v3358_v37 = vadd.f32 %v6205_v6, %v3357_v3  ;;  %v3359_v52 = vpop.f32.mrb[233].mxu0 }
 0x2ca   :  { %v3360_v60 = vpop.f32.mrb[234].mxu0 }
 0x2cb   :  { %4246 = vst [vmem:[%s6351_s3 + $0x58] sm:$0xff] %v4229_v18   ;;  %v3388_v29 = vmax.f32 %v3358_v37, 0.0  ;;  %v3361_v46 = vadd.f32 %v6205_v6, %v3360_v60  ;;  %v3362_v28 = vpop.f32.mrb[235].mxu0 }
 0x2cd   :  { %v3414_v13 = vmax.f32 %v3042_v0, %v3388_v29  ;;  %v3389_v54 = vmax.f32 %v3361_v46, 0.0 }
 0x2cf   :  { %v3415_v40 = vmax.f32 %v3043_v20, %v3389_v54 }
 0x2d1   :  { %v4234_v23 = vpack.c.bf16 %v3415_v40, %v3414_v13 }
 0x2d3   :  { %4247 = vst [vmem:[%s6351_s3 + $0x60] sm:$0xff] %v4234_v23  }

// kernel: cnn_forward.6
= control target key start
LH: loop header
LB: loop body
LE: loop exit
PB: predicated region body
PF: predicated region fallthrough
CT: control target
= control target key end

     0   :  { %vm242_vm0 = vcmask 261120   ;;  %s2079_s1 = inlined_call_operand.vmem [shape: bf16[288,128], index: 1, kind: input, shape index: {}]   ;;  %s2080_s0 = inlined_call_operand.vmem [shape: bf16[4,64,288], index: 0, kind: input, shape index: {}]   ;;  %s2081_s2 = inlined_call_operand.vmem [shape: f32[1,128], index: 2, kind: input, shape index: {}]   ;;  %s2082_s3 = inlined_call_operand.vmem [shape: bf16[64,128], index: 3, kind: output, shape index: {}]  }
   0x1   :  { %v1649_v0 = vld [vmem:[%s2079_s1 + $0x40] sm:$0xff]   ;;  %v1661_v2 = vld [vmem:[%s2079_s1 + $0x48] sm:$0xff]   ;;  %v1675_v4 = vld [vmem:[%s2079_s1 + $0x50] sm:$0xff]  }
   0x2   :  { %v1654_v1 = vld [vmem:[%s2079_s1] sm:$0xff]   ;;  %1312 = vmatprep.subr.bf16.mxu0 %v1649_v0  ;;  %1358 = vmatprep.subr.bf16.mxu1 %v1649_v0  ;;  %v1668_v3 = vld [vmem:[%s2079_s1 + $0x8] sm:$0xff]   ;;  %v1682_v5 = vld [vmem:[%s2079_s1 + $0x10] sm:$0xff]  }
   0x3   :  { %1313 = vmatpush3.bf16.msra.mxu0 %v1654_v1  ;;  %1359 = vmatpush3.bf16.msra.mxu1 %v1654_v1  ;;  %v1689_v6 = vld [vmem:[%s2079_s1 + $0x58] sm:$0xff]   ;;  %v1703_v8 = vld [vmem:[%s2079_s1 + $0x60] sm:$0xff]   ;;  %v1717_v10 = vld [vmem:[%s2079_s1 + $0x68] sm:$0xff]  }
   0x4   :  { %1314 = vmatprep.subr.bf16.mxu0 %v1661_v2  ;;  %1360 = vmatprep.subr.bf16.mxu1 %v1661_v2  ;;  %v1696_v7 = vld [vmem:[%s2079_s1 + $0x18] sm:$0xff]   ;;  %v1710_v9 = vld [vmem:[%s2079_s1 + $0x20] sm:$0xff]   ;;  %v1730_v13 = vld [vmem:[%s2079_s1 + $0x28] sm:$0xff]  }
   0x5   :  { %v1562_v11 = vld [vmem:[%s2080_s0 + $0x4] ss:$12 sps:$4 sm:$0xff]   ;;  %v1751_v16 = vld [vmem:[%s2079_s1 + $0x78] sm:$0xff]   ;;  %v1560_v19 = vld [vmem:[%s2080_s0] ss:$12 sps:$4 sm:$0xff]  }
   0x6   :  { %v1565_v12 = vld [vmem:[%s2080_s0 + $0x64] ss:$12 sps:$4 sm:$0xff]   ;;  %287 = vmatprep.mubr.bf16.mxu0 %v1562_v11  ;;  %v1758_v17 = vld [vmem:[%s2079_s1 + $0x38] sm:$0xff]   ;;  %v1563_v20 = vld [vmem:[%s2080_s0 + $0x60] ss:$12 sps:$4 sm:$0xff]  }
   0x7   :  { %1315 = vmatpush3.bf16.msra.mxu0 %v1668_v3  ;;  %1361 = vmatpush3.bf16.msra.mxu1 %v1668_v3  ;;  %v1737_v14 = vld [vmem:[%s2079_s1 + $0x70] sm:$0xff]   ;;  %v1765_v18 = vld [vmem:[%s2079_s1 + $0x80] sm:$0xff]   ;;  %v1567_v21 = vld [vmem:[%s2080_s0 + $0x1c] ss:$12 sps:$4 sm:$0xff]  }
   0x8   :  { %1316 = vmatprep.subr.bf16.mxu0 %v1675_v4  ;;  %1362 = vmatprep.subr.bf16.mxu1 %v1675_v4  ;;  %v1744_v15 = vld [vmem:[%s2079_s1 + $0x30] sm:$0xff]   ;;  %v1569_v22 = vld [vmem:[%s2080_s0 + $0x7c] ss:$12 sps:$4 sm:$0xff]   ;;  %v1571_v24 = vld [vmem:[%s2080_s0 + $0x18] ss:$12 sps:$4 sm:$0xff]  }
   0x9   :  { %514 = vmatprep.mubr.bf16.mxu1 %v1565_v12  ;;  %v1786_v23 = vld [vmem:[%s2079_s1 + $0x88] sm:$0xff]   ;;  %v1572_v25 = vld [vmem:[%s2080_s0 + $0x78] ss:$12 sps:$4 sm:$0xff]   ;;  %v1573_v26 = vld [vmem:[%s2080_s0 + $0x34] ss:$12 sps:$4 sm:$0xff]  }
   0xa   :  { %v1575_v27 = vld [vmem:[%s2080_s0 + $0x94] ss:$12 sps:$4 sm:$0xff]   ;;  %v1577_v28 = vld [vmem:[%s2080_s0 + $0x30] ss:$12 sps:$4 sm:$0xff]   ;;  %v1580_v30 = vld [vmem:[%s2080_s0 + $0x4c] ss:$12 sps:$4 sm:$0xff]  }
   0xb   :  { %1317 = vmatpush3.bf16.msra.mxu0 %v1682_v5  ;;  %1363 = vmatpush3.bf16.msra.mxu1 %v1682_v5  ;;  %v1578_v29 = vld [vmem:[%s2080_s0 + $0x90] ss:$12 sps:$4 sm:$0xff]   ;;  %v1582_v31 = vld [vmem:[%s2080_s0 + $0xac] ss:$12 sps:$4 sm:$0xff]   ;;  %v1584_v32 = vld [vmem:[%s2080_s0 + $0x48] ss:$12 sps:$4 sm:$0xff]  }
   0xc   :  { %1318 = vmatprep.subr.bf16.mxu0 %v1689_v6  ;;  %1364 = vmatprep.subr.bf16.mxu1 %v1689_v6  ;;  %v1585_v33 = vld [vmem:[%s2080_s0 + $0xa8] ss:$12 sps:$4 sm:$0xff]   ;;  %v1589_v35 = vld [vmem:[%s2080_s0 + $0xc4] ss:$12 sps:$4 sm:$0xff]   ;;  %v1587_v36 = vld [vmem:[%s2080_s0 + $0xc0] ss:$12 sps:$4 sm:$0xff]  }
   0xd   :  { %v1586_v34 = vld [vmem:[%s2080_s0 + $0x8] ss:$12 sps:$4 sm:$0xff]   ;;  %v1590_v37 = vld [vmem:[%s2080_s0 + $0x20] ss:$12 sps:$4 sm:$0xff]   ;;  %v1591_v38 = vld [vmem:[%s2080_s0 + $0x38] ss:$12 sps:$4 sm:$0xff]  }
   0xe   :  { %v1592_v39 = vld [vmem:[%s2080_s0 + $0xdc] ss:$12 sps:$4 sm:$0xff]   ;;  %v1595_v41 = vld [vmem:[%s2080_s0 + $0xd8] ss:$12 sps:$4 sm:$0xff]   ;;  %v1597_v43 = vld [vmem:[%s2080_s0 + $0xf4] ss:$12 sps:$4 sm:$0xff]  }
   0xf   :  { %1319 = vmatpush3.bf16.msra.mxu0 %v1696_v7  ;;  %1365 = vmatpush3.bf16.msra.mxu1 %v1696_v7  ;;  %v1594_v40 = vld [vmem:[%s2080_s0 + $0x50] ss:$12 sps:$4 sm:$0xff]   ;;  %v1596_v42 = vld [vmem:[%s2080_s0 + $0x68] ss:$12 sps:$4 sm:$0xff]   ;;  %v1599_v44 = vld [vmem:[%s2080_s0 + $0x80] ss:$12 sps:$4 sm:$0xff]  }
  0x10   :  { %1320 = vmatprep.subr.bf16.mxu0 %v1703_v8  ;;  %1366 = vmatprep.subr.bf16.mxu1 %v1703_v8  ;;  %v1600_v45 = vld [vmem:[%s2080_s0 + $0xf0] ss:$12 sps:$4 sm:$0xff]   ;;  %v1601_v46 = vld [vmem:[%s2080_s0 + $0x98] ss:$12 sps:$4 sm:$0xff]   ;;  %v1605_v49 = vld [vmem:[%s2080_s0 + $0x108] ss:$12 sps:$4 sm:$0xff]  }
  0x11   :  { %v1602_v47 = vld [vmem:[%s2080_s0 + $0x10c] ss:$12 sps:$4 sm:$0xff]   ;;  %v1604_v48 = vld [vmem:[%s2080_s0 + $0xb0] ss:$12 sps:$4 sm:$0xff]   ;;  %v1606_v50 = vld [vmem:[%s2080_s0 + $0xc8] ss:$12 sps:$4 sm:$0xff]  }
  0x12   :  { %v1609_v51 = vld [vmem:[%s2080_s0 + $0x124] ss:$12 sps:$4 sm:$0xff]   ;;  %v1607_v52 = vld [vmem:[%s2080_s0 + $0x120] ss:$12 sps:$4 sm:$0xff]   ;;  %v1612_v55 = vld [vmem:[%s2080_s0 + $0x13c] ss:$12 sps:$4 sm:$0xff]  }
  0x13   :  { %1321 = vmatpush3.bf16.msra.mxu0 %v1710_v9  ;;  %1367 = vmatpush3.bf16.msra.mxu1 %v1710_v9  ;;  %v1610_v53 = vld [vmem:[%s2080_s0 + $0xe0] ss:$12 sps:$4 sm:$0xff]   ;;  %v1611_v54 = vld [vmem:[%s2080_s0 + $0xf8] ss:$12 sps:$4 sm:$0xff]   ;;  %v1614_v56 = vld [vmem:[%s2080_s0 + $0x110] ss:$12 sps:$4 sm:$0xff]  }
  0x14   :  { %1322 = vmatprep.subr.bf16.mxu0 %v1717_v10  ;;  %1368 = vmatprep.subr.bf16.mxu1 %v1717_v10  ;;  %v1615_v57 = vld [vmem:[%s2080_s0 + $0x138] ss:$12 sps:$4 sm:$0xff]   ;;  %v1616_v58 = vld [vmem:[%s2080_s0 + $0x154] ss:$12 sps:$4 sm:$0xff]   ;;  %v1619_v60 = vld [vmem:[%s2080_s0 + $0x150] ss:$12 sps:$4 sm:$0xff]  }
  0x15   :  { %v1618_v59 = vld [vmem:[%s2080_s0 + $0x128] ss:$12 sps:$4 sm:$0xff]   ;;  %v1620_v61 = vld [vmem:[%s2080_s0 + $0x140] ss:$12 sps:$4 sm:$0xff]   ;;  %v1623_v63 = vld [vmem:[%s2080_s0 + $0x158] ss:$12 sps:$4 sm:$0xff]  }
  0x16   :  { %v1621_v62 = vld [vmem:[%s2080_s0 + $0x16c] ss:$12 sps:$4 sm:$0xff]  }
  0x17   :  { %1323 = vmatpush3.bf16.msra.mxu0 %v1730_v13  ;;  %1369 = vmatpush3.bf16.msra.mxu1 %v1730_v13 }
  0x18   :  { %1324 = vmatprep.subr.bf16.mxu0 %v1737_v14  ;;  %1370 = vmatprep.subr.bf16.mxu1 %v1737_v14 }
  0x1b   :  { %1325 = vmatpush3.bf16.msra.mxu0 %v1744_v15  ;;  %1371 = vmatpush3.bf16.msra.mxu1 %v1744_v15 }
  0x1c   :  { %1326 = vmatprep.subr.bf16.mxu0 %v1751_v16  ;;  %1372 = vmatprep.subr.bf16.mxu1 %v1751_v16 }
  0x1f   :  { %1327 = vmatpush3.bf16.msra.mxu0 %v1758_v17  ;;  %1373 = vmatpush3.bf16.msra.mxu1 %v1758_v17 }
  0x20   :  { %1404 = vmatprep.subr.bf16.mxu1 %v1649_v0  ;;  %1496 = vmatprep.subr.bf16.mxu0 %v1765_v18 }
  0x22   :  { %288 = vmatmul.mubr.bf16.vlgmr.msra.gmra.mrb[0].mxu0 %v1560_v19  ;;  %515 = vmatmul.mubr.bf16.vlgmr.msra.gmra.mrb[0].mxu1 %v1563_v20 }
  0x23   :  { %1405 = vmatpush3.bf16.msra.mxu1 %v1654_v1  ;;  %1497 = vmatpush3.bf16.msra.mxu0 %v1765_v18 }
  0x24   :  { %1406 = vmatprep.subr.bf16.mxu1 %v1661_v2  ;;  %295 = vmatprep.mubr.bf16.mxu0 %v1567_v21 }
  0x25   :  { %522 = vmatprep.mubr.bf16.mxu1 %v1569_v22  ;;  %1498 = vmatprep.subr.bf16.mxu0 %v1786_v23 }
  0x27   :  { %1407 = vmatpush3.bf16.msra.mxu1 %v1668_v3  ;;  %1499 = vmatpush3.bf16.msra.mxu0 %v1786_v23 }
  0x28   :  { %1408 = vmatprep.subr.bf16.mxu1 %v1675_v4  ;;  %1508 = vmatprep.subr.bf16.mxu0 %v1765_v18 }
  0x2a   :  { %296 = vmatmul.mubr.bf16.gmra.mrb[4].mxu0 %v1571_v24  ;;  %523 = vmatmul.mubr.bf16.gmra.mrb[4].mxu1 %v1572_v25 }
  0x2b   :  { %1409 = vmatpush3.bf16.msra.mxu1 %v1682_v5  ;;  %303 = vmatprep.mubr.bf16.mxu0 %v1573_v26 }
  0x2c   :  { %1410 = vmatprep.subr.bf16.mxu1 %v1689_v6  ;;  %530 = vmatprep.mubr.bf16.mxu1 %v1575_v27 }
  0x2f   :  { %1411 = vmatpush3.bf16.msra.mxu1 %v1696_v7 }
  0x30   :  { %1412 = vmatprep.subr.bf16.mxu1 %v1703_v8 }
  0x32   :  { %304 = vmatmul.mubr.bf16.gmra.mrb[8].mxu0 %v1577_v28  ;;  %531 = vmatmul.mubr.bf16.gmra.mrb[8].mxu1 %v1578_v29 }
  0x33   :  { %1413 = vmatpush3.bf16.msra.mxu1 %v1710_v9  ;;  %311 = vmatprep.mubr.bf16.mxu0 %v1580_v30 }
  0x34   :  { %1414 = vmatprep.subr.bf16.mxu1 %v1717_v10  ;;  %538 = vmatprep.mubr.bf16.mxu1 %v1582_v31 }
  0x37   :  { %1415 = vmatpush3.bf16.msra.mxu1 %v1730_v13 }
  0x38   :  { %1416 = vmatprep.subr.bf16.mxu1 %v1737_v14 }
  0x3a   :  { %312 = vmatmul.mubr.bf16.gmra.mrb[12].mxu0 %v1584_v32  ;;  %539 = vmatmul.mubr.bf16.gmra.mrb[12].mxu1 %v1585_v33 }
  0x3b   :  { %1417 = vmatpush3.bf16.msra.mxu1 %v1744_v15  ;;  %1500 = vmatprep.mubr.msk.bf16.mxu0 %vm242_vm0, %v1586_v34 }
  0x3c   :  { %1418 = vmatprep.subr.bf16.mxu1 %v1751_v16  ;;  %749 = vmatprep.mubr.bf16.mxu1 %v1589_v35 }
  0x3f   :  { %1419 = vmatpush3.bf16.msra.mxu1 %v1758_v17 }
  0x40   :  { %1450 = vmatprep.subr.bf16.mxu1 %v1649_v0  ;;  %v1624_v0 = vld [vmem:[%s2080_s0 + $0x168] ss:$12 sps:$4 sm:$0xff]  }
  0x42   :  { %1501 = vmatmul.mubr.msk.bf16.vlgmr.msra.gmra.mrb[16].mxu0 %vm242_vm0, %v1590_v37  ;;  %750 = vmatmul.mubr.bf16.vlgmr.msra.gmra.mrb[16].mxu1 %v1587_v36 }
  0x43   :  { %1451 = vmatpush3.bf16.msra.mxu1 %v1654_v1  ;;  %1509 = vmatpush3.bf16.msra.mxu0 %v1765_v18  ;;  %v1625_v1 = vld [vmem:[%s2080_s0 + $0x170] ss:$12 sps:$4 sm:$0xff]  }
  0x44   :  { %1452 = vmatprep.subr.bf16.mxu1 %v1661_v2  ;;  %1504 = vmatprep.mubr.msk.bf16.mxu0 %vm242_vm0, %v1591_v38 }
  0x45   :  { %757 = vmatprep.mubr.bf16.mxu1 %v1592_v39  ;;  %1510 = vmatprep.subr.bf16.mxu0 %v1786_v23 }
  0x47   :  { %1453 = vmatpush3.bf16.msra.mxu1 %v1668_v3  ;;  %1511 = vmatpush3.bf16.msra.mxu0 %v1786_v23 }
  0x48   :  { %1454 = vmatprep.subr.bf16.mxu1 %v1675_v4  ;;  %1520 = vmatprep.subr.bf16.mxu0 %v1765_v18 }
  0x4a   :  { %1505 = vmatmul.mubr.msk.bf16.gmra.mrb[20].mxu0 %vm242_vm0, %v1594_v40  ;;  %758 = vmatmul.mubr.bf16.gmra.mrb[20].mxu1 %v1595_v41 }
  0x4b   :  { %1455 = vmatpush3.bf16.msra.mxu1 %v1682_v5  ;;  %1512 = vmatprep.mubr.msk.bf16.mxu0 %vm242_vm0, %v1596_v42 }
  0x4c   :  { %1456 = vmatprep.subr.bf16.mxu1 %v1689_v6  ;;  %765 = vmatprep.mubr.bf16.mxu1 %v1597_v43 }
  0x4f   :  { %1457 = vmatpush3.bf16.msra.mxu1 %v1696_v7 }
  0x50   :  { %1458 = vmatprep.subr.bf16.mxu1 %v1703_v8 }
  0x52   :  { %1513 = vmatmul.mubr.msk.bf16.vlgmr.msra.gmra.mrb[24].mxu0 %vm242_vm0, %v1599_v44  ;;  %766 = vmatmul.mubr.bf16.gmra.mrb[24].mxu1 %v1600_v45 }
  0x53   :  { %1459 = vmatpush3.bf16.msra.mxu1 %v1710_v9  ;;  %1521 = vmatpush3.bf16.msra.mxu0 %v1765_v18 }
  0x54   :  { %1460 = vmatprep.subr.bf16.mxu1 %v1717_v10  ;;  %1516 = vmatprep.mubr.msk.bf16.mxu0 %vm242_vm0, %v1601_v46 }
  0x55   :  { %773 = vmatprep.mubr.bf16.mxu1 %v1602_v47  ;;  %1522 = vmatprep.subr.bf16.mxu0 %v1786_v23 }
  0x57   :  { %1461 = vmatpush3.bf16.msra.mxu1 %v1730_v13  ;;  %1523 = vmatpush3.bf16.msra.mxu0 %v1786_v23 }
  0x58   :  { %1462 = vmatprep.subr.bf16.mxu1 %v1737_v14  ;;  %1532 = vmatprep.subr.bf16.mxu0 %v1765_v18 }
  0x5a   :  { %1517 = vmatmul.mubr.msk.bf16.gmra.mrb[28].mxu0 %vm242_vm0, %v1604_v48  ;;  %774 = vmatmul.mubr.bf16.gmra.mrb[28].mxu1 %v1605_v49 }
  0x5b   :  { %1463 = vmatpush3.bf16.msra.mxu1 %v1744_v15  ;;  %1524 = vmatprep.mubr.msk.bf16.mxu0 %vm242_vm0, %v1606_v50  ;;  %v1995_v50 = vld [vmem:[%s2081_s2] ss:$0 sm:$0xff] }
  0x5c   :  { %1464 = vmatprep.subr.bf16.mxu1 %v1751_v16  ;;  %984 = vmatprep.mubr.bf16.mxu1 %v1609_v51 }
  0x5f   :  { %1465 = vmatpush3.bf16.msra.mxu1 %v1758_v17 }
  0x62   :  { %1525 = vmatmul.mubr.msk.bf16.vlgmr.msra.gmra.mrb[32].mxu0 %vm242_vm0, %v1610_v53  ;;  %985 = vmatmul.mubr.bf16.vlgmr.msra.gmra.mrb[32].mxu1 %v1607_v52 }
  0x63   :  { %1533 = vmatpush3.bf16.msra.mxu0 %v1765_v18  ;;  %1528 = vmatprep.mubr.msk.bf16.mxu0 %vm242_vm0, %v1611_v54 }
  0x64   :  { %992 = vmatprep.mubr.bf16.mxu1 %v1612_v55  ;;  %1534 = vmatprep.subr.bf16.mxu0 %v1786_v23 }
  0x67   :  { %1535 = vmatpush3.bf16.msra.mxu0 %v1786_v23 }
  0x6a   :  { %1529 = vmatmul.mubr.msk.bf16.gmra.mrb[36].mxu0 %vm242_vm0, %v1614_v56  ;;  %993 = vmatmul.mubr.bf16.gmra.mrb[36].mxu1 %v1615_v57 }
  0x6b   :  { %1000 = vmatprep.mubr.bf16.mxu1 %v1616_v58  ;;  %1536 = vmatprep.mubr.msk.bf16.mxu0 %vm242_vm0, %v1618_v59 }
  0x72   :  { %1001 = vmatmul.mubr.bf16.gmra.mrb[40].mxu1 %v1619_v60  ;;  %1537 = vmatmul.mubr.msk.bf16.vlgmr.msra.gmra.mrb[40].mxu0 %vm242_vm0, %v1620_v61 }
  0x73   :  { %1008 = vmatprep.mubr.bf16.mxu1 %v1621_v62  ;;  %1540 = vmatprep.mubr.msk.bf16.mxu0 %vm242_vm0, %v1623_v63 }
  0x7a   :  { %1009 = vmatmul.mubr.bf16.gmra.mrb[44].mxu1 %v1624_v0  ;;  %1541 = vmatmul.mubr.msk.bf16.gmra.mrb[44].mxu0 %vm242_vm0, %v1625_v1 }
  0xf5   :  { %v1374_v2 = vpop.f32.mrb[0].mxu1  ;;  %v1328_v3 = vpop.f32.mrb[0].mxu0 }
  0xf6   :  { %v1375_v4 = vpop.f32.mrb[1].mxu1  ;;  %v1329_v5 = vpop.f32.mrb[1].mxu0 }
  0xf7   :  { %v1976_v6 = vadd.f32 %v1375_v4, %v1374_v2  ;;  %v1377_v7 = vpop.f32.mrb[2].mxu1  ;;  %v1330_v8 = vadd.f32 %v1329_v5, %v1328_v3  ;;  %v1331_v9 = vpop.f32.mrb[2].mxu0 }
  0xf8   :  { %v1378_v10 = vpop.f32.mrb[3].mxu1  ;;  %v1332_v11 = vpop.f32.mrb[3].mxu0 }
  0xf9   :  { %v1978_v12 = vadd.f32 %v1378_v10, %v1377_v7  ;;  %v1333_v13 = vadd.f32 %v1332_v11, %v1331_v9  ;;  %v290_v54 = vadd.f32 %v1330_v8, %v1995_v50 }
  0xfb   :  { %v293_v63 = vadd.f32 %v1333_v13, %v1995_v50 }
  0xfd   :  { %v1380_v14 = vpop.f32.mrb[4].mxu1  ;;  %v1334_v15 = vpop.f32.mrb[4].mxu0 }
  0xfe   :  { %v1381_v16 = vpop.f32.mrb[5].mxu1  ;;  %v1335_v17 = vpop.f32.mrb[5].mxu0 }
  0xff   :  { %v1980_v18 = vadd.f32 %v1381_v16, %v1380_v14  ;;  %v1383_v19 = vpop.f32.mrb[6].mxu1  ;;  %v1336_v20 = vadd.f32 %v1335_v17, %v1334_v15  ;;  %v1337_v21 = vpop.f32.mrb[6].mxu0 }
 0x100   :  { %v1384_v22 = vpop.f32.mrb[7].mxu1  ;;  %v1338_v23 = vpop.f32.mrb[7].mxu0 }
 0x101   :  { %v1982_v24 = vadd.f32 %v1384_v22, %v1383_v19  ;;  %v1339_v25 = vadd.f32 %v1338_v23, %v1337_v21  ;;  %v298_v51 = vadd.f32 %v1336_v20, %v1995_v50 }
 0x103   :  { %v301_v58 = vadd.f32 %v1339_v25, %v1995_v50 }
 0x105   :  { %v1386_v26 = vpop.f32.mrb[8].mxu1  ;;  %v1340_v27 = vpop.f32.mrb[8].mxu0 }
 0x106   :  { %v1387_v28 = vpop.f32.mrb[9].mxu1  ;;  %v1341_v29 = vpop.f32.mrb[9].mxu0 }
 0x107   :  { %v1984_v30 = vadd.f32 %v1387_v28, %v1386_v26  ;;  %v1389_v31 = vpop.f32.mrb[10].mxu1  ;;  %v1342_v32 = vadd.f32 %v1341_v29, %v1340_v27  ;;  %v1343_v33 = vpop.f32.mrb[10].mxu0  ;;  %v525_v27 = vadd.f32 %v1980_v18, %v1995_v50 }
 0x108   :  { %v1390_v34 = vpop.f32.mrb[11].mxu1  ;;  %v1344_v35 = vpop.f32.mrb[11].mxu0 }
 0x109   :  { %v1986_v36 = vadd.f32 %v1390_v34, %v1389_v31  ;;  %v1345_v37 = vadd.f32 %v1344_v35, %v1343_v33  ;;  %v306_v9 = vadd.f32 %v1342_v32, %v1995_v50  ;;  %v517_v31 = vadd.f32 %v1976_v6, %v1995_v50 }
 0x10a   :  { %v528_v35 = vadd.f32 %v1982_v24, %v1995_v50 }
 0x10b   :  { %v309_v20 = vadd.f32 %v1345_v37, %v1995_v50 }
 0x10d   :  { %v1392_v38 = vpop.f32.mrb[12].mxu1  ;;  %v1346_v39 = vpop.f32.mrb[12].mxu0 }
 0x10e   :  { %v1393_v40 = vpop.f32.mrb[13].mxu1  ;;  %v1347_v41 = vpop.f32.mrb[13].mxu0 }
 0x10f   :  { %v1988_v42 = vadd.f32 %v1393_v40, %v1392_v38  ;;  %v1395_v43 = vpop.f32.mrb[14].mxu1  ;;  %v1348_v44 = vadd.f32 %v1347_v41, %v1346_v39  ;;  %v1349_v45 = vpop.f32.mrb[14].mxu0  ;;  %v520_v41 = vadd.f32 %v1978_v12, %v1995_v50 }
 0x110   :  { %v1396_v46 = vpop.f32.mrb[15].mxu1  ;;  %v1350_v47 = vpop.f32.mrb[15].mxu0 }
 0x111   :  { %v1990_v48 = vadd.f32 %v1396_v46, %v1395_v43  ;;  %v1351_v49 = vadd.f32 %v1350_v47, %v1349_v45  ;;  %v314_v5 = vadd.f32 %v1348_v44, %v1995_v50  ;;  %v541_v12 = vadd.f32 %v1988_v42, %v1995_v50 }
 0x113   :  { %v317_v15 = vadd.f32 %v1351_v49, %v1995_v50 }
 0x115   :  { %v1502_v52 = vpop.f32.mrb[16].mxu0  ;;  %v1420_v53 = vpop.f32.mrb[16].mxu1 }
 0x116   :  { %v363_v55 = vadd.f32 %v1502_v52, %v298_v51  ;;  %v354_v56 = vpop.f32.mrb[17].mxu0  ;;  %v1421_v57 = vpop.f32.mrb[17].mxu1 }
 0x117   :  { %v355_v59 = vadd.f32 %v354_v56, %v290_v54  ;;  %v2000_v60 = vadd.f32 %v1421_v57, %v1420_v53  ;;  %v1503_v61 = vpop.f32.mrb[18].mxu0  ;;  %v1423_v62 = vpop.f32.mrb[18].mxu1 }
 0x118   :  { %v366_v0 = vadd.f32 %v1503_v61, %v301_v58  ;;  %v357_v1 = vpop.f32.mrb[19].mxu0  ;;  %v1424_v2 = vpop.f32.mrb[19].mxu1  ;;  %v387_v18 = vmax.f32 %v363_v55, 0.0 }
 0x119   :  { %v358_v3 = vadd.f32 %v357_v1, %v293_v63  ;;  %v2003_v4 = vadd.f32 %v1424_v2, %v1423_v62  ;;  %v385_v6 = vmax.f32 %v355_v59, 0.0  ;;  %v533_v59 = vadd.f32 %v1984_v30, %v1995_v50 }
 0x11a   :  { %v388_v52 = vmax.f32 %v366_v0, 0.0  ;;  %v544_v0 = vadd.f32 %v1990_v48, %v1995_v50 }
 0x11b   :  { %v386_v54 = vmax.f32 %v358_v3, 0.0 }
 0x11d   :  { %v1506_v7 = vpop.f32.mrb[20].mxu0  ;;  %v1426_v8 = vpop.f32.mrb[20].mxu1 }
 0x11e   :  { %v2007_v10 = vadd.f32 %v1506_v7, %v314_v5  ;;  %v370_v11 = vpop.f32.mrb[21].mxu0  ;;  %v1427_v14 = vpop.f32.mrb[21].mxu1 }
 0x11f   :  { %v2010_v16 = vadd.f32 %v370_v11, %v306_v9  ;;  %v2012_v13 = vadd.f32 %v1427_v14, %v1426_v8  ;;  %v1507_v17 = vpop.f32.mrb[22].mxu0  ;;  %v1429_v19 = vpop.f32.mrb[22].mxu1  ;;  %v536_v9 = vadd.f32 %v1986_v36, %v1995_v50 }
 0x120   :  { %v2015_v21 = vadd.f32 %v1507_v17, %v317_v15  ;;  %v373_v22 = vpop.f32.mrb[23].mxu0  ;;  %v1430_v23 = vpop.f32.mrb[23].mxu1  ;;  %v391_v42 = vmax.f32 %v2007_v10, 0.0 }
 0x121   :  { %v2017_v25 = vadd.f32 %v373_v22, %v309_v20  ;;  %v2019_v26 = vadd.f32 %v1430_v23, %v1429_v19  ;;  %v389_v30 = vmax.f32 %v2010_v16, 0.0  ;;  %v760_v10 = vadd.f32 %v2012_v13, %v1995_v50 }
 0x122   :  { %v392_v48 = vmax.f32 %v2015_v21, 0.0  ;;  %v752_v16 = vadd.f32 %v2000_v60, %v1995_v50 }
 0x123   :  { %v763_v21 = vadd.f32 %v2019_v26, %v1995_v50 }
 0x125   :  { %v1514_v28 = vpop.f32.mrb[24].mxu0  ;;  %v1432_v29 = vpop.f32.mrb[24].mxu1 }
 0x126   :  { %v590_v32 = vadd.f32 %v1514_v28, %v525_v27  ;;  %v581_v33 = vpop.f32.mrb[25].mxu0  ;;  %v1433_v34 = vpop.f32.mrb[25].mxu1  ;;  %v390_v28 = vmax.f32 %v2017_v25, 0.0 }
 0x127   :  { %v582_v37 = vadd.f32 %v581_v33, %v517_v31  ;;  %v2027_v38 = vadd.f32 %v1433_v34, %v1432_v29  ;;  %v1515_v39 = vpop.f32.mrb[26].mxu0  ;;  %v1435_v40 = vpop.f32.mrb[26].mxu1 }
 0x128   :  { %v614_v43 = vmax.f32 %v590_v32, 0.0  ;;  %v593_v44 = vadd.f32 %v1515_v39, %v528_v35  ;;  %v584_v45 = vpop.f32.mrb[27].mxu0  ;;  %v1436_v46 = vpop.f32.mrb[27].mxu1 }
 0x129   :  { %v612_v47 = vmax.f32 %v582_v37, 0.0  ;;  %v585_v49 = vadd.f32 %v584_v45, %v520_v41  ;;  %v2031_v51 = vadd.f32 %v1436_v46, %v1435_v40 }
 0x12a   :  { %v622_v24 = vmax.f32 %v387_v18, %v614_v43  ;;  %v615_v53 = vmax.f32 %v593_v44, 0.0  ;;  %v755_v43 = vadd.f32 %v2003_v4, %v1995_v50  ;;  %v768_v4 = vadd.f32 %v2027_v38, %v1995_v50 }
 0x12b   :  { %v620_v56 = vmax.f32 %v385_v6, %v612_v47  ;;  %v613_v57 = vmax.f32 %v585_v49, 0.0 }
 0x12c   :  { %v623_v58 = vmax.f32 %v388_v52, %v615_v53 }
 0x12d   :  { %v621_v55 = vmax.f32 %v386_v54, %v613_v57  ;;  %v1518_v61 = vpop.f32.mrb[28].mxu0  ;;  %v1438_v62 = vpop.f32.mrb[28].mxu1 }
 0x12e   :  { %v606_v63 = vadd.f32 %v1518_v61, %v541_v12  ;;  %v597_v1 = vpop.f32.mrb[29].mxu0  ;;  %v1439_v2 = vpop.f32.mrb[29].mxu1 }
 0x12f   :  { %v598_v5 = vadd.f32 %v597_v1, %v533_v59  ;;  %v1440_v3 = vadd.f32 %v1439_v2, %v1438_v62  ;;  %v1519_v7 = vpop.f32.mrb[30].mxu0  ;;  %v1441_v8 = vpop.f32.mrb[30].mxu1 }
 0x130   :  { %v618_v11 = vmax.f32 %v606_v63, 0.0  ;;  %v609_v14 = vadd.f32 %v1519_v7, %v544_v0  ;;  %v600_v15 = vpop.f32.mrb[31].mxu0  ;;  %v1442_v17 = vpop.f32.mrb[31].mxu1 }
 0x131   :  { %v616_v19 = vmax.f32 %v598_v5, 0.0  ;;  %v601_v20 = vadd.f32 %v600_v15, %v536_v9  ;;  %v1443_v22 = vadd.f32 %v1442_v17, %v1441_v8  ;;  %v776_v26 = vadd.f32 %v1440_v3, %v1995_v50 }
 0x132   :  { %v626_v23 = vmax.f32 %v391_v42, %v618_v11  ;;  %v619_v27 = vmax.f32 %v609_v14, 0.0 }
 0x133   :  { %v624_v29 = vmax.f32 %v389_v30, %v616_v19  ;;  %v617_v31 = vmax.f32 %v601_v20, 0.0  ;;  %v779_v2 = vadd.f32 %v1443_v22, %v1995_v50 }
 0x134   :  { %v627_v36 = vmax.f32 %v392_v48, %v619_v27 }
 0x135   :  { %v625_v32 = vmax.f32 %v390_v28, %v617_v31  ;;  %v1526_v33 = vpop.f32.mrb[32].mxu0  ;;  %v1466_v34 = vpop.f32.mrb[32].mxu1 }
 0x136   :  { %v825_v35 = vadd.f32 %v1526_v33, %v760_v10  ;;  %v816_v37 = vpop.f32.mrb[33].mxu0  ;;  %v1467_v39 = vpop.f32.mrb[33].mxu1 }
 0x137   :  { %v817_v40 = vadd.f32 %v816_v37, %v752_v16  ;;  %v1468_v25 = vadd.f32 %v1467_v39, %v1466_v34  ;;  %v1527_v41 = vpop.f32.mrb[34].mxu0  ;;  %v1469_v18 = vpop.f32.mrb[34].mxu1 }
 0x138   :  { %v849_v13 = vmax.f32 %v825_v35, 0.0  ;;  %v828_v44 = vadd.f32 %v1527_v41, %v763_v21  ;;  %v819_v45 = vpop.f32.mrb[35].mxu0  ;;  %v1470_v46 = vpop.f32.mrb[35].mxu1 }
 0x139   :  { %v847_v6 = vmax.f32 %v817_v40, 0.0  ;;  %v820_v47 = vadd.f32 %v819_v45, %v755_v43  ;;  %v1471_v60 = vadd.f32 %v1470_v46, %v1469_v18  ;;  %v987_v27 = vadd.f32 %v1468_v25, %v1995_v50 }
 0x13a   :  { %v857_v49 = vmax.f32 %v622_v24, %v849_v13  ;;  %v850_v52 = vmax.f32 %v828_v44, 0.0 }
 0x13b   :  { %v855_v53 = vmax.f32 %v620_v56, %v847_v6  ;;  %v848_v54 = vmax.f32 %v820_v47, 0.0  ;;  %v771_v56 = vadd.f32 %v2031_v51, %v1995_v50 }
 0x13c   :  { %v858_v57 = vmax.f32 %v623_v58, %v850_v52 }
 0x13d   :  { %v856_v12 = vmax.f32 %v621_v55, %v848_v54  ;;  %v1530_v61 = vpop.f32.mrb[36].mxu0  ;;  %v1472_v62 = vpop.f32.mrb[36].mxu1 }
 0x13e   :  { %v841_v59 = vadd.f32 %v1530_v61, %v776_v26  ;;  %v832_v63 = vpop.f32.mrb[37].mxu0  ;;  %v1473_v1 = vpop.f32.mrb[37].mxu1 }
 0x13f   :  { %v833_v0 = vadd.f32 %v832_v63, %v768_v4  ;;  %v1474_v5 = vadd.f32 %v1473_v1, %v1472_v62  ;;  %v1531_v24 = vpop.f32.mrb[38].mxu0  ;;  %v1475_v7 = vpop.f32.mrb[38].mxu1 }
 0x140   :  { %v853_v58 = vmax.f32 %v841_v59, 0.0  ;;  %v844_v3 = vadd.f32 %v1531_v24, %v779_v2  ;;  %v835_v55 = vpop.f32.mrb[39].mxu0  ;;  %v1476_v8 = vpop.f32.mrb[39].mxu1 }
 0x141   :  { %v851_v9 = vmax.f32 %v833_v0, 0.0  ;;  %v836_v42 = vadd.f32 %v835_v55, %v771_v56  ;;  %v1477_v11 = vadd.f32 %v1476_v8, %v1475_v7  ;;  %v995_v19 = vadd.f32 %v1474_v5, %v1995_v50 }
 0x142   :  { %v861_v38 = vmax.f32 %v626_v23, %v853_v58  ;;  %v854_v14 = vmax.f32 %v844_v3, 0.0 }
 0x143   :  { %v859_v15 = vmax.f32 %v624_v29, %v851_v9  ;;  %v852_v17 = vmax.f32 %v836_v42, 0.0  ;;  %v998_v10 = vadd.f32 %v1477_v11, %v1995_v50  ;;  %v990_v29 = vadd.f32 %v1471_v60, %v1995_v50 }
 0x144   :  { %v862_v30 = vmax.f32 %v627_v36, %v854_v14 }
 0x145   :  { %v860_v20 = vmax.f32 %v625_v32, %v852_v17  ;;  %v1478_v22 = vpop.f32.mrb[40].mxu1  ;;  %v1538_v48 = vpop.f32.mrb[40].mxu0 }
 0x146   :  { %v1060_v51 = vadd.f32 %v1538_v48, %v995_v19  ;;  %v1479_v28 = vpop.f32.mrb[41].mxu1  ;;  %v1051_v31 = vpop.f32.mrb[41].mxu0 }
 0x147   :  { %v1480_v33 = vadd.f32 %v1479_v28, %v1478_v22  ;;  %v1052_v34 = vadd.f32 %v1051_v31, %v987_v27  ;;  %v1481_v16 = vpop.f32.mrb[42].mxu1  ;;  %v1539_v23 = vpop.f32.mrb[42].mxu0 }
 0x148   :  { %v1084_v35 = vmax.f32 %v1060_v51, 0.0  ;;  %v1063_v36 = vadd.f32 %v1539_v23, %v998_v10  ;;  %v1482_v37 = vpop.f32.mrb[43].mxu1  ;;  %v1054_v39 = vpop.f32.mrb[43].mxu0 }
 0x149   :  { %v1082_v32 = vmax.f32 %v1052_v34, 0.0  ;;  %v1483_v21 = vadd.f32 %v1482_v37, %v1481_v16  ;;  %v1055_v40 = vadd.f32 %v1054_v39, %v990_v29  ;;  %v1003_v6 = vadd.f32 %v1480_v33, %v1995_v50 }
 0x14a   :  { %v1092_v41 = vmax.f32 %v857_v49, %v1084_v35  ;;  %v1085_v25 = vmax.f32 %v1063_v36, 0.0 }
 0x14b   :  { %v1090_v18 = vmax.f32 %v855_v53, %v1082_v32  ;;  %v1083_v43 = vmax.f32 %v1055_v40, 0.0  ;;  %v1006_v59 = vadd.f32 %v1483_v21, %v1995_v50 }
 0x14c   :  { %v1093_v13 = vmax.f32 %v858_v57, %v1085_v25 }
 0x14d   :  { %v1091_v44 = vmax.f32 %v856_v12, %v1083_v43  ;;  %v1484_v45 = vpop.f32.mrb[44].mxu1  ;;  %v1542_v46 = vpop.f32.mrb[44].mxu0 }
 0x14e   :  { %v1297_v47 = vpack.c.bf16 %v1093_v13, %v1092_v41  ;;  %v1485_v52 = vpop.f32.mrb[45].mxu1  ;;  %v1067_v60 = vpop.f32.mrb[45].mxu0 }
 0x14f   :  { %v1292_v54 = vpack.c.bf16 %v1091_v44, %v1090_v18  ;;  %v1486_v26 = vadd.f32 %v1485_v52, %v1484_v45  ;;  %v1068_v61 = vadd.f32 %v1067_v60, %v1003_v6  ;;  %v1487_v62 = vpop.f32.mrb[46].mxu1  ;;  %v1543_v4 = vpop.f32.mrb[46].mxu0 }
 0x150   :  { %1309 = vst [vmem:[%s2082_s3 + $0x8] sm:$0xff] %v1297_v47   ;;  %v1488_v49 = vpop.f32.mrb[47].mxu1  ;;  %v1070_v53 = vpop.f32.mrb[47].mxu0 }
 0x151   :  { %1293 = vst [vmem:[%s2082_s3] sm:$0xff] %v1292_v54   ;;  %v1011_v57 = vadd.f32 %v1486_v26, %v1995_v50  ;;  %v1086_v12 = vmax.f32 %v1068_v61, 0.0  ;;  %v1489_v63 = vadd.f32 %v1488_v49, %v1487_v62  ;;  %v1071_v1 = vadd.f32 %v1070_v53, %v1006_v59 }
 0x153   :  { %v1076_v2 = vadd.f32 %v1542_v46, %v1011_v57  ;;  %v1094_v0 = vmax.f32 %v859_v15, %v1086_v12  ;;  %v1014_v5 = vadd.f32 %v1489_v63, %v1995_v50  ;;  %v1087_v24 = vmax.f32 %v1071_v1, 0.0 }
 0x155   :  { %v1088_v7 = vmax.f32 %v1076_v2, 0.0  ;;  %v1079_v56 = vadd.f32 %v1543_v4, %v1014_v5  ;;  %v1095_v58 = vmax.f32 %v860_v20, %v1087_v24 }
 0x157   :  { %v1096_v3 = vmax.f32 %v861_v38, %v1088_v7  ;;  %v1089_v55 = vmax.f32 %v1079_v56, 0.0  ;;  %v1302_v8 = vpack.c.bf16 %v1095_v58, %v1094_v0 }
 0x159   :  { %v1097_v9 = vmax.f32 %v862_v30, %v1089_v55  ;;  %1310 = vst [vmem:[%s2082_s3 + $0x10] sm:$0xff] %v1302_v8  }
 0x15b   :  { %v1307_v42 = vpack.c.bf16 %v1097_v9, %v1096_v3 }
 0x15d   :  { %1311 = vst [vmem:[%s2082_s3 + $0x18] sm:$0xff] %v1307_v42  }

// kernel: cnn_forward.7
= control target key start
LH: loop header
LB: loop body
LE: loop exit
PB: predicated region body
PF: predicated region fallthrough
CT: control target
= control target key end

     0   :  { %v1477_v32 = vmov 0.0   ;;  %vm1478_vm0 = vmmov 0   ;;  %vm555_vm1 = vcmask 523264   ;;  %vm837_vm2 = vcmask 261120   ;;  %s1834_s1 = inlined_call_operand.vmem [shape: bf16[256,64], index: 1, kind: input, shape index: {}]   ;;  %s1835_s0 = inlined_call_operand.vmem [shape: bf16[4,32,256], index: 0, kind: input, shape index: {}]   ;;  %s1836_s3 = inlined_call_operand.vmem [shape: bf16[256,32], index: 3, kind: input, shape index: {}]   ;;  %s1837_s2 = inlined_call_operand.vmem [shape: f32[1,64], index: 2, kind: input, shape index: {}]   ;;  %s1838_s5 = inlined_call_operand.vmem [shape: bf16[32,64], index: 5, kind: input, shape index: {}]   ;;  %s1839_s7 = inlined_call_operand.vmem [shape: bf16[64,128], index: 7, kind: input, shape index: {}]   ;;  %s1840_s4 = inlined_call_operand.vmem [shape: f32[1,32], index: 4, kind: input, shape index: {}]   ;;  %s1841_s9 = inlined_call_operand.vmem [shape: bf16[128,128], index: 9, kind: input, shape index: {}]   ;;  %s1842_s6 = inlined_call_operand.vmem [shape: f32[1,64], index: 6, kind: input, shape index: {}]   ;;  %s1843_s8 = inlined_call_operand.vmem [shape: f32[1,128], index: 8, kind: input, shape index: {}]   ;;  %s1844_s10 = inlined_call_operand.vmem [shape: f32[1,128], index: 10, kind: input, shape index: {}]   ;;  %s1845_s11 = inlined_call_operand.vmem [shape: f32[8,128], index: 11, kind: output, shape index: {}]  }
   0x1   :  { %v1407_v0 = vld [vmem:[%s1834_s1 + $0x40] sm:$0xff]   ;;  %v1409_v2 = vld [vmem:[%s1834_s1 + $0x48] sm:$0xff]   ;;  %v1411_v4 = vld [vmem:[%s1834_s1 + $0x50] sm:$0xff]  }
   0x2   :  { %v1408_v1 = vld [vmem:[%s1834_s1] sm:$0xff]   ;;  %1168 = vmatprep.subr.bf16.mxu0 %v1407_v0  ;;  %1196 = vmatprep.subr.bf16.mxu1 %v1407_v0  ;;  %v1410_v3 = vld [vmem:[%s1834_s1 + $0x8] sm:$0xff]   ;;  %v1557_v5 = vld [vmem:[%s1834_s1 + $0x10] sm:$0xff]  }
   0x3   :  { %1169 = vmatpush3.bf16.msra.mxu0 %v1408_v1  ;;  %1197 = vmatpush3.bf16.msra.mxu1 %v1408_v1  ;;  %v1562_v6 = vld [vmem:[%s1834_s1 + $0x58] sm:$0xff]   ;;  %v1576_v8 = vld [vmem:[%s1834_s1 + $0x60] sm:$0xff]   ;;  %v1417_v10 = vld [vmem:[%s1834_s1 + $0x68] sm:$0xff]  }
   0x4   :  { %1170 = vmatprep.subr.bf16.mxu0 %v1409_v2  ;;  %1198 = vmatprep.subr.bf16.mxu1 %v1409_v2  ;;  %v1569_v7 = vld [vmem:[%s1834_s1 + $0x18] sm:$0xff]   ;;  %v1416_v9 = vld [vmem:[%s1834_s1 + $0x20] sm:$0xff]   ;;  %v1418_v13 = vld [vmem:[%s1834_s1 + $0x28] sm:$0xff]  }
   0x5   :  { %v1425_v11 = vld [vmem:[%s1835_s0 + $0x4] ss:$8 sps:$4 sm:$0xff]   ;;  %v1419_v14 = vld [vmem:[%s1834_s1 + $0x70] sm:$0xff]   ;;  %v1421_v16 = vld [vmem:[%s1834_s1 + $0x78] sm:$0xff]  }
   0x6   :  { %v1428_v12 = vld [vmem:[%s1835_s0 + $0x24] ss:$8 sps:$4 sm:$0xff]   ;;  %230 = vmatprep.mubr.bf16.mxu0 %v1425_v11  ;;  %v1420_v15 = vld [vmem:[%s1834_s1 + $0x30] sm:$0xff]   ;;  %v1422_v17 = vld [vmem:[%s1834_s1 + $0x38] sm:$0xff]  }
   0x7   :  { %1171 = vmatpush3.bf16.msra.mxu0 %v1410_v3  ;;  %1199 = vmatpush3.bf16.msra.mxu1 %v1410_v3  ;;  %v1423_v18 = vld [vmem:[%s1835_s0] ss:$8 sps:$4 sm:$0xff]   ;;  %v1429_v20 = vld [vmem:[%s1835_s0 + $0x14] ss:$8 sps:$4 sm:$0xff]   ;;  %v1433_v22 = vld [vmem:[%s1835_s0 + $0x10] ss:$8 sps:$4 sm:$0xff]  }
   0x8   :  { %1172 = vmatprep.subr.bf16.mxu0 %v1411_v4  ;;  %1200 = vmatprep.subr.bf16.mxu1 %v1411_v4  ;;  %v1426_v19 = vld [vmem:[%s1835_s0 + $0x20] ss:$8 sps:$4 sm:$0xff]   ;;  %v1431_v21 = vld [vmem:[%s1835_s0 + $0x34] ss:$8 sps:$4 sm:$0xff]   ;;  %v1434_v23 = vld [vmem:[%s1835_s0 + $0x30] ss:$8 sps:$4 sm:$0xff]  }
   0x9   :  { %308 = vmatprep.mubr.bf16.mxu1 %v1428_v12  ;;  %v1437_v24 = vld [vmem:[%s1835_s0 + $0x44] ss:$8 sps:$4 sm:$0xff]   ;;  %v1435_v26 = vld [vmem:[%s1835_s0 + $0x40] ss:$8 sps:$4 sm:$0xff]   ;;  %v1441_v28 = vld [vmem:[%s1835_s0 + $0x54] ss:$8 sps:$4 sm:$0xff]  }
   0xa   :  { %v1440_v25 = vld [vmem:[%s1835_s0 + $0x64] ss:$8 sps:$4 sm:$0xff]   ;;  %v1438_v27 = vld [vmem:[%s1835_s0 + $0x60] ss:$8 sps:$4 sm:$0xff]   ;;  %v1444_v29 = vld [vmem:[%s1835_s0 + $0x74] ss:$8 sps:$4 sm:$0xff]  }
   0xb   :  { %1173 = vmatpush3.bf16.msra.mxu0 %v1557_v5  ;;  %1201 = vmatpush3.bf16.msra.mxu1 %v1557_v5  ;;  %v1443_v30 = vld [vmem:[%s1835_s0 + $0x50] ss:$8 sps:$4 sm:$0xff]   ;;  %v1447_v33 = vld [vmem:[%s1836_s3 + $0x20] sm:$0xff]   ;;  %v1448_v34 = vld [vmem:[%s1836_s3 + $0x28] sm:$0xff]  }
   0xc   :  { %1174 = vmatprep.subr.bf16.mxu0 %v1562_v6  ;;  %1202 = vmatprep.subr.bf16.mxu1 %v1562_v6  ;;  %v1446_v31 = vld [vmem:[%s1835_s0 + $0x70] ss:$8 sps:$4 sm:$0xff]   ;;  %v1449_v35 = vld [vmem:[%s1836_s3 + $0x40] sm:$0xff]   ;;  %v1451_v37 = vld [vmem:[%s1836_s3 + $0x48] sm:$0xff]  }
   0xd   :  { %v1450_v36 = vld [vmem:[%s1836_s3 + $0x30] sm:$0xff]   ;;  %v1452_v38 = vld [vmem:[%s1836_s3 + $0x38] sm:$0xff]   ;;  %v1700_v43 = vld [vmem:[%s1837_s2] ss:$0 sm:$0xff] }
   0xe   :  { %v1453_v39 = vld [vmem:[%s1836_s3 + $0x50] sm:$0xff]   ;;  %v1455_v40 = vld [vmem:[%s1836_s3 + $0x58] sm:$0xff]  }
   0xf   :  { %1175 = vmatpush3.bf16.msra.mxu0 %v1569_v7  ;;  %1203 = vmatpush3.bf16.msra.mxu1 %v1569_v7 }
  0x10   :  { %1176 = vmatprep.subr.bf16.mxu0 %v1576_v8  ;;  %1204 = vmatprep.subr.bf16.mxu1 %v1576_v8 }
  0x13   :  { %1177 = vmatpush3.bf16.msra.mxu0 %v1416_v9  ;;  %1205 = vmatpush3.bf16.msra.mxu1 %v1416_v9 }
  0x14   :  { %1178 = vmatprep.subr.bf16.mxu0 %v1417_v10  ;;  %1206 = vmatprep.subr.bf16.mxu1 %v1417_v10 }
  0x17   :  { %1179 = vmatpush3.bf16.msra.mxu0 %v1418_v13  ;;  %1207 = vmatpush3.bf16.msra.mxu1 %v1418_v13 }
  0x18   :  { %1180 = vmatprep.subr.bf16.mxu0 %v1419_v14  ;;  %1208 = vmatprep.subr.bf16.mxu1 %v1419_v14 }
  0x1b   :  { %1181 = vmatpush3.bf16.msra.mxu0 %v1420_v15  ;;  %1209 = vmatpush3.bf16.msra.mxu1 %v1420_v15 }
  0x1c   :  { %1182 = vmatprep.subr.bf16.mxu0 %v1421_v16  ;;  %1210 = vmatprep.subr.bf16.mxu1 %v1421_v16 }
  0x1f   :  { %1183 = vmatpush3.bf16.msra.mxu0 %v1422_v17  ;;  %1211 = vmatpush3.bf16.msra.mxu1 %v1422_v17 }
  0x20   :  { %1224 = vmatprep.subr.bf16.mxu0 %v1407_v0  ;;  %1252 = vmatprep.subr.bf16.mxu1 %v1407_v0 }
  0x22   :  { %231 = vmatmul.mubr.bf16.vlgmr.msra.gmra.mrb[0].mxu0 %v1423_v18  ;;  %309 = vmatmul.mubr.bf16.vlgmr.msra.gmra.mrb[0].mxu1 %v1426_v19 }
  0x23   :  { %1225 = vmatpush3.bf16.msra.mxu0 %v1408_v1  ;;  %1253 = vmatpush3.bf16.msra.mxu1 %v1408_v1 }
  0x24   :  { %1226 = vmatprep.subr.bf16.mxu0 %v1409_v2  ;;  %1254 = vmatprep.subr.bf16.mxu1 %v1409_v2 }
  0x25   :  { %238 = vmatprep.mubr.bf16.mxu0 %v1429_v20  ;;  %316 = vmatprep.mubr.bf16.mxu1 %v1431_v21 }
  0x27   :  { %1227 = vmatpush3.bf16.msra.mxu0 %v1410_v3  ;;  %1255 = vmatpush3.bf16.msra.mxu1 %v1410_v3 }
  0x28   :  { %1228 = vmatprep.subr.bf16.mxu0 %v1411_v4  ;;  %1256 = vmatprep.subr.bf16.mxu1 %v1411_v4 }
  0x2a   :  { %239 = vmatmul.mubr.bf16.gmra.mrb[4].mxu0 %v1433_v22  ;;  %317 = vmatmul.mubr.bf16.gmra.mrb[4].mxu1 %v1434_v23 }
  0x2b   :  { %1229 = vmatpush3.bf16.msra.mxu0 %v1557_v5  ;;  %1257 = vmatpush3.bf16.msra.mxu1 %v1557_v5 }
  0x2c   :  { %1230 = vmatprep.subr.bf16.mxu0 %v1562_v6  ;;  %1258 = vmatprep.subr.bf16.mxu1 %v1562_v6 }
  0x2d   :  { %390 = vmatprep.mubr.bf16.mxu0 %v1437_v24  ;;  %472 = vmatprep.mubr.bf16.mxu1 %v1440_v25 }
  0x2f   :  { %1231 = vmatpush3.bf16.msra.mxu0 %v1569_v7  ;;  %1259 = vmatpush3.bf16.msra.mxu1 %v1569_v7 }
  0x30   :  { %1232 = vmatprep.subr.bf16.mxu0 %v1576_v8  ;;  %1260 = vmatprep.subr.bf16.mxu1 %v1576_v8 }
  0x33   :  { %1233 = vmatpush3.bf16.msra.mxu0 %v1416_v9  ;;  %1261 = vmatpush3.bf16.msra.mxu1 %v1416_v9 }
  0x34   :  { %1234 = vmatprep.subr.bf16.mxu0 %v1417_v10  ;;  %1262 = vmatprep.subr.bf16.mxu1 %v1417_v10 }
  0x37   :  { %1235 = vmatpush3.bf16.msra.mxu0 %v1418_v13  ;;  %1263 = vmatpush3.bf16.msra.mxu1 %v1418_v13 }
  0x38   :  { %1236 = vmatprep.subr.bf16.mxu0 %v1419_v14  ;;  %1264 = vmatprep.subr.bf16.mxu1 %v1419_v14 }
  0x3b   :  { %1237 = vmatpush3.bf16.msra.mxu0 %v1420_v15  ;;  %1265 = vmatpush3.bf16.msra.mxu1 %v1420_v15 }
  0x3c   :  { %1238 = vmatprep.subr.bf16.mxu0 %v1421_v16  ;;  %1266 = vmatprep.subr.bf16.mxu1 %v1421_v16 }
  0x3f   :  { %1239 = vmatpush3.bf16.msra.mxu0 %v1422_v17  ;;  %1267 = vmatpush3.bf16.msra.mxu1 %v1422_v17 }
  0x40   :  { %1317 = vmatprep.subr.bf16.mxu1 %v1477_v32  ;;  %1341 = vmatprep.subr.bf16.mxu0 %v1477_v32 }
  0x42   :  { %391 = vmatmul.mubr.bf16.vlgmr.msra.gmra.mrb[8].mxu0 %v1435_v26  ;;  %473 = vmatmul.mubr.bf16.vlgmr.msra.gmra.mrb[8].mxu1 %v1438_v27 }
  0x43   :  { %398 = vmatprep.mubr.bf16.mxu0 %v1441_v28  ;;  %480 = vmatprep.mubr.bf16.mxu1 %v1444_v29 }
  0x44   :  { %1318 = vmatpush3.bf16.msra.mxu1 %v1447_v33  ;;  %1342 = vmatpush3.bf16.msra.mxu0 %v1449_v35 }
  0x45   :  { %1319 = vmatprep.subr.bf16.mxu1 %v1477_v32  ;;  %1343 = vmatprep.subr.bf16.mxu0 %v1477_v32 }
  0x48   :  { %1320 = vmatpush3.bf16.msra.mxu1 %v1448_v34  ;;  %1344 = vmatpush3.bf16.msra.mxu0 %v1451_v37 }
  0x49   :  { %1321 = vmatprep.subr.bf16.mxu1 %v1477_v32  ;;  %1345 = vmatprep.subr.bf16.mxu0 %v1477_v32 }
  0x4a   :  { %399 = vmatmul.mubr.bf16.gmra.mrb[12].mxu0 %v1443_v30  ;;  %481 = vmatmul.mubr.bf16.gmra.mrb[12].mxu1 %v1446_v31 }
  0x4b   :  { %1325 = vmatprep.mubr.msk.bf16.mxu1 %vm1478_vm0, %v1477_v32  ;;  %1349 = vmatprep.mubr.msk.bf16.mxu0 %vm1478_vm0, %v1477_v32 }
  0x4c   :  { %1322 = vmatpush3.bf16.msra.mxu1 %v1450_v36  ;;  %1346 = vmatpush3.bf16.msra.mxu0 %v1453_v39 }
  0x4d   :  { %1323 = vmatprep.subr.bf16.mxu1 %v1477_v32  ;;  %1347 = vmatprep.subr.bf16.mxu0 %v1477_v32 }
  0x50   :  { %1324 = vmatpush3.bf16.msra.mxu1 %v1452_v38  ;;  %1348 = vmatpush3.bf16.msra.mxu0 %v1455_v40 }
  0x51   :  { %1329 = vmatprep.subr.bf16.mxu1 %v1477_v32  ;;  %1365 = vmatprep.subr.bf16.mxu0 %v1477_v32 }
  0xf5   :  { %v1184_v41 = vpop.f32.mrb[0].mxu0  ;;  %v1212_v42 = vpop.f32.mrb[0].mxu1 }
  0xf6   :  { %v1185_v44 = vpop.f32.mrb[1].mxu0  ;;  %v1213_v45 = vpop.f32.mrb[1].mxu1 }
  0xf7   :  { %v1186_v46 = vadd.f32 %v1185_v44, %v1184_v41  ;;  %v1214_v47 = vadd.f32 %v1213_v45, %v1212_v42  ;;  %v1187_v48 = vpop.f32.mrb[2].mxu0  ;;  %v1215_v49 = vpop.f32.mrb[2].mxu1 }
  0xf8   :  { %v1188_v50 = vpop.f32.mrb[3].mxu0  ;;  %v1216_v51 = vpop.f32.mrb[3].mxu1 }
  0xf9   :  { %v233_v52 = vadd.f32 %v1186_v46, %v1700_v43  ;;  %v311_v53 = vadd.f32 %v1214_v47, %v1700_v43  ;;  %v1189_v54 = vadd.f32 %v1188_v50, %v1187_v48  ;;  %v1217_v55 = vadd.f32 %v1216_v51, %v1215_v49 }
  0xfb   :  { %v247_v56 = vmax.f32 %v233_v52, 0.0  ;;  %v325_v57 = vmax.f32 %v311_v53, 0.0  ;;  %v236_v58 = vadd.f32 %v1189_v54, %v1700_v43  ;;  %v314_v59 = vadd.f32 %v1217_v55, %v1700_v43 }
  0xfd   :  { %v329_v60 = vmax.f32 %v247_v56, %v325_v57  ;;  %v248_v61 = vmax.f32 %v236_v58, 0.0  ;;  %v326_v62 = vmax.f32 %v314_v59, 0.0  ;;  %v1190_v63 = vpop.f32.mrb[4].mxu0  ;;  %v1218_v0 = vpop.f32.mrb[4].mxu1 }
  0xfe   :  { %v1191_v1 = vpop.f32.mrb[5].mxu0  ;;  %v1219_v2 = vpop.f32.mrb[5].mxu1 }
  0xff   :  { %v330_v3 = vmax.f32 %v248_v61, %v326_v62  ;;  %v1192_v4 = vadd.f32 %v1191_v1, %v1190_v63  ;;  %v1220_v5 = vadd.f32 %v1219_v2, %v1218_v0  ;;  %v1193_v6 = vpop.f32.mrb[6].mxu0  ;;  %v1221_v7 = vpop.f32.mrb[6].mxu1  ;;  %v1454_v62 = vld [vmem:[%s1836_s3] sm:$0xff]  }
 0x100   :  { %v1194_v8 = vpop.f32.mrb[7].mxu0  ;;  %v1222_v9 = vpop.f32.mrb[7].mxu1 }
 0x101   :  { %v241_v10 = vadd.f32 %v1192_v4, %v1700_v43  ;;  %v319_v11 = vadd.f32 %v1220_v5, %v1700_v43  ;;  %v1195_v12 = vadd.f32 %v1194_v8, %v1193_v6  ;;  %v1223_v13 = vadd.f32 %v1222_v9, %v1221_v7  ;;  %v1456_v7 = vld [vmem:[%s1836_s3 + $0x8] sm:$0xff]  }
 0x103   :  { %v249_v14 = vmax.f32 %v241_v10, 0.0  ;;  %v327_v15 = vmax.f32 %v319_v11, 0.0  ;;  %v244_v16 = vadd.f32 %v1195_v12, %v1700_v43  ;;  %v322_v17 = vadd.f32 %v1223_v13, %v1700_v43  ;;  %v1458_v12 = vld [vmem:[%s1836_s3 + $0x18] sm:$0xff]   ;;  %v1459_v13 = vld [vmem:[%s1836_s3 + $0x60] sm:$0xff]  }
 0x105   :  { %v331_v18 = vmax.f32 %v249_v14, %v327_v15  ;;  %v250_v19 = vmax.f32 %v244_v16, 0.0  ;;  %v328_v20 = vmax.f32 %v322_v17, 0.0  ;;  %v1460_v15 = vld [vmem:[%s1836_s3 + $0x68] sm:$0xff]   ;;  %v1461_v16 = vld [vmem:[%s1836_s3 + $0x70] sm:$0xff]   ;;  %v1462_v17 = vld [vmem:[%s1836_s3 + $0x78] sm:$0xff]  }
 0x107   :  { %v332_v21 = vmax.f32 %v250_v19, %v328_v20  ;;  %v1463_v19 = vld [vmem:[%s1838_s5] sm:$0xff]   ;;  %v1464_v20 = vld [vmem:[%s1838_s5 + $0x8] sm:$0xff]  }
 0x115   :  { %v1240_v22 = vpop.f32.mrb[8].mxu0  ;;  %v1268_v23 = vpop.f32.mrb[8].mxu1 }
 0x116   :  { %v1241_v24 = vpop.f32.mrb[9].mxu0  ;;  %v1269_v25 = vpop.f32.mrb[9].mxu1 }
 0x117   :  { %v1242_v26 = vadd.f32 %v1241_v24, %v1240_v22  ;;  %v1270_v27 = vadd.f32 %v1269_v25, %v1268_v23  ;;  %v1243_v28 = vpop.f32.mrb[10].mxu0  ;;  %v1271_v29 = vpop.f32.mrb[10].mxu1  ;;  %v1466_v22 = vld [vmem:[%s1839_s7 + $0x8] sm:$0xff]  }
 0x118   :  { %v1244_v30 = vpop.f32.mrb[11].mxu0  ;;  %v1272_v31 = vpop.f32.mrb[11].mxu1 }
 0x119   :  { %v393_v33 = vadd.f32 %v1242_v26, %v1700_v43  ;;  %v475_v34 = vadd.f32 %v1270_v27, %v1700_v43  ;;  %v1245_v35 = vadd.f32 %v1244_v30, %v1243_v28  ;;  %v1273_v36 = vadd.f32 %v1272_v31, %v1271_v29 }
 0x11b   :  { %v407_v37 = vmax.f32 %v393_v33, 0.0  ;;  %v489_v38 = vmax.f32 %v475_v34, 0.0  ;;  %v396_v39 = vadd.f32 %v1245_v35, %v1700_v43  ;;  %v478_v40 = vadd.f32 %v1273_v36, %v1700_v43 }
 0x11d   :  { %v411_v41 = vmax.f32 %v329_v60, %v407_v37  ;;  %v408_v42 = vmax.f32 %v396_v39, 0.0  ;;  %v1246_v44 = vpop.f32.mrb[12].mxu0  ;;  %v1274_v45 = vpop.f32.mrb[12].mxu1  ;;  %v490_v46 = vmax.f32 %v478_v40, 0.0  ;;  %v1148_v39 = vld [vmem:[%s1840_s4] ss:$0 sm:$0xff] }
 0x11e   :  { %v1247_v47 = vpop.f32.mrb[13].mxu0  ;;  %v1275_v48 = vpop.f32.mrb[13].mxu1 }
 0x11f   :  { %v493_v49 = vmax.f32 %v411_v41, %v489_v38  ;;  %v412_v50 = vmax.f32 %v330_v3, %v408_v42  ;;  %v1248_v51 = vadd.f32 %v1247_v47, %v1246_v44  ;;  %v1249_v52 = vpop.f32.mrb[14].mxu0  ;;  %v1276_v53 = vadd.f32 %v1275_v48, %v1274_v45  ;;  %v1277_v54 = vpop.f32.mrb[14].mxu1  ;;  %v1467_v48 = vld [vmem:[%s1839_s7 + $0x10] sm:$0xff]  }
 0x120   :  { %v1250_v55 = vpop.f32.mrb[15].mxu0  ;;  %v1278_v56 = vpop.f32.mrb[15].mxu1 }
 0x121   :  { %v494_v57 = vmax.f32 %v412_v50, %v490_v46  ;;  %v401_v58 = vadd.f32 %v1248_v51, %v1700_v43  ;;  %v1251_v59 = vadd.f32 %v1250_v55, %v1249_v52  ;;  %v483_v60 = vadd.f32 %v1276_v53, %v1700_v43  ;;  %v1469_v50 = vld [vmem:[%s1841_s9] sm:$0xff]   ;;  %v1470_v51 = vld [vmem:[%s1841_s9 + $0x8] sm:$0xff]   ;;  %v1471_v52 = vld [vmem:[%s1841_s9 + $0x10] sm:$0xff]  }
 0x122   :  { %v1279_v61 = vadd.f32 %v1278_v56, %v1277_v54  ;;  %v529_v14 = vpack.c.bf16 %v493_v49, %v493_v49  ;;  %v1468_v49 = vld [vmem:[%s1839_s7 + $0x18] sm:$0xff]   ;;  %v1473_v54 = vld [vmem:[%s1841_s9 + $0x20] sm:$0xff]   ;;  %v1474_v55 = vld [vmem:[%s1841_s9 + $0x28] sm:$0xff]  }
 0x123   :  { %v530_v63 = vpack.c.bf16 %v494_v57, %v494_v57  ;;  %v409_v0 = vmax.f32 %v401_v58, 0.0  ;;  %v404_v1 = vadd.f32 %v1251_v59, %v1700_v43  ;;  %v491_v2 = vmax.f32 %v483_v60, 0.0  ;;  %v1472_v53 = vld [vmem:[%s1841_s9 + $0x18] sm:$0xff]   ;;  %v1149_v56 = vld [vmem:[%s1842_s6] ss:$0 sm:$0xff] }
 0x124   :  { %v486_v3 = vadd.f32 %v1279_v61, %v1700_v43  ;;  %v1457_v43 = vld [vmem:[%s1836_s3 + $0x10] sm:$0xff]  }
 0x125   :  { %v413_v4 = vmax.f32 %v331_v18, %v409_v0  ;;  %v410_v5 = vmax.f32 %v404_v1, 0.0  ;;  %1326 = vmatmul.mubr.msk.bf16.vlgmr.msra.gmra.mrb[16].mxu1 %vm555_vm1, %v530_v63  ;;  %v1475_v0 = vld [vmem:[%s1841_s9 + $0x30] sm:$0xff]   ;;  %v1476_v1 = vld [vmem:[%s1841_s9 + $0x38] sm:$0xff]  }
 0x126   :  { %v492_v6 = vmax.f32 %v486_v3, 0.0  ;;  %1330 = vmatpush3.bf16.msra.mxu1 %v1454_v62  ;;  %1337 = vmatprep.mubr.msk.bf16.mxu1 %vm1478_vm0, %v1477_v32 }
 0x127   :  { %v414_v8 = vmax.f32 %v332_v21, %v410_v5  ;;  %v495_v9 = vmax.f32 %v413_v4, %v491_v2  ;;  %1331 = vmatprep.subr.bf16.mxu1 %v1477_v32  ;;  %v1465_v21 = vld [vmem:[%s1839_s7] sm:$0xff]  }
 0x128   :  { %v1153_v2 = vld [vmem:[%s1843_s8] ss:$0 sm:$0xff] }
 0x129   :  { %v666_v10 = vpack.c.bf16 %v495_v9, %v495_v9  ;;  %v496_v11 = vmax.f32 %v414_v8, %v492_v6 }
 0x12a   :  { %1332 = vmatpush3.bf16.msra.mxu1 %v1456_v7 }
 0x12b   :  { %1350 = vmatmul.mubr.msk.bf16.vlgmr.msra.gmra.mrb[16].mxu0 %vm555_vm1, %v666_v10  ;;  %1333 = vmatprep.subr.bf16.mxu1 %v1477_v32  ;;  %v735_v18 = vpack.c.bf16 %v496_v11, %v496_v11 }
 0x12c   :  { %1369 = vmatprep.mubr.msk.bf16.mxu0 %vm1478_vm0, %v1477_v32  ;;  %1366 = vmatpush3.bf16.msra.mxu0 %v1463_v19 }
 0x12d   :  { %1367 = vmatprep.subr.bf16.mxu0 %v1477_v32 }
 0x12e   :  { %1334 = vmatpush3.bf16.msra.mxu1 %v1457_v43 }
 0x12f   :  { %1335 = vmatprep.subr.bf16.mxu1 %v1477_v32 }
 0x130   :  { %1368 = vmatpush3.bf16.msra.mxu0 %v1464_v20 }
 0x131   :  { %1385 = vmatprep.subr.bf16.mxu0 %v1477_v32 }
 0x132   :  { %1336 = vmatpush3.bf16.msra.mxu1 %v1458_v12 }
 0x133   :  { %1353 = vmatprep.subr.bf16.mxu1 %v1477_v32 }
 0x135   :  { %1338 = vmatmul.mubr.msk.bf16.vlgmr.msra.gmra.mrb[20].mxu1 %vm555_vm1, %v529_v14 }
 0x136   :  { %1354 = vmatpush3.bf16.msra.mxu1 %v1459_v13  ;;  %1361 = vmatprep.mubr.msk.bf16.mxu1 %vm1478_vm0, %v1477_v32 }
 0x137   :  { %1355 = vmatprep.subr.bf16.mxu1 %v1477_v32 }
 0x13a   :  { %1356 = vmatpush3.bf16.msra.mxu1 %v1460_v15 }
 0x13b   :  { %1357 = vmatprep.subr.bf16.mxu1 %v1477_v32 }
 0x13e   :  { %1358 = vmatpush3.bf16.msra.mxu1 %v1461_v16 }
 0x13f   :  { %1359 = vmatprep.subr.bf16.mxu1 %v1477_v32 }
 0x142   :  { %1360 = vmatpush3.bf16.msra.mxu1 %v1462_v17 }
 0x143   :  { %1373 = vmatprep.subr.bf16.mxu1 %v1477_v32 }
 0x145   :  { %1362 = vmatmul.mubr.msk.bf16.vlgmr.msra.gmra.mrb[24].mxu1 %vm555_vm1, %v735_v18 }
 0x146   :  { %1381 = vmatprep.mubr.msk.bf16.mxu1 %vm1478_vm0, %v1477_v32  ;;  %1374 = vmatpush3.bf16.msra.mxu1 %v1465_v21 }
 0x147   :  { %1375 = vmatprep.subr.bf16.mxu1 %v1477_v32 }
 0x14a   :  { %1376 = vmatpush3.bf16.msra.mxu1 %v1466_v22 }
 0x14b   :  { %1377 = vmatprep.subr.bf16.mxu1 %v1477_v32 }
 0x14e   :  { %1378 = vmatpush3.bf16.msra.mxu1 %v1467_v48 }
 0x14f   :  { %1379 = vmatprep.subr.bf16.mxu1 %v1477_v32 }
 0x152   :  { %1380 = vmatpush3.bf16.msra.mxu1 %v1468_v49 }
 0x1f8   :  { %v593_v23 = vpop.f32.mrb[16].mxu1 }
 0x1f9   :  { %v1327_v24 = vpop.f32.mrb[17].mxu1 }
 0x1fa   :  { %v596_v25 = vpop.f32.mrb[18].mxu1 }
 0x1fb   :  { %v1328_v26 = vpop.f32.mrb[19].mxu1 }
 0x1fe   :  { %v728_v27 = vpop.f32.mrb[16].mxu0 }
 0x1ff   :  { %v1351_v28 = vpop.f32.mrb[17].mxu0 }
 0x200   :  { %v731_v29 = vpop.f32.mrb[18].mxu0 }
 0x201   :  { %v1352_v30 = vpop.f32.mrb[19].mxu0 }
 0x208   :  { %v660_v31 = vpop.f32.mrb[20].mxu1 }
 0x209   :  { %v661_v33 = vadd.f32 %v660_v31, %v593_v23  ;;  %v1339_v34 = vpop.f32.mrb[21].mxu1 }
 0x20a   :  { %v663_v35 = vpop.f32.mrb[22].mxu1 }
 0x20b   :  { %v1340_v36 = vpop.f32.mrb[23].mxu1  ;;  %v734_v37 = vadd.f32 %v728_v27, %v661_v33 }
 0x218   :  { %v797_v38 = vpop.f32.mrb[24].mxu1 }
 0x219   :  { %v803_v40 = vadd.f32 %v797_v38, %v734_v37  ;;  %v1363_v41 = vpop.f32.mrb[25].mxu1 }
 0x21a   :  { %v800_v42 = vpop.f32.mrb[26].mxu1 }
 0x21b   :  { %v811_v44 = vadd.f32 %v1148_v39, %v803_v40  ;;  %v1364_v45 = vpop.f32.mrb[27].mxu1 }
 0x21d   :  { %v812_v46 = vmax.f32 %v811_v44, 0.0 }
 0x21f   :  { %v813_v47 = vpack.c.bf16 %v812_v46, %v812_v46 }
 0x221   :  { %1370 = vmatmul.mubr.msk.bf16.vlgmr.msra.gmra.mrb[20].mxu0 %vm837_vm2, %v813_v47 }
 0x222   :  { %1401 = vmatprep.mubr.msk.bf16.mxu0 %vm1478_vm0, %v1477_v32  ;;  %1386 = vmatpush3.bf16.msra.mxu0 %v1469_v50 }
 0x223   :  { %1387 = vmatprep.subr.bf16.mxu0 %v1477_v32 }
 0x226   :  { %1388 = vmatpush3.bf16.msra.mxu0 %v1470_v51 }
 0x227   :  { %1389 = vmatprep.subr.bf16.mxu0 %v1477_v32 }
 0x22a   :  { %1390 = vmatpush3.bf16.msra.mxu0 %v1471_v52 }
 0x22b   :  { %1391 = vmatprep.subr.bf16.mxu0 %v1477_v32 }
 0x22e   :  { %1392 = vmatpush3.bf16.msra.mxu0 %v1472_v53 }
 0x22f   :  { %1393 = vmatprep.subr.bf16.mxu0 %v1477_v32 }
 0x232   :  { %1394 = vmatpush3.bf16.msra.mxu0 %v1473_v54 }
 0x233   :  { %1395 = vmatprep.subr.bf16.mxu0 %v1477_v32 }
 0x236   :  { %1396 = vmatpush3.bf16.msra.mxu0 %v1474_v55 }
 0x237   :  { %1397 = vmatprep.subr.bf16.mxu0 %v1477_v32 }
 0x23a   :  { %1398 = vmatpush3.bf16.msra.mxu0 %v1475_v0 }
 0x23b   :  { %1399 = vmatprep.subr.bf16.mxu0 %v1477_v32  ;;  %v1159_v32 = vld [vmem:[%s1844_s10] ss:$0 sm:$0xff] }
 0x23e   :  { %1400 = vmatpush3.bf16.msra.mxu0 %v1476_v1 }
 0x2f4   :  { %v875_v57 = vpop.f32.mrb[20].mxu0 }
 0x2f5   :  { %v876_v58 = vadd.f32 %v1149_v56, %v875_v57  ;;  %v1371_v59 = vpop.f32.mrb[21].mxu0 }
 0x2f6   :  { %v878_v60 = vpop.f32.mrb[22].mxu0 }
 0x2f7   :  { %v881_v61 = vmax.f32 %v876_v58, 0.0  ;;  %v1372_v62 = vpop.f32.mrb[23].mxu0 }
 0x2f9   :  { %v882_v63 = vpack.c.bf16 %v881_v61, %v881_v61 }
 0x2fb   :  { %1382 = vmatmul.mubr.msk.bf16.vlgmr.msra.gmra.mrb[28].mxu1 %vm555_vm1, %v882_v63 }
 0x3ce   :  { %v959_v3 = vpop.f32.mrb[28].mxu1 }
 0x3cf   :  { %v960_v4 = vadd.f32 %v1153_v2, %v959_v3  ;;  %v1383_v5 = vpop.f32.mrb[29].mxu1 }
 0x3d0   :  { %v962_v6 = vpop.f32.mrb[30].mxu1 }
 0x3d1   :  { %v965_v7 = vmax.f32 %v960_v4, 0.0  ;;  %v1384_v8 = vpop.f32.mrb[31].mxu1 }
 0x3d3   :  { %v966_v9 = vpack.c.bf16 %v965_v7, %v965_v7 }
 0x3d5   :  { %1402 = vmatmul.mubr.bf16.vlgmr.msra.gmra.mrb[24].mxu0 %v966_v9 }
 0x4a8   :  { %v1072_v10 = vpop.f32.mrb[24].mxu0 }
 0x4a9   :  { %v1073_v11 = vadd.f32 %v1159_v32, %v1072_v10  ;;  %v1403_v43 = vpop.f32.mrb[25].mxu0 }
 0x4aa   :  { %v1075_v12 = vpop.f32.mrb[26].mxu0 }
 0x4ab   :  { %1078 = vst [vmem:[%s1845_s11] sm:$0xff] %v1073_v11  ;;  %v1404_v13 = vpop.f32.mrb[27].mxu0 }

</bundles_post_ra>
